<compile_context>
chip_gen: v6e
topology: v6e:2x2x1
jax: 0.10.0
libtpu: 0.0.40
codegen_flags: <defaults>
</compile_context>

<pallas_src>
import numpy as np
import jax
import jax.numpy as jnp
from jax.experimental import pallas as pl
from jax.experimental.pallas import tpu as pltpu


# ----------------------------------------------------------------------------
# Fused per-layer kernel.
# ----------------------------------------------------------------------------
def _make_layer_kernel(B, L, C, F, num_heads):
    nh = num_heads
    hd = C // nh

    def kernel(x_ref, wqkv_ref, bqkv_ref, wo_ref, bo_ref, bias_ref,
               g1_ref, b1_ref, w1_ref, c1_ref, w2_ref, c2_ref,
               g2_ref, b2_ref, o_ref):
        eps = 1e-5
        x = x_ref[...]                                             # (T, C) f32

        # Fused QKV projection over all B*L rows (full-width MXU matmul);
        # the 1/sqrt(head_dim) scale is folded into the Q weights/bias.
        qkv = jnp.dot(x.astype(jnp.bfloat16), wqkv_ref[...],
                      preferred_element_type=jnp.float32) + bqkv_ref[...]  # (T, 3C)

        # One-hot lane mask per head: head_mask[h, c] = 1 iff lane c is head h.
        col = jax.lax.broadcasted_iota(jnp.int32, (nh, C), 1)
        row = jax.lax.broadcasted_iota(jnp.int32, (nh, C), 0)
        head_mask = jnp.logical_and(col >= row * hd,
                                    col < (row + 1) * hd).astype(jnp.float32)

        bias = bias_ref[...]                                       # (nh*L, L) f32
        att_rows = []
        for b in range(B):                                         # static unroll
            r0, r1 = b * L, (b + 1) * L
            qb = qkv[r0:r1, 0:C]                                   # (L, C) f32
            kb = qkv[r0:r1, C:2 * C].astype(jnp.bfloat16)          # (L, C)
            vb = qkv[r0:r1, 2 * C:3 * C].astype(jnp.bfloat16)      # (L, C)

            # Row-stacked masked Q: block h keeps only head-h lanes, so
            # qm @ K^T gives every head's Q_h K_h^T exactly (zeroed lanes
            # contribute exact zeros) with full-depth, full-row MXU matmuls.
            qm = (head_mask[:, None, :] * qb[None, :, :]
                  ).reshape(nh * L, C).astype(jnp.bfloat16)        # (nh*L, C)
            s = jax.lax.dot_general(qm, kb, (((1,), (1,)), ((), ())),
                                    preferred_element_type=jnp.float32)  # (nh*L, L)

            # windows / shift mask / relative-position bias (all f32)
            s = s + bias

            # softmax (f32); division on the EUP via approximate reciprocal
            m = jnp.max(s, axis=-1, keepdims=True)
            e = jnp.exp(s - m)
            den = jnp.sum(e, axis=-1, keepdims=True)
            p = (e * pl.reciprocal(den, approx=True)).astype(jnp.bfloat16)

            of = jax.lax.dot_general(p, vb, (((1,), (0,)), ((), ())),
                                     preferred_element_type=jnp.float32)  # (nh*L, C)
            # keep head-h lanes of row-block h and sum the blocks -> (L, C)
            ob = jnp.sum(of.reshape(nh, L, C) * head_mask[:, None, :], axis=0)
            att_rows.append(ob)

        attn = jnp.concatenate(att_rows, axis=0)                   # (T, C) f32
        attn = jnp.dot(attn.astype(jnp.bfloat16), wo_ref[...],
                       preferred_element_type=jnp.float32) + bo_ref[...]

        # residual + LayerNorm1
        h = attn + x
        mu = jnp.mean(h, axis=-1, keepdims=True)
        var = jnp.mean(jnp.square(h - mu), axis=-1, keepdims=True)
        h1 = (h - mu) * jax.lax.rsqrt(var + eps) * g1_ref[...] + b1_ref[...]

        # FFN: Linear -> ReLU -> Linear (dropout = identity in eval mode)
        f = jnp.dot(h1.astype(jnp.bfloat16), w1_ref[...],
                    preferred_element_type=jnp.float32) + c1_ref[...]
        f = jnp.maximum(f, 0.0)
        f = jnp.dot(f.astype(jnp.bfloat16), w2_ref[...],
                    preferred_element_type=jnp.float32) + c2_ref[...]

        # residual + LayerNorm2
        h2 = f + h1
        mu2 = jnp.mean(h2, axis=-1, keepdims=True)
        var2 = jnp.mean(jnp.square(h2 - mu2), axis=-1, keepdims=True)
        o_ref[...] = ((h2 - mu2) * jax.lax.rsqrt(var2 + eps)
                      * g2_ref[...] + b2_ref[...]).astype(o_ref.dtype)

    return kernel


def encoder_layer_pallas(x, p, num_heads):
    B, L, C = x.shape
    T = B * L
    F = p["w1"].shape[1]
    nh = num_heads

    args = (x.reshape(T, C), p["wqkv"], p["bqkv"], p["wo"], p["bo"],
            p["bias_mask"], p["ln1_g"], p["ln1_b"], p["w1"], p["c1"],
            p["w2"], p["c2"], p["ln2_g"], p["ln2_b"])

    def full_spec(a):
        return pl.BlockSpec(a.shape, lambda i, nd=a.ndim: (0,) * nd)

    flops = (2 * T * C * 3 * C                       # fused QKV projection
             + B * 2 * nh * L * C * L                # Q K^T (masked, full depth)
             + B * 2 * nh * L * L * C                # P V
             + 2 * T * C * C                         # output projection
             + 2 * 2 * T * C * F)                    # FFN
    bytes_accessed = (sum(int(np.prod(a.shape)) * a.dtype.itemsize for a in args)
                      + T * C * 4)

    out = pl.pallas_call(
        _make_layer_kernel(B, L, C, F, nh),
        out_shape=jax.ShapeDtypeStruct((T, C), jnp.float32),
        grid_spec=pltpu.PrefetchScalarGridSpec(
            num_scalar_prefetch=0,
            grid=(1,),
            in_specs=[full_spec(a) for a in args],
            out_specs=pl.BlockSpec((T, C), lambda i: (0, 0)),
        ),
        compiler_params=pltpu.CompilerParams(
            dimension_semantics=("arbitrary",)),
        cost_estimate=pl.CostEstimate(flops=flops,
                                      transcendentals=B * nh * L * L,
                                      bytes_accessed=bytes_accessed),
    )(*args)
    return out.reshape(B, L, C)


def encoder_forward(x, params, config):
    O = x
    for p in params["layers"]:
        O = encoder_layer_pallas(O, p, config["num_heads"])
    gx = jnp.mean(O, axis=1)
    return gx, O


# ----------------------------------------------------------------------------
# Precompute: full-token additive bias encoding windows / shift mask / rel-pos.
# ----------------------------------------------------------------------------
def build_bias_mask(rel_table, H, W, ws, shift, num_heads):
    hh, wwg = np.meshgrid(np.arange(H), np.arange(W), indexing="ij")
    hi = hh.reshape(-1)
    wi = wwg.reshape(-1)
    a = (hi - shift) % H                      # position after torch.roll(-shift)
    b = (wi - shift) % W
    win = (a // ws) * (W // ws) + (b // ws)
    same_win = win[:, None] == win[None, :]
    if shift > 0:
        def reg(v, size):                     # region labels of the Swin shift mask
            return np.where(v < size - ws, 0, np.where(v < size - shift, 1, 2))
        lab = reg(a, H) * 3 + reg(b, W)
        allowed = same_win & (lab[:, None] == lab[None, :])
    else:
        allowed = same_win
    dh = (a % ws)[:, None] - (a % ws)[None, :] + (ws - 1)
    dw = (b % ws)[:, None] - (b % ws)[None, :] + (ws - 1)
    ridx = dh * (2 * ws - 1) + dw                                 # (L, L)
    bias = np.asarray(rel_table)[ridx]                            # (L, L, nh)
    bias = np.transpose(bias, (2, 0, 1)).astype(np.float32)       # (nh, L, L)
    return np.where(allowed[None], bias, np.float32(-1e9)).astype(np.float32)


# Reference helpers (original per-window construction).
def relative_position_index(ws):
    coords = np.stack(np.meshgrid(np.arange(ws), np.arange(ws), indexing="ij"))
    flat = coords.reshape(2, -1)
    rel = flat[:, :, None] - flat[:, None, :]
    rel = rel.transpose(1, 2, 0).copy()
    rel[:, :, 0] += ws - 1
    rel[:, :, 1] += ws - 1
    rel[:, :, 0] *= 2 * ws - 1
    return rel.sum(-1)


def compute_attn_mask(H, W, ws, shift):
    N = ws * ws
    nW = (H // ws) * (W // ws)
    if shift == 0:
        return np.zeros((nW, N, N), np.float32)
    img_mask = np.zeros((1, H, W, 1), np.float32)
    slices = (slice(0, -ws), slice(-ws, -shift), slice(-shift, None))
    cnt = 0
    for hs in slices:
        for wss in slices:
            img_mask[:, hs, wss, :] = cnt
            cnt += 1
    mw = (img_mask.reshape(1, H // ws, ws, W // ws, ws, 1)
          .transpose(0, 1, 3, 2, 4, 5).reshape(-1, N))
    diff = mw[:, None, :] - mw[:, :, None]
    return np.where(diff != 0, -1e9, 0.0).astype(np.float32)


# ----------------------------------------------------------------------------
# Pure-JAX reference of the ORIGINAL windowed algorithm (same bf16 rounding).
# ----------------------------------------------------------------------------
def _layernorm(x, g, b, eps=1e-5):
    mu = jnp.mean(x, axis=-1, keepdims=True)
    var = jnp.mean(jnp.square(x - mu), axis=-1, keepdims=True)
    return (x - mu) * jax.lax.rsqrt(var + eps) * g + b


def _bdot(a, w):
    # bf16-operand matmul with f32 accumulation (same convention as the kernel)
    return jnp.einsum("...ij,jk->...ik", a.astype(jnp.bfloat16), w,
                      preferred_element_type=jnp.float32)


def _reference_layer(x, p, H, W, ws, shift, num_heads):
    B, L, C = x.shape
    nh = num_heads
    hd = C // nh
    shortcut = x
    xi = x.reshape(B, H, W, C)
    if shift > 0:
        xi = jnp.roll(xi, shift=(-shift, -shift), axis=(1, 2))
    xw = (xi.reshape(B, H // ws, ws, W // ws, ws, C)
            .transpose(0, 1, 3, 2, 4, 5).reshape(-1, ws * ws, C))
    nWB, N, _ = xw.shape
    nW = p["ref_attn_mask"].shape[0]
    qkv = _bdot(xw, p["wqkv"]) + p["bqkv"]
    q = qkv[..., :C].reshape(nWB, N, nh, hd).transpose(0, 2, 1, 3).astype(jnp.bfloat16)
    k = qkv[..., C:2 * C].reshape(nWB, N, nh, hd).transpose(0, 2, 1, 3).astype(jnp.bfloat16)
    v = qkv[..., 2 * C:].reshape(nWB, N, nh, hd).transpose(0, 2, 1, 3).astype(jnp.bfloat16)
    s = jnp.einsum("whnd,whmd->whnm", q, k,
                   preferred_element_type=jnp.float32)           # q pre-scaled
    s = s + p["ref_rel_bias"][None]
    s = (s.reshape(B, nW, nh, N, N)
         + p["ref_attn_mask"][None, :, None]).reshape(nWB, nh, N, N)
    att = jax.nn.softmax(s, axis=-1)
    o = jnp.einsum("whnm,whmd->whnd", att.astype(jnp.bfloat16), v,
                   preferred_element_type=jnp.float32)
    o = o.transpose(0, 2, 1, 3).reshape(nWB, N, C)
    o = _bdot(o, p["wo"]) + p["bo"]
    ow = (o.reshape(B, H // ws, W // ws, ws, ws, C)
            .transpose(0, 1, 3, 2, 4, 5).reshape(B, H, W, C))
    if shift > 0:
        ow = jnp.roll(ow, shift=(shift, shift), axis=(1, 2))
    h1 = _layernorm(ow.reshape(B, L, C) + shortcut, p["ln1_g"], p["ln1_b"])
    f = jnp.maximum(_bdot(h1, p["w1"]) + p["c1"], 0.0)
    f = _bdot(f, p["w2"]) + p["c2"]
    return _layernorm(f + h1, p["ln2_g"], p["ln2_b"])


def reference_forward(x, params, config):
    O = x
    for p, shift in zip(params["layers"], config["shifts"]):
        O = _reference_layer(O, p, config["H"], config["W"], config["ws"],
                             shift, config["num_heads"])
    return jnp.mean(O, axis=1), O


# ----------------------------------------------------------------------------
# Parameter init (weights in bf16 for the MXU; biases / LN / masks in f32).
# ----------------------------------------------------------------------------
def init_params(key, embed_dim, num_heads, mlp_ratio, depth, ws, H, W, shifts):
    N = ws * ws
    L = H * W
    ffn = embed_dim * mlp_ratio
    head_dim = embed_dim // num_heads
    scale = float(head_dim) ** (-0.5)
    rpi = relative_position_index(ws)
    layers = []
    for i in range(depth):
        key, *ks = jax.random.split(key, 16)

        def w(k, shape, std=0.02):
            return jax.random.normal(k, shape, jnp.float32) * std

        table = w(ks[0], ((2 * ws - 1) * (2 * ws - 1), num_heads))
        wq, bq = w(ks[1], (embed_dim, embed_dim)), w(ks[2], (1, embed_dim))
        wk, bk = w(ks[3], (embed_dim, embed_dim)), w(ks[4], (1, embed_dim))
        wv, bv = w(ks[5], (embed_dim, embed_dim)), w(ks[6], (1, embed_dim))
        ref_rel_bias = jnp.transpose(
            table[rpi.reshape(-1)].reshape(N, N, num_heads), (2, 0, 1))
        bias_full = build_bias_mask(np.asarray(table), H, W, ws, shifts[i],
                                    num_heads)                      # (nh, L, L)
        p = dict(
            # fused QKV (bf16 MXU operands); attention scale folded into Q
            wqkv=jnp.concatenate([wq * scale, wk, wv], axis=1).astype(jnp.bfloat16),
            bqkv=jnp.concatenate([bq * scale, bk, bv], axis=1),
            wo=w(ks[7], (embed_dim, embed_dim)).astype(jnp.bfloat16),
            bo=w(ks[8], (1, embed_dim)),
            w1=w(ks[9], (embed_dim, ffn)).astype(jnp.bfloat16),
            c1=w(ks[10], (1, ffn)),
            w2=w(ks[11], (ffn, embed_dim)).astype(jnp.bfloat16),
            c2=w(ks[12], (1, embed_dim)),
            ln1_g=jnp.ones((1, embed_dim), jnp.float32),
            ln1_b=jnp.zeros((1, embed_dim), jnp.float32),
            ln2_g=jnp.ones((1, embed_dim), jnp.float32),
            ln2_b=jnp.zeros((1, embed_dim), jnp.float32),
            # combined windows + shift-mask + relative-position bias,
            # row-stacked per head: (nh*L, L) to match the kernel score layout
            bias_mask=jnp.asarray(bias_full.reshape(num_heads * L, L)),
            # reference-only buffers (original per-window form)
            ref_rel_bias=jnp.asarray(ref_rel_bias, jnp.float32),
            ref_attn_mask=jnp.asarray(compute_attn_mask(H, W, ws, shifts[i])),
        )
        layers.append(p)
    return dict(layers=layers)


if __name__ == "__main__":
    # Small config consistent with the module: tokens are (B, H*W, C).
    B = 2
    embed_dim = 128
    num_heads = 4
    H = W = 8
    ws = 4
    shift_size = 2
    depth = 2
    mlp_ratio = 4
    # Encoder: even layers shift=0, odd layers shift=shift_size.
    shifts = [0 if i % 2 == 0 else shift_size for i in range(depth)]

    key = jax.random.PRNGKey(0)
    kx, kp = jax.random.split(key)
    x = jax.random.normal(kx, (B, H * W, embed_dim), jnp.float32)
    params = init_params(kp, embed_dim, num_heads, mlp_ratio, depth,
                         ws, H, W, shifts)
    config = dict(H=H, W=W, ws=ws, num_heads=num_heads, shifts=shifts)

    fwd = jax.jit(lambda xx, pp: encoder_forward(xx, pp, config))
    gx, out = fwd(x, params)
    jax.block_until_ready((gx, out))

    assert gx.shape == (B, embed_dim)
    assert out.shape == (B, H * W, embed_dim)
    assert bool(jnp.all(jnp.isfinite(out)))

    # Verify against a pure-JAX implementation of the original windowed
    # algorithm (same bf16 matmul-operand rounding as the kernel).
    ref_fwd = jax.jit(lambda xx, pp: reference_forward(xx, pp, config))
    ref_gx, ref_out = ref_fwd(x, params)
    jax.block_until_ready((ref_gx, ref_out))
    err = float(jnp.max(jnp.abs(out - ref_out)))
    assert err < 5e-3, f"mismatch vs pure-JAX reference: max abs err = {err}"

    print("KERNEL_OK")
</pallas_src>

<mosaic_0001>
module attributes {stable_mosaic.version = 11 : i64} {
  func.func @kernel(%arg0: i32, %arg1: memref<128x128xf32, #tpu.memory_space<vmem>>, %arg2: memref<128x384xbf16, #tpu.memory_space<vmem>>, %arg3: memref<1x384xf32, #tpu.memory_space<vmem>>, %arg4: memref<128x128xbf16, #tpu.memory_space<vmem>>, %arg5: memref<1x128xf32, #tpu.memory_space<vmem>>, %arg6: memref<256x64xf32, #tpu.memory_space<vmem>>, %arg7: memref<1x128xf32, #tpu.memory_space<vmem>>, %arg8: memref<1x128xf32, #tpu.memory_space<vmem>>, %arg9: memref<128x512xbf16, #tpu.memory_space<vmem>>, %arg10: memref<1x512xf32, #tpu.memory_space<vmem>>, %arg11: memref<512x128xbf16, #tpu.memory_space<vmem>>, %arg12: memref<1x128xf32, #tpu.memory_space<vmem>>, %arg13: memref<1x128xf32, #tpu.memory_space<vmem>>, %arg14: memref<1x128xf32, #tpu.memory_space<vmem>>, %arg15: memref<128x128xf32, #tpu.memory_space<vmem>>) attributes {dimension_semantics = [#tpu.dimension_semantics<arbitrary>], iteration_bounds = array<i64: 1>, scalar_prefetch = 0 : i64, scratch_operands = 0 : i64, tpu.core_type = #tpu.core_type<tc>, window_params = [{pipeline_mode = #tpu.pipeline_mode<synchronous>, transform_indices = @transform_0, window_bounds = array<i64: 128, 128>}, {pipeline_mode = #tpu.pipeline_mode<synchronous>, transform_indices = @transform_1, window_bounds = array<i64: 128, 384>}, {pipeline_mode = #tpu.pipeline_mode<synchronous>, transform_indices = @transform_2, window_bounds = array<i64: 1, 384>}, {pipeline_mode = #tpu.pipeline_mode<synchronous>, transform_indices = @transform_3, window_bounds = array<i64: 128, 128>}, {pipeline_mode = #tpu.pipeline_mode<synchronous>, transform_indices = @transform_4, window_bounds = array<i64: 1, 128>}, {pipeline_mode = #tpu.pipeline_mode<synchronous>, transform_indices = @transform_5, window_bounds = array<i64: 256, 64>}, {pipeline_mode = #tpu.pipeline_mode<synchronous>, transform_indices = @transform_6, window_bounds = array<i64: 1, 128>}, {pipeline_mode = #tpu.pipeline_mode<synchronous>, transform_indices = @transform_7, window_bounds = array<i64: 1, 128>}, {pipeline_mode = #tpu.pipeline_mode<synchronous>, transform_indices = @transform_8, window_bounds = array<i64: 128, 512>}, {pipeline_mode = #tpu.pipeline_mode<synchronous>, transform_indices = @transform_9, window_bounds = array<i64: 1, 512>}, {pipeline_mode = #tpu.pipeline_mode<synchronous>, transform_indices = @transform_10, window_bounds = array<i64: 512, 128>}, {pipeline_mode = #tpu.pipeline_mode<synchronous>, transform_indices = @transform_11, window_bounds = array<i64: 1, 128>}, {pipeline_mode = #tpu.pipeline_mode<synchronous>, transform_indices = @transform_12, window_bounds = array<i64: 1, 128>}, {pipeline_mode = #tpu.pipeline_mode<synchronous>, transform_indices = @transform_13, window_bounds = array<i64: 1, 128>}, {pipeline_mode = #tpu.pipeline_mode<synchronous>, transform_indices = @transform_14, window_bounds = array<i64: 128, 128>}]} {
    %c0 = arith.constant 0 : index
    %c0_0 = arith.constant 0 : index
    %0 = vector.load %arg1[%c0, %c0_0] : memref<128x128xf32, #tpu.memory_space<vmem>>, vector<128x128xf32>
    %1 = arith.truncf %0 : vector<128x128xf32> to vector<128x128xbf16>
    %c0_1 = arith.constant 0 : index
    %c0_2 = arith.constant 0 : index
    %2 = vector.load %arg2[%c0_1, %c0_2] : memref<128x384xbf16, #tpu.memory_space<vmem>>, vector<128x384xbf16>
    %cst = arith.constant dense<0.000000e+00> : vector<128x384xf32>
    %3 = tpu.matmul %1, %2, %cst {dimension_numbers = #tpu.dot_dimension_numbers<[1], [0], [0], [1], [0, 0, 1, 1], [], []>} : vector<128x128xbf16>, vector<128x384xbf16>, vector<128x384xf32> -> vector<128x384xf32>
    %c0_3 = arith.constant 0 : index
    %c0_4 = arith.constant 0 : index
    %4 = vector.load %arg3[%c0_3, %c0_4] : memref<1x384xf32, #tpu.memory_space<vmem>>, vector<1x384xf32>
    %5 = vector.broadcast %4 : vector<1x384xf32> to vector<128x384xf32>
    %6 = arith.addf %3, %5 : vector<128x384xf32>
    %7 = tpu.iota {dimensions = array<i32: 1>} : vector<4x128xi32>
    %8 = tpu.iota {dimensions = array<i32: 0>} : vector<4x128xi32>
    %c32_i32 = arith.constant 32 : i32
    %9 = vector.broadcast %c32_i32 : i32 to vector<4x128xi32>
    %10 = arith.muli %8, %9 : vector<4x128xi32>
    %11 = arith.cmpi sge, %7, %10 : vector<4x128xi32>
    %c1_i32 = arith.constant 1 : i32
    %12 = vector.broadcast %c1_i32 : i32 to vector<4x128xi32>
    %13 = arith.addi %8, %12 : vector<4x128xi32>
    %c32_i32_5 = arith.constant 32 : i32
    %14 = vector.broadcast %c32_i32_5 : i32 to vector<4x128xi32>
    %15 = arith.muli %13, %14 : vector<4x128xi32>
    %16 = arith.cmpi slt, %7, %15 : vector<4x128xi32>
    %17 = arith.andi %11, %16 : vector<4x128xi1>
    %18 = arith.extui %17 : vector<4x128xi1> to vector<4x128xi32>
    %19 = arith.sitofp %18 : vector<4x128xi32> to vector<4x128xf32>
    %c0_6 = arith.constant 0 : index
    %c0_7 = arith.constant 0 : index
    %20 = vector.load %arg6[%c0_6, %c0_7] : memref<256x64xf32, #tpu.memory_space<vmem>>, vector<256x64xf32>
    %21 = vector.extract_strided_slice %6 {offsets = [0, 0], sizes = [64, 128], strides = [1, 1]} : vector<128x384xf32> to vector<64x128xf32>
    %22 = vector.extract_strided_slice %6 {offsets = [0, 128], sizes = [64, 128], strides = [1, 1]} : vector<128x384xf32> to vector<64x128xf32>
    %23 = arith.truncf %22 : vector<64x128xf32> to vector<64x128xbf16>
    %24 = vector.extract_strided_slice %6 {offsets = [0, 256], sizes = [64, 128], strides = [1, 1]} : vector<128x384xf32> to vector<64x128xf32>
    %25 = arith.truncf %24 : vector<64x128xf32> to vector<64x128xbf16>
    %26 = vector.shape_cast %19 : vector<4x128xf32> to vector<4x1x128xf32>
    %27 = vector.shape_cast %21 : vector<64x128xf32> to vector<1x64x128xf32>
    %28 = vector.broadcast %26 : vector<4x1x128xf32> to vector<4x64x128xf32>
    %29 = vector.broadcast %27 : vector<1x64x128xf32> to vector<4x64x128xf32>
    %30 = arith.mulf %28, %29 : vector<4x64x128xf32>
    %31 = vector.shape_cast %30 : vector<4x64x128xf32> to vector<256x128xf32>
    %32 = arith.truncf %31 : vector<256x128xf32> to vector<256x128xbf16>
    %cst_8 = arith.constant dense<0.000000e+00> : vector<256x64xf32>
    %33 = tpu.matmul %32, %23, %cst_8 {dimension_numbers = #tpu.dot_dimension_numbers<[1], [1], [0], [0], [0, 0, 1, 0], [], []>} : vector<256x128xbf16>, vector<64x128xbf16>, vector<256x64xf32> -> vector<256x64xf32>
    %34 = arith.addf %33, %20 : vector<256x64xf32>
    %cst_9 = arith.constant dense<0xFF800000> : vector<256xf32>
    %35 = vector.multi_reduction <maximumf>, %34, %cst_9 [1] : vector<256x64xf32> to vector<256xf32>
    %36 = vector.shape_cast %35 : vector<256xf32> to vector<256x1xf32>
    %37 = vector.broadcast %36 : vector<256x1xf32> to vector<256x64xf32>
    %38 = arith.subf %34, %37 : vector<256x64xf32>
    %39 = math.exp %38 : vector<256x64xf32>
    %cst_10 = arith.constant dense<0.000000e+00> : vector<256xf32>
    %40 = vector.multi_reduction <add>, %39, %cst_10 [1] : vector<256x64xf32> to vector<256xf32>
    %41 = vector.shape_cast %40 : vector<256xf32> to vector<256x1xf32>
    %42 = tpu.reciprocal %41 {approx = true} : vector<256x1xf32> -> vector<256x1xf32>
    %43 = vector.broadcast %42 : vector<256x1xf32> to vector<256x64xf32>
    %44 = arith.mulf %39, %43 : vector<256x64xf32>
    %45 = arith.truncf %44 : vector<256x64xf32> to vector<256x64xbf16>
    %cst_11 = arith.constant dense<0.000000e+00> : vector<256x128xf32>
    %46 = tpu.matmul %45, %25, %cst_11 {dimension_numbers = #tpu.dot_dimension_numbers<[1], [0], [0], [1], [0, 0, 1, 1], [], []>} : vector<256x64xbf16>, vector<64x128xbf16>, vector<256x128xf32> -> vector<256x128xf32>
    %47 = vector.shape_cast %46 : vector<256x128xf32> to vector<4x64x128xf32>
    %48 = vector.shape_cast %19 : vector<4x128xf32> to vector<4x1x128xf32>
    %49 = vector.broadcast %48 : vector<4x1x128xf32> to vector<4x64x128xf32>
    %50 = arith.mulf %47, %49 : vector<4x64x128xf32>
    %cst_12 = arith.constant dense<0.000000e+00> : vector<64x128xf32>
    %51 = vector.multi_reduction <add>, %50, %cst_12 [0] : vector<4x64x128xf32> to vector<64x128xf32>
    %52 = vector.extract_strided_slice %6 {offsets = [64, 0], sizes = [64, 128], strides = [1, 1]} : vector<128x384xf32> to vector<64x128xf32>
    %53 = vector.extract_strided_slice %6 {offsets = [64, 128], sizes = [64, 128], strides = [1, 1]} : vector<128x384xf32> to vector<64x128xf32>
    %54 = arith.truncf %53 : vector<64x128xf32> to vector<64x128xbf16>
    %55 = vector.extract_strided_slice %6 {offsets = [64, 256], sizes = [64, 128], strides = [1, 1]} : vector<128x384xf32> to vector<64x128xf32>
    %56 = arith.truncf %55 : vector<64x128xf32> to vector<64x128xbf16>
    %57 = vector.shape_cast %19 : vector<4x128xf32> to vector<4x1x128xf32>
    %58 = vector.shape_cast %52 : vector<64x128xf32> to vector<1x64x128xf32>
    %59 = vector.broadcast %57 : vector<4x1x128xf32> to vector<4x64x128xf32>
    %60 = vector.broadcast %58 : vector<1x64x128xf32> to vector<4x64x128xf32>
    %61 = arith.mulf %59, %60 : vector<4x64x128xf32>
    %62 = vector.shape_cast %61 : vector<4x64x128xf32> to vector<256x128xf32>
    %63 = arith.truncf %62 : vector<256x128xf32> to vector<256x128xbf16>
    %cst_13 = arith.constant dense<0.000000e+00> : vector<256x64xf32>
    %64 = tpu.matmul %63, %54, %cst_13 {dimension_numbers = #tpu.dot_dimension_numbers<[1], [1], [0], [0], [0, 0, 1, 0], [], []>} : vector<256x128xbf16>, vector<64x128xbf16>, vector<256x64xf32> -> vector<256x64xf32>
    %65 = arith.addf %64, %20 : vector<256x64xf32>
    %cst_14 = arith.constant dense<0xFF800000> : vector<256xf32>
    %66 = vector.multi_reduction <maximumf>, %65, %cst_14 [1] : vector<256x64xf32> to vector<256xf32>
    %67 = vector.shape_cast %66 : vector<256xf32> to vector<256x1xf32>
    %68 = vector.broadcast %67 : vector<256x1xf32> to vector<256x64xf32>
    %69 = arith.subf %65, %68 : vector<256x64xf32>
    %70 = math.exp %69 : vector<256x64xf32>
    %cst_15 = arith.constant dense<0.000000e+00> : vector<256xf32>
    %71 = vector.multi_reduction <add>, %70, %cst_15 [1] : vector<256x64xf32> to vector<256xf32>
    %72 = vector.shape_cast %71 : vector<256xf32> to vector<256x1xf32>
    %73 = tpu.reciprocal %72 {approx = true} : vector<256x1xf32> -> vector<256x1xf32>
    %74 = vector.broadcast %73 : vector<256x1xf32> to vector<256x64xf32>
    %75 = arith.mulf %70, %74 : vector<256x64xf32>
    %76 = arith.truncf %75 : vector<256x64xf32> to vector<256x64xbf16>
    %cst_16 = arith.constant dense<0.000000e+00> : vector<256x128xf32>
    %77 = tpu.matmul %76, %56, %cst_16 {dimension_numbers = #tpu.dot_dimension_numbers<[1], [0], [0], [1], [0, 0, 1, 1], [], []>} : vector<256x64xbf16>, vector<64x128xbf16>, vector<256x128xf32> -> vector<256x128xf32>
    %78 = vector.shape_cast %77 : vector<256x128xf32> to vector<4x64x128xf32>
    %79 = vector.shape_cast %19 : vector<4x128xf32> to vector<4x1x128xf32>
    %80 = vector.broadcast %79 : vector<4x1x128xf32> to vector<4x64x128xf32>
    %81 = arith.mulf %78, %80 : vector<4x64x128xf32>
    %cst_17 = arith.constant dense<0.000000e+00> : vector<64x128xf32>
    %82 = vector.multi_reduction <add>, %81, %cst_17 [0] : vector<4x64x128xf32> to vector<64x128xf32>
    %83 = tpu.concatenate %51, %82 in 0 : vector<64x128xf32>, vector<64x128xf32> -> vector<128x128xf32>
    %84 = arith.truncf %83 : vector<128x128xf32> to vector<128x128xbf16>
    %c0_18 = arith.constant 0 : index
    %c0_19 = arith.constant 0 : index
    %85 = vector.load %arg4[%c0_18, %c0_19] : memref<128x128xbf16, #tpu.memory_space<vmem>>, vector<128x128xbf16>
    %cst_20 = arith.constant dense<0.000000e+00> : vector<128x128xf32>
    %86 = tpu.matmul %84, %85, %cst_20 {dimension_numbers = #tpu.dot_dimension_numbers<[1], [0], [0], [1], [0, 0, 1, 1], [], []>} : vector<128x128xbf16>, vector<128x128xbf16>, vector<128x128xf32> -> vector<128x128xf32>
    %c0_21 = arith.constant 0 : index
    %c0_22 = arith.constant 0 : index
    %87 = vector.load %arg5[%c0_21, %c0_22] : memref<1x128xf32, #tpu.memory_space<vmem>>, vector<1x128xf32>
    %88 = vector.broadcast %87 : vector<1x128xf32> to vector<128x128xf32>
    %89 = arith.addf %86, %88 : vector<128x128xf32>
    %90 = arith.addf %89, %0 : vector<128x128xf32>
    %cst_23 = arith.constant dense<0.000000e+00> : vector<128xf32>
    %91 = vector.multi_reduction <add>, %90, %cst_23 [1] : vector<128x128xf32> to vector<128xf32>
    %92 = vector.shape_cast %91 : vector<128xf32> to vector<128x1xf32>
    %cst_24 = arith.constant 1.280000e+02 : f32
    %93 = vector.broadcast %cst_24 : f32 to vector<128x1xf32>
    %94 = arith.divf %92, %93 : vector<128x1xf32>
    %95 = vector.broadcast %94 : vector<128x1xf32> to vector<128x128xf32>
    %96 = arith.subf %90, %95 : vector<128x128xf32>
    %97 = arith.mulf %96, %96 : vector<128x128xf32>
    %cst_25 = arith.constant dense<0.000000e+00> : vector<128xf32>
    %98 = vector.multi_reduction <add>, %97, %cst_25 [1] : vector<128x128xf32> to vector<128xf32>
    %99 = vector.shape_cast %98 : vector<128xf32> to vector<128x1xf32>
    %cst_26 = arith.constant 1.280000e+02 : f32
    %100 = vector.broadcast %cst_26 : f32 to vector<128x1xf32>
    %101 = arith.divf %99, %100 : vector<128x1xf32>
    %102 = vector.broadcast %94 : vector<128x1xf32> to vector<128x128xf32>
    %103 = arith.subf %90, %102 : vector<128x128xf32>
    %cst_27 = arith.constant 9.99999974E-6 : f32
    %104 = vector.broadcast %cst_27 : f32 to vector<128x1xf32>
    %105 = arith.addf %101, %104 : vector<128x1xf32>
    %106 = math.rsqrt %105 : vector<128x1xf32>
    %107 = vector.broadcast %106 : vector<128x1xf32> to vector<128x128xf32>
    %108 = arith.mulf %103, %107 : vector<128x128xf32>
    %c0_28 = arith.constant 0 : index
    %c0_29 = arith.constant 0 : index
    %109 = vector.load %arg7[%c0_28, %c0_29] : memref<1x128xf32, #tpu.memory_space<vmem>>, vector<1x128xf32>
    %110 = vector.broadcast %109 : vector<1x128xf32> to vector<128x128xf32>
    %111 = arith.mulf %108, %110 : vector<128x128xf32>
    %c0_30 = arith.constant 0 : index
    %c0_31 = arith.constant 0 : index
    %112 = vector.load %arg8[%c0_30, %c0_31] : memref<1x128xf32, #tpu.memory_space<vmem>>, vector<1x128xf32>
    %113 = vector.broadcast %112 : vector<1x128xf32> to vector<128x128xf32>
    %114 = arith.addf %111, %113 : vector<128x128xf32>
    %115 = arith.truncf %114 : vector<128x128xf32> to vector<128x128xbf16>
    %c0_32 = arith.constant 0 : index
    %c0_33 = arith.constant 0 : index
    %116 = vector.load %arg9[%c0_32, %c0_33] : memref<128x512xbf16, #tpu.memory_space<vmem>>, vector<128x512xbf16>
    %cst_34 = arith.constant dense<0.000000e+00> : vector<128x512xf32>
    %117 = tpu.matmul %115, %116, %cst_34 {dimension_numbers = #tpu.dot_dimension_numbers<[1], [0], [0], [1], [0, 0, 1, 1], [], []>} : vector<128x128xbf16>, vector<128x512xbf16>, vector<128x512xf32> -> vector<128x512xf32>
    %c0_35 = arith.constant 0 : index
    %c0_36 = arith.constant 0 : index
    %118 = vector.load %arg10[%c0_35, %c0_36] : memref<1x512xf32, #tpu.memory_space<vmem>>, vector<1x512xf32>
    %119 = vector.broadcast %118 : vector<1x512xf32> to vector<128x512xf32>
    %120 = arith.addf %117, %119 : vector<128x512xf32>
    %cst_37 = arith.constant 0.000000e+00 : f32
    %121 = vector.broadcast %cst_37 : f32 to vector<128x512xf32>
    %122 = arith.maximumf %120, %121 : vector<128x512xf32>
    %123 = arith.truncf %122 : vector<128x512xf32> to vector<128x512xbf16>
    %c0_38 = arith.constant 0 : index
    %c0_39 = arith.constant 0 : index
    %124 = vector.load %arg11[%c0_38, %c0_39] : memref<512x128xbf16, #tpu.memory_space<vmem>>, vector<512x128xbf16>
    %cst_40 = arith.constant dense<0.000000e+00> : vector<128x128xf32>
    %125 = tpu.matmul %123, %124, %cst_40 {dimension_numbers = #tpu.dot_dimension_numbers<[1], [0], [0], [1], [0, 0, 1, 1], [], []>} : vector<128x512xbf16>, vector<512x128xbf16>, vector<128x128xf32> -> vector<128x128xf32>
    %c0_41 = arith.constant 0 : index
    %c0_42 = arith.constant 0 : index
    %126 = vector.load %arg12[%c0_41, %c0_42] : memref<1x128xf32, #tpu.memory_space<vmem>>, vector<1x128xf32>
    %127 = vector.broadcast %126 : vector<1x128xf32> to vector<128x128xf32>
    %128 = arith.addf %125, %127 : vector<128x128xf32>
    %129 = arith.addf %128, %114 : vector<128x128xf32>
    %cst_43 = arith.constant dense<0.000000e+00> : vector<128xf32>
    %130 = vector.multi_reduction <add>, %129, %cst_43 [1] : vector<128x128xf32> to vector<128xf32>
    %131 = vector.shape_cast %130 : vector<128xf32> to vector<128x1xf32>
    %cst_44 = arith.constant 1.280000e+02 : f32
    %132 = vector.broadcast %cst_44 : f32 to vector<128x1xf32>
    %133 = arith.divf %131, %132 : vector<128x1xf32>
    %134 = vector.broadcast %133 : vector<128x1xf32> to vector<128x128xf32>
    %135 = arith.subf %129, %134 : vector<128x128xf32>
    %136 = arith.mulf %135, %135 : vector<128x128xf32>
    %cst_45 = arith.constant dense<0.000000e+00> : vector<128xf32>
    %137 = vector.multi_reduction <add>, %136, %cst_45 [1] : vector<128x128xf32> to vector<128xf32>
    %138 = vector.shape_cast %137 : vector<128xf32> to vector<128x1xf32>
    %cst_46 = arith.constant 1.280000e+02 : f32
    %139 = vector.broadcast %cst_46 : f32 to vector<128x1xf32>
    %140 = arith.divf %138, %139 : vector<128x1xf32>
    %141 = vector.broadcast %133 : vector<128x1xf32> to vector<128x128xf32>
    %142 = arith.subf %129, %141 : vector<128x128xf32>
    %cst_47 = arith.constant 9.99999974E-6 : f32
    %143 = vector.broadcast %cst_47 : f32 to vector<128x1xf32>
    %144 = arith.addf %140, %143 : vector<128x1xf32>
    %145 = math.rsqrt %144 : vector<128x1xf32>
    %146 = vector.broadcast %145 : vector<128x1xf32> to vector<128x128xf32>
    %147 = arith.mulf %142, %146 : vector<128x128xf32>
    %c0_48 = arith.constant 0 : index
    %c0_49 = arith.constant 0 : index
    %148 = vector.load %arg13[%c0_48, %c0_49] : memref<1x128xf32, #tpu.memory_space<vmem>>, vector<1x128xf32>
    %149 = vector.broadcast %148 : vector<1x128xf32> to vector<128x128xf32>
    %150 = arith.mulf %147, %149 : vector<128x128xf32>
    %c0_50 = arith.constant 0 : index
    %c0_51 = arith.constant 0 : index
    %151 = vector.load %arg14[%c0_50, %c0_51] : memref<1x128xf32, #tpu.memory_space<vmem>>, vector<1x128xf32>
    %152 = vector.broadcast %151 : vector<1x128xf32> to vector<128x128xf32>
    %153 = arith.addf %150, %152 : vector<128x128xf32>
    %c0_52 = arith.constant 0 : index
    %c0_53 = arith.constant 0 : index
    %154 = vector.load %arg15[%c0_52, %c0_53] : memref<128x128xf32, #tpu.memory_space<vmem>>, vector<128x128xf32>
    tpu.vector_store %arg15[%c0_52, %c0_53], %153 {strides = array<i32>} : memref<128x128xf32, #tpu.memory_space<vmem>>, vector<128x128xf32>,
    return
  }
  func.func @transform_0(%arg0: i32) -> (i32, i32) {
    %c0_i32 = arith.constant 0 : i32
    %c0_i32_0 = arith.constant 0 : i32
    %c0_i32_1 = arith.constant 0 : i32
    return %c0_i32, %c0_i32_0 : i32, i32
  }
  func.func @transform_1(%arg0: i32) -> (i32, i32) {
    %c0_i32 = arith.constant 0 : i32
    %c0_i32_0 = arith.constant 0 : i32
    %c0_i32_1 = arith.constant 0 : i32
    return %c0_i32, %c0_i32_0 : i32, i32
  }
  func.func @transform_2(%arg0: i32) -> (i32, i32) {
    %c0_i32 = arith.constant 0 : i32
    %c0_i32_0 = arith.constant 0 : i32
    %c0_i32_1 = arith.constant 0 : i32
    return %c0_i32, %c0_i32_0 : i32, i32
  }
  func.func @transform_3(%arg0: i32) -> (i32, i32) {
    %c0_i32 = arith.constant 0 : i32
    %c0_i32_0 = arith.constant 0 : i32
    %c0_i32_1 = arith.constant 0 : i32
    return %c0_i32, %c0_i32_0 : i32, i32
  }
  func.func @transform_4(%arg0: i32) -> (i32, i32) {
    %c0_i32 = arith.constant 0 : i32
    %c0_i32_0 = arith.constant 0 : i32
    %c0_i32_1 = arith.constant 0 : i32
    return %c0_i32, %c0_i32_0 : i32, i32
  }
  func.func @transform_5(%arg0: i32) -> (i32, i32) {
    %c0_i32 = arith.constant 0 : i32
    %c0_i32_0 = arith.constant 0 : i32
    %c0_i32_1 = arith.constant 0 : i32
    return %c0_i32, %c0_i32_0 : i32, i32
  }
  func.func @transform_6(%arg0: i32) -> (i32, i32) {
    %c0_i32 = arith.constant 0 : i32
    %c0_i32_0 = arith.constant 0 : i32
    %c0_i32_1 = arith.constant 0 : i32
    return %c0_i32, %c0_i32_0 : i32, i32
  }
  func.func @transform_7(%arg0: i32) -> (i32, i32) {
    %c0_i32 = arith.constant 0 : i32
    %c0_i32_0 = arith.constant 0 : i32
    %c0_i32_1 = arith.constant 0 : i32
    return %c0_i32, %c0_i32_0 : i32, i32
  }
  func.func @transform_8(%arg0: i32) -> (i32, i32) {
    %c0_i32 = arith.constant 0 : i32
    %c0_i32_0 = arith.constant 0 : i32
    %c0_i32_1 = arith.constant 0 : i32
    return %c0_i32, %c0_i32_0 : i32, i32
  }
  func.func @transform_9(%arg0: i32) -> (i32, i32) {
    %c0_i32 = arith.constant 0 : i32
    %c0_i32_0 = arith.constant 0 : i32
    %c0_i32_1 = arith.constant 0 : i32
    return %c0_i32, %c0_i32_0 : i32, i32
  }
  func.func @transform_10(%arg0: i32) -> (i32, i32) {
    %c0_i32 = arith.constant 0 : i32
    %c0_i32_0 = arith.constant 0 : i32
    %c0_i32_1 = arith.constant 0 : i32
    return %c0_i32, %c0_i32_0 : i32, i32
  }
  func.func @transform_11(%arg0: i32) -> (i32, i32) {
    %c0_i32 = arith.constant 0 : i32
    %c0_i32_0 = arith.constant 0 : i32
    %c0_i32_1 = arith.constant 0 : i32
    return %c0_i32, %c0_i32_0 : i32, i32
  }
  func.func @transform_12(%arg0: i32) -> (i32, i32) {
    %c0_i32 = arith.constant 0 : i32
    %c0_i32_0 = arith.constant 0 : i32
    %c0_i32_1 = arith.constant 0 : i32
    return %c0_i32, %c0_i32_0 : i32, i32
  }
  func.func @transform_13(%arg0: i32) -> (i32, i32) {
    %c0_i32 = arith.constant 0 : i32
    %c0_i32_0 = arith.constant 0 : i32
    %c0_i32_1 = arith.constant 0 : i32
    return %c0_i32, %c0_i32_0 : i32, i32
  }
  func.func @transform_14(%arg0: i32) -> (i32, i32) {
    %c0_i32 = arith.constant 0 : i32
    %c0_i32_0 = arith.constant 0 : i32
    %c0_i32_1 = arith.constant 0 : i32
    return %c0_i32, %c0_i32_0 : i32, i32
  }
}

module attributes {stable_mosaic.version = 11 : i64} {
  func.func @kernel(%arg0: i32, %arg1: memref<128x128xf32, #tpu.memory_space<vmem>>, %arg2: memref<128x384xbf16, #tpu.memory_space<vmem>>, %arg3: memref<1x384xf32, #tpu.memory_space<vmem>>, %arg4: memref<128x128xbf16, #tpu.memory_space<vmem>>, %arg5: memref<1x128xf32, #tpu.memory_space<vmem>>, %arg6: memref<256x64xf32, #tpu.memory_space<vmem>>, %arg7: memref<1x128xf32, #tpu.memory_space<vmem>>, %arg8: memref<1x128xf32, #tpu.memory_space<vmem>>, %arg9: memref<128x512xbf16, #tpu.memory_space<vmem>>, %arg10: memref<1x512xf32, #tpu.memory_space<vmem>>, %arg11: memref<512x128xbf16, #tpu.memory_space<vmem>>, %arg12: memref<1x128xf32, #tpu.memory_space<vmem>>, %arg13: memref<1x128xf32, #tpu.memory_space<vmem>>, %arg14: memref<1x128xf32, #tpu.memory_space<vmem>>, %arg15: memref<128x128xf32, #tpu.memory_space<vmem>>) attributes {dimension_semantics = [#tpu.dimension_semantics<arbitrary>], iteration_bounds = array<i64: 1>, scalar_prefetch = 0 : i64, scratch_operands = 0 : i64, tpu.core_type = #tpu.core_type<tc>, window_params = [{pipeline_mode = #tpu.pipeline_mode<synchronous>, transform_indices = @transform_0, window_bounds = array<i64: 128, 128>}, {pipeline_mode = #tpu.pipeline_mode<synchronous>, transform_indices = @transform_1, window_bounds = array<i64: 128, 384>}, {pipeline_mode = #tpu.pipeline_mode<synchronous>, transform_indices = @transform_2, window_bounds = array<i64: 1, 384>}, {pipeline_mode = #tpu.pipeline_mode<synchronous>, transform_indices = @transform_3, window_bounds = array<i64: 128, 128>}, {pipeline_mode = #tpu.pipeline_mode<synchronous>, transform_indices = @transform_4, window_bounds = array<i64: 1, 128>}, {pipeline_mode = #tpu.pipeline_mode<synchronous>, transform_indices = @transform_5, window_bounds = array<i64: 256, 64>}, {pipeline_mode = #tpu.pipeline_mode<synchronous>, transform_indices = @transform_6, window_bounds = array<i64: 1, 128>}, {pipeline_mode = #tpu.pipeline_mode<synchronous>, transform_indices = @transform_7, window_bounds = array<i64: 1, 128>}, {pipeline_mode = #tpu.pipeline_mode<synchronous>, transform_indices = @transform_8, window_bounds = array<i64: 128, 512>}, {pipeline_mode = #tpu.pipeline_mode<synchronous>, transform_indices = @transform_9, window_bounds = array<i64: 1, 512>}, {pipeline_mode = #tpu.pipeline_mode<synchronous>, transform_indices = @transform_10, window_bounds = array<i64: 512, 128>}, {pipeline_mode = #tpu.pipeline_mode<synchronous>, transform_indices = @transform_11, window_bounds = array<i64: 1, 128>}, {pipeline_mode = #tpu.pipeline_mode<synchronous>, transform_indices = @transform_12, window_bounds = array<i64: 1, 128>}, {pipeline_mode = #tpu.pipeline_mode<synchronous>, transform_indices = @transform_13, window_bounds = array<i64: 1, 128>}, {pipeline_mode = #tpu.pipeline_mode<synchronous>, transform_indices = @transform_14, window_bounds = array<i64: 128, 128>}]} {
    %c0 = arith.constant 0 : index
    %c0_0 = arith.constant 0 : index
    %0 = vector.load %arg1[%c0, %c0_0] : memref<128x128xf32, #tpu.memory_space<vmem>>, vector<128x128xf32>
    %1 = arith.truncf %0 : vector<128x128xf32> to vector<128x128xbf16>
    %c0_1 = arith.constant 0 : index
    %c0_2 = arith.constant 0 : index
    %2 = vector.load %arg2[%c0_1, %c0_2] : memref<128x384xbf16, #tpu.memory_space<vmem>>, vector<128x384xbf16>
    %cst = arith.constant dense<0.000000e+00> : vector<128x384xf32>
    %3 = tpu.matmul %1, %2, %cst {dimension_numbers = #tpu.dot_dimension_numbers<[1], [0], [0], [1], [0, 0, 1, 1], [], []>} : vector<128x128xbf16>, vector<128x384xbf16>, vector<128x384xf32> -> vector<128x384xf32>
    %c0_3 = arith.constant 0 : index
    %c0_4 = arith.constant 0 : index
    %4 = vector.load %arg3[%c0_3, %c0_4] : memref<1x384xf32, #tpu.memory_space<vmem>>, vector<1x384xf32>
    %5 = vector.broadcast %4 : vector<1x384xf32> to vector<128x384xf32>
    %6 = arith.addf %3, %5 : vector<128x384xf32>
    %7 = tpu.iota {dimensions = array<i32: 1>} : vector<4x128xi32>
    %8 = tpu.iota {dimensions = array<i32: 0>} : vector<4x128xi32>
    %c32_i32 = arith.constant 32 : i32
    %9 = vector.broadcast %c32_i32 : i32 to vector<4x128xi32>
    %10 = arith.muli %8, %9 : vector<4x128xi32>
    %11 = arith.cmpi sge, %7, %10 : vector<4x128xi32>
    %c1_i32 = arith.constant 1 : i32
    %12 = vector.broadcast %c1_i32 : i32 to vector<4x128xi32>
    %13 = arith.addi %8, %12 : vector<4x128xi32>
    %c32_i32_5 = arith.constant 32 : i32
    %14 = vector.broadcast %c32_i32_5 : i32 to vector<4x128xi32>
    %15 = arith.muli %13, %14 : vector<4x128xi32>
    %16 = arith.cmpi slt, %7, %15 : vector<4x128xi32>
    %17 = arith.andi %11, %16 : vector<4x128xi1>
    %18 = arith.extui %17 : vector<4x128xi1> to vector<4x128xi32>
    %19 = arith.sitofp %18 : vector<4x128xi32> to vector<4x128xf32>
    %c0_6 = arith.constant 0 : index
    %c0_7 = arith.constant 0 : index
    %20 = vector.load %arg6[%c0_6, %c0_7] : memref<256x64xf32, #tpu.memory_space<vmem>>, vector<256x64xf32>
    %21 = vector.extract_strided_slice %6 {offsets = [0, 0], sizes = [64, 128], strides = [1, 1]} : vector<128x384xf32> to vector<64x128xf32>
    %22 = vector.extract_strided_slice %6 {offsets = [0, 128], sizes = [64, 128], strides = [1, 1]} : vector<128x384xf32> to vector<64x128xf32>
    %23 = arith.truncf %22 : vector<64x128xf32> to vector<64x128xbf16>
    %24 = vector.extract_strided_slice %6 {offsets = [0, 256], sizes = [64, 128], strides = [1, 1]} : vector<128x384xf32> to vector<64x128xf32>
    %25 = arith.truncf %24 : vector<64x128xf32> to vector<64x128xbf16>
    %26 = vector.shape_cast %19 : vector<4x128xf32> to vector<4x1x128xf32>
    %27 = vector.shape_cast %21 : vector<64x128xf32> to vector<1x64x128xf32>
    %28 = vector.broadcast %26 : vector<4x1x128xf32> to vector<4x64x128xf32>
    %29 = vector.broadcast %27 : vector<1x64x128xf32> to vector<4x64x128xf32>
    %30 = arith.mulf %28, %29 : vector<4x64x128xf32>
    %31 = vector.shape_cast %30 : vector<4x64x128xf32> to vector<256x128xf32>
    %32 = arith.truncf %31 : vector<256x128xf32> to vector<256x128xbf16>
    %cst_8 = arith.constant dense<0.000000e+00> : vector<256x64xf32>
    %33 = tpu.matmul %32, %23, %cst_8 {dimension_numbers = #tpu.dot_dimension_numbers<[1], [1], [0], [0], [0, 0, 1, 0], [], []>} : vector<256x128xbf16>, vector<64x128xbf16>, vector<256x64xf32> -> vector<256x64xf32>
    %34 = arith.addf %33, %20 : vector<256x64xf32>
    %cst_9 = arith.constant dense<0xFF800000> : vector<256xf32>
    %35 = vector.multi_reduction <maximumf>, %34, %cst_9 [1] : vector<256x64xf32> to vector<256xf32>
    %36 = vector.shape_cast %35 : vector<256xf32> to vector<256x1xf32>
    %37 = vector.broadcast %36 : vector<256x1xf32> to vector<256x64xf32>
    %38 = arith.subf %34, %37 : vector<256x64xf32>
    %39 = math.exp %38 : vector<256x64xf32>
    %cst_10 = arith.constant dense<0.000000e+00> : vector<256xf32>
    %40 = vector.multi_reduction <add>, %39, %cst_10 [1] : vector<256x64xf32> to vector<256xf32>
    %41 = vector.shape_cast %40 : vector<256xf32> to vector<256x1xf32>
    %42 = tpu.reciprocal %41 {approx = true} : vector<256x1xf32> -> vector<256x1xf32>
    %43 = vector.broadcast %42 : vector<256x1xf32> to vector<256x64xf32>
    %44 = arith.mulf %39, %43 : vector<256x64xf32>
    %45 = arith.truncf %44 : vector<256x64xf32> to vector<256x64xbf16>
    %cst_11 = arith.constant dense<0.000000e+00> : vector<256x128xf32>
    %46 = tpu.matmul %45, %25, %cst_11 {dimension_numbers = #tpu.dot_dimension_numbers<[1], [0], [0], [1], [0, 0, 1, 1], [], []>} : vector<256x64xbf16>, vector<64x128xbf16>, vector<256x128xf32> -> vector<256x128xf32>
    %47 = vector.shape_cast %46 : vector<256x128xf32> to vector<4x64x128xf32>
    %48 = vector.shape_cast %19 : vector<4x128xf32> to vector<4x1x128xf32>
    %49 = vector.broadcast %48 : vector<4x1x128xf32> to vector<4x64x128xf32>
    %50 = arith.mulf %47, %49 : vector<4x64x128xf32>
    %cst_12 = arith.constant dense<0.000000e+00> : vector<64x128xf32>
    %51 = vector.multi_reduction <add>, %50, %cst_12 [0] : vector<4x64x128xf32> to vector<64x128xf32>
    %52 = vector.extract_strided_slice %6 {offsets = [64, 0], sizes = [64, 128], strides = [1, 1]} : vector<128x384xf32> to vector<64x128xf32>
    %53 = vector.extract_strided_slice %6 {offsets = [64, 128], sizes = [64, 128], strides = [1, 1]} : vector<128x384xf32> to vector<64x128xf32>
    %54 = arith.truncf %53 : vector<64x128xf32> to vector<64x128xbf16>
    %55 = vector.extract_strided_slice %6 {offsets = [64, 256], sizes = [64, 128], strides = [1, 1]} : vector<128x384xf32> to vector<64x128xf32>
    %56 = arith.truncf %55 : vector<64x128xf32> to vector<64x128xbf16>
    %57 = vector.shape_cast %19 : vector<4x128xf32> to vector<4x1x128xf32>
    %58 = vector.shape_cast %52 : vector<64x128xf32> to vector<1x64x128xf32>
    %59 = vector.broadcast %57 : vector<4x1x128xf32> to vector<4x64x128xf32>
    %60 = vector.broadcast %58 : vector<1x64x128xf32> to vector<4x64x128xf32>
    %61 = arith.mulf %59, %60 : vector<4x64x128xf32>
    %62 = vector.shape_cast %61 : vector<4x64x128xf32> to vector<256x128xf32>
    %63 = arith.truncf %62 : vector<256x128xf32> to vector<256x128xbf16>
    %cst_13 = arith.constant dense<0.000000e+00> : vector<256x64xf32>
    %64 = tpu.matmul %63, %54, %cst_13 {dimension_numbers = #tpu.dot_dimension_numbers<[1], [1], [0], [0], [0, 0, 1, 0], [], []>} : vector<256x128xbf16>, vector<64x128xbf16>, vector<256x64xf32> -> vector<256x64xf32>
    %65 = arith.addf %64, %20 : vector<256x64xf32>
    %cst_14 = arith.constant dense<0xFF800000> : vector<256xf32>
    %66 = vector.multi_reduction <maximumf>, %65, %cst_14 [1] : vector<256x64xf32> to vector<256xf32>
    %67 = vector.shape_cast %66 : vector<256xf32> to vector<256x1xf32>
    %68 = vector.broadcast %67 : vector<256x1xf32> to vector<256x64xf32>
    %69 = arith.subf %65, %68 : vector<256x64xf32>
    %70 = math.exp %69 : vector<256x64xf32>
    %cst_15 = arith.constant dense<0.000000e+00> : vector<256xf32>
    %71 = vector.multi_reduction <add>, %70, %cst_15 [1] : vector<256x64xf32> to vector<256xf32>
    %72 = vector.shape_cast %71 : vector<256xf32> to vector<256x1xf32>
    %73 = tpu.reciprocal %72 {approx = true} : vector<256x1xf32> -> vector<256x1xf32>
    %74 = vector.broadcast %73 : vector<256x1xf32> to vector<256x64xf32>
    %75 = arith.mulf %70, %74 : vector<256x64xf32>
    %76 = arith.truncf %75 : vector<256x64xf32> to vector<256x64xbf16>
    %cst_16 = arith.constant dense<0.000000e+00> : vector<256x128xf32>
    %77 = tpu.matmul %76, %56, %cst_16 {dimension_numbers = #tpu.dot_dimension_numbers<[1], [0], [0], [1], [0, 0, 1, 1], [], []>} : vector<256x64xbf16>, vector<64x128xbf16>, vector<256x128xf32> -> vector<256x128xf32>
    %78 = vector.shape_cast %77 : vector<256x128xf32> to vector<4x64x128xf32>
    %79 = vector.shape_cast %19 : vector<4x128xf32> to vector<4x1x128xf32>
    %80 = vector.broadcast %79 : vector<4x1x128xf32> to vector<4x64x128xf32>
    %81 = arith.mulf %78, %80 : vector<4x64x128xf32>
    %cst_17 = arith.constant dense<0.000000e+00> : vector<64x128xf32>
    %82 = vector.multi_reduction <add>, %81, %cst_17 [0] : vector<4x64x128xf32> to vector<64x128xf32>
    %83 = tpu.concatenate %51, %82 in 0 : vector<64x128xf32>, vector<64x128xf32> -> vector<128x128xf32>
    %84 = arith.truncf %83 : vector<128x128xf32> to vector<128x128xbf16>
    %c0_18 = arith.constant 0 : index
    %c0_19 = arith.constant 0 : index
    %85 = vector.load %arg4[%c0_18, %c0_19] : memref<128x128xbf16, #tpu.memory_space<vmem>>, vector<128x128xbf16>
    %cst_20 = arith.constant dense<0.000000e+00> : vector<128x128xf32>
    %86 = tpu.matmul %84, %85, %cst_20 {dimension_numbers = #tpu.dot_dimension_numbers<[1], [0], [0], [1], [0, 0, 1, 1], [], []>} : vector<128x128xbf16>, vector<128x128xbf16>, vector<128x128xf32> -> vector<128x128xf32>
    %c0_21 = arith.constant 0 : index
    %c0_22 = arith.constant 0 : index
    %87 = vector.load %arg5[%c0_21, %c0_22] : memref<1x128xf32, #tpu.memory_space<vmem>>, vector<1x128xf32>
    %88 = vector.broadcast %87 : vector<1x128xf32> to vector<128x128xf32>
    %89 = arith.addf %86, %88 : vector<128x128xf32>
    %90 = arith.addf %89, %0 : vector<128x128xf32>
    %cst_23 = arith.constant dense<0.000000e+00> : vector<128xf32>
    %91 = vector.multi_reduction <add>, %90, %cst_23 [1] : vector<128x128xf32> to vector<128xf32>
    %92 = vector.shape_cast %91 : vector<128xf32> to vector<128x1xf32>
    %cst_24 = arith.constant 1.280000e+02 : f32
    %93 = vector.broadcast %cst_24 : f32 to vector<128x1xf32>
    %94 = arith.divf %92, %93 : vector<128x1xf32>
    %95 = vector.broadcast %94 : vector<128x1xf32> to vector<128x128xf32>
    %96 = arith.subf %90, %95 : vector<128x128xf32>
    %97 = arith.mulf %96, %96 : vector<128x128xf32>
    %cst_25 = arith.constant dense<0.000000e+00> : vector<128xf32>
    %98 = vector.multi_reduction <add>, %97, %cst_25 [1] : vector<128x128xf32> to vector<128xf32>
    %99 = vector.shape_cast %98 : vector<128xf32> to vector<128x1xf32>
    %cst_26 = arith.constant 1.280000e+02 : f32
    %100 = vector.broadcast %cst_26 : f32 to vector<128x1xf32>
    %101 = arith.divf %99, %100 : vector<128x1xf32>
    %102 = vector.broadcast %94 : vector<128x1xf32> to vector<128x128xf32>
    %103 = arith.subf %90, %102 : vector<128x128xf32>
    %cst_27 = arith.constant 9.99999974E-6 : f32
    %104 = vector.broadcast %cst_27 : f32 to vector<128x1xf32>
    %105 = arith.addf %101, %104 : vector<128x1xf32>
    %106 = math.rsqrt %105 : vector<128x1xf32>
    %107 = vector.broadcast %106 : vector<128x1xf32> to vector<128x128xf32>
    %108 = arith.mulf %103, %107 : vector<128x128xf32>
    %c0_28 = arith.constant 0 : index
    %c0_29 = arith.constant 0 : index
    %109 = vector.load %arg7[%c0_28, %c0_29] : memref<1x128xf32, #tpu.memory_space<vmem>>, vector<1x128xf32>
    %110 = vector.broadcast %109 : vector<1x128xf32> to vector<128x128xf32>
    %111 = arith.mulf %108, %110 : vector<128x128xf32>
    %c0_30 = arith.constant 0 : index
    %c0_31 = arith.constant 0 : index
    %112 = vector.load %arg8[%c0_30, %c0_31] : memref<1x128xf32, #tpu.memory_space<vmem>>, vector<1x128xf32>
    %113 = vector.broadcast %112 : vector<1x128xf32> to vector<128x128xf32>
    %114 = arith.addf %111, %113 : vector<128x128xf32>
    %115 = arith.truncf %114 : vector<128x128xf32> to vector<128x128xbf16>
    %c0_32 = arith.constant 0 : index
    %c0_33 = arith.constant 0 : index
    %116 = vector.load %arg9[%c0_32, %c0_33] : memref<128x512xbf16, #tpu.memory_space<vmem>>, vector<128x512xbf16>
    %cst_34 = arith.constant dense<0.000000e+00> : vector<128x512xf32>
    %117 = tpu.matmul %115, %116, %cst_34 {dimension_numbers = #tpu.dot_dimension_numbers<[1], [0], [0], [1], [0, 0, 1, 1], [], []>} : vector<128x128xbf16>, vector<128x512xbf16>, vector<128x512xf32> -> vector<128x512xf32>
    %c0_35 = arith.constant 0 : index
    %c0_36 = arith.constant 0 : index
    %118 = vector.load %arg10[%c0_35, %c0_36] : memref<1x512xf32, #tpu.memory_space<vmem>>, vector<1x512xf32>
    %119 = vector.broadcast %118 : vector<1x512xf32> to vector<128x512xf32>
    %120 = arith.addf %117, %119 : vector<128x512xf32>
    %cst_37 = arith.constant 0.000000e+00 : f32
    %121 = vector.broadcast %cst_37 : f32 to vector<128x512xf32>
    %122 = arith.maximumf %120, %121 : vector<128x512xf32>
    %123 = arith.truncf %122 : vector<128x512xf32> to vector<128x512xbf16>
    %c0_38 = arith.constant 0 : index
    %c0_39 = arith.constant 0 : index
    %124 = vector.load %arg11[%c0_38, %c0_39] : memref<512x128xbf16, #tpu.memory_space<vmem>>, vector<512x128xbf16>
    %cst_40 = arith.constant dense<0.000000e+00> : vector<128x128xf32>
    %125 = tpu.matmul %123, %124, %cst_40 {dimension_numbers = #tpu.dot_dimension_numbers<[1], [0], [0], [1], [0, 0, 1, 1], [], []>} : vector<128x512xbf16>, vector<512x128xbf16>, vector<128x128xf32> -> vector<128x128xf32>
    %c0_41 = arith.constant 0 : index
    %c0_42 = arith.constant 0 : index
    %126 = vector.load %arg12[%c0_41, %c0_42] : memref<1x128xf32, #tpu.memory_space<vmem>>, vector<1x128xf32>
    %127 = vector.broadcast %126 : vector<1x128xf32> to vector<128x128xf32>
    %128 = arith.addf %125, %127 : vector<128x128xf32>
    %129 = arith.addf %128, %114 : vector<128x128xf32>
    %cst_43 = arith.constant dense<0.000000e+00> : vector<128xf32>
    %130 = vector.multi_reduction <add>, %129, %cst_43 [1] : vector<128x128xf32> to vector<128xf32>
    %131 = vector.shape_cast %130 : vector<128xf32> to vector<128x1xf32>
    %cst_44 = arith.constant 1.280000e+02 : f32
    %132 = vector.broadcast %cst_44 : f32 to vector<128x1xf32>
    %133 = arith.divf %131, %132 : vector<128x1xf32>
    %134 = vector.broadcast %133 : vector<128x1xf32> to vector<128x128xf32>
    %135 = arith.subf %129, %134 : vector<128x128xf32>
    %136 = arith.mulf %135, %135 : vector<128x128xf32>
    %cst_45 = arith.constant dense<0.000000e+00> : vector<128xf32>
    %137 = vector.multi_reduction <add>, %136, %cst_45 [1] : vector<128x128xf32> to vector<128xf32>
    %138 = vector.shape_cast %137 : vector<128xf32> to vector<128x1xf32>
    %cst_46 = arith.constant 1.280000e+02 : f32
    %139 = vector.broadcast %cst_46 : f32 to vector<128x1xf32>
    %140 = arith.divf %138, %139 : vector<128x1xf32>
    %141 = vector.broadcast %133 : vector<128x1xf32> to vector<128x128xf32>
    %142 = arith.subf %129, %141 : vector<128x128xf32>
    %cst_47 = arith.constant 9.99999974E-6 : f32
    %143 = vector.broadcast %cst_47 : f32 to vector<128x1xf32>
    %144 = arith.addf %140, %143 : vector<128x1xf32>
    %145 = math.rsqrt %144 : vector<128x1xf32>
    %146 = vector.broadcast %145 : vector<128x1xf32> to vector<128x128xf32>
    %147 = arith.mulf %142, %146 : vector<128x128xf32>
    %c0_48 = arith.constant 0 : index
    %c0_49 = arith.constant 0 : index
    %148 = vector.load %arg13[%c0_48, %c0_49] : memref<1x128xf32, #tpu.memory_space<vmem>>, vector<1x128xf32>
    %149 = vector.broadcast %148 : vector<1x128xf32> to vector<128x128xf32>
    %150 = arith.mulf %147, %149 : vector<128x128xf32>
    %c0_50 = arith.constant 0 : index
    %c0_51 = arith.constant 0 : index
    %151 = vector.load %arg14[%c0_50, %c0_51] : memref<1x128xf32, #tpu.memory_space<vmem>>, vector<1x128xf32>
    %152 = vector.broadcast %151 : vector<1x128xf32> to vector<128x128xf32>
    %153 = arith.addf %150, %152 : vector<128x128xf32>
    %c0_52 = arith.constant 0 : index
    %c0_53 = arith.constant 0 : index
    %154 = vector.load %arg15[%c0_52, %c0_53] : memref<128x128xf32, #tpu.memory_space<vmem>>, vector<128x128xf32>
    tpu.vector_store %arg15[%c0_52, %c0_53], %153 {strides = array<i32>} : memref<128x128xf32, #tpu.memory_space<vmem>>, vector<128x128xf32>,
    return
  }
  func.func @transform_0(%arg0: i32) -> (i32, i32) {
    %c0_i32 = arith.constant 0 : i32
    %c0_i32_0 = arith.constant 0 : i32
    %c0_i32_1 = arith.constant 0 : i32
    return %c0_i32, %c0_i32_0 : i32, i32
  }
  func.func @transform_1(%arg0: i32) -> (i32, i32) {
    %c0_i32 = arith.constant 0 : i32
    %c0_i32_0 = arith.constant 0 : i32
    %c0_i32_1 = arith.constant 0 : i32
    return %c0_i32, %c0_i32_0 : i32, i32
  }
  func.func @transform_2(%arg0: i32) -> (i32, i32) {
    %c0_i32 = arith.constant 0 : i32
    %c0_i32_0 = arith.constant 0 : i32
    %c0_i32_1 = arith.constant 0 : i32
    return %c0_i32, %c0_i32_0 : i32, i32
  }
  func.func @transform_3(%arg0: i32) -> (i32, i32) {
    %c0_i32 = arith.constant 0 : i32
    %c0_i32_0 = arith.constant 0 : i32
    %c0_i32_1 = arith.constant 0 : i32
    return %c0_i32, %c0_i32_0 : i32, i32
  }
  func.func @transform_4(%arg0: i32) -> (i32, i32) {
    %c0_i32 = arith.constant 0 : i32
    %c0_i32_0 = arith.constant 0 : i32
    %c0_i32_1 = arith.constant 0 : i32
    return %c0_i32, %c0_i32_0 : i32, i32
  }
  func.func @transform_5(%arg0: i32) -> (i32, i32) {
    %c0_i32 = arith.constant 0 : i32
    %c0_i32_0 = arith.constant 0 : i32
    %c0_i32_1 = arith.constant 0 : i32
    return %c0_i32, %c0_i32_0 : i32, i32
  }
  func.func @transform_6(%arg0: i32) -> (i32, i32) {
    %c0_i32 = arith.constant 0 : i32
    %c0_i32_0 = arith.constant 0 : i32
    %c0_i32_1 = arith.constant 0 : i32
    return %c0_i32, %c0_i32_0 : i32, i32
  }
  func.func @transform_7(%arg0: i32) -> (i32, i32) {
    %c0_i32 = arith.constant 0 : i32
    %c0_i32_0 = arith.constant 0 : i32
    %c0_i32_1 = arith.constant 0 : i32
    return %c0_i32, %c0_i32_0 : i32, i32
  }
  func.func @transform_8(%arg0: i32) -> (i32, i32) {
    %c0_i32 = arith.constant 0 : i32
    %c0_i32_0 = arith.constant 0 : i32
    %c0_i32_1 = arith.constant 0 : i32
    return %c0_i32, %c0_i32_0 : i32, i32
  }
  func.func @transform_9(%arg0: i32) -> (i32, i32) {
    %c0_i32 = arith.constant 0 : i32
    %c0_i32_0 = arith.constant 0 : i32
    %c0_i32_1 = arith.constant 0 : i32
    return %c0_i32, %c0_i32_0 : i32, i32
  }
  func.func @transform_10(%arg0: i32) -> (i32, i32) {
    %c0_i32 = arith.constant 0 : i32
    %c0_i32_0 = arith.constant 0 : i32
    %c0_i32_1 = arith.constant 0 : i32
    return %c0_i32, %c0_i32_0 : i32, i32
  }
  func.func @transform_11(%arg0: i32) -> (i32, i32) {
    %c0_i32 = arith.constant 0 : i32
    %c0_i32_0 = arith.constant 0 : i32
    %c0_i32_1 = arith.constant 0 : i32
    return %c0_i32, %c0_i32_0 : i32, i32
  }
  func.func @transform_12(%arg0: i32) -> (i32, i32) {
    %c0_i32 = arith.constant 0 : i32
    %c0_i32_0 = arith.constant 0 : i32
    %c0_i32_1 = arith.constant 0 : i32
    return %c0_i32, %c0_i32_0 : i32, i32
  }
  func.func @transform_13(%arg0: i32) -> (i32, i32) {
    %c0_i32 = arith.constant 0 : i32
    %c0_i32_0 = arith.constant 0 : i32
    %c0_i32_1 = arith.constant 0 : i32
    return %c0_i32, %c0_i32_0 : i32, i32
  }
  func.func @transform_14(%arg0: i32) -> (i32, i32) {
    %c0_i32 = arith.constant 0 : i32
    %c0_i32_0 = arith.constant 0 : i32
    %c0_i32_1 = arith.constant 0 : i32
    return %c0_i32, %c0_i32_0 : i32, i32
  }
}

</mosaic_0001>

<bundles_post_ra>
// kernel: _lambda_.2
= control target key start
LH: loop header
LB: loop body
LE: loop exit
PB: predicated region body
PF: predicated region fallthrough
CT: control target
= control target key end

     0   :  { %19 = vsyncpa [#allocation3], 0  ;;  %s7390_s0 = inlined_call_operand.vmem [shape: f32[128,128], index: 0, kind: input, shape index: {}]   ;;  %s7391_s1 = inlined_call_operand.hbm [shape: bf16[128,384], index: 1, kind: input, shape index: {}]   ;;  %s7392_s2 = inlined_call_operand.vmem [shape: f32[1,384], index: 2, kind: input, shape index: {}]   ;;  %s7393_s3 = inlined_call_operand.hbm [shape: bf16[128,128], index: 3, kind: input, shape index: {}]   ;;  %s7394_s4 = inlined_call_operand.vmem [shape: f32[1,128], index: 4, kind: input, shape index: {}]   ;;  %s7395_s5 = inlined_call_operand.vmem [shape: f32[256,64], index: 5, kind: input, shape index: {}]   ;;  %s7396_s6 = inlined_call_operand.vmem [shape: f32[1,128], index: 6, kind: input, shape index: {}]   ;;  %s7397_s7 = inlined_call_operand.vmem [shape: f32[1,128], index: 7, kind: input, shape index: {}]   ;;  %s7398_s8 = inlined_call_operand.vmem [shape: bf16[128,512], index: 8, kind: input, shape index: {}]   ;;  %s7399_s9 = inlined_call_operand.vmem [shape: f32[1,512], index: 9, kind: input, shape index: {}]   ;;  %s7400_s10 = inlined_call_operand.hbm [shape: bf16[512,128], index: 10, kind: input, shape index: {}]   ;;  %s7401_s11 = inlined_call_operand.vmem [shape: f32[1,128], index: 11, kind: input, shape index: {}]   ;;  %s7402_s12 = inlined_call_operand.vmem [shape: f32[1,128], index: 12, kind: input, shape index: {}]   ;;  %s7403_s13 = inlined_call_operand.vmem [shape: f32[1,128], index: 13, kind: input, shape index: {}]   ;;  %s7404_s14 = inlined_call_operand.vmem [shape: f32[128,128], index: 14, kind: output, shape index: {}]  }
   0x1   :  { %20 = vsyncpa [#allocation5], 0  ;;  %s5095_s29 = smov [#allocation4]  }
   0x2   :  { %s42_s30 = sshll.u32 %s5095_s29, 4  ;;  %s43_s30 = int_to_ptr.vmem [resolvable:$true] %s42_s30 }
   0x3   :  { %s5039_s15 = scalar_lea.vmem %s43_s30, 1024  ;;  %p5044_p1 = scmp.lt.s32.totalorder %s43_s30, %s43_s30 }
   0x4   :  { %p5040_p0 = scmp.ne.s32.totalorder %s43_s30, %s5039_s15  ;;  %p5045_p2 = scmp.lt.s32.totalorder %s5039_s15, %s5039_s15 }
   0x6   :  { %p5046_p3 = por %p5045_p2, %p5044_p1 }
   0x8   :  { %p5047_p4 = pnand %p5046_p3, %p5040_p0 }
   0xa   :  { %5050 = shalt.err (!%p5047_p4)
}
   0xb   :  { %s5096_s16 = smov 64   ;;  %s5097_s17 = smov 4  }
   0xc   :  { %48 = dma.hbm_to_vmem [thread:$0]  %s7393_s3, 1024, %s43_s30, [#allocation5], %s5096_s16, %s5096_s16, %s5097_s17  }
   0xd   :  { %s5098_s20 = smov [#allocation2]  }
   0xe   :  { %s28_s21 = sshll.u32 %s5098_s20, 4  ;;  %s29_s21 = int_to_ptr.vmem [resolvable:$true] %s28_s21 }
   0xf   :  { %s5059_s22 = scalar_lea.vmem %s29_s21, 3072  ;;  %p5064_p6 = scmp.lt.s32.totalorder %s29_s21, %s29_s21 }
  0x10   :  { %p5060_p5 = scmp.ne.s32.totalorder %s29_s21, %s5059_s22  ;;  %p5065_p7 = scmp.lt.s32.totalorder %s5059_s22, %s5059_s22 }
  0x12   :  { %p5066_p8 = por %p5065_p7, %p5064_p6 }
  0x14   :  { %p5067_p9 = pnand %p5066_p8, %p5060_p5 }
  0x16   :  { %5070 = shalt.err (!%p5067_p9)
}
  0x17   :  { %s5099_s23 = smov 192   ;;  %s5100_s24 = smov 12  }
  0x18   :  { %34 = dma.hbm_to_vmem [thread:$0]  %s7391_s1, 3072, %s29_s21, [#allocation3], %s5099_s23, %s5099_s23, %s5100_s24  }
  0x19   :  { %s5101_s27 = smov [#allocation6]  }
  0x1a   :  { %s66_s28 = sshll.u32 %s5101_s27, 4  ;;  %s67_s28 = int_to_ptr.vmem [resolvable:$true] %s66_s28 }
  0x1b   :  { %s5079_s3 = scalar_lea.vmem %s67_s28, 4096  ;;  %p5084_p11 = scmp.lt.s32.totalorder %s67_s28, %s67_s28 }
  0x1c   :  { %p5080_p10 = scmp.ne.s32.totalorder %s67_s28, %s5079_s3  ;;  %p5085_p12 = scmp.lt.s32.totalorder %s5079_s3, %s5079_s3 }
  0x1e   :  { %p5086_p13 = por %p5085_p12, %p5084_p11 }
  0x20   :  { %p5087_p0 = pnand %p5086_p13, %p5080_p10 }
  0x22   :  { %5090 = shalt.err (!%p5087_p0)
}
  0x23   :  { %72 = dma.hbm_to_vmem [thread:$0]  %s7400_s10, 4096, %s67_s28, [#allocation5], %s5096_s16, %s5096_s16, %s5097_s17  }
  0x24   :  { %5091 = dma.done.wait [#allocation3], 3072  }
  0x25   :  { %5092 = vsyncadd [#allocation3], 4294964224 }
  0x26   :  { %5093 = dma.done.wait [#allocation5], 5120  }
  0x27   :  { %5094 = vsyncadd [#allocation5], 4294962176  ;;  %v7406_v0 = vmov 0   ;;  %v4575_v1 = vld [vmem:[#allocation2 + $0xac] ss:$12 sps:$4 sm:$0xff]   ;;  %v89_v8 = vld [vmem:[%s7390_s0] sm:$0xff]  ;;  %v147_v49 = vlaneseq }
  0x28   :  { %322 = vmatprep.mubr.bf16.mxu0 %v7406_v0  ;;  %v4577_v2 = vld [vmem:[#allocation2 + $0xa8] ss:$12 sps:$4 sm:$0xff]   ;;  %290 = vmatprep.subr.bf16.mxu0 %v4575_v1  ;;  %v4580_v4 = vld [vmem:[#allocation2 + $0x90] ss:$12 sps:$4 sm:$0xff]   ;;  %v4583_v6 = vld [vmem:[#allocation2 + $0x78] ss:$12 sps:$4 sm:$0xff]  }
  0x29   :  { %v4578_v3 = vld [vmem:[#allocation2 + $0x94] ss:$12 sps:$4 sm:$0xff]   ;;  %291 = vmatpush1.bf16.msra.mxu0 %v4577_v2  ;;  %v4581_v5 = vld [vmem:[#allocation2 + $0x7c] ss:$12 sps:$4 sm:$0xff]   ;;  %v4584_v7 = vld [vmem:[#allocation2 + $0x64] ss:$12 sps:$4 sm:$0xff]  }
  0x2a   :  { %292 = vmatprep.subr.bf16.mxu0 %v4578_v3  ;;  %v4586_v9 = vld [vmem:[#allocation2 + $0x60] ss:$12 sps:$4 sm:$0xff]   ;;  %v4589_v13 = vld [vmem:[#allocation2 + $0x48] ss:$12 sps:$4 sm:$0xff]   ;;  %v4599_v15 = vld [vmem:[#allocation2 + $0xb0] ss:$12 sps:$4 sm:$0xff]  }
  0x2b   :  { %v90_v10 = vld [vmem:[%s7390_s0 + $0x8] sm:$0xff]  ;;  %v4590_v14 = vld [vmem:[#allocation2 + $0x34] ss:$12 sps:$4 sm:$0xff]   ;;  %v4600_v16 = vld [vmem:[#allocation2 + $0x98] ss:$12 sps:$4 sm:$0xff]   ;;  %4341 = vmatprep.subr.bf16.mxu1 %v4599_v15  ;;  %v5244_v50 = vshrl.u32 %v147_v49, 7 }
  0x2c   :  { %v4587_v11 = vld [vmem:[#allocation2 + $0x4c] ss:$12 sps:$4 sm:$0xff]   ;;  %v105_v12 = vpack.c.bf16 %v90_v10, %v89_v8  ;;  %v4592_v17 = vld [vmem:[#allocation2 + $0x30] ss:$12 sps:$4 sm:$0xff]   ;;  %4342 = vmatpush3.bf16.msra.mxu1 %v4599_v15  ;;  %v4602_v22 = vld [vmem:[#allocation2 + $0x68] ss:$12 sps:$4 sm:$0xff]  }
  0x2d   :  { %293 = vmatpush1.bf16.msra.mxu0 %v4580_v4  ;;  %v4593_v18 = vld [vmem:[#allocation2 + $0x1c] ss:$12 sps:$4 sm:$0xff]   ;;  %4343 = vmatprep.subr.bf16.mxu1 %v4600_v16  ;;  %v4601_v19 = vld [vmem:[#allocation2 + $0x80] ss:$12 sps:$4 sm:$0xff]   ;;  %v4595_v20 = vld [vmem:[#allocation2 + $0x18] ss:$12 sps:$4 sm:$0xff]  }
  0x2e   :  { %294 = vmatprep.subr.bf16.mxu0 %v4581_v5  ;;  %4357 = vmatprep.mubr.bf16.mxu1 %v105_v12  ;;  %v4596_v21 = vld [vmem:[#allocation2 + $0x4] ss:$12 sps:$4 sm:$0xff]   ;;  %v4598_v23 = vld [vmem:[#allocation2] ss:$12 sps:$4 sm:$0xff]   ;;  %v92_v27 = vld [vmem:[%s7390_s0 + $0x18] sm:$0xff]  ;;  %7463 = vst [vmem:[#allocation9_spill] sm:$0xff] %v5244_v50 }
  0x2f   :  { %v4603_v24 = vld [vmem:[#allocation2 + $0x50] ss:$12 sps:$4 sm:$0xff]   ;;  %v4604_v25 = vld [vmem:[#allocation2 + $0x38] ss:$12 sps:$4 sm:$0xff]   ;;  %v4605_v28 = vld [vmem:[#allocation2 + $0x20] ss:$12 sps:$4 sm:$0xff]  }
  0x30   :  { %4344 = vmatpush3.bf16.msra.mxu1 %v4600_v16  ;;  %v91_v26 = vld [vmem:[%s7390_s0 + $0x10] sm:$0xff]  ;;  %v93_v31 = vld [vmem:[%s7390_s0 + $0x20] sm:$0xff]  ;;  %v94_v32 = vld [vmem:[%s7390_s0 + $0x28] sm:$0xff]  ;;  %v506_v51 = vadd.s32 1, %v5244_v50  ;;  %v5103_v52 = vmov 1966171168  }
  0x31   :  { %295 = vmatpush1.bf16.msra.mxu0 %v4583_v6  ;;  %4345 = vmatprep.subr.bf16.mxu1 %v4601_v19  ;;  %v106_v29 = vpack.c.bf16 %v92_v27, %v91_v26  ;;  %v4606_v30 = vld [vmem:[#allocation2 + $0x8] ss:$12 sps:$4 sm:$0xff]   ;;  %v107_v33 = vpack.c.bf16 %v94_v32, %v93_v31  ;;  %v96_v35 = vld [vmem:[%s7390_s0 + $0x38] sm:$0xff]  ;;  %v97_v36 = vld [vmem:[%s7390_s0 + $0x40] sm:$0xff]  ;;  %v554_v53 = vunpack.c.l.s4 %v5103_v52  ;;  %v501_v54 = vand.u32 127, %v147_v49 }
  0x32   :  { %296 = vmatprep.subr.bf16.mxu0 %v4584_v7  ;;  %v95_v34 = vld [vmem:[%s7390_s0 + $0x30] sm:$0xff]  ;;  %v98_v37 = vld [vmem:[%s7390_s0 + $0x48] sm:$0xff]  ;;  %v100_v41 = vld [vmem:[%s7390_s0 + $0x58] sm:$0xff]  ;;  %v504_v55 = vmul.u32 32, %v5244_v50  ;;  %v507_v56 = vmul.u32 32, %v506_v51  ;;  %v5104_v59 = vmov 0.0  }
  0x33   :  { %v108_v38 = vpack.c.bf16 %v96_v35, %v95_v34  ;;  %v109_v39 = vpack.c.bf16 %v98_v37, %v97_v36  ;;  %v99_v40 = vld [vmem:[%s7390_s0 + $0x50] sm:$0xff]  ;;  %v101_v42 = vld [vmem:[%s7390_s0 + $0x60] sm:$0xff]  ;;  %v102_v43 = vld [vmem:[%s7390_s0 + $0x68] sm:$0xff]  ;;  %v555_v57 = vunpack.c.0.s8 %v554_v53  ;;  %v5251_v1 = vsub.s32 0, %v5244_v50 }
  0x34   :  { %4346 = vmatpush3.bf16.msra.mxu1 %v4601_v19  ;;  %v110_v44 = vpack.c.bf16 %v100_v41, %v99_v40  ;;  %v111_v45 = vpack.c.bf16 %v102_v43, %v101_v42  ;;  %v103_v46 = vld [vmem:[%s7390_s0 + $0x70] sm:$0xff]  ;;  %v104_v47 = vld [vmem:[%s7390_s0 + $0x78] sm:$0xff]  ;;  %vm505_vm0 = vcmp.ge.s32.totalorder %v501_v54, %v504_v55  ;;  %vm508_vm1 = vcmp.lt.s32.totalorder %v501_v54, %v507_v56  ;;  %v5256_v2 = vld [vmem:[%s7392_s2] sm:$0x7] }
  0x35   :  { %297 = vmatpush1.bf16.msra.mxu0 %v4586_v9  ;;  %4347 = vmatprep.subr.bf16.mxu1 %v4602_v22  ;;  %v112_v48 = vpack.c.bf16 %v104_v47, %v103_v46  ;;  %vm509_vm2 = vmand %vm505_vm0, %vm508_vm1  ;;  %v558_v58 = vsub.s32 %v555_v57, %v5244_v50  ;;  %7464 = vst [vmem:[#allocation10_spill] sm:$0xff] %v5251_v1  ;;  %vm806_vm3 = vcmask 523264  }
  0x36   :  { %298 = vmatprep.subr.bf16.mxu0 %v4587_v11  ;;  %v3990_v60 = vsel %vm509_vm2, 1.0, %v5104_v59  ;;  %v5260_v4 = vrot.slane %v5256_v2, %v5251_v1 }
  0x37   :  { %v559_v61 = vrot.slane %v3990_v60, %v558_v58 }
  0x38   :  { %4348 = vmatpush3.bf16.msra.mxu1 %v4602_v22 }
  0x39   :  { %299 = vmatpush1.bf16.msra.mxu0 %v4589_v13  ;;  %4349 = vmatprep.subr.bf16.mxu1 %v4603_v24  ;;  %v560_v62 = vcombine.high %v559_v61, %v559_v61  ;;  %v567_v3 = vrot.slane %v559_v61, %v558_v58 }
  0x3a   :  { %300 = vmatprep.subr.bf16.mxu0 %v4590_v14 }
  0x3b   :  { %v574_v63 = vrot.slane %v560_v62, %v558_v58  ;;  %v575_v6 = vcombine.high %v567_v3, %v567_v3  ;;  %v5266_v10 = vrot.slane %v567_v3, %v5251_v1 }
  0x3c   :  { %4350 = vmatpush3.bf16.msra.mxu1 %v4603_v24 }
  0x3d   :  { %301 = vmatpush1.bf16.msra.mxu0 %v4592_v17  ;;  %4351 = vmatprep.subr.bf16.mxu1 %v4604_v25  ;;  %v576_v7 = vcombine.high %v574_v63, %v574_v63  ;;  %7465 = vst [vmem:[#allocation11_spill] sm:$0xff] %v5266_v10  ;;  %v5269_v11 = vrot.slane %v574_v63, %v5251_v1 }
  0x3e   :  { %302 = vmatprep.subr.bf16.mxu0 %v4593_v18  ;;  %v5272_v13 = vrot.slane %v575_v6, %v5251_v1 }
  0x3f   :  { %7466 = vst [vmem:[#allocation12_spill] sm:$0xff] %v5269_v11  ;;  %v5275_v14 = vrot.slane %v576_v7, %v5251_v1 }
  0x40   :  { %4352 = vmatpush3.bf16.msra.mxu1 %v4604_v25  ;;  %7467 = vst [vmem:[#allocation13_spill] sm:$0xff] %v5272_v13 }
  0x41   :  { %303 = vmatpush1.bf16.msra.mxu0 %v4595_v20  ;;  %4353 = vmatprep.subr.bf16.mxu1 %v4605_v28  ;;  %7468 = vst [vmem:[#allocation14_spill] sm:$0xff] %v5275_v14 }
  0x42   :  { %304 = vmatprep.subr.bf16.mxu0 %v4596_v21 }
  0x44   :  { %4354 = vmatpush3.bf16.msra.mxu1 %v4605_v28 }
  0x45   :  { %305 = vmatpush1.bf16.msra.mxu0 %v4598_v23  ;;  %4355 = vmatprep.subr.bf16.mxu1 %v4606_v30 }
  0x48   :  { %323 = vmatmul.mubr.bf16.vlgmr.msra.gmra.mxu0 %v105_v12  ;;  %4356 = vmatpush3.bf16.msra.mxu1 %v4606_v30 }
  0x49   :  { %332 = vmatprep.mubr.bf16.mxu0 %v7406_v0 }
  0x4b   :  { %4358 = vmatmul.mubr.bf16.vlgmr.msra.gmra.mxu1 %v106_v29 }
  0x4c   :  { %4361 = vmatprep.mubr.bf16.mxu1 %v107_v33 }
  0x50   :  { %333 = vmatmul.mubr.bf16.gmra.mxu0 %v106_v29 }
  0x51   :  { %342 = vmatprep.mubr.bf16.mxu0 %v7406_v0 }
  0x53   :  { %4362 = vmatmul.mubr.bf16.gmra.mxu1 %v108_v38 }
  0x54   :  { %4365 = vmatprep.mubr.bf16.mxu1 %v109_v39 }
  0x58   :  { %343 = vmatmul.mubr.bf16.gmra.mxu0 %v107_v33 }
  0x59   :  { %352 = vmatprep.mubr.bf16.mxu0 %v7406_v0 }
  0x5b   :  { %4366 = vmatmul.mubr.bf16.gmra.mxu1 %v110_v44 }
  0x5c   :  { %4369 = vmatprep.mubr.bf16.mxu1 %v111_v45 }
  0x60   :  { %353 = vmatmul.mubr.bf16.gmra.mxu0 %v108_v38  ;;  %v7405_v38 = vsub.s32 1, %v5244_v50 }
  0x61   :  { %362 = vmatprep.mubr.bf16.mxu0 %v7406_v0 }
  0x62   :  { %v5322_v41 = vrot.slane %v5256_v2, %v7405_v38 }
  0x63   :  { %4370 = vmatmul.mubr.bf16.gmra.mxu1 %v112_v48 }
  0x68   :  { %363 = vmatmul.mubr.bf16.gmra.mxu0 %v109_v39 }
  0x69   :  { %372 = vmatprep.mubr.bf16.mxu0 %v7406_v0 }
  0x70   :  { %373 = vmatmul.mubr.bf16.gmra.mxu0 %v110_v44 }
  0x71   :  { %382 = vmatprep.mubr.bf16.mxu0 %v7406_v0 }
  0x78   :  { %383 = vmatmul.mubr.bf16.gmra.mxu0 %v111_v45 }
  0x79   :  { %392 = vmatprep.mubr.bf16.mxu0 %v7406_v0 }
  0x80   :  { %393 = vmatmul.mubr.bf16.gmra.mxu0 %v112_v48 }
 0x108   :  { %v324_v5 = vpop.f32.mrf.mxu0 }
 0x109   :  { %v325_v8 = vadd.f32 %v324_v5, %v5260_v4 }
 0x10a   :  { %v5263_v9 = vpop.f32.mrf.mxu0 }
 0x10b   :  { %v597_v17 = vmul.f32 %v5266_v10, %v325_v8  ;;  %v5283_v19 = vmul.f32 %v5269_v11, %v325_v8  ;;  %v5294_v23 = vmul.f32 %v5272_v13, %v325_v8  ;;  %v5297_v24 = vmul.f32 %v5275_v14, %v325_v8  ;;  %v4359_v8 = vpop.f32.mrf.mxu1 }
 0x10c   :  { %v328_v12 = vpop.f32.mrf.mxu0 }
 0x10d   :  { %v329_v15 = vadd.f32 %v328_v12, %v5260_v4 }
 0x10e   :  { %v5278_v16 = vpop.f32.mrf.mxu0 }
 0x10f   :  { %v598_v18 = vmul.f32 %v5266_v10, %v329_v15  ;;  %v5286_v20 = vmul.f32 %v5269_v11, %v329_v15  ;;  %v5289_v21 = vmul.f32 %v5272_v13, %v329_v15  ;;  %v5300_v25 = vmul.f32 %v5275_v14, %v329_v15 }
 0x110   :  { %v5291_v22 = vpop.f32.mrf.mxu0 }
 0x111   :  { %v629_v26 = vpack.c.bf16 %v598_v18, %v597_v17 }
 0x112   :  { %v336_v28 = vpop.f32.mrf.mxu0 }
 0x113   :  { %4381 = vmatprep.mubr.bf16.mxu1 %v629_v26  ;;  %v337_v6 = vadd.f32 %v336_v28, %v5322_v41 }
 0x114   :  { %v5308_v31 = vpop.f32.mrf.mxu0 }
 0x115   :  { %v5420_v38 = vadd.f32 %v5308_v31, %v5260_v4 }
 0x116   :  { %v340_v32 = vpop.f32.mrf.mxu0 }
 0x117   :  { %v341_v60 = vadd.f32 %v340_v32, %v5322_v41 }
 0x118   :  { %v5310_v33 = vpop.f32.mrf.mxu0 }
 0x119   :  { %v545_v26 = vpack.c.bf16 %v341_v60, %v337_v6 }
 0x11a   :  { %v346_v34 = vpop.f32.mrf.mxu0 }
 0x11b   :  { %v347_v47 = vadd.f32 %v346_v34, %v5322_v41 }
 0x11c   :  { %v5312_v35 = vpop.f32.mrf.mxu0 }
 0x11d   :  { %v5453_v12 = vadd.f32 %v5312_v35, %v5260_v4 }
 0x11e   :  { %v350_v36 = vpop.f32.mrf.mxu0 }
 0x11f   :  { %v351_v43 = vadd.f32 %v350_v36, %v5322_v41 }
 0x120   :  { %v5314_v37 = vpop.f32.mrf.mxu0 }
 0x121   :  { %v546_v52 = vpack.c.bf16 %v351_v43, %v347_v47 }
 0x122   :  { %v356_v39 = vpop.f32.mrf.mxu0 }
 0x123   :  { %v357_v44 = vadd.f32 %v356_v39, %v5322_v41 }
 0x124   :  { %v5317_v40 = vpop.f32.mrf.mxu0 }
 0x126   :  { %v360_v42 = vpop.f32.mrf.mxu0 }
 0x127   :  { %v361_v45 = vadd.f32 %v360_v42, %v5322_v41 }
 0x128   :  { %v364_v46 = vpop.f32.mrf.mxu0 }
 0x129   :  { %v547_v48 = vpack.c.bf16 %v361_v45, %v357_v44  ;;  %v365_v49 = vadd.f32 %v364_v46, %v5260_v4  ;;  %v331_v44 = vadd.f32 %v5278_v16, %v5322_v41 }
 0x12a   :  { %v5329_v51 = vpop.f32.mrf.mxu0 }
 0x12b   :  { %4373 = vmatprep.subr.bf16.mxu1 %v547_v48  ;;  %v5333_v55 = vmul.f32 %v5266_v10, %v365_v49  ;;  %v5336_v56 = vmul.f32 %v5269_v11, %v365_v49  ;;  %v5341_v58 = vmul.f32 %v5272_v13, %v365_v49  ;;  %v5344_v59 = vmul.f32 %v5275_v14, %v365_v49 }
 0x12c   :  { %v368_v53 = vpop.f32.mrf.mxu0  ;;  %4374 = vmatpush3.bf16.xpose.msra.mxu1 %v547_v48 }
 0x12d   :  { %v369_v54 = vadd.f32 %v368_v53, %v5260_v4  ;;  %4375 = vmatprep.subr.bf16.mxu1 %v546_v52  ;;  %7469 = vst [vmem:[#allocation15_spill] sm:$0xff] %v5344_v59 }
 0x12e   :  { %v5338_v57 = vpop.f32.mrf.mxu0 }
 0x12f   :  { %v5348_v61 = vmul.f32 %v5266_v10, %v369_v54  ;;  %v5351_v62 = vmul.f32 %v5269_v11, %v369_v54  ;;  %v5354_v63 = vmul.f32 %v5272_v13, %v369_v54  ;;  %v5357_v5 = vmul.f32 %v5275_v14, %v369_v54 }
 0x130   :  { %v374_v3 = vpop.f32.mrf.mxu0  ;;  %v600_v54 = vmul.f32 %v5266_v10, %v5420_v38 }
 0x131   :  { %7470 = vst [vmem:[#allocation16_spill] sm:$0xff] %v5357_v5  ;;  %v375_v7 = vadd.f32 %v374_v3, %v5260_v4 }
 0x132   :  { %v5365_v15 = vpop.f32.mrf.mxu0 }
 0x133   :  { %v5372_v28 = vmul.f32 %v5266_v10, %v375_v7  ;;  %v5376_v36 = vmul.f32 %v5269_v11, %v375_v7  ;;  %v5381_v42 = vmul.f32 %v5272_v13, %v375_v7  ;;  %v5384_v43 = vmul.f32 %v5275_v14, %v375_v7 }
 0x134   :  { %v378_v32 = vpop.f32.mrf.mxu0  ;;  %4376 = vmatpush3.bf16.xpose.msra.mxu1 %v546_v52  ;;  %v327_v52 = vadd.f32 %v5263_v9, %v5322_v41 }
 0x135   :  { %v379_v34 = vadd.f32 %v378_v32, %v5260_v4  ;;  %4377 = vmatprep.subr.bf16.mxu1 %v545_v26  ;;  %7471 = vst [vmem:[#allocation17_spill] sm:$0xff] %v5381_v42  ;;  %7472 = vst [vmem:[#allocation18_spill] sm:$0xff] %v5384_v43 }
 0x136   :  { %v5378_v39 = vpop.f32.mrf.mxu0  ;;  %v544_v7 = vpack.c.bf16 %v331_v44, %v327_v52 }
 0x137   :  { %v5389_v45 = vmul.f32 %v5266_v10, %v379_v34  ;;  %v5392_v46 = vmul.f32 %v5269_v11, %v379_v34  ;;  %v5395_v47 = vmul.f32 %v5272_v13, %v379_v34  ;;  %v5398_v49 = vmul.f32 %v5275_v14, %v379_v34 }
 0x138   :  { %v384_v48 = vpop.f32.mrf.mxu0 }
 0x139   :  { %7473 = vst [vmem:[#allocation19_spill] sm:$0xff] %v5395_v47  ;;  %7474 = vst [vmem:[#allocation20_spill] sm:$0xff] %v5398_v49  ;;  %v385_v16 = vadd.f32 %v384_v48, %v5260_v4 }
 0x13a   :  { %v386_v60 = vpop.f32.mrf.mxu0 }
 0x13b   :  { %v5413_v34 = vmul.f32 %v5266_v10, %v385_v16  ;;  %v5416_v48 = vmul.f32 %v5269_v11, %v385_v16  ;;  %v5423_v18 = vmul.f32 %v5272_v13, %v385_v16  ;;  %v5426_v44 = vmul.f32 %v5275_v14, %v385_v16 }
 0x13c   :  { %v388_v32 = vpop.f32.mrf.mxu0  ;;  %4378 = vmatpush3.bf16.xpose.msra.mxu1 %v545_v26  ;;  %v5430_v26 = vadd.f32 %v5291_v22, %v5260_v4  ;;  %v5463_v22 = vadd.f32 %v5310_v33, %v5260_v4  ;;  %v387_v30 = vadd.f32 %v386_v60, %v5322_v41  ;;  %v437_v33 = vpop.f32.mrf.mxu1 }
 0x13d   :  { %v389_v9 = vadd.f32 %v388_v32, %v5260_v4  ;;  %4379 = vmatprep.subr.bf16.mxu1 %v544_v7  ;;  %7475 = vst [vmem:[#allocation21_spill] sm:$0xff] %v5423_v18  ;;  %7476 = vst [vmem:[#allocation22_spill] sm:$0xff] %v5426_v44 }
 0x13e   :  { %v390_v0 = vpop.f32.mrf.mxu0  ;;  %v599_v17 = vmul.f32 %v5266_v10, %v5430_v26 }
 0x13f   :  { %v5433_v52 = vmul.f32 %v5266_v10, %v389_v9  ;;  %v5436_v32 = vmul.f32 %v5269_v11, %v389_v9  ;;  %v5439_v31 = vmul.f32 %v5272_v13, %v389_v9  ;;  %v5442_v3 = vmul.f32 %v5275_v14, %v389_v9 }
 0x140   :  { %v394_v6 = vpop.f32.mrf.mxu0  ;;  %v391_v35 = vadd.f32 %v390_v0, %v5322_v41  ;;  %v602_v0 = vmul.f32 %v5266_v10, %v5453_v12 }
 0x141   :  { %7477 = vst [vmem:[#allocation23_spill] sm:$0xff] %v5439_v31  ;;  %7478 = vst [vmem:[#allocation24_spill] sm:$0xff] %v5442_v3  ;;  %v395_v16 = vadd.f32 %v394_v6, %v5260_v4  ;;  %v630_v3 = vpack.c.bf16 %v600_v54, %v599_v17  ;;  %v4360_v17 = vpop.f32.mrf.mxu1  ;;  %v5496_v54 = vadd.f32 %v5317_v40, %v5260_v4 }
 0x142   :  { %v396_v53 = vpop.f32.mrf.mxu0 }
 0x143   :  { %v397_v29 = vadd.f32 %v396_v53, %v5322_v41  ;;  %v5470_v6 = vmul.f32 %v5266_v10, %v395_v16  ;;  %v5473_v1 = vmul.f32 %v5269_v11, %v395_v16  ;;  %v5476_v44 = vmul.f32 %v5272_v13, %v395_v16  ;;  %v440_v47 = vpop.f32.mrf.mxu1 }
 0x144   :  { %v398_v27 = vpop.f32.mrf.mxu0  ;;  %4380 = vmatpush3.bf16.xpose.msra.mxu1 %v544_v7  ;;  %v5481_v53 = vmul.f32 %v5275_v14, %v395_v16  ;;  %v1442_v16 = vpack.c.bf16 %v391_v35, %v387_v30  ;;  %v7479_v35 = vsub.s32 2, %v5244_v50  ;;  %v604_v30 = vmul.f32 %v5266_v10, %v5496_v54 }
 0x145   :  { %v399_v9 = vadd.f32 %v398_v27, %v5260_v4  ;;  %v601_v27 = vmul.f32 %v5266_v10, %v5463_v22 }
 0x146   :  { %v400_v60 = vpop.f32.mrf.mxu0 }
 0x147   :  { %v401_v7 = vadd.f32 %v400_v60, %v5322_v41  ;;  %v5486_v43 = vmul.f32 %v5266_v10, %v399_v9  ;;  %v5489_v49 = vmul.f32 %v5269_v11, %v399_v9  ;;  %v5492_v59 = vmul.f32 %v5272_v13, %v399_v9 }
 0x148   :  { %v5501_v60 = vmul.f32 %v5275_v14, %v399_v9  ;;  %v631_v40 = vpack.c.bf16 %v602_v0, %v601_v27  ;;  %v5514_v9 = vrot.slane %v5256_v2, %v7479_v35  ;;  %v377_v0 = vadd.f32 %v5365_v15, %v5322_v41 }
 0x149   :  { %v1443_v5 = vpack.c.bf16 %v401_v7, %v397_v29  ;;  %v5518_v29 = vadd.f32 %v5314_v37, %v5260_v4  ;;  %v4363_v7 = vpop.f32.mrf.mxu1  ;;  %v381_v27 = vadd.f32 %v5378_v39, %v5322_v41 }
 0x14a   :  { %v462_v35 = vadd.f32 %v4363_v7, %v5514_v9  ;;  %v446_v18 = vadd.f32 %v4359_v8, %v5514_v9  ;;  %v449_v50 = vadd.f32 %v4360_v17, %v5514_v9  ;;  %v608_v8 = vmul.f32 %v5269_v11, %v5420_v38 }
 0x14b   :  { %4382 = vmatmul.mubr.bf16.vlgmr.msra.gmra.mxu1 %v630_v3  ;;  %4453 = vmatprep.subr.bf16.mxu1 %v1443_v5  ;;  %v453_v2 = vpop.f32.mrf.mxu1  ;;  %v603_v4 = vmul.f32 %v5266_v10, %v5518_v29  ;;  %v7480_v10 = vpack.c.bf16 %v5286_v20, %v5283_v19  ;;  %v610_v19 = vmul.f32 %v5269_v11, %v5453_v12 }
 0x14c   :  { %4385 = vmatprep.mubr.bf16.mxu1 %v631_v40  ;;  %4454 = vmatpush3.bf16.xpose.msra.mxu1 %v1443_v5  ;;  %v454_v3 = vadd.f32 %v453_v2, %v5514_v9  ;;  %v1441_v40 = vpack.c.bf16 %v381_v27, %v377_v0  ;;  %v607_v20 = vmul.f32 %v5269_v11, %v5430_v26 }
 0x14d   :  { %4455 = vmatprep.subr.bf16.mxu1 %v1442_v16  ;;  %v4364_v37 = vpop.f32.mrf.mxu1  ;;  %v632_v15 = vpack.c.bf16 %v604_v30, %v603_v4  ;;  %v367_v30 = vadd.f32 %v5329_v51, %v5322_v41  ;;  %v438_v51 = vadd.f32 %v437_v33, %v5514_v9  ;;  %v609_v0 = vmul.f32 %v5269_v11, %v5463_v22 }
 0x14e   :  { %v465_v5 = vadd.f32 %v4364_v37, %v5514_v9  ;;  %v634_v4 = vpack.c.bf16 %v608_v8, %v607_v20  ;;  %v612_v33 = vmul.f32 %v5269_v11, %v5496_v54 }
 0x14f   :  { %v456_v42 = vpop.f32.mrf.mxu1 }
 0x150   :  { %v551_v31 = vpack.c.bf16 %v465_v5, %v462_v35  ;;  %v457_v39 = vadd.f32 %v456_v42, %v5514_v9  ;;  %v371_v42 = vadd.f32 %v5338_v57, %v5322_v41  ;;  %v441_v41 = vadd.f32 %v440_v47, %v5514_v9 }
 0x151   :  { %v4367_v7 = vpop.f32.mrf.mxu1 }
 0x152   :  { %v550_v2 = vpack.c.bf16 %v457_v39, %v454_v3  ;;  %v478_v37 = vadd.f32 %v4367_v7, %v5514_v9  ;;  %4413 = vmatprep.subr.bf16.mxu0 %v551_v31  ;;  %v1440_v35 = vpack.c.bf16 %v371_v42, %v367_v30  ;;  %v635_v3 = vpack.c.bf16 %v610_v19, %v609_v0 }
 0x153   :  { %4386 = vmatmul.mubr.bf16.gmra.mxu1 %v632_v15  ;;  %v469_v17 = vpop.f32.mrf.mxu1  ;;  %4414 = vmatpush3.bf16.msra.mxu0 %v551_v31  ;;  %v619_v0 = vmul.f32 %v5272_v13, %v5518_v29 }
 0x154   :  { %4389 = vmatprep.mubr.bf16.mxu1 %v7480_v10  ;;  %4456 = vmatpush3.bf16.xpose.msra.mxu1 %v1442_v16  ;;  %v470_v10 = vadd.f32 %v469_v17, %v5514_v9  ;;  %v549_v16 = vpack.c.bf16 %v449_v50, %v446_v18  ;;  %v548_v50 = vpack.c.bf16 %v441_v41, %v438_v51 }
 0x155   :  { %4457 = vmatprep.subr.bf16.mxu1 %v1441_v40  ;;  %4415 = vmatprep.subr.bf16.mxu0 %v550_v2  ;;  %v4368_v57 = vpop.f32.mrf.mxu1  ;;  %v616_v51 = vmul.f32 %v5272_v13, %v5420_v38  ;;  %v615_v41 = vmul.f32 %v5272_v13, %v5430_v26 }
 0x156   :  { %v481_v27 = vadd.f32 %v4368_v57, %v5514_v9 }
 0x157   :  { %v472_v31 = vpop.f32.mrf.mxu1  ;;  %4416 = vmatpush3.bf16.msra.mxu0 %v550_v2  ;;  %v638_v57 = vpack.c.bf16 %v616_v51, %v615_v41 }
 0x158   :  { %v5554_v5 = vpack.c.bf16 %v481_v27, %v478_v37  ;;  %v473_v15 = vadd.f32 %v472_v31, %v5514_v9  ;;  %4417 = vmatprep.subr.bf16.mxu0 %v549_v16  ;;  %v611_v37 = vmul.f32 %v5269_v11, %v5518_v29  ;;  %v626_v31 = vmul.f32 %v5275_v14, %v5453_v12 }
 0x159   :  { %v4371_v18 = vpop.f32.mrf.mxu1 }
 0x15a   :  { %7481 = vst [vmem:[#allocation25_spill] sm:$0xff] %v5554_v5  ;;  %v5557_v47 = vpack.c.bf16 %v473_v15, %v470_v10  ;;  %v494_v7 = vadd.f32 %v4371_v18, %v5514_v9  ;;  %v7484_v10 = vpack.c.bf16 %v5289_v21, %v5294_v23  ;;  %v620_v23 = vmul.f32 %v5272_v13, %v5496_v54 }
 0x15b   :  { %4390 = vmatmul.mubr.bf16.gmra.mxu1 %v634_v4  ;;  %v485_v39 = vpop.f32.mrf.mxu1  ;;  %4418 = vmatpush3.bf16.msra.mxu0 %v549_v16  ;;  %v618_v16 = vmul.f32 %v5272_v13, %v5453_v12  ;;  %v624_v4 = vmul.f32 %v5275_v14, %v5420_v38  ;;  %v625_v15 = vmul.f32 %v5275_v14, %v5463_v22 }
 0x15c   :  { %4393 = vmatprep.mubr.bf16.mxu1 %v635_v3  ;;  %4458 = vmatpush3.bf16.xpose.msra.mxu1 %v1441_v40  ;;  %7482 = vst [vmem:[#allocation26_spill] sm:$0xff] %v5557_v47  ;;  %v486_v2 = vadd.f32 %v485_v39, %v5514_v9  ;;  %v636_v40 = vpack.c.bf16 %v612_v33, %v611_v37  ;;  %v7510_v33 = vld [vmem:[#allocation22_spill] sm:$0xff] }
 0x15d   :  { %4459 = vmatprep.subr.bf16.mxu1 %v1440_v35  ;;  %4419 = vmatprep.subr.bf16.mxu0 %v548_v50  ;;  %v4372_v30 = vpop.f32.mrf.mxu1  ;;  %v640_v27 = vpack.c.bf16 %v620_v23, %v619_v0  ;;  %v623_v3 = vmul.f32 %v5275_v14, %v5430_v26  ;;  %v643_v18 = vpack.c.bf16 %v626_v31, %v625_v15  ;;  %v5711_v31 = vld [vmem:[%s7395_s5 + $0x28] sm:$0xff] }
 0x15e   :  { %v497_v42 = vadd.f32 %v4372_v30, %v5514_v9  ;;  %v7487_v12 = vpack.c.bf16 %v5348_v61, %v5333_v55  ;;  %v7488_v26 = vpack.c.bf16 %v5389_v45, %v5372_v28  ;;  %v7492_v55 = vpack.c.bf16 %v5392_v46, %v5376_v36  ;;  %v7496_v45 = vld [vmem:[#allocation19_spill] sm:$0xff] }
 0x15f   :  { %v488_v8 = vpop.f32.mrf.mxu1  ;;  %4420 = vmatpush3.bf16.msra.mxu0 %v548_v50  ;;  %v642_v50 = vpack.c.bf16 %v624_v4, %v623_v3  ;;  %v7493_v61 = vpack.c.bf16 %v5436_v32, %v5416_v48  ;;  %v7494_v28 = vpack.c.bf16 %v5489_v49, %v5473_v1  ;;  %v7502_v46 = vpack.c.bf16 %v5492_v59, %v5476_v44  ;;  %v7503_v48 = vld [vmem:[#allocation16_spill] sm:$0xff]  ;;  %v7504_v32 = vld [vmem:[#allocation15_spill] sm:$0xff] }
 0x160   :  { %v5566_v17 = vpack.c.bf16 %v497_v42, %v494_v7  ;;  %v489_v19 = vadd.f32 %v488_v8, %v5514_v9  ;;  %v617_v9 = vmul.f32 %v5272_v13, %v5463_v22  ;;  %v7489_v22 = vpack.c.bf16 %v5433_v52, %v5413_v34  ;;  %v7497_v34 = vld [vmem:[#allocation17_spill] sm:$0xff]  ;;  %v7506_v49 = vld [vmem:[#allocation20_spill] sm:$0xff]  ;;  %v5653_v59 = vld [vmem:[%s7395_s5 + $0x10] sm:$0xff] }
 0x161   :  { %v7500_v52 = vld [vmem:[#allocation21_spill] sm:$0xff]  ;;  %v7505_v1 = vpack.c.bf16 %v7503_v48, %v7504_v32  ;;  %v7512_v7 = vpack.c.bf16 %v5501_v60, %v5481_v53  ;;  %v5666_v53 = vld [vmem:[%s7395_s5 + $0x18] sm:$0xff]  ;;  %v5676_v8 = vld [vmem:[%s7395_s5 + $0x8] sm:$0xff] }
 0x162   :  { %7483 = vst [vmem:[#allocation27_spill] sm:$0xff] %v5566_v17  ;;  %v5572_v20 = vpack.c.bf16 %v489_v19, %v486_v2  ;;  %4493 = vmatprep.subr.bf16.mxu0 %v5566_v17  ;;  %v639_v21 = vpack.c.bf16 %v618_v16, %v617_v9  ;;  %v5658_v2 = vld [vmem:[%s7395_s5] sm:$0xff]  ;;  %v5686_v16 = vld [vmem:[%s7395_s5 + $0x30] sm:$0xff] }
 0x163   :  { %4394 = vmatmul.mubr.bf16.gmra.mxu1 %v636_v40  ;;  %v5939_v17 = vld [vmem:[%s7395_s5 + $0xe0] sm:$0xff] }
 0x164   :  { %4397 = vmatprep.mubr.bf16.mxu1 %v7484_v10  ;;  %4460 = vmatpush3.bf16.xpose.msra.mxu1 %v1440_v35  ;;  %7485 = vst [vmem:[#allocation28_spill] sm:$0xff] %v5572_v20  ;;  %v7486_v35 = vpack.c.bf16 %v5300_v25, %v5297_v24  ;;  %v628_v24 = vmul.f32 %v5275_v14, %v5496_v54 }
 0x165   :  { %v627_v25 = vmul.f32 %v5275_v14, %v5518_v29  ;;  %v7490_v54 = vpack.c.bf16 %v5486_v43, %v5470_v6  ;;  %v7491_v29 = vpack.c.bf16 %v5351_v62, %v5336_v56  ;;  %v7495_v43 = vpack.c.bf16 %v5354_v63, %v5341_v58  ;;  %v7499_v62 = vld [vmem:[#allocation23_spill] sm:$0xff]  ;;  %v7507_v6 = vld [vmem:[#allocation18_spill] sm:$0xff]  ;;  %v7509_v63 = vld [vmem:[#allocation24_spill] sm:$0xff] }
 0x166   :  { %v7498_v56 = vpack.c.bf16 %v7496_v45, %v7497_v34  ;;  %v7501_v36 = vpack.c.bf16 %v7499_v62, %v7500_v52  ;;  %v7508_v58 = vpack.c.bf16 %v7506_v49, %v7507_v6  ;;  %v7511_v39 = vpack.c.bf16 %v7509_v63, %v7510_v33  ;;  %v5764_v52 = vld [vmem:[%s7395_s5 + $0x70] sm:$0xff]  ;;  %v5779_v6 = vld [vmem:[%s7395_s5 + $0x60] sm:$0xff] }
 0x167   :  { %v644_v38 = vpack.c.bf16 %v628_v24, %v627_v25  ;;  %v5724_v24 = vld [vmem:[%s7395_s5 + $0x50] sm:$0xff] }
 0x16b   :  { %4398 = vmatmul.mubr.bf16.gmra.mxu1 %v638_v57 }
 0x16c   :  { %4401 = vmatprep.mubr.bf16.mxu1 %v639_v21 }
 0x173   :  { %4402 = vmatmul.mubr.bf16.gmra.mxu1 %v640_v27  ;;  %v5701_v27 = vld [vmem:[%s7395_s5 + $0x20] sm:$0xff] }
 0x174   :  { %4405 = vmatprep.mubr.bf16.mxu1 %v7486_v35  ;;  %v5706_v35 = vld [vmem:[%s7395_s5 + $0x38] sm:$0xff] }
 0x17b   :  { %4406 = vmatmul.mubr.bf16.gmra.mxu1 %v642_v50 }
 0x17c   :  { %4409 = vmatprep.mubr.bf16.mxu1 %v643_v18 }
 0x183   :  { %4410 = vmatmul.mubr.bf16.gmra.mxu1 %v644_v38 }
 0x184   :  { %4461 = vmatprep.mubr.bf16.mxu1 %v7487_v12 }
 0x18b   :  { %4462 = vmatmul.mubr.bf16.vlgmr.msra.gmra.mxu1 %v7488_v26 }
 0x18c   :  { %4465 = vmatprep.mubr.bf16.mxu1 %v7489_v22 }
 0x193   :  { %4466 = vmatmul.mubr.bf16.gmra.mxu1 %v7490_v54 }
 0x194   :  { %4469 = vmatprep.mubr.bf16.mxu1 %v7491_v29  ;;  %v5739_v29 = vld [vmem:[%s7395_s5 + $0x40] sm:$0xff] }
 0x19b   :  { %4470 = vmatmul.mubr.bf16.gmra.mxu1 %v7492_v55  ;;  %v5744_v55 = vld [vmem:[%s7395_s5 + $0x58] sm:$0xff] }
 0x19c   :  { %4473 = vmatprep.mubr.bf16.mxu1 %v7493_v61 }
 0x1a3   :  { %4474 = vmatmul.mubr.bf16.gmra.mxu1 %v7494_v28 }
 0x1a4   :  { %4477 = vmatprep.mubr.bf16.mxu1 %v7495_v43  ;;  %v5751_v43 = vld [vmem:[%s7395_s5 + $0x48] sm:$0xff] }
 0x1ab   :  { %4478 = vmatmul.mubr.bf16.gmra.mxu1 %v7498_v56 }
 0x1ac   :  { %4481 = vmatprep.mubr.bf16.mxu1 %v7501_v36 }
 0x1b3   :  { %4482 = vmatmul.mubr.bf16.gmra.mxu1 %v7502_v46 }
 0x1b4   :  { %4485 = vmatprep.mubr.bf16.mxu1 %v7505_v1 }
 0x1bb   :  { %4486 = vmatmul.mubr.bf16.gmra.mxu1 %v7508_v58  ;;  %v5784_v58 = vld [vmem:[%s7395_s5 + $0x78] sm:$0xff] }
 0x1bc   :  { %4489 = vmatprep.mubr.bf16.mxu1 %v7511_v39  ;;  %v5791_v39 = vld [vmem:[%s7395_s5 + $0x68] sm:$0xff] }
 0x1c3   :  { %4490 = vmatmul.mubr.bf16.gmra.mxu1 %v7512_v7 }
 0x20b   :  { %v4383_v44 = vpop.f32.mrf.mxu1 }
 0x20c   :  { %v5661_v37 = vadd.f32 %v4383_v44, %v5653_v59 }
 0x20d   :  { %v679_v30 = vpop.f32.mrf.mxu1 }
 0x20e   :  { %v5669_v60 = vadd.f32 %v679_v30, %v5658_v2  ;;  %v813_v42 = vsel %vm806_vm3, %v5661_v37, -inf }
 0x20f   :  { %814 = vmax.xlane.f32.xlu1 %v813_v42  ;;  %v4384_v40 = vpop.f32.mrf.mxu1 }
 0x210   :  { %v5679_v19 = vadd.f32 %v4384_v40, %v5666_v53  ;;  %v807_v10 = vsel %vm806_vm3, %v5669_v60, -inf  ;;  %v5804_v40 = vld [vmem:[%s7395_s5 + $0x90] sm:$0xff] }
 0x211   :  { %v682_v51 = vpop.f32.mrf.mxu1  ;;  %808 = vmax.xlane.f32.xlu0 %v807_v10 }
 0x212   :  { %v5689_v41 = vadd.f32 %v682_v51, %v5676_v8  ;;  %v816_v9 = vsel %vm806_vm3, %v5679_v19, -inf }
 0x213   :  { %817 = vmax.xlane.f32.xlu1 %v816_v9  ;;  %v4387_v57 = vpop.f32.mrf.mxu1 }
 0x214   :  { %v5694_v21 = vadd.f32 %v4387_v57, %v5686_v16  ;;  %v810_v23 = vsel %vm806_vm3, %v5689_v41, -inf }
 0x215   :  { %v695_v0 = vpop.f32.mrf.mxu1  ;;  %811 = vmax.xlane.f32.xlu0 %v810_v23 }
 0x216   :  { %v5714_v3 = vadd.f32 %v695_v0, %v5701_v27  ;;  %v825_v50 = vsel %vm806_vm3, %v5694_v21, -inf }
 0x217   :  { %v4388_v4 = vpop.f32.mrf.mxu1 }
 0x218   :  { %v5717_v15 = vadd.f32 %v4388_v4, %v5706_v35  ;;  %v819_v22 = vsel %vm806_vm3, %v5714_v3, -inf  ;;  %v5819_v4 = vld [vmem:[%s7395_s5 + $0x80] sm:$0xff] }
 0x219   :  { %v698_v18 = vpop.f32.mrf.mxu1  ;;  %826 = vmax.xlane.f32.xlu0 %v825_v50  ;;  %v5824_v50 = vld [vmem:[%s7395_s5 + $0x98] sm:$0xff] }
 0x21a   :  { %v5727_v25 = vadd.f32 %v698_v18, %v5711_v31  ;;  %v828_v38 = vsel %vm806_vm3, %v5717_v15, -inf }
 0x21b   :  { %829 = vmax.xlane.f32.xlu1 %v828_v38  ;;  %v4391_v12 = vpop.f32.mrf.mxu1 }
 0x21c   :  { %v5732_v26 = vadd.f32 %v4391_v12, %v5724_v24  ;;  %v822_v61 = vsel %vm806_vm3, %v5727_v25, -inf  ;;  %v5831_v12 = vld [vmem:[%s7395_s5 + $0x88] sm:$0xff] }
 0x21d   :  { %v711_v54 = vpop.f32.mrf.mxu1  ;;  %820 = vmax.xlane.f32.xlu0 %v819_v22 }
 0x21e   :  { %v5754_v45 = vadd.f32 %v711_v54, %v5739_v29  ;;  %v837_v56 = vsel %vm806_vm3, %v5732_v26, -inf }
 0x21f   :  { %v4392_v28 = vpop.f32.mrf.mxu1  ;;  %823 = vmax.xlane.f32.xlu1 %v822_v61 }
 0x220   :  { %v5757_v34 = vadd.f32 %v4392_v28, %v5744_v55  ;;  %v831_v1 = vsel %vm806_vm3, %v5754_v45, -inf }
 0x221   :  { %v714_v62 = vpop.f32.mrf.mxu1  ;;  %838 = vmax.xlane.f32.xlu0 %v837_v56  ;;  %v5844_v56 = vld [vmem:[%s7395_s5 + $0xb0] sm:$0xff] }
 0x222   :  { %v5767_v36 = vadd.f32 %v714_v62, %v5751_v43  ;;  %v840_v46 = vsel %vm806_vm3, %v5757_v34, -inf }
 0x223   :  { %v4395_v48 = vpop.f32.mrf.mxu1  ;;  %841 = vmax.xlane.f32.xlu1 %v840_v46 }
 0x224   :  { %v5772_v32 = vadd.f32 %v4395_v48, %v5764_v52  ;;  %v834_v63 = vsel %vm806_vm3, %v5767_v36, -inf }
 0x225   :  { %v727_v49 = vpop.f32.mrf.mxu1  ;;  %832 = vmax.xlane.f32.xlu0 %v831_v1 }
 0x226   :  { %v5794_v7 = vadd.f32 %v727_v49, %v5779_v6  ;;  %v849_v30 = vsel %vm806_vm3, %v5772_v32, -inf }
 0x227   :  { %v4396_v33 = vpop.f32.mrf.mxu1  ;;  %835 = vmax.xlane.f32.xlu1 %v834_v63 }
 0x228   :  { %v5797_v44 = vadd.f32 %v4396_v33, %v5784_v58  ;;  %v843_v23 = vsel %vm806_vm3, %v5794_v7, -inf  ;;  %v5859_v33 = vld [vmem:[%s7395_s5 + $0xa0] sm:$0xff] }
 0x229   :  { %v730_v42 = vpop.f32.mrf.mxu1  ;;  %850 = vmax.xlane.f32.xlu0 %v849_v30  ;;  %v5864_v30 = vld [vmem:[%s7395_s5 + $0xb8] sm:$0xff] }
 0x22a   :  { %v5807_v10 = vadd.f32 %v730_v42, %v5791_v39  ;;  %v852_v51 = vsel %vm806_vm3, %v5797_v44, -inf }
 0x22b   :  { %v4399_v9 = vpop.f32.mrf.mxu1  ;;  %853 = vmax.xlane.f32.xlu1 %v852_v51 }
 0x22c   :  { %v5812_v57 = vadd.f32 %v4399_v9, %v5804_v40  ;;  %v846_v18 = vsel %vm806_vm3, %v5807_v10, -inf  ;;  %v5871_v9 = vld [vmem:[%s7395_s5 + $0xa8] sm:$0xff] }
 0x22d   :  { %v743_v0 = vpop.f32.mrf.mxu1  ;;  %844 = vmax.xlane.f32.xlu0 %v843_v23 }
 0x22e   :  { %v5834_v22 = vadd.f32 %v743_v0, %v5819_v4  ;;  %v861_v61 = vsel %vm806_vm3, %v5812_v57, -inf }
 0x22f   :  { %v4400_v38 = vpop.f32.mrf.mxu1  ;;  %847 = vmax.xlane.f32.xlu1 %v846_v18 }
 0x230   :  { %v5837_v54 = vadd.f32 %v4400_v38, %v5824_v50  ;;  %v855_v49 = vsel %vm806_vm3, %v5834_v22, -inf }
 0x231   :  { %v746_v28 = vpop.f32.mrf.mxu1  ;;  %862 = vmax.xlane.f32.xlu0 %v861_v61  ;;  %v5884_v61 = vld [vmem:[%s7395_s5 + $0xd0] sm:$0xff] }
 0x232   :  { %v5847_v62 = vadd.f32 %v746_v28, %v5831_v12  ;;  %v864_v46 = vsel %vm806_vm3, %v5837_v54, -inf }
 0x233   :  { %v4403_v48 = vpop.f32.mrf.mxu1  ;;  %865 = vmax.xlane.f32.xlu1 %v864_v46 }
 0x234   :  { %v5852_v1 = vadd.f32 %v4403_v48, %v5844_v56  ;;  %v858_v42 = vsel %vm806_vm3, %v5847_v62, -inf }
 0x235   :  { %v759_v63 = vpop.f32.mrf.mxu1  ;;  %856 = vmax.xlane.f32.xlu0 %v855_v49 }
 0x236   :  { %v5874_v23 = vadd.f32 %v759_v63, %v5859_v33  ;;  %v873_v18 = vsel %vm806_vm3, %v5852_v1, -inf }
 0x237   :  { %v4404_v51 = vpop.f32.mrf.mxu1  ;;  %859 = vmax.xlane.f32.xlu1 %v858_v42 }
 0x238   :  { %7513 = vst [vmem:[#allocation19_spill] sm:$0xff] %v5874_v23  ;;  %v5877_v0 = vadd.f32 %v4404_v51, %v5864_v30  ;;  %v867_v63 = vsel %vm806_vm3, %v5874_v23, -inf  ;;  %v5899_v51 = vld [vmem:[%s7395_s5 + $0xc0] sm:$0xff] }
 0x239   :  { %v762_v38 = vpop.f32.mrf.mxu1  ;;  %874 = vmax.xlane.f32.xlu0 %v873_v18  ;;  %v5904_v18 = vld [vmem:[%s7395_s5 + $0xd8] sm:$0xff] }
 0x23a   :  { %7514 = vst [vmem:[#allocation17_spill] sm:$0xff] %v5877_v0  ;;  %v5887_v28 = vadd.f32 %v762_v38, %v5871_v9  ;;  %v876_v46 = vsel %vm806_vm3, %v5877_v0, -inf }
 0x23b   :  { %v4407_v48 = vpop.f32.mrf.mxu1  ;;  %877 = vmax.xlane.f32.xlu1 %v876_v46 }
 0x23c   :  { %7515 = vst [vmem:[#allocation23_spill] sm:$0xff] %v5887_v28  ;;  %v5892_v49 = vadd.f32 %v4407_v48, %v5884_v61  ;;  %v870_v38 = vsel %vm806_vm3, %v5887_v28, -inf  ;;  %v5911_v48 = vld [vmem:[%s7395_s5 + $0xc8] sm:$0xff] }
 0x23d   :  { %v775_v42 = vpop.f32.mrf.mxu1  ;;  %868 = vmax.xlane.f32.xlu0 %v867_v63 }
 0x23e   :  { %7516 = vst [vmem:[#allocation21_spill] sm:$0xff] %v5892_v49  ;;  %v5914_v14 = vadd.f32 %v775_v42, %v5899_v51  ;;  %v885_v13 = vsel %vm806_vm3, %v5892_v49, -inf }
 0x23f   :  { %v4408_v46 = vpop.f32.mrf.mxu1  ;;  %871 = vmax.xlane.f32.xlu1 %v870_v38  ;;  %v5924_v38 = vld [vmem:[%s7395_s5 + $0xf0] sm:$0xff] }
 0x240   :  { %7517 = vst [vmem:[#allocation16_spill] sm:$0xff] %v5914_v14  ;;  %v5917_v63 = vadd.f32 %v4408_v46, %v5904_v18  ;;  %v879_v20 = vsel %vm806_vm3, %v5914_v14, -inf  ;;  %v5951_v14 = vld [vmem:[%s7395_s5 + $0xe8] sm:$0xff] }
 0x241   :  { %v778_v11 = vpop.f32.mrf.mxu1  ;;  %886 = vmax.xlane.f32.xlu0 %v885_v13 }
 0x242   :  { %7518 = vst [vmem:[#allocation15_spill] sm:$0xff] %v5917_v63  ;;  %v5927_v47 = vadd.f32 %v778_v11, %v5911_v48  ;;  %v888_v42 = vsel %vm806_vm3, %v5917_v63, -inf  ;;  %v5944_v11 = vld [vmem:[%s7395_s5 + $0xf8] sm:$0xff] }
 0x243   :  { %v4411_v5 = vpop.f32.mrf.mxu1  ;;  %889 = vmax.xlane.f32.xlu1 %v888_v42 }
 0x244   :  { %7519 = vst [vmem:[#allocation20_spill] sm:$0xff] %v5927_v47  ;;  %v5932_v46 = vadd.f32 %v4411_v5, %v5924_v38  ;;  %v882_v42 = vsel %vm806_vm3, %v5927_v47, -inf }
 0x245   :  { %v791_v13 = vpop.f32.mrf.mxu1  ;;  %880 = vmax.xlane.f32.xlu0 %v879_v20 }
 0x246   :  { %7520 = vst [vmem:[#allocation18_spill] sm:$0xff] %v5932_v46  ;;  %v5954_v63 = vadd.f32 %v791_v13, %v5939_v17  ;;  %v897_v49 = vsel %vm806_vm3, %v5932_v46, -inf }
 0x247   :  { %v4412_v5 = vpop.f32.mrf.mxu1  ;;  %883 = vmax.xlane.f32.xlu1 %v882_v42 }
 0x248   :  { %v5957_v20 = vadd.f32 %v4412_v5, %v5944_v11  ;;  %v891_v13 = vsel %vm806_vm3, %v5954_v63, -inf }
 0x249   :  { %v794_v28 = vpop.f32.mrf.mxu1  ;;  %898 = vmax.xlane.f32.xlu0 %v897_v49 }
 0x24a   :  { %7521 = vst [vmem:[#allocation24_spill] sm:$0xff] %v5957_v20  ;;  %v5962_v47 = vadd.f32 %v794_v28, %v5951_v14  ;;  %v900_v42 = vsel %vm806_vm3, %v5957_v20, -inf }
 0x24b   :  { %v4463_v23 = vpop.f32.mrf.mxu1  ;;  %901 = vmax.xlane.f32.xlu1 %v900_v42 }
 0x24c   :  { %7522 = vst [vmem:[#allocation22_spill] sm:$0xff] %v5962_v47  ;;  %v5967_v0 = vadd.f32 %v4463_v23, %v5653_v59  ;;  %v894_v46 = vsel %vm806_vm3, %v5962_v47, -inf }
 0x24d   :  { %v1530_v5 = vpop.f32.mrf.mxu1  ;;  %892 = vmax.xlane.f32.xlu0 %v891_v13 }
 0x24e   :  { %v5974_v28 = vadd.f32 %v1530_v5, %v5658_v2  ;;  %v1663_v59 = vsel %vm806_vm3, %v5967_v0, -inf }
 0x24f   :  { %v4464_v49 = vpop.f32.mrf.mxu1  ;;  %895 = vmax.xlane.f32.xlu1 %v894_v46 }
 0x250   :  { %v5977_v20 = vadd.f32 %v4464_v49, %v5666_v53  ;;  %v1657_v2 = vsel %vm806_vm3, %v5974_v28, -inf }
 0x251   :  { %v1533_v23 = vpop.f32.mrf.mxu1  ;;  %1664 = vmax.xlane.f32.xlu0 %v1663_v59 }
 0x252   :  { %v5982_v42 = vadd.f32 %v1533_v23, %v5676_v8  ;;  %v1666_v13 = vsel %vm806_vm3, %v5977_v20, -inf }
 0x253   :  { %v4467_v47 = vpop.f32.mrf.mxu1  ;;  %1667 = vmax.xlane.f32.xlu1 %v1666_v13 }
 0x254   :  { %v5987_v46 = vadd.f32 %v4467_v47, %v5686_v16  ;;  %v1660_v5 = vsel %vm806_vm3, %v5982_v42, -inf }
 0x255   :  { %v1546_v53 = vpop.f32.mrf.mxu1  ;;  %1658 = vmax.xlane.f32.xlu0 %v1657_v2 }
 0x256   :  { %v5994_v8 = vadd.f32 %v1546_v53, %v5701_v27  ;;  %v1675_v47 = vsel %vm806_vm3, %v5987_v46, -inf }
 0x257   :  { %v4468_v49 = vpop.f32.mrf.mxu1  ;;  %1661 = vmax.xlane.f32.xlu1 %v1660_v5 }
 0x258   :  { %v5997_v59 = vadd.f32 %v4468_v49, %v5706_v35  ;;  %v1669_v27 = vsel %vm806_vm3, %v5994_v8, -inf }
 0x259   :  { %v1549_v16 = vpop.f32.mrf.mxu1  ;;  %1676 = vmax.xlane.f32.xlu0 %v1675_v47 }
 0x25a   :  { %v6002_v23 = vadd.f32 %v1549_v16, %v5711_v31  ;;  %v1678_v13 = vsel %vm806_vm3, %v5997_v59, -inf }
 0x25b   :  { %v4471_v2 = vpop.f32.mrf.mxu1  ;;  %1679 = vmax.xlane.f32.xlu1 %v1678_v13 }
 0x25c   :  { %v6007_v5 = vadd.f32 %v4471_v2, %v5724_v24  ;;  %v1672_v53 = vsel %vm806_vm3, %v6002_v23, -inf }
 0x25d   :  { %v1562_v35 = vpop.f32.mrf.mxu1  ;;  %1670 = vmax.xlane.f32.xlu0 %v1669_v27 }
 0x25e   :  { %v6014_v31 = vadd.f32 %v1562_v35, %v5739_v29  ;;  %v1687_v24 = vsel %vm806_vm3, %v6007_v5, -inf }
 0x25f   :  { %v4472_v49 = vpop.f32.mrf.mxu1  ;;  %1673 = vmax.xlane.f32.xlu1 %v1672_v53 }
 0x260   :  { %v6017_v47 = vadd.f32 %v4472_v49, %v5744_v55  ;;  %v1681_v29 = vsel %vm806_vm3, %v6014_v31, -inf }
 0x261   :  { %v1565_v16 = vpop.f32.mrf.mxu1  ;;  %1688 = vmax.xlane.f32.xlu0 %v1687_v24 }
 0x262   :  { %v6022_v13 = vadd.f32 %v1565_v16, %v5751_v43  ;;  %v1690_v2 = vsel %vm806_vm3, %v6017_v47, -inf }
 0x263   :  { %v4475_v27 = vpop.f32.mrf.mxu1  ;;  %1691 = vmax.xlane.f32.xlu1 %v1690_v2 }
 0x264   :  { %v6027_v53 = vadd.f32 %v4475_v27, %v5764_v52  ;;  %v1684_v35 = vsel %vm806_vm3, %v6022_v13, -inf }
 0x265   :  { %v1578_v55 = vpop.f32.mrf.mxu1  ;;  %1682 = vmax.xlane.f32.xlu0 %v1681_v29 }
 0x266   :  { %v6034_v43 = vadd.f32 %v1578_v55, %v5779_v6  ;;  %v1699_v52 = vsel %vm806_vm3, %v6027_v53, -inf }
 0x267   :  { %v4476_v49 = vpop.f32.mrf.mxu1  ;;  %1685 = vmax.xlane.f32.xlu1 %v1684_v35 }
 0x268   :  { %v6037_v24 = vadd.f32 %v4476_v49, %v5784_v58  ;;  %v1693_v6 = vsel %vm806_vm3, %v6034_v43, -inf }
 0x269   :  { %v1581_v16 = vpop.f32.mrf.mxu1  ;;  %1700 = vmax.xlane.f32.xlu0 %v1699_v52 }
 0x26a   :  { %v6042_v2 = vadd.f32 %v1581_v16, %v5791_v39  ;;  %v1702_v27 = vsel %vm806_vm3, %v6037_v24, -inf }
 0x26b   :  { %v4479_v29 = vpop.f32.mrf.mxu1  ;;  %1703 = vmax.xlane.f32.xlu1 %v1702_v27 }
 0x26c   :  { %v6047_v35 = vadd.f32 %v4479_v29, %v5804_v40  ;;  %v1696_v55 = vsel %vm806_vm3, %v6042_v2, -inf }
 0x26d   :  { %v1594_v58 = vpop.f32.mrf.mxu1  ;;  %1694 = vmax.xlane.f32.xlu0 %v1693_v6 }
 0x26e   :  { %v6054_v39 = vadd.f32 %v1594_v58, %v5819_v4  ;;  %v1711_v40 = vsel %vm806_vm3, %v6047_v35, -inf }
 0x26f   :  { %v4480_v49 = vpop.f32.mrf.mxu1  ;;  %1697 = vmax.xlane.f32.xlu1 %v1696_v55 }
 0x270   :  { %v6057_v52 = vadd.f32 %v4480_v49, %v5824_v50  ;;  %v1705_v4 = vsel %vm806_vm3, %v6054_v39, -inf }
 0x271   :  { %v1597_v16 = vpop.f32.mrf.mxu1  ;;  %1712 = vmax.xlane.f32.xlu0 %v1711_v40 }
 0x272   :  { %v6062_v27 = vadd.f32 %v1597_v16, %v5831_v12  ;;  %v1714_v29 = vsel %vm806_vm3, %v6057_v52, -inf }
 0x273   :  { %v4483_v6 = vpop.f32.mrf.mxu1  ;;  %1715 = vmax.xlane.f32.xlu1 %v1714_v29 }
 0x274   :  { %v6067_v55 = vadd.f32 %v4483_v6, %v5844_v56  ;;  %v1708_v58 = vsel %vm806_vm3, %v6062_v27, -inf }
 0x275   :  { %v1610_v50 = vpop.f32.mrf.mxu1  ;;  %1706 = vmax.xlane.f32.xlu0 %v1705_v4 }
 0x276   :  { %v6074_v12 = vadd.f32 %v1610_v50, %v5859_v33  ;;  %v1723_v56 = vsel %vm806_vm3, %v6067_v55, -inf }
 0x277   :  { %v4484_v49 = vpop.f32.mrf.mxu1  ;;  %1709 = vmax.xlane.f32.xlu1 %v1708_v58 }
 0x278   :  { %v6077_v40 = vadd.f32 %v4484_v49, %v5864_v30  ;;  %v1717_v33 = vsel %vm806_vm3, %v6074_v12, -inf }
 0x279   :  { %v1613_v16 = vpop.f32.mrf.mxu1  ;;  %1724 = vmax.xlane.f32.xlu0 %v1723_v56 }
 0x27a   :  { %v6082_v29 = vadd.f32 %v1613_v16, %v5871_v9  ;;  %v1726_v6 = vsel %vm806_vm3, %v6077_v40, -inf }
 0x27b   :  { %v4487_v4 = vpop.f32.mrf.mxu1  ;;  %1727 = vmax.xlane.f32.xlu1 %v1726_v6 }
 0x27c   :  { %v6087_v58 = vadd.f32 %v4487_v4, %v5884_v61  ;;  %v1720_v50 = vsel %vm806_vm3, %v6082_v29, -inf }
 0x27d   :  { %v1626_v30 = vpop.f32.mrf.mxu1  ;;  %1718 = vmax.xlane.f32.xlu0 %v1717_v33 }
 0x27e   :  { %v6094_v9 = vadd.f32 %v1626_v30, %v5899_v51  ;;  %v1735_v61 = vsel %vm806_vm3, %v6087_v58, -inf }
 0x27f   :  { %v4488_v49 = vpop.f32.mrf.mxu1  ;;  %1721 = vmax.xlane.f32.xlu1 %v1720_v50 }
 0x280   :  { %v6097_v56 = vadd.f32 %v4488_v49, %v5904_v18  ;;  %v1729_v51 = vsel %vm806_vm3, %v6094_v9, -inf }
 0x281   :  { %v1629_v16 = vpop.f32.mrf.mxu1  ;;  %1736 = vmax.xlane.f32.xlu0 %v1735_v61 }
 0x282   :  { %v6102_v6 = vadd.f32 %v1629_v16, %v5911_v48  ;;  %v1738_v4 = vsel %vm806_vm3, %v6097_v56, -inf }
 0x283   :  { %v4491_v33 = vpop.f32.mrf.mxu1  ;;  %1739 = vmax.xlane.f32.xlu1 %v1738_v4 }
 0x284   :  { %7523 = vst [vmem:[#allocation29_spill] sm:$0xff] %v6102_v6  ;;  %v6107_v50 = vadd.f32 %v4491_v33, %v5924_v38  ;;  %v1732_v48 = vsel %vm806_vm3, %v6102_v6, -inf }
 0x285   :  { %v1642_v18 = vpop.f32.mrf.mxu1  ;;  %1730 = vmax.xlane.f32.xlu0 %v1729_v51 }
 0x286   :  { %v6112_v30 = vadd.f32 %v1642_v18, %v5939_v17 }
 0x287   :  { %v4492_v49 = vpop.f32.mrf.mxu1  ;;  %1733 = vmax.xlane.f32.xlu1 %v1732_v48 }
 0x288   :  { %7524 = vst [vmem:[#allocation30_spill] sm:$0xff] %v6112_v30  ;;  %v6117_v61 = vadd.f32 %v4492_v49, %v5944_v11  ;;  %v1741_v38 = vsel %vm806_vm3, %v6112_v30, -inf }
 0x289   :  { %v1645_v16 = vpop.f32.mrf.mxu1  ;;  %1742 = vmax.xlane.f32.xlu0 %v1741_v38 }
 0x28a   :  { %v6122_v4 = vadd.f32 %v1645_v16, %v5951_v14 }
 0x28c   :  { %7525 = vst [vmem:[#allocation31_spill] sm:$0xff] %v6122_v4  ;;  %v1744_v17 = vsel %vm806_vm3, %v6122_v4, -inf }
 0x28d   :  { %1745 = vmax.xlane.f32.xlu1 %v1744_v17 }
 0x298   :  { %v815_v33 = vpop.xlane.xlu1 %814 }
 0x299   :  { %v905_v51 = vsub.f32 %v5661_v37, %v815_v33 }
 0x29a   :  { %v809_v18 = vpop.xlane.xlu0 %808 }
 0x29b   :  { %v939_v48 = vmul.f32 1.442695, %v905_v51  ;;  %v903_v11 = vsub.f32 %v5669_v60, %v809_v18 }
 0x29c   :  { %v818_v49 = vpop.xlane.xlu1 %817 }
 0x29d   :  { %4695 = vpow2.f32 %v939_v48  ;;  %v935_v6 = vmul.f32 1.442695, %v903_v11  ;;  %v906_v30 = vsub.f32 %v5679_v19, %v818_v49 }
 0x29e   :  { %v812_v38 = vpop.xlane.xlu0 %811 }
 0x29f   :  { %4697 = vpow2.f32 %v935_v6  ;;  %v941_v14 = vmul.f32 1.442695, %v906_v30  ;;  %v904_v16 = vsub.f32 %v5689_v41, %v812_v38 }
 0x2a1   :  { %4699 = vpow2.f32 %v941_v14  ;;  %v937_v4 = vmul.f32 1.442695, %v904_v16 }
 0x2a2   :  { %v827_v17 = vpop.xlane.xlu0 %826 }
 0x2a3   :  { %4701 = vpow2.f32 %v937_v4  ;;  %v909_v37 = vsub.f32 %v5694_v21, %v827_v17 }
 0x2a4   :  { %v830_v33 = vpop.xlane.xlu1 %829 }
 0x2a5   :  { %v947_v51 = vmul.f32 1.442695, %v909_v37  ;;  %v910_v60 = vsub.f32 %v5717_v15, %v830_v33 }
 0x2a6   :  { %v821_v18 = vpop.xlane.xlu0 %820 }
 0x2a7   :  { %4703 = vpow2.f32 %v947_v51  ;;  %v949_v48 = vmul.f32 1.442695, %v910_v60  ;;  %v907_v19 = vsub.f32 %v5714_v3, %v821_v18 }
 0x2a8   :  { %v824_v11 = vpop.xlane.xlu1 %823 }
 0x2a9   :  { %4705 = vpow2.f32 %v949_v48  ;;  %v943_v6 = vmul.f32 1.442695, %v907_v19  ;;  %v908_v41 = vsub.f32 %v5727_v25, %v824_v11 }
 0x2aa   :  { %v6134_v30 = vpop.eup %4695  ;;  %v839_v49 = vpop.xlane.xlu0 %838 }
 0x2ab   :  { %4707 = vpow2.f32 %v943_v6  ;;  %v945_v4 = vmul.f32 1.442695, %v908_v41  ;;  %v913_v21 = vsub.f32 %v5732_v26, %v839_v49  ;;  %v1005_v15 = vsel %vm806_vm3, %v6134_v30, 0.0 }
 0x2ac   :  { %v6139_v38 = vpop.eup %4697  ;;  %v842_v14 = vpop.xlane.xlu1 %841  ;;  %1006 = vadd.xlane.f32.xlu0 %v1005_v15 }
 0x2ad   :  { %4709 = vpow2.f32 %v945_v4  ;;  %v955_v3 = vmul.f32 1.442695, %v913_v21  ;;  %v914_v16 = vsub.f32 %v5757_v34, %v842_v14  ;;  %v999_v37 = vsel %vm806_vm3, %v6139_v38, 0.0 }
 0x2ae   :  { %v6142_v17 = vpop.eup %4699  ;;  %v833_v25 = vpop.xlane.xlu0 %832 }
 0x2af   :  { %4711 = vpow2.f32 %v955_v3  ;;  %v957_v33 = vmul.f32 1.442695, %v914_v16  ;;  %v911_v26 = vsub.f32 %v5754_v45, %v833_v25  ;;  %v1008_v51 = vsel %vm806_vm3, %v6142_v17, 0.0 }
 0x2b0   :  { %v6149_v60 = vpop.eup %4701  ;;  %1009 = vadd.xlane.f32.xlu1 %v1008_v51  ;;  %v836_v18 = vpop.xlane.xlu1 %835  ;;  %1000 = vadd.xlane.f32.xlu0 %v999_v37 }
 0x2b1   :  { %4713 = vpow2.f32 %v957_v33  ;;  %v951_v34 = vmul.f32 1.442695, %v911_v26  ;;  %v912_v48 = vsub.f32 %v5767_v36, %v836_v18  ;;  %v1002_v45 = vsel %vm806_vm3, %v6149_v60, 0.0 }
 0x2b2   :  { %v851_v19 = vpop.xlane.xlu0 %850 }
 0x2b3   :  { %4715 = vpow2.f32 %v951_v34  ;;  %v953_v11 = vmul.f32 1.442695, %v912_v48  ;;  %v917_v6 = vsub.f32 %v5772_v32, %v851_v19 }
 0x2b4   :  { %v6155_v41 = vpop.eup %4703  ;;  %v854_v49 = vpop.xlane.xlu1 %853  ;;  %1003 = vadd.xlane.f32.xlu1 %v1002_v45 }
 0x2b5   :  { %4717 = vpow2.f32 %v953_v11  ;;  %v963_v4 = vmul.f32 1.442695, %v917_v6  ;;  %v918_v21 = vsub.f32 %v5797_v44, %v854_v49  ;;  %v1017_v15 = vsel %vm806_vm3, %v6155_v41, 0.0 }
 0x2b6   :  { %v6160_v36 = vpop.eup %4705  ;;  %1018 = vadd.xlane.f32.xlu0 %v1017_v15  ;;  %v845_v14 = vpop.xlane.xlu0 %844 }
 0x2b7   :  { %4719 = vpow2.f32 %v963_v4  ;;  %v965_v32 = vmul.f32 1.442695, %v918_v21  ;;  %v915_v3 = vsub.f32 %v5794_v7, %v845_v14  ;;  %v1020_v16 = vsel %vm806_vm3, %v6160_v36, 0.0 }
 0x2b8   :  { %v6165_v25 = vpop.eup %4707  ;;  %v848_v37 = vpop.xlane.xlu1 %847  ;;  %1021 = vadd.xlane.f32.xlu1 %v1020_v16 }
 0x2b9   :  { %4721 = vpow2.f32 %v965_v32  ;;  %v959_v44 = vmul.f32 1.442695, %v915_v3  ;;  %v916_v33 = vsub.f32 %v5807_v10, %v848_v37  ;;  %v1011_v26 = vsel %vm806_vm3, %v6165_v25, 0.0 }
 0x2ba   :  { %v6170_v51 = vpop.eup %4709  ;;  %1012 = vadd.xlane.f32.xlu0 %v1011_v26  ;;  %v863_v18 = vpop.xlane.xlu0 %862 }
 0x2bb   :  { %4723 = vpow2.f32 %v959_v44  ;;  %v961_v7 = vmul.f32 1.442695, %v916_v33  ;;  %v921_v34 = vsub.f32 %v5812_v57, %v863_v18  ;;  %v1014_v48 = vsel %vm806_vm3, %v6170_v51, 0.0 }
 0x2bc   :  { %v6175_v19 = vpop.eup %4711  ;;  %v866_v11 = vpop.xlane.xlu1 %865  ;;  %1015 = vadd.xlane.f32.xlu1 %v1014_v48 }
 0x2bd   :  { %4725 = vpow2.f32 %v961_v7  ;;  %v971_v10 = vmul.f32 1.442695, %v921_v34  ;;  %v922_v6 = vsub.f32 %v5837_v54, %v866_v11  ;;  %v1029_v45 = vsel %vm806_vm3, %v6175_v19, 0.0  ;;  %v7526_v11 = vld [vmem:[#allocation17_spill] sm:$0xff] }
 0x2be   :  { %v6180_v49 = vpop.eup %4713  ;;  %1030 = vadd.xlane.f32.xlu0 %v1029_v45  ;;  %v857_v4 = vpop.xlane.xlu0 %856 }
 0x2bf   :  { %4727 = vpow2.f32 %v971_v10  ;;  %v973_v57 = vmul.f32 1.442695, %v922_v6  ;;  %v919_v21 = vsub.f32 %v5834_v22, %v857_v4  ;;  %v1032_v15 = vsel %vm806_vm3, %v6180_v49, 0.0  ;;  %v7527_v6 = vld [vmem:[#allocation19_spill] sm:$0xff] }
 0x2c0   :  { %v6185_v14 = vpop.eup %4715  ;;  %v860_v32 = vpop.xlane.xlu1 %859  ;;  %1033 = vadd.xlane.f32.xlu1 %v1032_v15 }
 0x2c1   :  { %4729 = vpow2.f32 %v973_v57  ;;  %v967_v54 = vmul.f32 1.442695, %v919_v21  ;;  %v920_v3 = vsub.f32 %v5847_v62, %v860_v32  ;;  %v1023_v16 = vsel %vm806_vm3, %v6185_v14, 0.0  ;;  %v7528_v32 = vld [vmem:[#allocation23_spill] sm:$0xff] }
 0x2c2   :  { %v6190_v37 = vpop.eup %4717  ;;  %1024 = vadd.xlane.f32.xlu0 %v1023_v16  ;;  %v875_v44 = vpop.xlane.xlu0 %874 }
 0x2c3   :  { %4731 = vpow2.f32 %v967_v54  ;;  %v969_v22 = vmul.f32 1.442695, %v920_v3  ;;  %v1026_v33 = vsel %vm806_vm3, %v6190_v37, 0.0  ;;  %v925_v18 = vsub.f32 %v5852_v1, %v875_v44 }
 0x2c4   :  { %v6194_v26 = vpop.eup %4719  ;;  %v878_v7 = vpop.xlane.xlu1 %877  ;;  %1027 = vadd.xlane.f32.xlu1 %v1026_v33 }
 0x2c5   :  { %4733 = vpow2.f32 %v969_v22  ;;  %v1041_v62 = vsel %vm806_vm3, %v6194_v26, 0.0  ;;  %v926_v10 = vsub.f32 %v7526_v11, %v878_v7  ;;  %v979_v1 = vmul.f32 1.442695, %v925_v18  ;;  %v7530_v18 = vld [vmem:[#allocation21_spill] sm:$0xff] }
 0x2c6   :  { %v6199_v34 = vpop.eup %4721  ;;  %1042 = vadd.xlane.f32.xlu0 %v1041_v62  ;;  %v869_v48 = vpop.xlane.xlu0 %868 }
 0x2c7   :  { %v923_v45 = vsub.f32 %v7527_v6, %v869_v48  ;;  %v1044_v4 = vsel %vm806_vm3, %v6199_v34, 0.0  ;;  %v981_v22 = vmul.f32 1.442695, %v926_v10 }
 0x2c8   :  { %v6205_v57 = vpop.eup %4723  ;;  %v872_v21 = vpop.xlane.xlu1 %871  ;;  %1045 = vadd.xlane.f32.xlu1 %v1044_v4  ;;  %v7531_v4 = vld [vmem:[#allocation15_spill] sm:$0xff] }
 0x2c9   :  { %v975_v15 = vmul.f32 1.442695, %v923_v45  ;;  %v924_v54 = vsub.f32 %v7528_v32, %v872_v21  ;;  %v1035_v3 = vsel %vm806_vm3, %v6205_v57, 0.0 }
 0x2ca   :  { %v6210_v16 = vpop.eup %4725  ;;  %1036 = vadd.xlane.f32.xlu0 %v1035_v3  ;;  %v887_v44 = vpop.xlane.xlu0 %886 }
 0x2cb   :  { %4735 = vpow2.f32 %v975_v15  ;;  %v977_v33 = vmul.f32 1.442695, %v924_v54  ;;  %v1038_v7 = vsel %vm806_vm3, %v6210_v16, 0.0  ;;  %v929_v48 = vsub.f32 %v7530_v18, %v887_v44  ;;  %v7532_v15 = vld [vmem:[#allocation16_spill] sm:$0xff] }
 0x2cc   :  { %v6214_v62 = vpop.eup %4727  ;;  %4737 = vpow2.f32 %v979_v1  ;;  %v890_v11 = vpop.xlane.xlu1 %889  ;;  %1039 = vadd.xlane.f32.xlu1 %v1038_v7  ;;  %v7533_v7 = vld [vmem:[#allocation20_spill] sm:$0xff] }
 0x2cd   :  { %7529 = vst [vmem:[#allocation17_spill] sm:$0xff] %v6214_v62  ;;  %4739 = vpow2.f32 %v977_v33  ;;  %v1053_v6 = vsel %vm806_vm3, %v6214_v62, 0.0  ;;  %v930_v21 = vsub.f32 %v7531_v4, %v890_v11  ;;  %v987_v3 = vmul.f32 1.442695, %v929_v48  ;;  %v7535_v48 = vld [vmem:[#allocation18_spill] sm:$0xff] }
 0x2ce   :  { %v6219_v45 = vpop.eup %4729  ;;  %1054 = vadd.xlane.f32.xlu0 %v1053_v6  ;;  %v881_v10 = vpop.xlane.xlu0 %880  ;;  %4741 = vpow2.f32 %v981_v22 }
 0x2cf   :  { %v927_v32 = vsub.f32 %v7532_v15, %v881_v10  ;;  %v1056_v1 = vsel %vm806_vm3, %v6219_v45, 0.0  ;;  %v989_v11 = vmul.f32 1.442695, %v930_v21 }
 0x2d0   :  { %v6225_v54 = vpop.eup %4731  ;;  %v884_v44 = vpop.xlane.xlu1 %883  ;;  %1057 = vadd.xlane.f32.xlu1 %v1056_v1 }
 0x2d1   :  { %v983_v33 = vmul.f32 1.442695, %v927_v32  ;;  %v928_v18 = vsub.f32 %v7533_v7, %v884_v44  ;;  %v1047_v6 = vsel %vm806_vm3, %v6225_v54, 0.0  ;;  %v1747_v32 = vsel %vm806_vm3, %v6107_v50, -inf  ;;  %v7536_v7 = vld [vmem:[#allocation24_spill] sm:$0xff] }
 0x2d2   :  { %v6230_v62 = vpop.eup %4733  ;;  %1048 = vadd.xlane.f32.xlu0 %v1047_v6  ;;  %v899_v22 = vpop.xlane.xlu0 %898 }
 0x2d3   :  { %7534 = vst [vmem:[#allocation19_spill] sm:$0xff] %v6230_v62  ;;  %4743 = vpow2.f32 %v983_v33  ;;  %v985_v10 = vmul.f32 1.442695, %v928_v18  ;;  %v1050_v4 = vsel %vm806_vm3, %v6230_v62, 0.0  ;;  %v933_v15 = vsub.f32 %v7535_v48, %v899_v22  ;;  %v7537_v48 = vld [vmem:[#allocation22_spill] sm:$0xff] }
 0x2d4   :  { %4745 = vpow2.f32 %v987_v3  ;;  %v902_v1 = vpop.xlane.xlu1 %901  ;;  %1051 = vadd.xlane.f32.xlu1 %v1050_v4  ;;  %v1750_v33 = vsel %vm806_vm3, %v6117_v61, -inf }
 0x2d5   :  { %4747 = vpow2.f32 %v985_v10  ;;  %v934_v6 = vsub.f32 %v7536_v7, %v902_v1  ;;  %v995_v3 = vmul.f32 1.442695, %v933_v15 }
 0x2d6   :  { %1748 = vmax.xlane.f32.xlu0 %v1747_v32  ;;  %v893_v44 = vpop.xlane.xlu0 %892  ;;  %4749 = vpow2.f32 %v989_v11 }
 0x2d7   :  { %v931_v21 = vsub.f32 %v5954_v63, %v893_v44  ;;  %v997_v1 = vmul.f32 1.442695, %v934_v6 }
 0x2d8   :  { %v6241_v18 = vpop.eup %4735  ;;  %v896_v22 = vpop.xlane.xlu1 %895  ;;  %1751 = vmax.xlane.f32.xlu1 %v1750_v33 }
 0x2d9   :  { %v6243_v4 = vpop.eup %4737  ;;  %v991_v10 = vmul.f32 1.442695, %v931_v21  ;;  %v932_v62 = vsub.f32 %v7537_v48, %v896_v22  ;;  %v1059_v11 = vsel %vm806_vm3, %v6241_v18, 0.0 }
 0x2da   :  { %v6248_v32 = vpop.eup %4739  ;;  %1060 = vadd.xlane.f32.xlu0 %v1059_v11  ;;  %v1665_v63 = vpop.xlane.xlu0 %1664  ;;  %v1065_v22 = vsel %vm806_vm3, %v6243_v4, 0.0 }
 0x2db   :  { %4751 = vpow2.f32 %v991_v10  ;;  %v993_v44 = vmul.f32 1.442695, %v932_v62  ;;  %v1062_v15 = vsel %vm806_vm3, %v6248_v32, 0.0  ;;  %v6252_v7 = vpop.eup %4741  ;;  %v1755_v21 = vsub.f32 %v5967_v0, %v1665_v63 }
 0x2dc   :  { %4753 = vpow2.f32 %v995_v3  ;;  %v1668_v33 = vpop.xlane.xlu1 %1667  ;;  %1063 = vadd.xlane.f32.xlu1 %v1062_v15  ;;  %v1068_v10 = vsel %vm806_vm3, %v6252_v7, 0.0 }
 0x2dd   :  { %4755 = vpow2.f32 %v993_v44  ;;  %v1756_v6 = vsub.f32 %v5977_v20, %v1668_v33  ;;  %v1789_v3 = vmul.f32 1.442695, %v1755_v21 }
 0x2de   :  { %1066 = vadd.xlane.f32.xlu0 %v1065_v22  ;;  %v1659_v48 = vpop.xlane.xlu0 %1658  ;;  %4757 = vpow2.f32 %v997_v1 }
 0x2df   :  { %v1753_v62 = vsub.f32 %v5974_v28, %v1659_v48  ;;  %v1791_v28 = vmul.f32 1.442695, %v1756_v6 }
 0x2e0   :  { %v6261_v11 = vpop.eup %4743  ;;  %v1662_v0 = vpop.xlane.xlu1 %1661  ;;  %1069 = vadd.xlane.f32.xlu1 %v1068_v10 }
 0x2e1   :  { %v6263_v63 = vpop.eup %4745  ;;  %v1785_v44 = vmul.f32 1.442695, %v1753_v62  ;;  %v1754_v15 = vsub.f32 %v5982_v42, %v1662_v0  ;;  %v1071_v1 = vsel %vm806_vm3, %v6261_v11, 0.0 }
 0x2e2   :  { %v6268_v22 = vpop.eup %4747  ;;  %1072 = vadd.xlane.f32.xlu0 %v1071_v1  ;;  %v1677_v20 = vpop.xlane.xlu0 %1676  ;;  %v1077_v42 = vsel %vm806_vm3, %v6263_v63, 0.0 }
 0x2e3   :  { %4759 = vpow2.f32 %v1785_v44  ;;  %v1787_v33 = vmul.f32 1.442695, %v1754_v15  ;;  %v1074_v21 = vsel %vm806_vm3, %v6268_v22, 0.0  ;;  %v6272_v48 = vpop.eup %4749  ;;  %v1759_v62 = vsub.f32 %v5987_v46, %v1677_v20 }
 0x2e4   :  { %4761 = vpow2.f32 %v1789_v3  ;;  %v1680_v10 = vpop.xlane.xlu1 %1679  ;;  %1075 = vadd.xlane.f32.xlu1 %v1074_v21  ;;  %v1080_v15 = vsel %vm806_vm3, %v6272_v48, 0.0 }
 0x2e5   :  { %4763 = vpow2.f32 %v1787_v33  ;;  %v1760_v6 = vsub.f32 %v5997_v59, %v1680_v10  ;;  %v1797_v3 = vmul.f32 1.442695, %v1759_v62 }
 0x2e6   :  { %1078 = vadd.xlane.f32.xlu0 %v1077_v42  ;;  %v1671_v0 = vpop.xlane.xlu0 %1670  ;;  %4765 = vpow2.f32 %v1791_v28 }
 0x2e7   :  { %v1757_v44 = vsub.f32 %v5994_v8, %v1671_v0  ;;  %v1799_v59 = vmul.f32 1.442695, %v1760_v6 }
 0x2e8   :  { %v6281_v1 = vpop.eup %4751  ;;  %v1674_v46 = vpop.xlane.xlu1 %1673  ;;  %1081 = vadd.xlane.f32.xlu1 %v1080_v15 }
 0x2e9   :  { %v6283_v20 = vpop.eup %4753  ;;  %v1793_v33 = vmul.f32 1.442695, %v1757_v44  ;;  %v1758_v21 = vsub.f32 %v6002_v23, %v1674_v46  ;;  %v1083_v28 = vsel %vm806_vm3, %v6281_v1, 0.0 }
 0x2ea   :  { %v6288_v42 = vpop.eup %4755  ;;  %1084 = vadd.xlane.f32.xlu0 %v1083_v28  ;;  %v1689_v8 = vpop.xlane.xlu0 %1688  ;;  %v1089_v23 = vsel %vm806_vm3, %v6283_v20, 0.0 }
 0x2eb   :  { %4767 = vpow2.f32 %v1793_v33  ;;  %v1795_v10 = vmul.f32 1.442695, %v1758_v21  ;;  %v1086_v62 = vsel %vm806_vm3, %v6288_v42, 0.0  ;;  %v6292_v0 = vpop.eup %4757  ;;  %v1763_v44 = vsub.f32 %v6007_v5, %v1689_v8 }
 0x2ec   :  { %4769 = vpow2.f32 %v1797_v3  ;;  %v1692_v15 = vpop.xlane.xlu1 %1691  ;;  %1087 = vadd.xlane.f32.xlu1 %v1086_v62  ;;  %v1092_v21 = vsel %vm806_vm3, %v6292_v0, 0.0 }
 0x2ed   :  { %4771 = vpow2.f32 %v1795_v10  ;;  %v1764_v6 = vsub.f32 %v6017_v47, %v1692_v15  ;;  %v1805_v3 = vmul.f32 1.442695, %v1763_v44 }
 0x2ee   :  { %1090 = vadd.xlane.f32.xlu0 %v1089_v23  ;;  %v1683_v46 = vpop.xlane.xlu0 %1682  ;;  %4773 = vpow2.f32 %v1799_v59 }
 0x2ef   :  { %v1761_v33 = vsub.f32 %v6014_v31, %v1683_v46  ;;  %v1807_v47 = vmul.f32 1.442695, %v1764_v6 }
 0x2f0   :  { %v6301_v28 = vpop.eup %4759  ;;  %v1686_v5 = vpop.xlane.xlu1 %1685  ;;  %1093 = vadd.xlane.f32.xlu1 %v1092_v21 }
 0x2f1   :  { %v6303_v8 = vpop.eup %4761  ;;  %v1801_v10 = vmul.f32 1.442695, %v1761_v33  ;;  %v1762_v62 = vsub.f32 %v6022_v13, %v1686_v5  ;;  %v1849_v59 = vsel %vm806_vm3, %v6301_v28, 0.0 }
 0x2f2   :  { %v6308_v23 = vpop.eup %4763  ;;  %1850 = vadd.xlane.f32.xlu0 %v1849_v59  ;;  %v1701_v31 = vpop.xlane.xlu0 %1700  ;;  %v1855_v13 = vsel %vm806_vm3, %v6303_v8, 0.0 }
 0x2f3   :  { %4775 = vpow2.f32 %v1801_v10  ;;  %v1803_v15 = vmul.f32 1.442695, %v1762_v62  ;;  %v1852_v44 = vsel %vm806_vm3, %v6308_v23, 0.0  ;;  %v6312_v46 = vpop.eup %4765  ;;  %v1767_v33 = vsub.f32 %v6027_v53, %v1701_v31 }
 0x2f4   :  { %4777 = vpow2.f32 %v1805_v3  ;;  %v1704_v21 = vpop.xlane.xlu1 %1703  ;;  %1853 = vadd.xlane.f32.xlu1 %v1852_v44  ;;  %v1858_v62 = vsel %vm806_vm3, %v6312_v46, 0.0 }
 0x2f5   :  { %4779 = vpow2.f32 %v1803_v15  ;;  %v1768_v6 = vsub.f32 %v6037_v24, %v1704_v21  ;;  %v1813_v3 = vmul.f32 1.442695, %v1767_v33 }
 0x2f6   :  { %1856 = vadd.xlane.f32.xlu0 %v1855_v13  ;;  %v1695_v5 = vpop.xlane.xlu0 %1694  ;;  %4781 = vpow2.f32 %v1807_v47 }
 0x2f7   :  { %v1765_v10 = vsub.f32 %v6034_v43, %v1695_v5  ;;  %v1815_v24 = vmul.f32 1.442695, %v1768_v6 }
 0x2f8   :  { %v6321_v59 = vpop.eup %4767  ;;  %v1698_v53 = vpop.xlane.xlu1 %1697  ;;  %1859 = vadd.xlane.f32.xlu1 %v1858_v62 }
 0x2f9   :  { %v6323_v31 = vpop.eup %4769  ;;  %v1809_v15 = vmul.f32 1.442695, %v1765_v10  ;;  %v1766_v44 = vsub.f32 %v6042_v2, %v1698_v53  ;;  %v1861_v47 = vsel %vm806_vm3, %v6321_v59, 0.0 }
 0x2fa   :  { %v6328_v13 = vpop.eup %4771  ;;  %1862 = vadd.xlane.f32.xlu0 %v1861_v47  ;;  %v1713_v43 = vpop.xlane.xlu0 %1712  ;;  %v1867_v2 = vsel %vm806_vm3, %v6323_v31, 0.0 }
 0x2fb   :  { %4783 = vpow2.f32 %v1809_v15  ;;  %v1811_v21 = vmul.f32 1.442695, %v1766_v44  ;;  %v1864_v33 = vsel %vm806_vm3, %v6328_v13, 0.0  ;;  %v6332_v5 = vpop.eup %4773  ;;  %v1771_v10 = vsub.f32 %v6047_v35, %v1713_v43 }
 0x2fc   :  { %4785 = vpow2.f32 %v1813_v3  ;;  %v1716_v62 = vpop.xlane.xlu1 %1715  ;;  %1865 = vadd.xlane.f32.xlu1 %v1864_v33  ;;  %v1870_v44 = vsel %vm806_vm3, %v6332_v5, 0.0 }
 0x2fd   :  { %4787 = vpow2.f32 %v1811_v21  ;;  %v1772_v6 = vsub.f32 %v6057_v52, %v1716_v62  ;;  %v1821_v3 = vmul.f32 1.442695, %v1771_v10 }
 0x2fe   :  { %1868 = vadd.xlane.f32.xlu0 %v1867_v2  ;;  %v1707_v53 = vpop.xlane.xlu0 %1706  ;;  %4789 = vpow2.f32 %v1815_v24 }
 0x2ff   :  { %v1769_v15 = vsub.f32 %v6054_v39, %v1707_v53  ;;  %v1823_v52 = vmul.f32 1.442695, %v1772_v6 }
 0x300   :  { %v6341_v47 = vpop.eup %4775  ;;  %v1710_v35 = vpop.xlane.xlu1 %1709  ;;  %1871 = vadd.xlane.f32.xlu1 %v1870_v44 }
 0x301   :  { %v6343_v43 = vpop.eup %4777  ;;  %v1817_v21 = vmul.f32 1.442695, %v1769_v15  ;;  %v1770_v33 = vsub.f32 %v6062_v27, %v1710_v35  ;;  %v1873_v24 = vsel %vm806_vm3, %v6341_v47, 0.0 }
 0x302   :  { %v6348_v2 = vpop.eup %4779  ;;  %1874 = vadd.xlane.f32.xlu0 %v1873_v24  ;;  %v1725_v39 = vpop.xlane.xlu0 %1724  ;;  %v1879_v27 = vsel %vm806_vm3, %v6343_v43, 0.0 }
 0x303   :  { %4791 = vpow2.f32 %v1817_v21  ;;  %v1819_v62 = vmul.f32 1.442695, %v1770_v33  ;;  %v1876_v10 = vsel %vm806_vm3, %v6348_v2, 0.0  ;;  %v6352_v53 = vpop.eup %4781  ;;  %v1775_v15 = vsub.f32 %v6067_v55, %v1725_v39 }
 0x304   :  { %4793 = vpow2.f32 %v1821_v3  ;;  %v1728_v44 = vpop.xlane.xlu1 %1727  ;;  %1877 = vadd.xlane.f32.xlu1 %v1876_v10  ;;  %v1882_v33 = vsel %vm806_vm3, %v6352_v53, 0.0 }
 0x305   :  { %4795 = vpow2.f32 %v1819_v62  ;;  %v1776_v6 = vsub.f32 %v6077_v40, %v1728_v44  ;;  %v1829_v3 = vmul.f32 1.442695, %v1775_v15 }
 0x306   :  { %1880 = vadd.xlane.f32.xlu0 %v1879_v27  ;;  %v1719_v35 = vpop.xlane.xlu0 %1718  ;;  %4797 = vpow2.f32 %v1823_v52 }
 0x307   :  { %v1773_v21 = vsub.f32 %v6074_v12, %v1719_v35  ;;  %v1831_v40 = vmul.f32 1.442695, %v1776_v6 }
 0x308   :  { %v6361_v24 = vpop.eup %4783  ;;  %v1722_v55 = vpop.xlane.xlu1 %1721  ;;  %1883 = vadd.xlane.f32.xlu1 %v1882_v33 }
 0x309   :  { %v6363_v39 = vpop.eup %4785  ;;  %v1825_v62 = vmul.f32 1.442695, %v1773_v21  ;;  %v1774_v10 = vsub.f32 %v6082_v29, %v1722_v55  ;;  %v1885_v52 = vsel %vm806_vm3, %v6361_v24, 0.0 }
 0x30a   :  { %7538 = vst [vmem:[#allocation23_spill] sm:$0xff] %v6363_v39  ;;  %v6368_v27 = vpop.eup %4787  ;;  %1886 = vadd.xlane.f32.xlu0 %v1885_v52  ;;  %v1737_v12 = vpop.xlane.xlu0 %1736  ;;  %v1891_v29 = vsel %vm806_vm3, %v6363_v39, 0.0 }
 0x30b   :  { %4799 = vpow2.f32 %v1825_v62  ;;  %v1827_v44 = vmul.f32 1.442695, %v1774_v10  ;;  %v1888_v15 = vsel %vm806_vm3, %v6368_v27, 0.0  ;;  %v6372_v35 = vpop.eup %4789  ;;  %v1779_v21 = vsub.f32 %v6087_v58, %v1737_v12 }
 0x30c   :  { %7539 = vst [vmem:[#allocation21_spill] sm:$0xff] %v6372_v35  ;;  %4801 = vpow2.f32 %v1829_v3  ;;  %v1740_v33 = vpop.xlane.xlu1 %1739  ;;  %1889 = vadd.xlane.f32.xlu1 %v1888_v15  ;;  %v1894_v10 = vsel %vm806_vm3, %v6372_v35, 0.0  ;;  %v7541_v15 = vld [vmem:[#allocation29_spill] sm:$0xff] }
 0x30d   :  { %4803 = vpow2.f32 %v1827_v44  ;;  %v1780_v55 = vsub.f32 %v6097_v56, %v1740_v33  ;;  %v1837_v3 = vmul.f32 1.442695, %v1779_v21 }
 0x30e   :  { %1892 = vadd.xlane.f32.xlu0 %v1891_v29  ;;  %v1731_v6 = vpop.xlane.xlu0 %1730  ;;  %4805 = vpow2.f32 %v1831_v40 }
 0x30f   :  { %v1777_v62 = vsub.f32 %v6094_v9, %v1731_v6  ;;  %v1839_v40 = vmul.f32 1.442695, %v1780_v55  ;;  %v7543_v6 = vld [vmem:[#allocation30_spill] sm:$0xff]  ;;  %v7545_v55 = vld [vmem:[#allocation31_spill] sm:$0xff] }
 0x310   :  { %v6381_v52 = vpop.eup %4791  ;;  %v1734_v58 = vpop.xlane.xlu1 %1733  ;;  %1895 = vadd.xlane.f32.xlu1 %v1894_v10 }
 0x311   :  { %v6383_v12 = vpop.eup %4793  ;;  %v1833_v44 = vmul.f32 1.442695, %v1777_v62  ;;  %v1778_v39 = vsub.f32 %v7541_v15, %v1734_v58  ;;  %v1897_v56 = vsel %vm806_vm3, %v6381_v52, 0.0 }
 0x312   :  { %7540 = vst [vmem:[#allocation15_spill] sm:$0xff] %v6383_v12  ;;  %v6388_v33 = vpop.eup %4795  ;;  %1898 = vadd.xlane.f32.xlu0 %v1897_v56  ;;  %v1743_v9 = vpop.xlane.xlu0 %1742  ;;  %v1903_v58 = vsel %vm806_vm3, %v6383_v12, 0.0 }
 0x313   :  { %7542 = vst [vmem:[#allocation16_spill] sm:$0xff] %v6388_v33  ;;  %4807 = vpow2.f32 %v1833_v44  ;;  %v1835_v29 = vmul.f32 1.442695, %v1778_v39  ;;  %v1781_v35 = vsub.f32 %v7543_v6, %v1743_v9  ;;  %v1900_v21 = vsel %vm806_vm3, %v6388_v33, 0.0  ;;  %v6393_v10 = vpop.eup %4797 }
 0x314   :  { %7544 = vst [vmem:[#allocation20_spill] sm:$0xff] %v6393_v10  ;;  %4809 = vpow2.f32 %v1837_v3  ;;  %1901 = vadd.xlane.f32.xlu1 %v1900_v21  ;;  %v1906_v39 = vsel %vm806_vm3, %v6393_v10, 0.0 }
 0x315   :  { %4811 = vpow2.f32 %v1835_v29  ;;  %v1841_v62 = vmul.f32 1.442695, %v1781_v35 }
 0x316   :  { %v1746_v15 = vpop.xlane.xlu1 %1745  ;;  %1904 = vadd.xlane.f32.xlu0 %v1903_v58  ;;  %4813 = vpow2.f32 %v1839_v40 }
 0x317   :  { %v1782_v44 = vsub.f32 %v7545_v55, %v1746_v15  ;;  %4815 = vpow2.f32 %v1841_v62 }
 0x318   :  { %v6400_v56 = vpop.eup %4799  ;;  %1907 = vadd.xlane.f32.xlu1 %v1906_v39 }
 0x319   :  { %7546 = vst [vmem:[#allocation18_spill] sm:$0xff] %v6400_v56  ;;  %v6402_v9 = vpop.eup %4801  ;;  %v1843_v3 = vmul.f32 1.442695, %v1782_v44  ;;  %v1909_v35 = vsel %vm806_vm3, %v6400_v56, 0.0 }
 0x31a   :  { %7547 = vst [vmem:[#allocation24_spill] sm:$0xff] %v6402_v9  ;;  %v6406_v29 = vpop.eup %4803  ;;  %1910 = vadd.xlane.f32.xlu0 %v1909_v35  ;;  %v1915_v21 = vsel %vm806_vm3, %v6402_v9, 0.0 }
 0x31b   :  { %7548 = vst [vmem:[#allocation22_spill] sm:$0xff] %v6406_v29  ;;  %4817 = vpow2.f32 %v1843_v3  ;;  %v1912_v40 = vsel %vm806_vm3, %v6406_v29, 0.0  ;;  %v6410_v6 = vpop.eup %4805 }
 0x31c   :  { %7549 = vst [vmem:[#allocation29_spill] sm:$0xff] %v6410_v6  ;;  %1913 = vadd.xlane.f32.xlu1 %v1912_v40  ;;  %v1918_v62 = vsel %vm806_vm3, %v6410_v6, 0.0 }
 0x31e   :  { %1916 = vadd.xlane.f32.xlu0 %v1915_v21 }
 0x320   :  { %v6416_v58 = vpop.eup %4807  ;;  %1919 = vadd.xlane.f32.xlu1 %v1918_v62 }
 0x321   :  { %7550 = vst [vmem:[#allocation30_spill] sm:$0xff] %v6416_v58  ;;  %v6418_v15 = vpop.eup %4809  ;;  %v1921_v55 = vsel %vm806_vm3, %v6416_v58, 0.0 }
 0x322   :  { %7551 = vst [vmem:[#allocation31_spill] sm:$0xff] %v6418_v15  ;;  %v6422_v44 = vpop.eup %4811  ;;  %1922 = vadd.xlane.f32.xlu0 %v1921_v55  ;;  %v1927_v35 = vsel %vm806_vm3, %v6418_v15, 0.0 }
 0x323   :  { %7552 = vst [vmem:[#allocation32_spill] sm:$0xff] %v6422_v44  ;;  %v1924_v39 = vsel %vm806_vm3, %v6422_v44, 0.0  ;;  %v6426_v3 = vpop.eup %4813 }
 0x324   :  { %7553 = vst [vmem:[#allocation33_spill] sm:$0xff] %v6426_v3  ;;  %1925 = vadd.xlane.f32.xlu1 %v1924_v39  ;;  %v6430_v40 = vpop.eup %4815  ;;  %v1930_v21 = vsel %vm806_vm3, %v6426_v3, 0.0 }
 0x325   :  { %7554 = vst [vmem:[#allocation34_spill] sm:$0xff] %v6430_v40  ;;  %v1933_v55 = vsel %vm806_vm3, %v6430_v40, 0.0 }
 0x326   :  { %1928 = vadd.xlane.f32.xlu0 %v1927_v35 }
 0x328   :  { %v6434_v62 = vpop.eup %4817  ;;  %1931 = vadd.xlane.f32.xlu1 %v1930_v21 }
 0x329   :  { %7555 = vst [vmem:[#allocation35_spill] sm:$0xff] %v6434_v62  ;;  %v1936_v44 = vsel %vm806_vm3, %v6434_v62, 0.0 }
 0x32a   :  { %1934 = vadd.xlane.f32.xlu0 %v1933_v55 }
 0x32c   :  { %1937 = vadd.xlane.f32.xlu1 %v1936_v44 }
 0x335   :  { %v1007_v39 = vpop.xlane.xlu0 %1006 }
 0x339   :  { %v1010_v58 = vpop.xlane.xlu1 %1009  ;;  %v1001_v15 = vpop.xlane.xlu0 %1000 }
 0x33a   :  { %4819 = vrcp.f32 %v1010_v58 }
 0x33b   :  { %4821 = vrcp.f32 %v1001_v15 }
 0x33c   :  { %4823 = vrcp.f32 %v1007_v39 }
 0x33d   :  { %v1004_v35 = vpop.xlane.xlu1 %1003 }
 0x33e   :  { %4825 = vrcp.f32 %v1004_v35 }
 0x33f   :  { %v1019_v3 = vpop.xlane.xlu0 %1018 }
 0x341   :  { %v1022_v6 = vpop.xlane.xlu1 %1021 }
 0x342   :  { %4827 = vrcp.f32 %v1022_v6 }
 0x343   :  { %v1013_v21 = vpop.xlane.xlu0 %1012 }
 0x344   :  { %4829 = vrcp.f32 %v1013_v21 }
 0x345   :  { %4831 = vrcp.f32 %v1019_v3  ;;  %v1016_v40 = vpop.xlane.xlu1 %1015 }
 0x346   :  { %4833 = vrcp.f32 %v1016_v40 }
 0x347   :  { %v1031_v55 = vpop.xlane.xlu0 %1030  ;;  %v4820_v9 = vpop.eup %4819 }
 0x348   :  { %v4822_v62 = vpop.eup %4821  ;;  %v1130_v58 = vmul.f32 %v4820_v9, %v6142_v17 }
 0x349   :  { %v1034_v44 = vpop.xlane.xlu1 %1033  ;;  %v4824_v29 = vpop.eup %4823  ;;  %v1127_v39 = vmul.f32 %v4822_v62, %v6139_v38 }
 0x34a   :  { %4835 = vrcp.f32 %v1034_v44  ;;  %v1129_v35 = vmul.f32 %v4824_v29, %v6134_v30  ;;  %v7556_v44 = vld [vmem:[#allocation27_spill] sm:$0xff] }
 0x34b   :  { %v4826_v56 = vpop.eup %4825  ;;  %v1025_v15 = vpop.xlane.xlu0 %1024 }
 0x34c   :  { %4837 = vrcp.f32 %v1025_v15  ;;  %v1128_v6 = vmul.f32 %v4826_v56, %v6149_v60  ;;  %v1160_v10 = vpack.c.bf16 %v1130_v58, %v1129_v35  ;;  %v7557_v60 = vld [vmem:[#allocation28_spill] sm:$0xff]  ;;  %v7558_v15 = vld [vmem:[#allocation25_spill] sm:$0xff] }
 0x34d   :  { %4839 = vrcp.f32 %v1031_v55  ;;  %v1028_v3 = vpop.xlane.xlu1 %1027 }
 0x34e   :  { %4841 = vrcp.f32 %v1028_v3  ;;  %v1159_v40 = vpack.c.bf16 %v1128_v6, %v1127_v39 }
 0x34f   :  { %v1043_v21 = vpop.xlane.xlu0 %1042  ;;  %v4828_v12 = vpop.eup %4827 }
 0x350   :  { %4421 = vmatprep.mubr.msk.bf16.mxu0 %vm806_vm3, %v1159_v40  ;;  %v1134_v56 = vmul.f32 %v4828_v12, %v6160_v36 }
 0x351   :  { %v4830_v33 = vpop.eup %4829  ;;  %v1046_v17 = vpop.xlane.xlu1 %1045  ;;  %4422 = vmatmul.mubr.msk.bf16.vlgmr.msra.gmra.mxu0 %vm806_vm3, %v1160_v10 }
 0x352   :  { %v4832_v9 = vpop.eup %4831  ;;  %4494 = vmatpush3.bf16.msra.mxu0 %v7556_v44  ;;  %4843 = vrcp.f32 %v1046_v17  ;;  %v1131_v29 = vmul.f32 %v4830_v33, %v6165_v25 }
 0x353   :  { %v4834_v38 = vpop.eup %4833  ;;  %4495 = vmatprep.subr.bf16.mxu0 %v7557_v60  ;;  %v1037_v30 = vpop.xlane.xlu0 %1036  ;;  %v1133_v58 = vmul.f32 %v4832_v9, %v6155_v41  ;;  %v7559_v41 = vld [vmem:[#allocation26_spill] sm:$0xff] }
 0x354   :  { %4845 = vrcp.f32 %v1037_v30  ;;  %v1132_v62 = vmul.f32 %v4834_v38, %v6170_v51 }
 0x355   :  { %4847 = vrcp.f32 %v1043_v21  ;;  %v1040_v55 = vpop.xlane.xlu1 %1039  ;;  %v1162_v6 = vpack.c.bf16 %v1134_v56, %v1133_v58 }
 0x356   :  { %4849 = vrcp.f32 %v1040_v55  ;;  %4496 = vmatpush3.bf16.msra.mxu0 %v7557_v60  ;;  %v1161_v10 = vpack.c.bf16 %v1132_v62, %v1131_v29 }
 0x357   :  { %4497 = vmatprep.subr.bf16.mxu0 %v7558_v15  ;;  %v1055_v39 = vpop.xlane.xlu0 %1054  ;;  %v4836_v35 = vpop.eup %4835 }
 0x358   :  { %4425 = vmatprep.mubr.msk.bf16.mxu0 %vm806_vm3, %v1161_v10  ;;  %v1138_v3 = vmul.f32 %v4836_v35, %v6180_v49 }
 0x359   :  { %v4838_v36 = vpop.eup %4837  ;;  %v1058_v12 = vpop.xlane.xlu1 %1057  ;;  %4426 = vmatmul.mubr.msk.bf16.gmra.mxu0 %vm806_vm3, %v1162_v6 }
 0x35a   :  { %v4840_v25 = vpop.eup %4839  ;;  %4498 = vmatpush3.bf16.msra.mxu0 %v7558_v15  ;;  %4851 = vrcp.f32 %v1058_v12  ;;  %v1135_v40 = vmul.f32 %v4838_v36, %v6185_v14 }
 0x35b   :  { %v4842_v51 = vpop.eup %4841  ;;  %4499 = vmatprep.subr.bf16.mxu0 %v7559_v41  ;;  %v1049_v33 = vpop.xlane.xlu0 %1048  ;;  %v1137_v9 = vmul.f32 %v4840_v25, %v6175_v19 }
 0x35c   :  { %4853 = vrcp.f32 %v1049_v33  ;;  %v1136_v21 = vmul.f32 %v4842_v51, %v6190_v37  ;;  %v7560_v33 = vld [vmem:[#allocation19_spill] sm:$0xff] }
 0x35d   :  { %4855 = vrcp.f32 %v1055_v39  ;;  %v1052_v17 = vpop.xlane.xlu1 %1051  ;;  %v1164_v60 = vpack.c.bf16 %v1138_v3, %v1137_v9 }
 0x35e   :  { %4857 = vrcp.f32 %v1052_v17  ;;  %4500 = vmatpush3.bf16.msra.mxu0 %v7559_v41  ;;  %v1163_v44 = vpack.c.bf16 %v1136_v21, %v1135_v40  ;;  %v7561_v21 = vld [vmem:[#allocation17_spill] sm:$0xff] }
 0x35f   :  { %v1749_v38 = vpop.xlane.xlu0 %1748  ;;  %v4844_v30 = vpop.eup %4843 }
 0x360   :  { %v1783_v56 = vsub.f32 %v6107_v50, %v1749_v38  ;;  %4429 = vmatprep.mubr.msk.bf16.mxu0 %vm806_vm3, %v1163_v44  ;;  %v1142_v58 = vmul.f32 %v4844_v30, %v6199_v34 }
 0x361   :  { %v4846_v49 = vpop.eup %4845  ;;  %v1752_v29 = vpop.xlane.xlu1 %1751  ;;  %4430 = vmatmul.mubr.msk.bf16.gmra.mxu0 %vm806_vm3, %v1164_v60 }
 0x362   :  { %v4848_v14 = vpop.eup %4847  ;;  %v1845_v37 = vmul.f32 1.442695, %v1783_v56  ;;  %v1784_v62 = vsub.f32 %v6117_v61, %v1752_v29  ;;  %v1139_v15 = vmul.f32 %v4846_v49, %v6205_v57 }
 0x363   :  { %v4850_v19 = vpop.eup %4849  ;;  %v1061_v55 = vpop.xlane.xlu0 %1060  ;;  %v1141_v6 = vmul.f32 %v4848_v14, %v6194_v26 }
 0x364   :  { %4859 = vpow2.f32 %v1845_v37  ;;  %v1847_v10 = vmul.f32 1.442695, %v1784_v62  ;;  %v1140_v50 = vmul.f32 %v4850_v19, %v6210_v16 }
 0x365   :  { %4861 = vrcp.f32 %v1061_v55  ;;  %v1064_v39 = vpop.xlane.xlu1 %1063  ;;  %v1166_v12 = vpack.c.bf16 %v1142_v58, %v1141_v6 }
 0x366   :  { %4863 = vpow2.f32 %v1847_v10  ;;  %v1165_v35 = vpack.c.bf16 %v1140_v50, %v1139_v15 }
 0x367   :  { %4865 = vrcp.f32 %v1064_v39  ;;  %v1067_v36 = vpop.xlane.xlu0 %1066  ;;  %v4852_v61 = vpop.eup %4851 }
 0x368   :  { %4867 = vrcp.f32 %v1067_v36  ;;  %4433 = vmatprep.mubr.msk.bf16.mxu0 %vm806_vm3, %v1165_v35  ;;  %v1146_v41 = vmul.f32 %v4852_v61, %v6219_v45 }
 0x369   :  { %v4854_v34 = vpop.eup %4853  ;;  %v1070_v25 = vpop.xlane.xlu1 %1069  ;;  %4434 = vmatmul.mubr.msk.bf16.gmra.mxu0 %vm806_vm3, %v1166_v12 }
 0x36a   :  { %v4856_v57 = vpop.eup %4855  ;;  %4869 = vrcp.f32 %v1070_v25  ;;  %v1143_v26 = vmul.f32 %v4854_v34, %v6225_v54 }
 0x36b   :  { %v4858_v16 = vpop.eup %4857  ;;  %v1073_v51 = vpop.xlane.xlu0 %1072  ;;  %v1145_v17 = vmul.f32 %v4856_v57, %v7561_v21 }
 0x36c   :  { %4871 = vrcp.f32 %v1073_v51  ;;  %v1144_v3 = vmul.f32 %v4858_v16, %v7560_v33 }
 0x36d   :  { %v1076_v40 = vpop.xlane.xlu1 %1075  ;;  %v1168_v38 = vpack.c.bf16 %v1146_v41, %v1145_v17 }
 0x36e   :  { %4873 = vrcp.f32 %v1076_v40  ;;  %v1167_v9 = vpack.c.bf16 %v1144_v3, %v1143_v26 }
 0x36f   :  { %v1079_v44 = vpop.xlane.xlu0 %1078 }
 0x370   :  { %4875 = vrcp.f32 %v1079_v44  ;;  %4437 = vmatprep.mubr.msk.bf16.mxu0 %vm806_vm3, %v1167_v9 }
 0x371   :  { %v6478_v60 = vpop.eup %4859  ;;  %v1082_v30 = vpop.xlane.xlu1 %1081  ;;  %4438 = vmatmul.mubr.msk.bf16.gmra.mxu0 %vm806_vm3, %v1168_v38 }
 0x372   :  { %v4862_v45 = vpop.eup %4861  ;;  %4877 = vrcp.f32 %v1082_v30  ;;  %v1939_v54 = vsel %vm806_vm3, %v6478_v60, 0.0 }
 0x373   :  { %v6483_v56 = vpop.eup %4863  ;;  %1940 = vadd.xlane.f32.xlu0 %v1939_v54  ;;  %v1085_v49 = vpop.xlane.xlu0 %1084  ;;  %v1147_v19 = vmul.f32 %v4862_v45, %v6241_v18 }
 0x374   :  { %v4866_v29 = vpop.eup %4865  ;;  %4879 = vrcp.f32 %v1085_v49  ;;  %v1942_v14 = vsel %vm806_vm3, %v6483_v56, 0.0 }
 0x375   :  { %v4868_v37 = vpop.eup %4867  ;;  %1943 = vadd.xlane.f32.xlu1 %v1942_v14  ;;  %v1088_v62 = vpop.xlane.xlu1 %1087  ;;  %v1148_v55 = vmul.f32 %v4866_v29, %v6248_v32 }
 0x376   :  { %4881 = vrcp.f32 %v1088_v62  ;;  %v1149_v50 = vmul.f32 %v4868_v37, %v6243_v4 }
 0x377   :  { %v4870_v58 = vpop.eup %4869  ;;  %v1091_v10 = vpop.xlane.xlu0 %1090  ;;  %v1169_v15 = vpack.c.bf16 %v1148_v55, %v1147_v19 }
 0x378   :  { %4883 = vrcp.f32 %v1091_v10  ;;  %v1150_v39 = vmul.f32 %v4870_v58, %v6252_v7 }
 0x379   :  { %v4872_v6 = vpop.eup %4871  ;;  %4441 = vmatprep.mubr.msk.bf16.mxu0 %vm806_vm3, %v1169_v15  ;;  %v1094_v35 = vpop.xlane.xlu1 %1093 }
 0x37a   :  { %4885 = vrcp.f32 %v1094_v35  ;;  %v1170_v36 = vpack.c.bf16 %v1150_v39, %v1149_v50  ;;  %v1151_v18 = vmul.f32 %v4872_v6, %v6261_v11 }
 0x37b   :  { %v4874_v12 = vpop.eup %4873  ;;  %v1851_v61 = vpop.xlane.xlu0 %1850 }
 0x37c   :  { %4887 = vrcp.f32 %v1851_v61  ;;  %4442 = vmatmul.mubr.msk.bf16.gmra.mxu0 %vm806_vm3, %v1170_v36  ;;  %v1152_v32 = vmul.f32 %v4874_v12, %v6268_v22 }
 0x37d   :  { %v4876_v34 = vpop.eup %4875  ;;  %v1854_v25 = vpop.xlane.xlu1 %1853 }
 0x37e   :  { %4889 = vrcp.f32 %v1854_v25  ;;  %v1171_v4 = vpack.c.bf16 %v1152_v32, %v1151_v18  ;;  %v1153_v16 = vmul.f32 %v4876_v34, %v6263_v63 }
 0x37f   :  { %v4878_v7 = vpop.eup %4877  ;;  %v1857_v57 = vpop.xlane.xlu0 %1856 }
 0x380   :  { %4891 = vrcp.f32 %v1857_v57  ;;  %4445 = vmatprep.mubr.msk.bf16.mxu0 %vm806_vm3, %v1171_v4  ;;  %v1154_v51 = vmul.f32 %v4878_v7, %v6272_v48 }
 0x381   :  { %v4880_v41 = vpop.eup %4879  ;;  %v1860_v26 = vpop.xlane.xlu1 %1859 }
 0x382   :  { %4893 = vrcp.f32 %v1860_v26  ;;  %v1172_v33 = vpack.c.bf16 %v1154_v51, %v1153_v16  ;;  %v1155_v22 = vmul.f32 %v4880_v41, %v6281_v1 }
 0x383   :  { %v4882_v11 = vpop.eup %4881  ;;  %v1863_v3 = vpop.xlane.xlu0 %1862 }
 0x384   :  { %4895 = vrcp.f32 %v1863_v3  ;;  %4446 = vmatmul.mubr.msk.bf16.gmra.mxu0 %vm806_vm3, %v1172_v33  ;;  %v1156_v40 = vmul.f32 %v4882_v11, %v6288_v42 }
 0x385   :  { %v4884_v21 = vpop.eup %4883  ;;  %v1866_v17 = vpop.xlane.xlu1 %1865 }
 0x386   :  { %4897 = vrcp.f32 %v1866_v17  ;;  %v1173_v9 = vpack.c.bf16 %v1156_v40, %v1155_v22  ;;  %v1157_v48 = vmul.f32 %v4884_v21, %v6283_v20 }
 0x387   :  { %v4886_v63 = vpop.eup %4885  ;;  %v1869_v44 = vpop.xlane.xlu0 %1868 }
 0x388   :  { %4899 = vrcp.f32 %v1869_v44  ;;  %4449 = vmatprep.mubr.msk.bf16.mxu0 %vm806_vm3, %v1173_v9  ;;  %v1158_v38 = vmul.f32 %v4886_v63, %v6292_v0  ;;  %v7563_v44 = vld [vmem:[#allocation21_spill] sm:$0xff] }
 0x389   :  { %v4888_v30 = vpop.eup %4887  ;;  %v1872_v45 = vpop.xlane.xlu1 %1871 }
 0x38a   :  { %4901 = vrcp.f32 %v1872_v45  ;;  %v1174_v54 = vpack.c.bf16 %v1158_v38, %v1157_v48  ;;  %v1977_v42 = vmul.f32 %v4888_v30, %v6301_v28 }
 0x38b   :  { %v4890_v1 = vpop.eup %4889  ;;  %v1875_v49 = vpop.xlane.xlu0 %1874 }
 0x38c   :  { %4903 = vrcp.f32 %v1875_v49  ;;  %4450 = vmatmul.mubr.msk.bf16.gmra.mxu0 %vm806_vm3, %v1174_v54  ;;  %v1978_v29 = vmul.f32 %v4890_v1, %v6308_v23  ;;  %v7564_v1 = vld [vmem:[#allocation16_spill] sm:$0xff] }
 0x38d   :  { %v4892_v14 = vpop.eup %4891  ;;  %v1878_v37 = vpop.xlane.xlu1 %1877 }
 0x38e   :  { %4905 = vrcp.f32 %v1878_v37  ;;  %v2009_v62 = vpack.c.bf16 %v1978_v29, %v1977_v42  ;;  %v1979_v0 = vmul.f32 %v4892_v14, %v6303_v8 }
 0x38f   :  { %v4894_v20 = vpop.eup %4893  ;;  %v1881_v19 = vpop.xlane.xlu0 %1880 }
 0x390   :  { %v1980_v55 = vmul.f32 %v4894_v20, %v6312_v46  ;;  %4907 = vrcp.f32 %v1881_v19  ;;  %4501 = vmatprep.mubr.msk.bf16.mxu0 %vm806_vm3, %v2009_v62  ;;  %v7565_v20 = vld [vmem:[#allocation15_spill] sm:$0xff] }
 0x391   :  { %v4896_v58 = vpop.eup %4895  ;;  %v1884_v10 = vpop.xlane.xlu1 %1883 }
 0x392   :  { %v2010_v15 = vpack.c.bf16 %v1980_v55, %v1979_v0  ;;  %4909 = vrcp.f32 %v1884_v10  ;;  %v1981_v23 = vmul.f32 %v4896_v58, %v6321_v59  ;;  %v7566_v0 = vld [vmem:[#allocation20_spill] sm:$0xff] }
 0x393   :  { %v4898_v28 = vpop.eup %4897  ;;  %v1887_v50 = vpop.xlane.xlu0 %1886 }
 0x394   :  { %4911 = vrcp.f32 %v1887_v50  ;;  %4502 = vmatmul.mubr.msk.bf16.vlgmr.msra.gmra.mxu0 %vm806_vm3, %v2010_v15  ;;  %v1982_v39 = vmul.f32 %v4898_v28, %v6328_v13  ;;  %v4607_v15 = vld [vmem:[#allocation4 + $0x38] sm:$0xff]  }
 0x395   :  { %v4900_v6 = vpop.eup %4899  ;;  %v1890_v8 = vpop.xlane.xlu1 %1889  ;;  %4533 = vmatprep.subr.bf16.mxu1 %v4607_v15 }
 0x396   :  { %4913 = vrcp.f32 %v1890_v8  ;;  %v2011_v46 = vpack.c.bf16 %v1982_v39, %v1981_v23  ;;  %v1983_v12 = vmul.f32 %v4900_v6, %v6323_v31  ;;  %v7567_v23 = vld [vmem:[#allocation18_spill] sm:$0xff]  ;;  %4534 = vmatpush3.bf16.msra.mxu1 %v4607_v15 }
 0x397   :  { %v4902_v35 = vpop.eup %4901  ;;  %v1893_v36 = vpop.xlane.xlu0 %1892  ;;  %v7568_v6 = vld [vmem:[#allocation22_spill] sm:$0xff] }
 0x398   :  { %4915 = vrcp.f32 %v1893_v36  ;;  %4505 = vmatprep.mubr.msk.bf16.mxu0 %vm806_vm3, %v2011_v46  ;;  %v1984_v61 = vmul.f32 %v4902_v35, %v6332_v5  ;;  %v4608_v36 = vld [vmem:[#allocation4 + $0x30] sm:$0xff]  }
 0x399   :  { %v4904_v18 = vpop.eup %4903  ;;  %v1896_v32 = vpop.xlane.xlu1 %1895  ;;  %4535 = vmatprep.subr.bf16.mxu1 %v4608_v36 }
 0x39a   :  { %4917 = vrcp.f32 %v1896_v32  ;;  %v2012_v34 = vpack.c.bf16 %v1984_v61, %v1983_v12  ;;  %v1985_v13 = vmul.f32 %v4904_v18, %v6341_v47  ;;  %v7569_v18 = vld [vmem:[#allocation24_spill] sm:$0xff]  ;;  %4536 = vmatpush3.bf16.msra.mxu1 %v4608_v36 }
 0x39b   :  { %v4906_v59 = vpop.eup %4905  ;;  %v1899_v25 = vpop.xlane.xlu0 %1898 }
 0x39c   :  { %4919 = vrcp.f32 %v1899_v25  ;;  %4506 = vmatmul.mubr.msk.bf16.gmra.mxu0 %vm806_vm3, %v2012_v34  ;;  %v1986_v4 = vmul.f32 %v4906_v59, %v6348_v2  ;;  %v7570_v34 = vld [vmem:[#allocation29_spill] sm:$0xff] }
 0x39d   :  { %v4908_v7 = vpop.eup %4907  ;;  %v1902_v57 = vpop.xlane.xlu1 %1901 }
 0x39e   :  { %4921 = vrcp.f32 %v1902_v57  ;;  %v2013_v16 = vpack.c.bf16 %v1986_v4, %v1985_v13  ;;  %v1987_v5 = vmul.f32 %v4908_v7, %v6343_v43  ;;  %v4609_v13 = vld [vmem:[#allocation4 + $0x28] sm:$0xff]  }
 0x39f   :  { %v4910_v31 = vpop.eup %4909  ;;  %v1905_v51 = vpop.xlane.xlu0 %1904  ;;  %4537 = vmatprep.subr.bf16.mxu1 %v4609_v13  ;;  %v7571_v57 = vld [vmem:[#allocation30_spill] sm:$0xff] }
 0x3a0   :  { %4923 = vrcp.f32 %v1905_v51  ;;  %4509 = vmatprep.mubr.msk.bf16.mxu0 %vm806_vm3, %v2013_v16  ;;  %v1988_v41 = vmul.f32 %v4910_v31, %v6352_v53  ;;  %v7562_v53 = vld [vmem:[#allocation23_spill] sm:$0xff]  ;;  %v7572_v31 = vld [vmem:[#allocation32_spill] sm:$0xff]  ;;  %4538 = vmatpush3.bf16.msra.mxu1 %v4609_v13 }
 0x3a1   :  { %v4912_v26 = vpop.eup %4911  ;;  %v1908_v33 = vpop.xlane.xlu1 %1907  ;;  %v7579_v13 = vld [vmem:[#allocation11_spill] sm:$0xff] }
 0x3a2   :  { %4925 = vrcp.f32 %v1908_v33  ;;  %v2014_v11 = vpack.c.bf16 %v1988_v41, %v1987_v5  ;;  %v1989_v2 = vmul.f32 %v4912_v26, %v6361_v24  ;;  %v4610_v41 = vld [vmem:[#allocation4 + $0x20] sm:$0xff]  }
 0x3a3   :  { %v4914_v47 = vpop.eup %4913  ;;  %v1911_v3 = vpop.xlane.xlu0 %1910  ;;  %4539 = vmatprep.subr.bf16.mxu1 %v4610_v41 }
 0x3a4   :  { %4927 = vrcp.f32 %v1911_v3  ;;  %4510 = vmatmul.mubr.msk.bf16.gmra.mxu0 %vm806_vm3, %v2014_v11  ;;  %v1990_v22 = vmul.f32 %v4914_v47, %v6368_v27  ;;  %v7573_v11 = vld [vmem:[#allocation31_spill] sm:$0xff]  ;;  %v7574_v3 = vld [vmem:[#allocation33_spill] sm:$0xff]  ;;  %4540 = vmatpush3.bf16.msra.mxu1 %v4610_v41 }
 0x3a5   :  { %v4916_v40 = vpop.eup %4915  ;;  %v1914_v21 = vpop.xlane.xlu1 %1913 }
 0x3a6   :  { %4929 = vrcp.f32 %v1914_v21  ;;  %v2015_v17 = vpack.c.bf16 %v1990_v22, %v1989_v2  ;;  %v1991_v63 = vmul.f32 %v4916_v40, %v7562_v53  ;;  %v4611_v40 = vld [vmem:[#allocation4 + $0x18] sm:$0xff]   ;;  %v7576_v53 = vld [vmem:[#allocation35_spill] sm:$0xff] }
 0x3a7   :  { %v4918_v43 = vpop.eup %4917  ;;  %v1917_v9 = vpop.xlane.xlu0 %1916  ;;  %4541 = vmatprep.subr.bf16.mxu1 %v4611_v40 }
 0x3a8   :  { %4931 = vrcp.f32 %v1917_v9  ;;  %4513 = vmatprep.mubr.msk.bf16.mxu0 %vm806_vm3, %v2015_v17  ;;  %v1992_v48 = vmul.f32 %v4918_v43, %v7563_v44  ;;  %v7575_v43 = vld [vmem:[#allocation34_spill] sm:$0xff]  ;;  %4542 = vmatpush3.bf16.msra.mxu1 %v4611_v40  ;;  %v4612_v44 = vld [vmem:[#allocation4 + $0x10] sm:$0xff]  }
 0x3a9   :  { %v4920_v38 = vpop.eup %4919  ;;  %v1920_v30 = vpop.xlane.xlu1 %1919  ;;  %4543 = vmatprep.subr.bf16.mxu1 %v4612_v44  ;;  %v7581_v40 = vld [vmem:[#allocation14_spill] sm:$0xff] }
 0x3aa   :  { %4933 = vrcp.f32 %v1920_v30  ;;  %v2016_v45 = vpack.c.bf16 %v1992_v48, %v1991_v63  ;;  %v1993_v27 = vmul.f32 %v4920_v38, %v6381_v52  ;;  %v4613_v38 = vld [vmem:[#allocation4 + $0x8] sm:$0xff]   ;;  %v4614_v30 = vld [vmem:[#allocation4] sm:$0xff]  }
 0x3ab   :  { %v4922_v24 = vpop.eup %4921  ;;  %v1923_v54 = vpop.xlane.xlu0 %1922 }
 0x3ac   :  { %4935 = vrcp.f32 %v1923_v54  ;;  %4514 = vmatmul.mubr.msk.bf16.gmra.mxu0 %vm806_vm3, %v2016_v45  ;;  %v1994_v49 = vmul.f32 %v4922_v24, %v7564_v1  ;;  %4544 = vmatpush3.bf16.msra.mxu1 %v4612_v44 }
 0x3ad   :  { %v4924_v42 = vpop.eup %4923  ;;  %v1926_v29 = vpop.xlane.xlu1 %1925  ;;  %4545 = vmatprep.subr.bf16.mxu1 %v4613_v38 }
 0x3ae   :  { %4937 = vrcp.f32 %v1926_v29  ;;  %v2017_v14 = vpack.c.bf16 %v1994_v49, %v1993_v27  ;;  %v1995_v19 = vmul.f32 %v4924_v42, %v7565_v20 }
 0x3af   :  { %v4926_v37 = vpop.eup %4925  ;;  %v1929_v62 = vpop.xlane.xlu0 %1928 }
 0x3b0   :  { %4939 = vrcp.f32 %v1929_v62  ;;  %4517 = vmatprep.mubr.msk.bf16.mxu0 %vm806_vm3, %v2017_v14  ;;  %v1996_v55 = vmul.f32 %v4926_v37, %v7566_v0  ;;  %4546 = vmatpush3.bf16.msra.mxu1 %v4613_v38  ;;  %v7577_v14 = vmov 0  }
 0x3b1   :  { %v4928_v58 = vpop.eup %4927  ;;  %v1932_v10 = vpop.xlane.xlu1 %1931  ;;  %4547 = vmatprep.subr.bf16.mxu1 %v4614_v30 }
 0x3b2   :  { %4941 = vrcp.f32 %v1932_v10  ;;  %v2018_v52 = vpack.c.bf16 %v1996_v55, %v1995_v19  ;;  %v1997_v39 = vmul.f32 %v4928_v58, %v7567_v23 }
 0x3b3   :  { %v4930_v28 = vpop.eup %4929  ;;  %v1935_v50 = vpop.xlane.xlu0 %1934 }
 0x3b4   :  { %4943 = vrcp.f32 %v1935_v50  ;;  %4518 = vmatmul.mubr.msk.bf16.gmra.mxu0 %vm806_vm3, %v2018_v52  ;;  %v1998_v8 = vmul.f32 %v4930_v28, %v7568_v6  ;;  %4548 = vmatpush3.bf16.msra.mxu1 %v4614_v30 }
 0x3b5   :  { %v4932_v46 = vpop.eup %4931  ;;  %v1938_v35 = vpop.xlane.xlu1 %1937 }
 0x3b6   :  { %4945 = vrcp.f32 %v1938_v35  ;;  %v2019_v12 = vpack.c.bf16 %v1998_v8, %v1997_v39  ;;  %v1999_v32 = vmul.f32 %v4932_v46, %v7569_v18  ;;  %v7578_v18 = vld [vmem:[#allocation12_spill] sm:$0xff] }
 0x3b7   :  { %v4934_v61 = vpop.eup %4933 }
 0x3b8   :  { %4521 = vmatprep.mubr.msk.bf16.mxu0 %vm806_vm3, %v2019_v12  ;;  %v2000_v59 = vmul.f32 %v4934_v61, %v7570_v34 }
 0x3b9   :  { %v4936_v25 = vpop.eup %4935 }
 0x3ba   :  { %v2020_v4 = vpack.c.bf16 %v2000_v59, %v1999_v32  ;;  %v2001_v16 = vmul.f32 %v4936_v25, %v7571_v57  ;;  %v7580_v57 = vld [vmem:[#allocation13_spill] sm:$0xff] }
 0x3bb   :  { %v4938_v7 = vpop.eup %4937 }
 0x3bc   :  { %4522 = vmatmul.mubr.msk.bf16.gmra.mxu0 %vm806_vm3, %v2020_v4  ;;  %v2002_v51 = vmul.f32 %v4938_v7, %v7572_v31 }
 0x3bd   :  { %v4940_v5 = vpop.eup %4939 }
 0x3be   :  { %v2021_v26 = vpack.c.bf16 %v2002_v51, %v2001_v16  ;;  %v2003_v47 = vmul.f32 %v4940_v5, %v7573_v11 }
 0x3bf   :  { %v4942_v33 = vpop.eup %4941 }
 0x3c0   :  { %4525 = vmatprep.mubr.msk.bf16.mxu0 %vm806_vm3, %v2021_v26  ;;  %v2004_v2 = vmul.f32 %v4942_v33, %v7574_v3 }
 0x3c1   :  { %v4944_v22 = vpop.eup %4943 }
 0x3c2   :  { %v2022_v21 = vpack.c.bf16 %v2004_v2, %v2003_v47  ;;  %v2005_v9 = vmul.f32 %v4944_v22, %v7575_v43 }
 0x3c3   :  { %v4946_v17 = vpop.eup %4945 }
 0x3c4   :  { %4526 = vmatmul.mubr.msk.bf16.gmra.mxu0 %vm806_vm3, %v2022_v21  ;;  %v2006_v63 = vmul.f32 %v4946_v17, %v7576_v53 }
 0x3c6   :  { %v2023_v48 = vpack.c.bf16 %v2006_v63, %v2005_v9 }
 0x3c8   :  { %4529 = vmatprep.mubr.msk.bf16.mxu0 %vm806_vm3, %v2023_v48 }
 0x3fc   :  { %v1941_v45 = vpop.xlane.xlu0 %1940 }
 0x3fd   :  { %4947 = vrcp.f32 %v1941_v45 }
 0x3fe   :  { %v1944_v24 = vpop.xlane.xlu1 %1943 }
 0x3ff   :  { %4949 = vrcp.f32 %v1944_v24 }
 0x40a   :  { %v4948_v54 = vpop.eup %4947 }
 0x40b   :  { %v2007_v1 = vmul.f32 %v4948_v54, %v6478_v60 }
 0x40c   :  { %v4950_v27 = vpop.eup %4949 }
 0x40d   :  { %v2008_v49 = vmul.f32 %v4950_v27, %v6483_v56 }
 0x40f   :  { %v2024_v42 = vpack.c.bf16 %v2008_v49, %v2007_v1 }
 0x411   :  { %v4423_v29 = vpop.f32.mrf.mxu0  ;;  %4530 = vmatmul.mubr.msk.bf16.gmra.mxu0 %vm806_vm3, %v2024_v42 }
 0x412   :  { %2959 = vmatprep.mubr.bf16.mxu0 %v7577_v14  ;;  %v1386_v33 = vmul.f32 %v4423_v29, %v7579_v13 }
 0x413   :  { %v1257_v37 = vpop.f32.mrf.mxu0 }
 0x414   :  { %v1384_v51 = vmul.f32 %v1257_v37, %v7579_v13 }
 0x415   :  { %v4424_v62 = vpop.f32.mrf.mxu0 }
 0x416   :  { %v1387_v4 = vmul.f32 %v4424_v62, %v7579_v13 }
 0x417   :  { %v1260_v20 = vpop.f32.mrf.mxu0 }
 0x418   :  { %v1385_v5 = vmul.f32 %v1260_v20, %v7579_v13 }
 0x419   :  { %v6554_v19 = vpop.f32.mrf.mxu0 }
 0x41b   :  { %v1273_v0 = vpop.f32.mrf.mxu0 }
 0x41c   :  { %v1388_v30 = vmul.f32 %v1273_v0, %v7579_v13 }
 0x41d   :  { %v4428_v55 = vpop.f32.mrf.mxu0 }
 0x41e   :  { %v1391_v37 = vmul.f32 %v4428_v55, %v7579_v13 }
 0x41f   :  { %v1276_v58 = vpop.f32.mrf.mxu0 }
 0x420   :  { %v1389_v0 = vmul.f32 %v1276_v58, %v7579_v13 }
 0x421   :  { %v4431_v10 = vpop.f32.mrf.mxu0 }
 0x422   :  { %v1394_v7 = vmul.f32 %v4431_v10, %v7578_v18 }
 0x423   :  { %v1289_v15 = vpop.f32.mrf.mxu0 }
 0x424   :  { %v1392_v59 = vmul.f32 %v1289_v15, %v7578_v18  ;;  %v1422_v43 = vadd.f32 %v1394_v7, %v1386_v33 }
 0x425   :  { %v4432_v52 = vpop.f32.mrf.mxu0 }
 0x426   :  { %v1395_v32 = vmul.f32 %v4432_v52, %v7578_v18  ;;  %v1416_v2 = vadd.f32 %v1392_v59, %v1384_v51 }
 0x427   :  { %v1292_v60 = vpop.f32.mrf.mxu0 }
 0x428   :  { %v1393_v25 = vmul.f32 %v1292_v60, %v7578_v18  ;;  %v1425_v11 = vadd.f32 %v1395_v32, %v1387_v4 }
 0x429   :  { %v4435_v28 = vpop.f32.mrf.mxu0 }
 0x42a   :  { %v1419_v22 = vadd.f32 %v1393_v25, %v1385_v5  ;;  %v1398_v62 = vmul.f32 %v4435_v28, %v7578_v18 }
 0x42b   :  { %v1305_v56 = vpop.f32.mrf.mxu0 }
 0x42c   :  { %v1396_v1 = vmul.f32 %v1305_v56, %v7578_v18  ;;  %v1390_v56 = vmul.f32 %v6554_v19, %v7579_v13 }
 0x42d   :  { %v4436_v50 = vpop.f32.mrf.mxu0 }
 0x42e   :  { %v1399_v45 = vmul.f32 %v4436_v50, %v7578_v18  ;;  %v1428_v28 = vadd.f32 %v1396_v1, %v1388_v30  ;;  %v1434_v58 = vadd.f32 %v1398_v62, %v1390_v56 }
 0x42f   :  { %v1308_v23 = vpop.f32.mrf.mxu0 }
 0x430   :  { %v1397_v49 = vmul.f32 %v1308_v23, %v7578_v18  ;;  %v1437_v23 = vadd.f32 %v1399_v45, %v1391_v37 }
 0x431   :  { %v4439_v39 = vpop.f32.mrf.mxu0 }
 0x432   :  { %v1402_v47 = vmul.f32 %v4439_v39, %v7580_v57 }
 0x433   :  { %v1321_v6 = vpop.f32.mrf.mxu0 }
 0x434   :  { %v1400_v41 = vmul.f32 %v1321_v6, %v7580_v57  ;;  %v1423_v24 = vadd.f32 %v1422_v43, %v1402_v47 }
 0x435   :  { %v4440_v8 = vpop.f32.mrf.mxu0 }
 0x436   :  { %v1403_v16 = vmul.f32 %v4440_v8, %v7580_v57  ;;  %v1417_v44 = vadd.f32 %v1416_v2, %v1400_v41  ;;  %v1431_v8 = vadd.f32 %v1397_v49, %v1389_v0 }
 0x437   :  { %v1324_v46 = vpop.f32.mrf.mxu0 }
 0x438   :  { %v1401_v26 = vmul.f32 %v1324_v46, %v7580_v57  ;;  %v1426_v9 = vadd.f32 %v1425_v11, %v1403_v16 }
 0x43a   :  { %v1420_v48 = vadd.f32 %v1419_v22, %v1401_v26 }
 0x43c   :  { %v4443_v35 = vpop.f32.mrf.mxu0 }
 0x43d   :  { %v1406_v39 = vmul.f32 %v4443_v35, %v7580_v57 }
 0x43e   :  { %v1337_v36 = vpop.f32.mrf.mxu0 }
 0x43f   :  { %v1404_v52 = vmul.f32 %v1337_v36, %v7580_v57  ;;  %v1435_v35 = vadd.f32 %v1434_v58, %v1406_v39 }
 0x440   :  { %v4444_v12 = vpop.f32.mrf.mxu0 }
 0x441   :  { %v1407_v20 = vmul.f32 %v4444_v12, %v7580_v57 }
 0x442   :  { %v1340_v61 = vpop.f32.mrf.mxu0 }
 0x443   :  { %v1405_v60 = vmul.f32 %v1340_v61, %v7580_v57  ;;  %v1438_v36 = vadd.f32 %v1437_v23, %v1407_v20 }
 0x444   :  { %v4447_v34 = vpop.f32.mrf.mxu0 }
 0x445   :  { %v1410_v53 = vmul.f32 %v4447_v34, %v7581_v40  ;;  %v1429_v34 = vadd.f32 %v1428_v28, %v1404_v52  ;;  %v1432_v19 = vadd.f32 %v1431_v8, %v1405_v60 }
 0x446   :  { %v1353_v31 = vpop.f32.mrf.mxu0 }
 0x447   :  { %v1408_v21 = vmul.f32 %v1353_v31, %v7581_v40  ;;  %v1424_v10 = vadd.f32 %v1423_v24, %v1410_v53 }
 0x448   :  { %v4448_v3 = vpop.f32.mrf.mxu0 }
 0x449   :  { %v1411_v17 = vmul.f32 %v4448_v3, %v7581_v40  ;;  %v1418_v42 = vadd.f32 %v1417_v44, %v1408_v21 }
 0x44a   :  { %v1356_v63 = vpop.f32.mrf.mxu0 }
 0x44b   :  { %v1409_v38 = vmul.f32 %v1356_v63, %v7581_v40  ;;  %v1427_v54 = vadd.f32 %v1426_v9, %v1411_v17 }
 0x44c   :  { %v4451_v27 = vpop.f32.mrf.mxu0 }
 0x44d   :  { %v1421_v29 = vadd.f32 %v1420_v48, %v1409_v38  ;;  %v2291_v55 = vpack.c.bf16 %v1427_v54, %v1424_v10  ;;  %v1414_v61 = vmul.f32 %v4451_v27, %v7581_v40 }
 0x44e   :  { %v1369_v15 = vpop.f32.mrf.mxu0 }
 0x44f   :  { %v2290_v50 = vpack.c.bf16 %v1421_v29, %v1418_v42  ;;  %v1412_v46 = vmul.f32 %v1369_v15, %v7581_v40  ;;  %v1436_v31 = vadd.f32 %v1435_v35, %v1414_v61 }
 0x450   :  { %v4452_v6 = vpop.f32.mrf.mxu0 }
 0x451   :  { %v1415_v12 = vmul.f32 %v4452_v6, %v7581_v40  ;;  %4549 = vmatprep.mubr.bf16.mxu1 %v2290_v50  ;;  %v1430_v7 = vadd.f32 %v1429_v34, %v1412_v46 }
 0x452   :  { %v1372_v32 = vpop.f32.mrf.mxu0  ;;  %4550 = vmatmul.mubr.bf16.vlgmr.msra.gmra.mxu1 %v2291_v55 }
 0x453   :  { %v1413_v59 = vmul.f32 %v1372_v32, %v7581_v40  ;;  %v1439_v25 = vadd.f32 %v1438_v36, %v1415_v12 }
 0x454   :  { %v6589_v4 = vpop.f32.mrf.mxu0 }
 0x455   :  { %v1433_v16 = vadd.f32 %v1432_v19, %v1413_v59  ;;  %v2293_v26 = vpack.c.bf16 %v1439_v25, %v1436_v31  ;;  %v2236_v31 = vmul.f32 %v6589_v4, %v7579_v13 }
 0x456   :  { %v2107_v51 = vpop.f32.mrf.mxu0 }
 0x457   :  { %v2292_v5 = vpack.c.bf16 %v1433_v16, %v1430_v7  ;;  %v2234_v35 = vmul.f32 %v2107_v51, %v7579_v13 }
 0x458   :  { %v4504_v41 = vpop.f32.mrf.mxu0 }
 0x459   :  { %4553 = vmatprep.mubr.bf16.mxu1 %v2292_v5  ;;  %v2237_v32 = vmul.f32 %v4504_v41, %v7579_v13 }
 0x45a   :  { %v2110_v33 = vpop.f32.mrf.mxu0  ;;  %4554 = vmatmul.mubr.bf16.gmra.mxu1 %v2293_v26 }
 0x45b   :  { %v2235_v25 = vmul.f32 %v2110_v33, %v7579_v13 }
 0x45c   :  { %v4507_v11 = vpop.f32.mrf.mxu0 }
 0x45d   :  { %v2240_v53 = vmul.f32 %v4507_v11, %v7579_v13 }
 0x45e   :  { %v2123_v47 = vpop.f32.mrf.mxu0 }
 0x45f   :  { %v2238_v48 = vmul.f32 %v2123_v47, %v7579_v13 }
 0x460   :  { %v4508_v3 = vpop.f32.mrf.mxu0 }
 0x461   :  { %v2241_v24 = vmul.f32 %v4508_v3, %v7579_v13 }
 0x462   :  { %v2126_v2 = vpop.f32.mrf.mxu0 }
 0x463   :  { %v2239_v49 = vmul.f32 %v2126_v2, %v7579_v13 }
 0x464   :  { %v4511_v22 = vpop.f32.mrf.mxu0 }
 0x465   :  { %v2244_v34 = vmul.f32 %v4511_v22, %v7578_v18 }
 0x466   :  { %v2139_v21 = vpop.f32.mrf.mxu0 }
 0x467   :  { %v2242_v58 = vmul.f32 %v2139_v21, %v7578_v18  ;;  %v2272_v51 = vadd.f32 %v2244_v34, %v2236_v31 }
 0x468   :  { %v4512_v17 = vpop.f32.mrf.mxu0 }
 0x469   :  { %v2245_v46 = vmul.f32 %v4512_v17, %v7578_v18  ;;  %v2266_v11 = vadd.f32 %v2242_v58, %v2234_v35 }
 0x46a   :  { %v2142_v43 = vpop.f32.mrf.mxu0 }
 0x46b   :  { %v2243_v36 = vmul.f32 %v2142_v43, %v7578_v18  ;;  %v2275_v5 = vadd.f32 %v2245_v46, %v2237_v32  ;;  %v5017_v46 = vld [vmem:[%s7390_s0 + $0x8] sm:$0xff]  ;;  %v5018_v32 = vld [vmem:[%s7390_s0 + $0x18] sm:$0xff] }
 0x46c   :  { %v4515_v9 = vpop.f32.mrf.mxu0 }
 0x46d   :  { %v2248_v63 = vmul.f32 %v4515_v9, %v7578_v18 }
 0x46e   :  { %v2155_v44 = vpop.f32.mrf.mxu0 }
 0x46f   :  { %v2284_v38 = vadd.f32 %v2248_v63, %v2240_v53  ;;  %v2246_v30 = vmul.f32 %v2155_v44, %v7578_v18 }
 0x470   :  { %v4516_v45 = vpop.f32.mrf.mxu0 }
 0x471   :  { %v2278_v54 = vadd.f32 %v2246_v30, %v2238_v48  ;;  %v2249_v27 = vmul.f32 %v4516_v45, %v7578_v18 }
 0x472   :  { %v2158_v1 = vpop.f32.mrf.mxu0 }
 0x473   :  { %v2287_v42 = vadd.f32 %v2249_v27, %v2241_v24  ;;  %v2247_v29 = vmul.f32 %v2158_v1, %v7578_v18  ;;  %v2269_v18 = vadd.f32 %v2243_v36, %v2235_v25 }
 0x474   :  { %v4519_v37 = vpop.f32.mrf.mxu0 }
 0x475   :  { %v2281_v62 = vadd.f32 %v2247_v29, %v2239_v49  ;;  %v2252_v26 = vmul.f32 %v4519_v37, %v7580_v57 }
 0x476   :  { %v2171_v20 = vpop.f32.mrf.mxu0 }
 0x477   :  { %v2250_v7 = vmul.f32 %v2171_v20, %v7580_v57  ;;  %v2273_v13 = vadd.f32 %v2272_v51, %v2252_v26  ;;  %v5021_v26 = vld [vmem:[%s7390_s0 + $0x28] sm:$0xff] }
 0x478   :  { %v4520_v10 = vpop.f32.mrf.mxu0 }
 0x479   :  { %v2253_v19 = vmul.f32 %v4520_v10, %v7580_v57  ;;  %v2267_v21 = vadd.f32 %v2266_v11, %v2250_v7  ;;  %v5022_v11 = vld [vmem:[%s7390_s0 + $0x38] sm:$0xff] }
 0x47a   :  { %v2174_v15 = vpop.f32.mrf.mxu0 }
 0x47b   :  { %v2251_v16 = vmul.f32 %v2174_v15, %v7580_v57  ;;  %v2276_v2 = vadd.f32 %v2275_v5, %v2253_v19  ;;  %v6628_v15 = vld [vmem:[%s7394_s4] ss:$0 sm:$0xff] }
 0x47c   :  { %v4523_v0 = vpop.f32.mrf.mxu0 }
 0x47d   :  { %v2256_v52 = vmul.f32 %v4523_v0, %v7580_v57  ;;  %v2270_v17 = vadd.f32 %v2269_v18, %v2251_v16  ;;  %v5020_v16 = vld [vmem:[%s7390_s0 + $0x30] sm:$0xff] }
 0x47e   :  { %v2187_v60 = vpop.f32.mrf.mxu0 }
 0x47f   :  { %v2285_v50 = vadd.f32 %v2284_v38, %v2256_v52  ;;  %v2254_v56 = vmul.f32 %v2187_v60, %v7580_v57 }
 0x480   :  { %v4524_v23 = vpop.f32.mrf.mxu0 }
 0x481   :  { %v2279_v39 = vadd.f32 %v2278_v54, %v2254_v56  ;;  %v2257_v55 = vmul.f32 %v4524_v23, %v7580_v57 }
 0x482   :  { %v2190_v6 = vpop.f32.mrf.mxu0 }
 0x483   :  { %v2288_v28 = vadd.f32 %v2287_v42, %v2257_v55  ;;  %v2255_v8 = vmul.f32 %v2190_v6, %v7580_v57  ;;  %v5016_v6 = vld [vmem:[%s7390_s0 + $0x10] sm:$0xff] }
 0x484   :  { %v4527_v12 = vpop.f32.mrf.mxu0 }
 0x485   :  { %v2282_v61 = vadd.f32 %v2281_v62, %v2255_v8  ;;  %v2260_v33 = vmul.f32 %v4527_v12, %v7581_v40 }
 0x486   :  { %v2203_v59 = vpop.f32.mrf.mxu0 }
 0x487   :  { %v2258_v47 = vmul.f32 %v2203_v59, %v7581_v40  ;;  %v2274_v53 = vadd.f32 %v2273_v13, %v2260_v33  ;;  %v5019_v59 = vld [vmem:[%s7390_s0 + $0x20] sm:$0xff]  ;;  %v5024_v13 = vld [vmem:[%s7390_s0 + $0x50] sm:$0xff] }
 0x488   :  { %v4528_v41 = vpop.f32.mrf.mxu0 }
 0x489   :  { %v2261_v3 = vmul.f32 %v4528_v41, %v7581_v40  ;;  %v2268_v9 = vadd.f32 %v2267_v21, %v2258_v47 }
 0x48a   :  { %v2206_v22 = vpop.f32.mrf.mxu0 }
 0x48b   :  { %v2259_v43 = vmul.f32 %v2206_v22, %v7581_v40  ;;  %v2277_v4 = vadd.f32 %v2276_v2, %v2261_v3  ;;  %v5023_v22 = vld [vmem:[%s7390_s0 + $0x40] sm:$0xff] }
 0x48d   :  { %v2271_v57 = vadd.f32 %v2270_v17, %v2259_v43  ;;  %v2295_v44 = vpack.c.bf16 %v2277_v4, %v2274_v53 }
 0x48f   :  { %v2294_v63 = vpack.c.bf16 %v2271_v57, %v2268_v9  ;;  %v5025_v57 = vld [vmem:[%s7390_s0 + $0x48] sm:$0xff] }
 0x491   :  { %4557 = vmatprep.mubr.bf16.mxu1 %v2294_v63  ;;  %v5026_v63 = vld [vmem:[%s7390_s0 + $0x58] sm:$0xff] }
 0x492   :  { %4558 = vmatmul.mubr.bf16.gmra.mxu1 %v2295_v44 }
 0x4d1   :  { %v4531_v48 = vpop.f32.mrf.mxu0 }
 0x4d2   :  { %v2264_v30 = vmul.f32 %v4531_v48, %v7581_v40 }
 0x4d3   :  { %v2219_v38 = vpop.f32.mrf.mxu0 }
 0x4d4   :  { %v2262_v24 = vmul.f32 %v2219_v38, %v7581_v40  ;;  %v2286_v1 = vadd.f32 %v2285_v50, %v2264_v30  ;;  %v5015_v50 = vld [vmem:[%s7390_s0] sm:$0xff] }
 0x4d5   :  { %v4532_v45 = vpop.f32.mrf.mxu0 }
 0x4d6   :  { %v2265_v54 = vmul.f32 %v4532_v45, %v7581_v40  ;;  %v2280_v29 = vadd.f32 %v2279_v39, %v2262_v24 }
 0x4d7   :  { %v2222_v27 = vpop.f32.mrf.mxu0 }
 0x4d8   :  { %v2289_v49 = vadd.f32 %v2288_v28, %v2265_v54  ;;  %v2263_v42 = vmul.f32 %v2222_v27, %v7581_v40  ;;  %v5027_v27 = vld [vmem:[%s7390_s0 + $0x60] sm:$0xff] }
 0x4da   :  { %v2283_v37 = vadd.f32 %v2282_v61, %v2263_v42  ;;  %v2297_v62 = vpack.c.bf16 %v2289_v49, %v2286_v1 }
 0x4dc   :  { %v2296_v20 = vpack.c.bf16 %v2283_v37, %v2280_v29 }
 0x4de   :  { %4561 = vmatprep.mubr.bf16.mxu1 %v2296_v20  ;;  %v5028_v20 = vld [vmem:[%s7390_s0 + $0x70] sm:$0xff] }
 0x4df   :  { %4562 = vmatmul.mubr.bf16.gmra.mxu1 %v2297_v62 }
 0x4e0   :  { %3072 = vmatprep.mubr.bf16.mxu1 %v7577_v14 }
 0x512   :  { %v4551_v10 = vpop.f32.mrf.mxu1 }
 0x513   :  { %v2412_v40 = vadd.f32 %v4551_v10, %v6628_v15 }
 0x514   :  { %v2403_v0 = vpop.f32.mrf.mxu1 }
 0x515   :  { %v2404_v52 = vadd.f32 %v6628_v15, %v2403_v0  ;;  %v6642_v28 = vadd.f32 %v5016_v6, %v2412_v40  ;;  %v5029_v40 = vld [vmem:[%s7390_s0 + $0x68] sm:$0xff] }
 0x516   :  { %v4552_v60 = vpop.f32.mrf.mxu1 }
 0x517   :  { %v6635_v56 = vadd.f32 %v5015_v50, %v2404_v52  ;;  %v2415_v8 = vadd.f32 %v4552_v60, %v6628_v15 }
 0x518   :  { %v2406_v23 = vpop.f32.mrf.mxu1 }
 0x519   :  { %v2407_v39 = vadd.f32 %v6628_v15, %v2406_v23  ;;  %2482 = vadd.xlane.f32.xlu0 %v6635_v56  ;;  %v6656_v34 = vadd.f32 %v5018_v32, %v2415_v8 }
 0x51a   :  { %v4555_v55 = vpop.f32.mrf.mxu1 }
 0x51b   :  { %v6648_v12 = vadd.f32 %v5017_v46, %v2407_v39  ;;  %v2428_v19 = vadd.f32 %v4555_v55, %v6628_v15 }
 0x51c   :  { %v2419_v58 = vpop.f32.mrf.mxu1 }
 0x51d   :  { %v2420_v36 = vadd.f32 %v6628_v15, %v2419_v58  ;;  %2484 = vadd.xlane.f32.xlu1 %v6648_v12  ;;  %2486 = vadd.xlane.f32.xlu0 %v6642_v28  ;;  %v6670_v31 = vadd.f32 %v5020_v16, %v2428_v19 }
 0x51e   :  { %v4556_v61 = vpop.f32.mrf.mxu1 }
 0x51f   :  { %v6662_v35 = vadd.f32 %v5019_v59, %v2420_v36  ;;  %v2431_v5 = vadd.f32 %v4556_v61, %v6628_v15 }
 0x520   :  { %v2422_v25 = vpop.f32.mrf.mxu1 }
 0x521   :  { %v2423_v7 = vadd.f32 %v6628_v15, %v2422_v25  ;;  %2488 = vadd.xlane.f32.xlu1 %v6656_v34  ;;  %2490 = vadd.xlane.f32.xlu0 %v6662_v35  ;;  %v6683_v18 = vadd.f32 %v5022_v11, %v2431_v5 }
 0x523   :  { %v6676_v41 = vadd.f32 %v5021_v26, %v2423_v7 }
 0x525   :  { %2492 = vadd.xlane.f32.xlu1 %v6676_v41  ;;  %2494 = vadd.xlane.f32.xlu0 %v6670_v31 }
 0x529   :  { %2496 = vadd.xlane.f32.xlu1 %v6683_v18 }
 0x552   :  { %v4559_v47 = vpop.f32.mrf.mxu1 }
 0x553   :  { %v2444_v33 = vadd.f32 %v4559_v47, %v6628_v15  ;;  %v4617_v47 = vld [vmem:[%s7398_s8 + $0xe4] ss:$16 sps:$4 sm:$0xff]  }
 0x554   :  { %v2435_v3 = vpop.f32.mrf.mxu1  ;;  %2927 = vmatprep.subr.bf16.mxu0 %v4617_v47 }
 0x555   :  { %v2436_v51 = vadd.f32 %v6628_v15, %v2435_v3  ;;  %v6698_v4 = vadd.f32 %v5024_v13, %v2444_v33  ;;  %v4620_v3 = vld [vmem:[%s7398_s8 + $0xec] ss:$16 sps:$4 sm:$0xff]  }
 0x556   :  { %v4560_v2 = vpop.f32.mrf.mxu1  ;;  %3040 = vmatprep.subr.bf16.mxu1 %v4620_v3 }
 0x557   :  { %v6691_v21 = vadd.f32 %v5023_v22, %v2436_v51  ;;  %v2447_v9 = vadd.f32 %v4560_v2, %v6628_v15  ;;  %v4623_v22 = vld [vmem:[%s7398_s8 + $0xc4] ss:$16 sps:$4 sm:$0xff]  }
 0x558   :  { %v2438_v17 = vpop.f32.mrf.mxu1 }
 0x559   :  { %v2439_v43 = vadd.f32 %v6628_v15, %v2438_v17  ;;  %2498 = vadd.xlane.f32.xlu0 %v6691_v21  ;;  %v6711_v44 = vadd.f32 %v5026_v63, %v2447_v9  ;;  %v4626_v17 = vld [vmem:[%s7398_s8 + $0xcc] ss:$16 sps:$4 sm:$0xff]   ;;  %v4629_v9 = vld [vmem:[%s7398_s8 + $0xa4] ss:$16 sps:$4 sm:$0xff]   ;;  %v4627_v63 = vld [vmem:[%s7398_s8 + $0xa0] ss:$16 sps:$4 sm:$0xff]  }
 0x55b   :  { %v6704_v53 = vadd.f32 %v5025_v57, %v2439_v43  ;;  %v4624_v43 = vld [vmem:[%s7398_s8 + $0xc8] ss:$16 sps:$4 sm:$0xff]   ;;  %v4632_v57 = vld [vmem:[%s7398_s8 + $0xac] ss:$16 sps:$4 sm:$0xff]  }
 0x55d   :  { %2500 = vadd.xlane.f32.xlu1 %v6704_v53  ;;  %2502 = vadd.xlane.f32.xlu0 %v6698_v4 }
 0x561   :  { %2504 = vadd.xlane.f32.xlu1 %v6711_v44 }
 0x59f   :  { %v4563_v48 = vpop.f32.mrf.mxu1 }
 0x5a0   :  { %v2460_v24 = vadd.f32 %v4563_v48, %v6628_v15  ;;  %v4630_v48 = vld [vmem:[%s7398_s8 + $0xa8] ss:$16 sps:$4 sm:$0xff]  }
 0x5a1   :  { %v2451_v38 = vpop.f32.mrf.mxu1 }
 0x5a2   :  { %v2452_v30 = vadd.f32 %v6628_v15, %v2451_v38  ;;  %v2483_v45 = vpop.xlane.xlu0 %2482  ;;  %v6726_v10 = vadd.f32 %v5028_v20, %v2460_v24  ;;  %v4635_v38 = vld [vmem:[%s7398_s8 + $0x84] ss:$16 sps:$4 sm:$0xff]   ;;  %v4636_v24 = vld [vmem:[%s7398_s8 + $0x88] ss:$16 sps:$4 sm:$0xff]  }
 0x5a3   :  { %v4564_v54 = vpop.f32.mrf.mxu1  ;;  %v2515_v49 = vmul.f32 0.0078125, %v2483_v45  ;;  %v4633_v45 = vld [vmem:[%s7398_s8 + $0x80] ss:$16 sps:$4 sm:$0xff]   ;;  %v4648_v20 = vld [vmem:[%s7398_s8 + $0x48] ss:$16 sps:$4 sm:$0xff]  }
 0x5a4   :  { %v6719_v1 = vadd.f32 %v5027_v27, %v2452_v30  ;;  %v2463_v60 = vadd.f32 %v4564_v54, %v6628_v15  ;;  %v4638_v30 = vld [vmem:[%s7398_s8 + $0x8c] ss:$16 sps:$4 sm:$0xff]   ;;  %v4641_v54 = vld [vmem:[%s7398_s8 + $0x64] ss:$16 sps:$4 sm:$0xff]  }
 0x5a5   :  { %v2454_v42 = vpop.f32.mrf.mxu1  ;;  %v6729_v52 = vsub.f32 %v6635_v56, %v2515_v49  ;;  %v4644_v27 = vld [vmem:[%s7398_s8 + $0x6c] ss:$16 sps:$4 sm:$0xff]   ;;  %v4639_v49 = vld [vmem:[%s7398_s8 + $0x60] ss:$16 sps:$4 sm:$0xff]  }
 0x5a6   :  { %v2455_v29 = vadd.f32 %v6628_v15, %v2454_v42  ;;  %v2485_v37 = vpop.xlane.xlu1 %2484  ;;  %2506 = vadd.xlane.f32.xlu0 %v6719_v1  ;;  %v2487_v62 = vpop.xlane.xlu0 %2486  ;;  %v5030_v15 = vld [vmem:[%s7390_s0 + $0x78] sm:$0xff] }
 0x5a7   :  { %v2516_v0 = vmul.f32 0.0078125, %v2485_v37  ;;  %v2517_v23 = vmul.f32 0.0078125, %v2487_v62  ;;  %v6745_v8 = vadd.f32 %v5030_v15, %v2463_v60  ;;  %v2547_v36 = vmul.f32 %v6729_v52, %v6729_v52  ;;  %v4642_v42 = vld [vmem:[%s7398_s8 + $0x68] ss:$16 sps:$4 sm:$0xff]   ;;  %v4650_v37 = vld [vmem:[%s7398_s8 + $0x4c] ss:$16 sps:$4 sm:$0xff]  }
 0x5a8   :  { %v6735_v50 = vadd.f32 %v5029_v40, %v2455_v29  ;;  %v4647_v29 = vld [vmem:[%s7398_s8 + $0x44] ss:$16 sps:$4 sm:$0xff]   ;;  %v4645_v62 = vld [vmem:[%s7398_s8 + $0x40] ss:$16 sps:$4 sm:$0xff]   ;;  %v4656_v60 = vld [vmem:[%s7398_s8 + $0x2c] ss:$16 sps:$4 sm:$0xff]  }
 0x5a9   :  { %v6740_v6 = vsub.f32 %v6648_v12, %v2516_v0  ;;  %v6748_v46 = vsub.f32 %v6642_v28, %v2517_v23  ;;  %v4653_v0 = vld [vmem:[%s7398_s8 + $0x24] ss:$16 sps:$4 sm:$0xff]   ;;  %v4651_v40 = vld [vmem:[%s7398_s8 + $0x20] ss:$16 sps:$4 sm:$0xff]   ;;  %v4654_v23 = vld [vmem:[%s7398_s8 + $0x28] ss:$16 sps:$4 sm:$0xff]  }
 0x5aa   :  { %v2489_v39 = vpop.xlane.xlu1 %2488  ;;  %2508 = vadd.xlane.f32.xlu1 %v6735_v50  ;;  %2510 = vadd.xlane.f32.xlu0 %v6726_v10  ;;  %v2491_v55 = vpop.xlane.xlu0 %2490  ;;  %v4660_v15 = vld [vmem:[%s7398_s8 + $0x8] ss:$16 sps:$4 sm:$0xff]  }
 0x5ab   :  { %v2518_v56 = vmul.f32 0.0078125, %v2489_v39  ;;  %v2519_v58 = vmul.f32 0.0078125, %v2491_v55  ;;  %v2548_v19 = vmul.f32 %v6740_v6, %v6740_v6  ;;  %v2549_v7 = vmul.f32 %v6748_v46, %v6748_v46  ;;  %v4659_v39 = vld [vmem:[%s7398_s8 + $0x4] ss:$16 sps:$4 sm:$0xff]   ;;  %v4662_v55 = vld [vmem:[%s7398_s8 + $0xc] ss:$16 sps:$4 sm:$0xff]  }
 0x5ad   :  { %v6754_v32 = vsub.f32 %v6656_v34, %v2518_v56  ;;  %v6759_v59 = vsub.f32 %v6662_v35, %v2519_v58  ;;  %v4657_v56 = vld [vmem:[%s7398_s8] ss:$16 sps:$4 sm:$0xff]  }
 0x5ae   :  { %v2493_v61 = vpop.xlane.xlu1 %2492  ;;  %2512 = vadd.xlane.f32.xlu1 %v6745_v8  ;;  %2563 = vadd.xlane.f32.xlu0 %v2547_v36  ;;  %v2495_v12 = vpop.xlane.xlu0 %2494 }
 0x5af   :  { %v2520_v28 = vmul.f32 0.0078125, %v2493_v61  ;;  %v2521_v25 = vmul.f32 0.0078125, %v2495_v12  ;;  %v2550_v5 = vmul.f32 %v6754_v32, %v6754_v32  ;;  %v2551_v35 = vmul.f32 %v6759_v59, %v6759_v59 }
 0x5b1   :  { %v6766_v34 = vsub.f32 %v6676_v41, %v2520_v28  ;;  %v6769_v26 = vsub.f32 %v6670_v31, %v2521_v25  ;;  %v4615_v41 = vld [vmem:[%s7398_s8 + $0xe0] ss:$16 sps:$4 sm:$0xff]   ;;  %v4618_v31 = vld [vmem:[%s7398_s8 + $0xe8] ss:$16 sps:$4 sm:$0xff]  }
 0x5b2   :  { %v2497_v16 = vpop.xlane.xlu1 %2496  ;;  %2565 = vadd.xlane.f32.xlu1 %v2548_v19  ;;  %2567 = vadd.xlane.f32.xlu0 %v2549_v7 }
 0x5b3   :  { %v2522_v11 = vmul.f32 0.0078125, %v2497_v16  ;;  %v2552_v2 = vmul.f32 %v6766_v34, %v6766_v34  ;;  %v2553_v33 = vmul.f32 %v6769_v26, %v6769_v26  ;;  %2928 = vmatpush1.bf16.msra.mxu0 %v4615_v41  ;;  %3041 = vmatpush1.bf16.msra.mxu1 %v4618_v31 }
 0x5b4   :  { %2929 = vmatprep.subr.bf16.mxu0 %v4623_v22  ;;  %3042 = vmatprep.subr.bf16.mxu1 %v4626_v17 }
 0x5b5   :  { %v6786_v51 = vsub.f32 %v6683_v18, %v2522_v11  ;;  %v4621_v18 = vld [vmem:[%s7398_s8 + $0xc0] ss:$16 sps:$4 sm:$0xff]  }
 0x5b6   :  { %2569 = vadd.xlane.f32.xlu1 %v2550_v5  ;;  %2571 = vadd.xlane.f32.xlu0 %v2551_v35 }
 0x5b7   :  { %v2554_v13 = vmul.f32 %v6786_v51, %v6786_v51  ;;  %2930 = vmatpush1.bf16.msra.mxu0 %v4621_v18  ;;  %3043 = vmatpush1.bf16.msra.mxu1 %v4624_v43 }
 0x5b8   :  { %2931 = vmatprep.subr.bf16.mxu0 %v4629_v9  ;;  %3044 = vmatprep.subr.bf16.mxu1 %v4632_v57 }
 0x5ba   :  { %2573 = vadd.xlane.f32.xlu1 %v2552_v2  ;;  %2575 = vadd.xlane.f32.xlu0 %v2553_v33 }
 0x5bb   :  { %2932 = vmatpush1.bf16.msra.mxu0 %v4627_v63  ;;  %3045 = vmatpush1.bf16.msra.mxu1 %v4630_v48 }
 0x5bc   :  { %2933 = vmatprep.subr.bf16.mxu0 %v4635_v38  ;;  %3046 = vmatprep.subr.bf16.mxu1 %v4638_v30 }
 0x5be   :  { %2577 = vadd.xlane.f32.xlu1 %v2554_v13 }
 0x5bf   :  { %2934 = vmatpush1.bf16.msra.mxu0 %v4633_v45  ;;  %3047 = vmatpush1.bf16.msra.mxu1 %v4636_v24 }
 0x5c0   :  { %2935 = vmatprep.subr.bf16.mxu0 %v4641_v54  ;;  %3048 = vmatprep.subr.bf16.mxu1 %v4644_v27 }
 0x5c3   :  { %2936 = vmatpush1.bf16.msra.mxu0 %v4639_v49  ;;  %3049 = vmatpush1.bf16.msra.mxu1 %v4642_v42 }
 0x5c4   :  { %2937 = vmatprep.subr.bf16.mxu0 %v4647_v29  ;;  %3050 = vmatprep.subr.bf16.mxu1 %v4650_v37 }
 0x5c7   :  { %2938 = vmatpush1.bf16.msra.mxu0 %v4645_v62  ;;  %3051 = vmatpush1.bf16.msra.mxu1 %v4648_v20 }
 0x5c8   :  { %2939 = vmatprep.subr.bf16.mxu0 %v4653_v0  ;;  %3052 = vmatprep.subr.bf16.mxu1 %v4656_v60 }
 0x5cb   :  { %2940 = vmatpush1.bf16.msra.mxu0 %v4651_v40  ;;  %3053 = vmatpush1.bf16.msra.mxu1 %v4654_v23 }
 0x5cc   :  { %2941 = vmatprep.subr.bf16.mxu0 %v4659_v39  ;;  %3054 = vmatprep.subr.bf16.mxu1 %v4662_v55 }
 0x5cf   :  { %2942 = vmatpush1.bf16.msra.mxu0 %v4657_v56  ;;  %3055 = vmatpush1.bf16.msra.mxu1 %v4660_v15 }
 0x5e2   :  { %v2499_v58 = vpop.xlane.xlu0 %2498 }
 0x5e3   :  { %v2523_v36 = vmul.f32 0.0078125, %v2499_v58 }
 0x5e5   :  { %v6879_v61 = vsub.f32 %v6691_v21, %v2523_v36  ;;  %v6922_v36 = vld [vmem:[%s7396_s6] ss:$0 sm:$0xff] }
 0x5e6   :  { %v2501_v12 = vpop.xlane.xlu1 %2500  ;;  %v2503_v19 = vpop.xlane.xlu0 %2502 }
 0x5e7   :  { %v2524_v28 = vmul.f32 0.0078125, %v2501_v12  ;;  %v2525_v25 = vmul.f32 0.0078125, %v2503_v19  ;;  %v2555_v7 = vmul.f32 %v6879_v61, %v6879_v61 }
 0x5e9   :  { %v6884_v16 = vsub.f32 %v6704_v53, %v2524_v28  ;;  %v6887_v5 = vsub.f32 %v6698_v4, %v2525_v25  ;;  %2579 = vadd.xlane.f32.xlu0 %v2555_v7 }
 0x5ea   :  { %v2505_v11 = vpop.xlane.xlu1 %2504 }
 0x5eb   :  { %v2526_v35 = vmul.f32 0.0078125, %v2505_v11  ;;  %v2556_v21 = vmul.f32 %v6884_v16, %v6884_v16  ;;  %v2557_v47 = vmul.f32 %v6887_v5, %v6887_v5 }
 0x5ed   :  { %v6894_v3 = vsub.f32 %v6711_v44, %v2526_v35  ;;  %2581 = vadd.xlane.f32.xlu1 %v2556_v21  ;;  %2583 = vadd.xlane.f32.xlu0 %v2557_v47  ;;  %v6929_v35 = vld [vmem:[%s7397_s7] ss:$0 sm:$0xff] }
 0x5ef   :  { %v2558_v53 = vmul.f32 %v6894_v3, %v6894_v3 }
 0x5f1   :  { %2585 = vadd.xlane.f32.xlu1 %v2558_v53 }
 0x62f   :  { %v2507_v4 = vpop.xlane.xlu0 %2506 }
 0x630   :  { %v2527_v41 = vmul.f32 0.0078125, %v2507_v4 }
 0x632   :  { %v6899_v31 = vsub.f32 %v6719_v1, %v2527_v41 }
 0x633   :  { %v2509_v2 = vpop.xlane.xlu1 %2508  ;;  %v2511_v33 = vpop.xlane.xlu0 %2510 }
 0x634   :  { %v2528_v22 = vmul.f32 0.0078125, %v2509_v2  ;;  %v2529_v17 = vmul.f32 0.0078125, %v2511_v33  ;;  %v2559_v18 = vmul.f32 %v6899_v31, %v6899_v31 }
 0x636   :  { %v6904_v44 = vsub.f32 %v6735_v50, %v2528_v22  ;;  %v6907_v43 = vsub.f32 %v6726_v10, %v2529_v17  ;;  %2587 = vadd.xlane.f32.xlu0 %v2559_v18 }
 0x637   :  { %v2513_v13 = vpop.xlane.xlu1 %2512  ;;  %v2564_v9 = vpop.xlane.xlu0 %2563 }
 0x638   :  { %v2530_v57 = vmul.f32 0.0078125, %v2513_v13  ;;  %v2595_v63 = vmul.f32 0.0078125, %v2564_v9  ;;  %v2560_v1 = vmul.f32 %v6904_v44, %v6904_v44  ;;  %v2561_v48 = vmul.f32 %v6907_v43, %v6907_v43 }
 0x63a   :  { %v6914_v38 = vsub.f32 %v6745_v8, %v2530_v57  ;;  %v2611_v30 = vadd.f32 1e-05, %v2595_v63  ;;  %2589 = vadd.xlane.f32.xlu1 %v2560_v1  ;;  %2591 = vadd.xlane.f32.xlu0 %v2561_v48 }
 0x63b   :  { %v2566_v50 = vpop.xlane.xlu1 %2565  ;;  %v2568_v10 = vpop.xlane.xlu0 %2567 }
 0x63c   :  { %4951 = vrsqrt.f32 %v2611_v30  ;;  %v2596_v45 = vmul.f32 0.0078125, %v2566_v50  ;;  %v2597_v24 = vmul.f32 0.0078125, %v2568_v10  ;;  %v2562_v54 = vmul.f32 %v6914_v38, %v6914_v38 }
 0x63e   :  { %v2612_v27 = vadd.f32 1e-05, %v2596_v45  ;;  %v2613_v49 = vadd.f32 1e-05, %v2597_v24  ;;  %2593 = vadd.xlane.f32.xlu1 %v2562_v54  ;;  %v4663_v54 = vld [vmem:[#allocation6 + $0x78] sm:$0xff]  }
 0x63f   :  { %v2570_v42 = vpop.xlane.xlu1 %2569  ;;  %v2572_v29 = vpop.xlane.xlu0 %2571  ;;  %4213 = vmatprep.subr.bf16.mxu0 %v4663_v54 }
 0x640   :  { %4953 = vrsqrt.f32 %v2612_v27  ;;  %v2598_v37 = vmul.f32 0.0078125, %v2570_v42  ;;  %v2599_v62 = vmul.f32 0.0078125, %v2572_v29  ;;  %v4664_v27 = vld [vmem:[#allocation6 + $0xf8] sm:$0xff]   ;;  %v4667_v42 = vld [vmem:[#allocation6 + $0x70] sm:$0xff]  }
 0x641   :  { %4955 = vrsqrt.f32 %v2613_v49  ;;  %v4665_v49 = vld [vmem:[#allocation6 + $0x38] sm:$0xff]   ;;  %v4668_v29 = vld [vmem:[#allocation6 + $0xf0] sm:$0xff]   ;;  %4277 = vmatprep.subr.bf16.mxu1 %v4664_v27 }
 0x642   :  { %v2614_v8 = vadd.f32 1e-05, %v2598_v37  ;;  %v2615_v60 = vadd.f32 1e-05, %v2599_v62  ;;  %v4669_v37 = vld [vmem:[#allocation6 + $0x30] sm:$0xff]  }
 0x643   :  { %v2574_v20 = vpop.xlane.xlu1 %2573  ;;  %v2576_v23 = vpop.xlane.xlu0 %2575 }
 0x644   :  { %4957 = vrsqrt.f32 %v2614_v8  ;;  %v2600_v0 = vmul.f32 0.0078125, %v2574_v20  ;;  %v2601_v15 = vmul.f32 0.0078125, %v2576_v23  ;;  %v4670_v8 = vld [vmem:[#allocation6 + $0xb0] sm:$0xff]   ;;  %v4674_v23 = vld [vmem:[#allocation6 + $0xa8] sm:$0xff]  }
 0x646   :  { %v2616_v40 = vadd.f32 1e-05, %v2600_v0  ;;  %v2617_v28 = vadd.f32 1e-05, %v2601_v15  ;;  %v4671_v0 = vld [vmem:[#allocation6 + $0x68] sm:$0xff]   ;;  %v4678_v15 = vld [vmem:[#allocation6 + $0xa0] sm:$0xff]  }
 0x647   :  { %v2578_v39 = vpop.xlane.xlu1 %2577 }
 0x648   :  { %4959 = vrsqrt.f32 %v2616_v40  ;;  %v2602_v55 = vmul.f32 0.0078125, %v2578_v39  ;;  %v4673_v40 = vld [vmem:[#allocation6 + $0x28] sm:$0xff]   ;;  %v4675_v39 = vld [vmem:[#allocation6 + $0x60] sm:$0xff]  }
 0x649   :  { %v4952_v56 = vpop.eup %4951  ;;  %4961 = vrsqrt.f32 %v2615_v60  ;;  %v4672_v60 = vld [vmem:[#allocation6 + $0xe8] sm:$0xff]  }
 0x64a   :  { %v2643_v58 = vmul.f32 %v4952_v56, %v6729_v52  ;;  %v2618_v12 = vadd.f32 1e-05, %v2602_v55  ;;  %v4676_v55 = vld [vmem:[#allocation6 + $0xe0] sm:$0xff]  }
 0x64b   :  { %v4677_v56 = vld [vmem:[#allocation6 + $0x20] sm:$0xff]  }
 0x64c   :  { %v2666_v7 = vmul.f32 %v6922_v36, %v2643_v58  ;;  %4963 = vrsqrt.f32 %v2618_v12  ;;  %v4679_v12 = vld [vmem:[#allocation6 + $0x58] sm:$0xff]  }
 0x64d   :  { %v4954_v19 = vpop.eup %4953  ;;  %4965 = vrsqrt.f32 %v2617_v28 }
 0x64e   :  { %v2644_v25 = vmul.f32 %v4954_v19, %v6740_v6  ;;  %v4956_v11 = vpop.eup %4955  ;;  %v6933_v47 = vadd.f32 %v6929_v35, %v2666_v7  ;;  %v4680_v19 = vld [vmem:[#allocation6 + $0xd8] sm:$0xff]  }
 0x64f   :  { %v2645_v6 = vmul.f32 %v4956_v11, %v6748_v46  ;;  %v4681_v7 = vld [vmem:[#allocation6 + $0x18] sm:$0xff]  }
 0x650   :  { %v2667_v52 = vmul.f32 %v6922_v36, %v2644_v25  ;;  %v4682_v11 = vld [vmem:[#allocation6 + $0x98] sm:$0xff]  }
 0x651   :  { %v4958_v21 = vpop.eup %4957  ;;  %v2668_v22 = vmul.f32 %v6922_v36, %v2645_v6 }
 0x652   :  { %v6936_v53 = vadd.f32 %v6929_v35, %v2667_v52  ;;  %v2646_v4 = vmul.f32 %v4958_v21, %v6754_v32 }
 0x653   :  { %v6951_v32 = vadd.f32 %v6929_v35, %v2668_v22 }
 0x654   :  { %v2705_v41 = vpack.c.bf16 %v6936_v53, %v6933_v47  ;;  %v2669_v2 = vmul.f32 %v6922_v36, %v2646_v4 }
 0x655   :  { %v4960_v33 = vpop.eup %4959 }
 0x656   :  { %2960 = vmatmul.mubr.bf16.vlgmr.msra.gmra.mxu0 %v2705_v41  ;;  %3073 = vmatmul.mubr.bf16.vlgmr.msra.gmra.mxu1 %v2705_v41  ;;  %v4962_v17 = vpop.eup %4961  ;;  %v6947_v18 = vadd.f32 %v6929_v35, %v2669_v2  ;;  %v2648_v46 = vmul.f32 %v4960_v33, %v6766_v34 }
 0x657   :  { %2969 = vmatprep.mubr.bf16.mxu0 %v7577_v14  ;;  %3082 = vmatprep.mubr.bf16.mxu1 %v7577_v14  ;;  %v2647_v13 = vmul.f32 %v4962_v17, %v6759_v59 }
 0x658   :  { %v2706_v9 = vpack.c.bf16 %v6947_v18, %v6951_v32  ;;  %v2671_v57 = vmul.f32 %v6922_v36, %v2648_v46  ;;  %4214 = vmatpush3.bf16.msra.mxu0 %v4665_v49  ;;  %v4683_v49 = vld [vmem:[#allocation6 + $0x50] sm:$0xff]  }
 0x659   :  { %v4964_v63 = vpop.eup %4963  ;;  %v2670_v48 = vmul.f32 %v6922_v36, %v2647_v13  ;;  %4215 = vmatprep.subr.bf16.mxu0 %v4667_v42  ;;  %v4685_v42 = vld [vmem:[#allocation6 + $0x10] sm:$0xff]  }
 0x65a   :  { %v4966_v1 = vpop.eup %4965  ;;  %v6961_v34 = vadd.f32 %v6929_v35, %v2671_v57  ;;  %v2650_v59 = vmul.f32 %v4964_v63, %v6786_v51  ;;  %v4666_v51 = vld [vmem:[#allocation6 + $0xb8] sm:$0xff]  }
 0x65b   :  { %v6965_v30 = vadd.f32 %v6929_v35, %v2670_v48  ;;  %v2649_v50 = vmul.f32 %v4966_v1, %v6769_v26  ;;  %4278 = vmatpush3.bf16.msra.mxu1 %v4666_v51  ;;  %v4684_v51 = vld [vmem:[#allocation6 + $0xd0] sm:$0xff]  }
 0x65c   :  { %v2673_v45 = vmul.f32 %v6922_v36, %v2650_v59  ;;  %4279 = vmatprep.subr.bf16.mxu1 %v4668_v29  ;;  %4216 = vmatpush3.bf16.msra.mxu0 %v4669_v37  ;;  %v4686_v29 = vld [vmem:[#allocation6 + $0x90] sm:$0xff]   ;;  %v4687_v37 = vld [vmem:[#allocation6 + $0x48] sm:$0xff]  }
 0x65d   :  { %v2707_v10 = vpack.c.bf16 %v6961_v34, %v6965_v30  ;;  %v2672_v24 = vmul.f32 %v6922_v36, %v2649_v50  ;;  %4217 = vmatprep.subr.bf16.mxu0 %v4671_v0  ;;  %v4690_v0 = vld [vmem:[#allocation6 + $0x88] sm:$0xff]  }
 0x65e   :  { %2970 = vmatmul.mubr.bf16.gmra.mxu0 %v2706_v9  ;;  %3083 = vmatmul.mubr.bf16.gmra.mxu1 %v2706_v9  ;;  %v6975_v26 = vadd.f32 %v6929_v35, %v2673_v45 }
 0x65f   :  { %2979 = vmatprep.mubr.bf16.mxu0 %v7577_v14  ;;  %3092 = vmatprep.mubr.bf16.mxu1 %v7577_v14  ;;  %v6978_v62 = vadd.f32 %v6929_v35, %v2672_v24 }
 0x660   :  { %4280 = vmatpush3.bf16.msra.mxu1 %v4670_v8  ;;  %4218 = vmatpush3.bf16.msra.mxu0 %v4673_v40  ;;  %v4688_v8 = vld [vmem:[#allocation6 + $0xc8] sm:$0xff]   ;;  %v4692_v40 = vld [vmem:[#allocation6 + $0xc0] sm:$0xff]  }
 0x661   :  { %v2708_v20 = vpack.c.bf16 %v6975_v26, %v6978_v62  ;;  %4281 = vmatprep.subr.bf16.mxu1 %v4672_v60  ;;  %4219 = vmatprep.subr.bf16.mxu0 %v4675_v39  ;;  %v4691_v60 = vld [vmem:[#allocation6 + $0x40] sm:$0xff]  }
 0x662   :  { %v4694_v39 = vld [vmem:[#allocation6 + $0x80] sm:$0xff]  }
 0x664   :  { %4282 = vmatpush3.bf16.msra.mxu1 %v4674_v23  ;;  %4220 = vmatpush3.bf16.msra.mxu0 %v4677_v56  ;;  %v4693_v23 = vld [vmem:[#allocation6] sm:$0xff]  }
 0x665   :  { %4283 = vmatprep.subr.bf16.mxu1 %v4676_v55  ;;  %4221 = vmatprep.subr.bf16.mxu0 %v4679_v12 }
 0x666   :  { %2980 = vmatmul.mubr.bf16.gmra.mxu0 %v2707_v10  ;;  %3093 = vmatmul.mubr.bf16.gmra.mxu1 %v2707_v10 }
 0x667   :  { %2989 = vmatprep.mubr.bf16.mxu0 %v7577_v14  ;;  %3102 = vmatprep.mubr.bf16.mxu1 %v7577_v14 }
 0x668   :  { %4284 = vmatpush3.bf16.msra.mxu1 %v4678_v15  ;;  %4222 = vmatpush3.bf16.msra.mxu0 %v4681_v7 }
 0x669   :  { %4285 = vmatprep.subr.bf16.mxu1 %v4680_v19  ;;  %4223 = vmatprep.subr.bf16.mxu0 %v4683_v49 }
 0x66c   :  { %4286 = vmatpush3.bf16.msra.mxu1 %v4682_v11  ;;  %4224 = vmatpush3.bf16.msra.mxu0 %v4685_v42 }
 0x66d   :  { %4287 = vmatprep.subr.bf16.mxu1 %v4684_v51  ;;  %4225 = vmatprep.subr.bf16.mxu0 %v4687_v37 }
 0x66e   :  { %2990 = vmatmul.mubr.bf16.gmra.mxu0 %v2708_v20  ;;  %3103 = vmatmul.mubr.bf16.gmra.mxu1 %v2708_v20  ;;  %v4689_v20 = vld [vmem:[#allocation6 + $0x8] sm:$0xff]  }
 0x66f   :  { %2999 = vmatprep.mubr.bf16.mxu0 %v7577_v14  ;;  %3112 = vmatprep.mubr.bf16.mxu1 %v7577_v14 }
 0x670   :  { %4288 = vmatpush3.bf16.msra.mxu1 %v4686_v29  ;;  %4226 = vmatpush3.bf16.msra.mxu0 %v4689_v20 }
 0x671   :  { %4289 = vmatprep.subr.bf16.mxu1 %v4688_v8  ;;  %4227 = vmatprep.subr.bf16.mxu0 %v4691_v60 }
 0x672   :  { %v2580_v58 = vpop.xlane.xlu0 %2579 }
 0x673   :  { %v2603_v28 = vmul.f32 0.0078125, %v2580_v58 }
 0x674   :  { %4290 = vmatpush3.bf16.msra.mxu1 %v4690_v0  ;;  %4228 = vmatpush3.bf16.msra.mxu0 %v4693_v23 }
 0x675   :  { %v2619_v25 = vadd.f32 1e-05, %v2603_v28  ;;  %4291 = vmatprep.subr.bf16.mxu1 %v4692_v40 }
 0x676   :  { %v2582_v52 = vpop.xlane.xlu1 %2581  ;;  %v2584_v21 = vpop.xlane.xlu0 %2583 }
 0x677   :  { %4967 = vrsqrt.f32 %v2619_v25  ;;  %v2604_v6 = vmul.f32 0.0078125, %v2582_v52  ;;  %v2605_v4 = vmul.f32 0.0078125, %v2584_v21 }
 0x678   :  { %4292 = vmatpush3.bf16.msra.mxu1 %v4694_v39 }
 0x679   :  { %v2620_v41 = vadd.f32 1e-05, %v2604_v6  ;;  %v2621_v2 = vadd.f32 1e-05, %v2605_v4 }
 0x67a   :  { %v2586_v33 = vpop.xlane.xlu1 %2585 }
 0x67b   :  { %4969 = vrsqrt.f32 %v2620_v41  ;;  %v2606_v22 = vmul.f32 0.0078125, %v2586_v33 }
 0x67c   :  { %4971 = vrsqrt.f32 %v2621_v2 }
 0x67d   :  { %v2622_v17 = vadd.f32 1e-05, %v2606_v22 }
 0x67f   :  { %4973 = vrsqrt.f32 %v2622_v17 }
 0x684   :  { %v4968_v46 = vpop.eup %4967 }
 0x685   :  { %v2651_v13 = vmul.f32 %v4968_v46, %v6879_v61 }
 0x687   :  { %v2674_v63 = vmul.f32 %v6922_v36, %v2651_v13 }
 0x688   :  { %v4970_v9 = vpop.eup %4969 }
 0x689   :  { %v2652_v57 = vmul.f32 %v4970_v9, %v6884_v16  ;;  %v4972_v1 = vpop.eup %4971  ;;  %v6989_v50 = vadd.f32 %v6929_v35, %v2674_v63 }
 0x68a   :  { %v2653_v45 = vmul.f32 %v4972_v1, %v6887_v5 }
 0x68b   :  { %v2675_v48 = vmul.f32 %v6922_v36, %v2652_v57 }
 0x68c   :  { %v4974_v59 = vpop.eup %4973  ;;  %v2676_v54 = vmul.f32 %v6922_v36, %v2653_v45 }
 0x68d   :  { %v6992_v10 = vadd.f32 %v6929_v35, %v2675_v48  ;;  %v2654_v24 = vmul.f32 %v4974_v59, %v6894_v3  ;;  %v7582_v59 = vld [vmem:[#allocation9_spill] sm:$0xff] }
 0x68e   :  { %v7006_v5 = vadd.f32 %v6929_v35, %v2676_v54  ;;  %v2761_v45 = vsub.s32 3, %v7582_v59  ;;  %v7585_v49 = vsub.s32 2, %v7582_v59 }
 0x68f   :  { %v2709_v61 = vpack.c.bf16 %v6992_v10, %v6989_v50  ;;  %v2677_v16 = vmul.f32 %v6922_v36, %v2654_v24 }
 0x691   :  { %3000 = vmatmul.mubr.bf16.gmra.mxu0 %v2709_v61  ;;  %3113 = vmatmul.mubr.bf16.gmra.mxu1 %v2709_v61  ;;  %v7003_v27 = vadd.f32 %v6929_v35, %v2677_v16 }
 0x692   :  { %3009 = vmatprep.mubr.bf16.mxu0 %v7577_v14  ;;  %3122 = vmatprep.mubr.bf16.mxu1 %v7577_v14 }
 0x693   :  { %v2710_v3 = vpack.c.bf16 %v7003_v27, %v7006_v5 }
 0x699   :  { %3010 = vmatmul.mubr.bf16.gmra.mxu0 %v2710_v3  ;;  %3123 = vmatmul.mubr.bf16.gmra.mxu1 %v2710_v3 }
 0x69a   :  { %3019 = vmatprep.mubr.bf16.mxu0 %v7577_v14  ;;  %3132 = vmatprep.mubr.bf16.mxu1 %v7577_v14 }
 0x6bf   :  { %v2588_v55 = vpop.xlane.xlu0 %2587 }
 0x6c0   :  { %v2607_v56 = vmul.f32 0.0078125, %v2588_v55 }
 0x6c2   :  { %v2623_v15 = vadd.f32 1e-05, %v2607_v56 }
 0x6c3   :  { %v2590_v58 = vpop.xlane.xlu1 %2589  ;;  %v2592_v12 = vpop.xlane.xlu0 %2591 }
 0x6c4   :  { %4975 = vrsqrt.f32 %v2623_v15  ;;  %v2608_v19 = vmul.f32 0.0078125, %v2590_v58  ;;  %v2609_v28 = vmul.f32 0.0078125, %v2592_v12 }
 0x6c6   :  { %v2624_v25 = vadd.f32 1e-05, %v2608_v19  ;;  %v2625_v7 = vadd.f32 1e-05, %v2609_v28 }
 0x6c7   :  { %v2594_v11 = vpop.xlane.xlu1 %2593 }
 0x6c8   :  { %4977 = vrsqrt.f32 %v2624_v25  ;;  %v2610_v52 = vmul.f32 0.0078125, %v2594_v11 }
 0x6c9   :  { %4979 = vrsqrt.f32 %v2625_v7 }
 0x6ca   :  { %v2626_v21 = vadd.f32 1e-05, %v2610_v52 }
 0x6cc   :  { %4981 = vrsqrt.f32 %v2626_v21 }
 0x6d1   :  { %v4976_v6 = vpop.eup %4975 }
 0x6d2   :  { %v2655_v4 = vmul.f32 %v4976_v6, %v6899_v31 }
 0x6d4   :  { %v2678_v33 = vmul.f32 %v6922_v36, %v2655_v4 }
 0x6d5   :  { %v4978_v41 = vpop.eup %4977 }
 0x6d6   :  { %v2656_v2 = vmul.f32 %v4978_v41, %v6904_v44  ;;  %v4980_v22 = vpop.eup %4979  ;;  %v7017_v13 = vadd.f32 %v6929_v35, %v2678_v33 }
 0x6d7   :  { %v2657_v57 = vmul.f32 %v4980_v22, %v6907_v43 }
 0x6d8   :  { %v2679_v17 = vmul.f32 %v6922_v36, %v2656_v2 }
 0x6d9   :  { %v4982_v46 = vpop.eup %4981  ;;  %v2680_v1 = vmul.f32 %v6922_v36, %v2657_v57 }
 0x6da   :  { %v7020_v9 = vadd.f32 %v6929_v35, %v2679_v17  ;;  %v2658_v63 = vmul.f32 %v4982_v46, %v6914_v38 }
 0x6db   :  { %v7034_v43 = vadd.f32 %v6929_v35, %v2680_v1 }
 0x6dc   :  { %v2711_v31 = vpack.c.bf16 %v7020_v9, %v7017_v13  ;;  %v2681_v44 = vmul.f32 %v6922_v36, %v2658_v63  ;;  %v2745_v36 = vld [vmem:[%s7399_s9] sm:$0xf] }
 0x6dd   :  { %v7046_v54 = vrot.slane %v2745_v36, %v2761_v45  ;;  %v7053_v51 = vrot.slane %v2745_v36, %v7585_v49 }
 0x6de   :  { %3020 = vmatmul.mubr.bf16.gmra.mxu0 %v2711_v31  ;;  %3133 = vmatmul.mubr.bf16.gmra.mxu1 %v2711_v31  ;;  %v7031_v48 = vadd.f32 %v6929_v35, %v2681_v44  ;;  %v7584_v35 = vld [vmem:[#allocation10_spill] sm:$0xff] }
 0x6df   :  { %3029 = vmatprep.mubr.bf16.mxu0 %v7577_v14  ;;  %3142 = vmatprep.mubr.bf16.mxu1 %v7577_v14  ;;  %v7583_v14 = vsub.s32 1, %v7582_v59  ;;  %v7049_v3 = vrot.slane %v2745_v36, %v7584_v35 }
 0x6e0   :  { %v2712_v38 = vpack.c.bf16 %v7031_v48, %v7034_v43 }
 0x6e1   :  { %v7044_v16 = vrot.slane %v2745_v36, %v7583_v14 }
 0x6e6   :  { %3030 = vmatmul.mubr.bf16.gmra.mxu0 %v2712_v38  ;;  %3143 = vmatmul.mubr.bf16.gmra.mxu1 %v2712_v38 }
 0x716   :  { %v2961_v24 = vpop.f32.mrf.mxu0  ;;  %v3074_v61 = vpop.f32.mrf.mxu1 }
 0x717   :  { %v2962_v23 = vadd.f32 %v2961_v24, %v7049_v3  ;;  %v3075_v39 = vadd.f32 %v3074_v61, %v7053_v51 }
 0x718   :  { %v2963_v42 = vpop.f32.mrf.mxu0  ;;  %v3076_v29 = vpop.f32.mrf.mxu1 }
 0x719   :  { %v2964_v20 = vadd.f32 %v2963_v42, %v7044_v16  ;;  %v3077_v0 = vadd.f32 %v3076_v29, %v7046_v54  ;;  %v3153_v6 = vmax.f32 %v2962_v23, 0.0  ;;  %v3155_v4 = vmax.f32 %v3075_v39, 0.0 }
 0x71a   :  { %v2965_v37 = vpop.f32.mrf.mxu0  ;;  %v3078_v8 = vpop.f32.mrf.mxu1 }
 0x71b   :  { %v2966_v60 = vadd.f32 %v2965_v37, %v7049_v3  ;;  %v3079_v40 = vadd.f32 %v3078_v8, %v7053_v51  ;;  %v3154_v7 = vmax.f32 %v2964_v20, 0.0  ;;  %v3156_v11 = vmax.f32 %v3077_v0, 0.0 }
 0x71c   :  { %v2967_v55 = vpop.f32.mrf.mxu0  ;;  %v3080_v56 = vpop.f32.mrf.mxu1 }
 0x71d   :  { %v2968_v15 = vadd.f32 %v2967_v55, %v7044_v16  ;;  %v3081_v58 = vadd.f32 %v3080_v56, %v7046_v54  ;;  %v3157_v12 = vmax.f32 %v2966_v60, 0.0  ;;  %v3159_v19 = vmax.f32 %v3079_v40, 0.0 }
 0x71e   :  { %v2971_v28 = vpop.f32.mrf.mxu0  ;;  %v3084_v25 = vpop.f32.mrf.mxu1 }
 0x71f   :  { %v3158_v52 = vmax.f32 %v2968_v15, 0.0  ;;  %v3160_v21 = vmax.f32 %v3081_v58, 0.0  ;;  %v3217_v17 = vpack.c.bf16 %v3157_v12, %v3153_v6  ;;  %v3219_v46 = vpack.c.bf16 %v3159_v19, %v3155_v4 }
 0x720   :  { %v2973_v41 = vpop.f32.mrf.mxu0  ;;  %v3086_v2 = vpop.f32.mrf.mxu1  ;;  %v2972_v59 = vadd.f32 %v2971_v28, %v7049_v3  ;;  %v3085_v45 = vadd.f32 %v3084_v25, %v7053_v51 }
 0x721   :  { %v3218_v33 = vpack.c.bf16 %v3158_v52, %v3154_v7  ;;  %v3220_v22 = vpack.c.bf16 %v3160_v21, %v3156_v11  ;;  %v2974_v57 = vadd.f32 %v2973_v41, %v7044_v16  ;;  %v3087_v44 = vadd.f32 %v3086_v2, %v7046_v54 }
 0x722   :  { %v2975_v63 = vpop.f32.mrf.mxu0  ;;  %v3088_v31 = vpop.f32.mrf.mxu1  ;;  %v3161_v60 = vmax.f32 %v2972_v59, 0.0  ;;  %v3163_v40 = vmax.f32 %v3085_v45, 0.0 }
 0x723   :  { %v2976_v1 = vadd.f32 %v2975_v63, %v7049_v3  ;;  %v3089_v38 = vadd.f32 %v3088_v31, %v7053_v51  ;;  %3544 = vmatprep.mubr.bf16.mxu0 %v3218_v33  ;;  %3641 = vmatprep.mubr.bf16.mxu1 %v3220_v22  ;;  %v3162_v37 = vmax.f32 %v2974_v57, 0.0  ;;  %v3164_v8 = vmax.f32 %v3087_v44, 0.0 }
 0x724   :  { %v2977_v36 = vpop.f32.mrf.mxu0  ;;  %v3090_v24 = vpop.f32.mrf.mxu1  ;;  %3545 = vmatmul.mubr.bf16.vlgmr.msra.gmra.mxu0 %v3217_v17  ;;  %3642 = vmatmul.mubr.bf16.vlgmr.msra.gmra.mxu1 %v3219_v46 }
 0x725   :  { %v2978_v61 = vadd.f32 %v2977_v36, %v7044_v16  ;;  %v3091_v14 = vadd.f32 %v3090_v24, %v7046_v54  ;;  %v3165_v35 = vmax.f32 %v2976_v1, 0.0  ;;  %v3167_v49 = vmax.f32 %v3089_v38, 0.0 }
 0x726   :  { %v2981_v42 = vpop.f32.mrf.mxu0  ;;  %v3094_v29 = vpop.f32.mrf.mxu1 }
 0x727   :  { %v3166_v20 = vmax.f32 %v2978_v61, 0.0  ;;  %v3168_v0 = vmax.f32 %v3091_v14, 0.0  ;;  %v3221_v15 = vpack.c.bf16 %v3165_v35, %v3161_v60  ;;  %v3223_v58 = vpack.c.bf16 %v3167_v49, %v3163_v40 }
 0x728   :  { %v2983_v23 = vpop.f32.mrf.mxu0  ;;  %v3096_v39 = vpop.f32.mrf.mxu1  ;;  %v2982_v52 = vadd.f32 %v2981_v42, %v7049_v3  ;;  %v3095_v21 = vadd.f32 %v3094_v29, %v7053_v51 }
 0x729   :  { %v3222_v55 = vpack.c.bf16 %v3166_v20, %v3162_v37  ;;  %v3224_v56 = vpack.c.bf16 %v3168_v0, %v3164_v8  ;;  %v2984_v12 = vadd.f32 %v2983_v23, %v7044_v16  ;;  %v3097_v25 = vadd.f32 %v3096_v39, %v7046_v54 }
 0x72a   :  { %v2985_v19 = vpop.f32.mrf.mxu0  ;;  %v3098_v28 = vpop.f32.mrf.mxu1  ;;  %v3169_v1 = vmax.f32 %v2982_v52, 0.0  ;;  %v3171_v38 = vmax.f32 %v3095_v21, 0.0 }
 0x72b   :  { %v2986_v7 = vadd.f32 %v2985_v19, %v7049_v3  ;;  %v3099_v11 = vadd.f32 %v3098_v28, %v7053_v51  ;;  %3552 = vmatprep.mubr.bf16.mxu0 %v3222_v55  ;;  %3649 = vmatprep.mubr.bf16.mxu1 %v3224_v56  ;;  %v3170_v57 = vmax.f32 %v2984_v12, 0.0  ;;  %v3172_v63 = vmax.f32 %v3097_v25, 0.0 }
 0x72c   :  { %v2987_v6 = vpop.f32.mrf.mxu0  ;;  %v3100_v4 = vpop.f32.mrf.mxu1  ;;  %3553 = vmatmul.mubr.bf16.gmra.mxu0 %v3221_v15  ;;  %3650 = vmatmul.mubr.bf16.gmra.mxu1 %v3223_v58 }
 0x72d   :  { %v2988_v41 = vadd.f32 %v2987_v6, %v7044_v16  ;;  %v3101_v2 = vadd.f32 %v3100_v4, %v7046_v54  ;;  %v3173_v33 = vmax.f32 %v2986_v7, 0.0  ;;  %v3175_v22 = vmax.f32 %v3099_v11, 0.0 }
 0x72e   :  { %v2991_v17 = vpop.f32.mrf.mxu0  ;;  %v3104_v46 = vpop.f32.mrf.mxu1 }
 0x72f   :  { %v3174_v31 = vmax.f32 %v2988_v41, 0.0  ;;  %v3176_v44 = vmax.f32 %v3101_v2, 0.0  ;;  %v3225_v61 = vpack.c.bf16 %v3173_v33, %v3169_v1  ;;  %v3227_v14 = vpack.c.bf16 %v3175_v22, %v3171_v38 }
 0x730   :  { %v2993_v59 = vpop.f32.mrf.mxu0  ;;  %v3106_v45 = vpop.f32.mrf.mxu1  ;;  %v2992_v20 = vadd.f32 %v2991_v17, %v7049_v3  ;;  %v3105_v0 = vadd.f32 %v3104_v46, %v7053_v51 }
 0x731   :  { %v3226_v36 = vpack.c.bf16 %v3174_v31, %v3170_v57  ;;  %v3228_v24 = vpack.c.bf16 %v3176_v44, %v3172_v63  ;;  %v2994_v35 = vadd.f32 %v2993_v59, %v7044_v16  ;;  %v3107_v29 = vadd.f32 %v3106_v45, %v7046_v54 }
 0x732   :  { %v2995_v49 = vpop.f32.mrf.mxu0  ;;  %v3108_v42 = vpop.f32.mrf.mxu1  ;;  %v3177_v28 = vmax.f32 %v2992_v20, 0.0  ;;  %v3179_v25 = vmax.f32 %v3105_v0, 0.0 }
 0x733   :  { %v2996_v37 = vadd.f32 %v2995_v49, %v7049_v3  ;;  %v3109_v8 = vadd.f32 %v3108_v42, %v7053_v51  ;;  %3560 = vmatprep.mubr.bf16.mxu0 %v3226_v36  ;;  %3657 = vmatprep.mubr.bf16.mxu1 %v3228_v24  ;;  %v3178_v15 = vmax.f32 %v2994_v35, 0.0  ;;  %v3180_v58 = vmax.f32 %v3107_v29, 0.0 }
 0x734   :  { %v2997_v60 = vpop.f32.mrf.mxu0  ;;  %v3110_v40 = vpop.f32.mrf.mxu1  ;;  %3561 = vmatmul.mubr.bf16.gmra.mxu0 %v3225_v61  ;;  %3658 = vmatmul.mubr.bf16.gmra.mxu1 %v3227_v14 }
 0x735   :  { %v2998_v23 = vadd.f32 %v2997_v60, %v7044_v16  ;;  %v3111_v39 = vadd.f32 %v3110_v40, %v7046_v54  ;;  %v3181_v55 = vmax.f32 %v2996_v37, 0.0  ;;  %v3183_v56 = vmax.f32 %v3109_v8, 0.0 }
 0x737   :  { %v3182_v12 = vmax.f32 %v2998_v23, 0.0  ;;  %v3184_v19 = vmax.f32 %v3111_v39, 0.0  ;;  %v3229_v52 = vpack.c.bf16 %v3181_v55, %v3177_v28  ;;  %v3231_v21 = vpack.c.bf16 %v3183_v56, %v3179_v25 }
 0x739   :  { %v3230_v7 = vpack.c.bf16 %v3182_v12, %v3178_v15  ;;  %v3232_v11 = vpack.c.bf16 %v3184_v19, %v3180_v58 }
 0x73b   :  { %3568 = vmatprep.mubr.bf16.mxu0 %v3230_v7  ;;  %3665 = vmatprep.mubr.bf16.mxu1 %v3232_v11 }
 0x73c   :  { %3569 = vmatmul.mubr.bf16.gmra.mxu0 %v3229_v52  ;;  %3666 = vmatmul.mubr.bf16.gmra.mxu1 %v3231_v21 }
 0x751   :  { %v3001_v6 = vpop.f32.mrf.mxu0  ;;  %v3114_v4 = vpop.f32.mrf.mxu1 }
 0x752   :  { %v3002_v31 = vadd.f32 %v3001_v6, %v7049_v3  ;;  %v3115_v44 = vadd.f32 %v3114_v4, %v7053_v51 }
 0x753   :  { %v3003_v41 = vpop.f32.mrf.mxu0  ;;  %v3116_v2 = vpop.f32.mrf.mxu1 }
 0x754   :  { %v3004_v17 = vadd.f32 %v3003_v41, %v7044_v16  ;;  %v3117_v46 = vadd.f32 %v3116_v2, %v7046_v54  ;;  %v3185_v37 = vmax.f32 %v3002_v31, 0.0  ;;  %v3187_v8 = vmax.f32 %v3115_v44, 0.0 }
 0x755   :  { %v3005_v33 = vpop.f32.mrf.mxu0  ;;  %v3118_v22 = vpop.f32.mrf.mxu1 }
 0x756   :  { %v3006_v57 = vadd.f32 %v3005_v33, %v7049_v3  ;;  %v3119_v63 = vadd.f32 %v3118_v22, %v7053_v51  ;;  %v3186_v35 = vmax.f32 %v3004_v17, 0.0  ;;  %v3188_v49 = vmax.f32 %v3117_v46, 0.0 }
 0x757   :  { %v3007_v1 = vpop.f32.mrf.mxu0  ;;  %v3120_v38 = vpop.f32.mrf.mxu1 }
 0x758   :  { %v3008_v59 = vadd.f32 %v3007_v1, %v7044_v16  ;;  %v3121_v45 = vadd.f32 %v3120_v38, %v7046_v54  ;;  %v3189_v36 = vmax.f32 %v3006_v57, 0.0  ;;  %v3191_v24 = vmax.f32 %v3119_v63, 0.0 }
 0x759   :  { %v3011_v61 = vpop.f32.mrf.mxu0  ;;  %v3124_v14 = vpop.f32.mrf.mxu1 }
 0x75a   :  { %v3190_v42 = vmax.f32 %v3008_v59, 0.0  ;;  %v3192_v29 = vmax.f32 %v3121_v45, 0.0  ;;  %v3233_v23 = vpack.c.bf16 %v3189_v36, %v3185_v37  ;;  %v3235_v39 = vpack.c.bf16 %v3191_v24, %v3187_v8 }
 0x75b   :  { %v3013_v20 = vpop.f32.mrf.mxu0  ;;  %v3126_v0 = vpop.f32.mrf.mxu1  ;;  %v3012_v28 = vadd.f32 %v3011_v61, %v7049_v3  ;;  %v3125_v25 = vadd.f32 %v3124_v14, %v7053_v51 }
 0x75c   :  { %v3234_v60 = vpack.c.bf16 %v3190_v42, %v3186_v35  ;;  %v3236_v40 = vpack.c.bf16 %v3192_v29, %v3188_v49  ;;  %v3014_v55 = vadd.f32 %v3013_v20, %v7044_v16  ;;  %v3127_v58 = vadd.f32 %v3126_v0, %v7046_v54 }
 0x75d   :  { %v3015_v56 = vpop.f32.mrf.mxu0  ;;  %v3128_v15 = vpop.f32.mrf.mxu1  ;;  %v3193_v17 = vmax.f32 %v3012_v28, 0.0  ;;  %v3195_v46 = vmax.f32 %v3125_v25, 0.0 }
 0x75e   :  { %v3016_v12 = vadd.f32 %v3015_v56, %v7049_v3  ;;  %v3129_v19 = vadd.f32 %v3128_v15, %v7053_v51  ;;  %3576 = vmatprep.mubr.bf16.mxu0 %v3234_v60  ;;  %3673 = vmatprep.mubr.bf16.mxu1 %v3236_v40  ;;  %v3194_v41 = vmax.f32 %v3014_v55, 0.0  ;;  %v3196_v2 = vmax.f32 %v3127_v58, 0.0 }
 0x75f   :  { %v3017_v7 = vpop.f32.mrf.mxu0  ;;  %v3130_v11 = vpop.f32.mrf.mxu1  ;;  %3577 = vmatmul.mubr.bf16.gmra.mxu0 %v3233_v23  ;;  %3674 = vmatmul.mubr.bf16.gmra.mxu1 %v3235_v39 }
 0x760   :  { %v3018_v52 = vadd.f32 %v3017_v7, %v7044_v16  ;;  %v3131_v21 = vadd.f32 %v3130_v11, %v7046_v54  ;;  %v3197_v6 = vmax.f32 %v3016_v12, 0.0  ;;  %v3199_v4 = vmax.f32 %v3129_v19, 0.0 }
 0x762   :  { %v3198_v33 = vmax.f32 %v3018_v52, 0.0  ;;  %v3200_v22 = vmax.f32 %v3131_v21, 0.0  ;;  %v3237_v31 = vpack.c.bf16 %v3197_v6, %v3193_v17  ;;  %v3239_v44 = vpack.c.bf16 %v3199_v4, %v3195_v46 }
 0x764   :  { %v3238_v57 = vpack.c.bf16 %v3198_v33, %v3194_v41  ;;  %v3240_v63 = vpack.c.bf16 %v3200_v22, %v3196_v2 }
 0x766   :  { %3584 = vmatprep.mubr.bf16.mxu0 %v3238_v57  ;;  %3681 = vmatprep.mubr.bf16.mxu1 %v3240_v63 }
 0x767   :  { %3585 = vmatmul.mubr.bf16.gmra.mxu0 %v3237_v31  ;;  %3682 = vmatmul.mubr.bf16.gmra.mxu1 %v3239_v44 }
 0x79e   :  { %v3021_v1 = vpop.f32.mrf.mxu0  ;;  %v3134_v38 = vpop.f32.mrf.mxu1 }
 0x79f   :  { %v3022_v42 = vadd.f32 %v3021_v1, %v7049_v3  ;;  %v3135_v29 = vadd.f32 %v3134_v38, %v7053_v51 }
 0x7a0   :  { %v3023_v59 = vpop.f32.mrf.mxu0  ;;  %v3136_v45 = vpop.f32.mrf.mxu1 }
 0x7a1   :  { %v3024_v61 = vadd.f32 %v3023_v59, %v7044_v16  ;;  %v3137_v14 = vadd.f32 %v3136_v45, %v7046_v54  ;;  %v3201_v12 = vmax.f32 %v3022_v42, 0.0  ;;  %v3203_v19 = vmax.f32 %v3135_v29, 0.0 }
 0x7a2   :  { %v3025_v36 = vpop.f32.mrf.mxu0  ;;  %v3138_v24 = vpop.f32.mrf.mxu1 }
 0x7a3   :  { %v3026_v35 = vadd.f32 %v3025_v36, %v7049_v3  ;;  %v3139_v49 = vadd.f32 %v3138_v24, %v7053_v51  ;;  %v3202_v55 = vmax.f32 %v3024_v61, 0.0  ;;  %v3204_v56 = vmax.f32 %v3137_v14, 0.0 }
 0x7a4   :  { %v3027_v37 = vpop.f32.mrf.mxu0  ;;  %v3140_v8 = vpop.f32.mrf.mxu1 }
 0x7a5   :  { %v3028_v20 = vadd.f32 %v3027_v37, %v7044_v16  ;;  %v3141_v0 = vadd.f32 %v3140_v8, %v7046_v54  ;;  %v3205_v60 = vmax.f32 %v3026_v35, 0.0  ;;  %v3207_v40 = vmax.f32 %v3139_v49, 0.0 }
 0x7a6   :  { %v3031_v23 = vpop.f32.mrf.mxu0  ;;  %v3144_v39 = vpop.f32.mrf.mxu1 }
 0x7a7   :  { %v3206_v15 = vmax.f32 %v3028_v20, 0.0  ;;  %v3208_v58 = vmax.f32 %v3141_v0, 0.0  ;;  %v3241_v52 = vpack.c.bf16 %v3205_v60, %v3201_v12  ;;  %v3243_v21 = vpack.c.bf16 %v3207_v40, %v3203_v19 }
 0x7a8   :  { %v3033_v28 = vpop.f32.mrf.mxu0  ;;  %v3146_v25 = vpop.f32.mrf.mxu1  ;;  %v3032_v17 = vadd.f32 %v3031_v23, %v7049_v3  ;;  %v3145_v46 = vadd.f32 %v3144_v39, %v7053_v51 }
 0x7a9   :  { %v3242_v7 = vpack.c.bf16 %v3206_v15, %v3202_v55  ;;  %v3244_v11 = vpack.c.bf16 %v3208_v58, %v3204_v56  ;;  %v3034_v6 = vadd.f32 %v3033_v28, %v7044_v16  ;;  %v3147_v2 = vadd.f32 %v3146_v25, %v7046_v54 }
 0x7aa   :  { %v3035_v4 = vpop.f32.mrf.mxu0  ;;  %v3148_v41 = vpop.f32.mrf.mxu1  ;;  %v3209_v61 = vmax.f32 %v3032_v17, 0.0  ;;  %v3211_v14 = vmax.f32 %v3145_v46, 0.0 }
 0x7ab   :  { %v3036_v33 = vadd.f32 %v3035_v4, %v7049_v3  ;;  %v3149_v22 = vadd.f32 %v3148_v41, %v7053_v51  ;;  %3592 = vmatprep.mubr.bf16.mxu0 %v3242_v7  ;;  %3689 = vmatprep.mubr.bf16.mxu1 %v3244_v11  ;;  %v3210_v59 = vmax.f32 %v3034_v6, 0.0  ;;  %v3212_v45 = vmax.f32 %v3147_v2, 0.0 }
 0x7ac   :  { %v3037_v57 = vpop.f32.mrf.mxu0  ;;  %v3150_v63 = vpop.f32.mrf.mxu1  ;;  %3593 = vmatmul.mubr.bf16.gmra.mxu0 %v3241_v52  ;;  %3690 = vmatmul.mubr.bf16.gmra.mxu1 %v3243_v21 }
 0x7ad   :  { %v3038_v31 = vadd.f32 %v3037_v57, %v7044_v16  ;;  %v3151_v44 = vadd.f32 %v3150_v63, %v7046_v54  ;;  %v3213_v1 = vmax.f32 %v3036_v33, 0.0  ;;  %v3215_v38 = vmax.f32 %v3149_v22, 0.0  ;;  %v7122_v54 = vld [vmem:[%s7401_s11] ss:$0 sm:$0xff] }
 0x7af   :  { %v3214_v36 = vmax.f32 %v3038_v31, 0.0  ;;  %v3216_v24 = vmax.f32 %v3151_v44, 0.0  ;;  %v3245_v49 = vpack.c.bf16 %v3213_v1, %v3209_v61  ;;  %v3247_v51 = vpack.c.bf16 %v3215_v38, %v3211_v14 }
 0x7b1   :  { %v3246_v35 = vpack.c.bf16 %v3214_v36, %v3210_v59  ;;  %v3248_v3 = vpack.c.bf16 %v3216_v24, %v3212_v45 }
 0x7b3   :  { %3600 = vmatprep.mubr.bf16.mxu0 %v3246_v35  ;;  %3697 = vmatprep.mubr.bf16.mxu1 %v3248_v3 }
 0x7b4   :  { %3601 = vmatmul.mubr.bf16.gmra.mxu0 %v3245_v49  ;;  %3698 = vmatmul.mubr.bf16.gmra.mxu1 %v3247_v51 }
 0x7e4   :  { %v4229_v42 = vpop.f32.mrf.mxu0  ;;  %v4293_v16 = vpop.f32.mrf.mxu1 }
 0x7e6   :  { %v4230_v29 = vpop.f32.mrf.mxu0  ;;  %v4294_v37 = vpop.f32.mrf.mxu1 }
 0x7e7   :  { %v4231_v8 = vadd.f32 %v4230_v29, %v4229_v42  ;;  %v4295_v40 = vadd.f32 %v4294_v37, %v4293_v16 }
 0x7e8   :  { %v4232_v20 = vpop.f32.mrf.mxu0  ;;  %v4296_v0 = vpop.f32.mrf.mxu1 }
 0x7e9   :  { %v3547_v60 = vadd.f32 %v4231_v8, %v7122_v54 }
 0x7ea   :  { %v4233_v23 = vpop.f32.mrf.mxu0  ;;  %v4297_v39 = vpop.f32.mrf.mxu1 }
 0x7eb   :  { %v3644_v55 = vadd.f32 %v4295_v40, %v3547_v60  ;;  %v4234_v56 = vadd.f32 %v4233_v23, %v4232_v20  ;;  %v4298_v19 = vadd.f32 %v4297_v39, %v4296_v0 }
 0x7ec   :  { %v4235_v15 = vpop.f32.mrf.mxu0  ;;  %v4299_v58 = vpop.f32.mrf.mxu1 }
 0x7ed   :  { %v3550_v12 = vadd.f32 %v4234_v56, %v7122_v54  ;;  %v7127_v28 = vadd.f32 %v3644_v55, %v6933_v47 }
 0x7ee   :  { %v4236_v25 = vpop.f32.mrf.mxu0  ;;  %v4300_v7 = vpop.f32.mrf.mxu1 }
 0x7ef   :  { %v3647_v11 = vadd.f32 %v4298_v19, %v3550_v12  ;;  %v4237_v52 = vadd.f32 %v4236_v25, %v4235_v15  ;;  %3722 = vadd.xlane.f32.xlu0 %v7127_v28  ;;  %v4301_v41 = vadd.f32 %v4300_v7, %v4299_v58 }
 0x7f0   :  { %v4238_v21 = vpop.f32.mrf.mxu0  ;;  %v4302_v6 = vpop.f32.mrf.mxu1 }
 0x7f1   :  { %v3555_v4 = vadd.f32 %v4237_v52, %v7122_v54  ;;  %v7132_v2 = vadd.f32 %v3647_v11, %v6936_v53 }
 0x7f2   :  { %v4239_v33 = vpop.f32.mrf.mxu0  ;;  %v4303_v22 = vpop.f32.mrf.mxu1 }
 0x7f3   :  { %v3652_v17 = vadd.f32 %v4301_v41, %v3555_v4  ;;  %v4240_v46 = vadd.f32 %v4239_v33, %v4238_v21  ;;  %3724 = vadd.xlane.f32.xlu1 %v7132_v2  ;;  %v4304_v31 = vadd.f32 %v4303_v22, %v4302_v6 }
 0x7f4   :  { %v4241_v47 = vpop.f32.mrf.mxu0  ;;  %v4305_v57 = vpop.f32.mrf.mxu1 }
 0x7f5   :  { %v3558_v63 = vadd.f32 %v4240_v46, %v7122_v54  ;;  %v7137_v44 = vadd.f32 %v3652_v17, %v6951_v32 }
 0x7f6   :  { %v4242_v1 = vpop.f32.mrf.mxu0  ;;  %v4306_v38 = vpop.f32.mrf.mxu1 }
 0x7f7   :  { %v3655_v59 = vadd.f32 %v4304_v31, %v3558_v63  ;;  %v4243_v45 = vadd.f32 %v4242_v1, %v4241_v47  ;;  %3726 = vadd.xlane.f32.xlu0 %v7137_v44  ;;  %v4307_v61 = vadd.f32 %v4306_v38, %v4305_v57 }
 0x7f8   :  { %v4244_v53 = vpop.f32.mrf.mxu0  ;;  %v4308_v36 = vpop.f32.mrf.mxu1 }
 0x7f9   :  { %v3563_v24 = vadd.f32 %v4243_v45, %v7122_v54  ;;  %v7142_v14 = vadd.f32 %v3655_v59, %v6947_v18 }
 0x7fa   :  { %v4245_v35 = vpop.f32.mrf.mxu0  ;;  %v4309_v3 = vpop.f32.mrf.mxu1 }
 0x7fb   :  { %v3660_v49 = vadd.f32 %v4307_v61, %v3563_v24  ;;  %v4246_v51 = vadd.f32 %v4245_v35, %v4244_v53  ;;  %3728 = vadd.xlane.f32.xlu1 %v7142_v14  ;;  %v4310_v29 = vadd.f32 %v4309_v3, %v4308_v36 }
 0x7fc   :  { %v4247_v32 = vpop.f32.mrf.mxu0  ;;  %v4311_v42 = vpop.f32.mrf.mxu1 }
 0x7fd   :  { %v3566_v16 = vadd.f32 %v4246_v51, %v7122_v54  ;;  %v7147_v37 = vadd.f32 %v3660_v49, %v6965_v30 }
 0x7fe   :  { %v4248_v8 = vpop.f32.mrf.mxu0  ;;  %v4312_v20 = vpop.f32.mrf.mxu1 }
 0x7ff   :  { %v3663_v0 = vadd.f32 %v4310_v29, %v3566_v16  ;;  %v4249_v60 = vadd.f32 %v4248_v8, %v4247_v32  ;;  %3730 = vadd.xlane.f32.xlu0 %v7147_v37  ;;  %v4313_v39 = vadd.f32 %v4312_v20, %v4311_v42 }
 0x800   :  { %v4250_v18 = vpop.f32.mrf.mxu0  ;;  %v4314_v40 = vpop.f32.mrf.mxu1 }
 0x801   :  { %v3571_v23 = vadd.f32 %v4249_v60, %v7122_v54  ;;  %v7152_v55 = vadd.f32 %v3663_v0, %v6961_v34 }
 0x802   :  { %v4251_v56 = vpop.f32.mrf.mxu0  ;;  %v4315_v15 = vpop.f32.mrf.mxu1 }
 0x803   :  { %v3668_v58 = vadd.f32 %v4313_v39, %v3571_v23  ;;  %v4252_v12 = vadd.f32 %v4251_v56, %v4250_v18  ;;  %3732 = vadd.xlane.f32.xlu1 %v7152_v55  ;;  %v4316_v19 = vadd.f32 %v4315_v15, %v4314_v40 }
 0x805   :  { %v3574_v30 = vadd.f32 %v4252_v12, %v7122_v54  ;;  %v7157_v25 = vadd.f32 %v3668_v58, %v6978_v62 }
 0x807   :  { %v3671_v7 = vadd.f32 %v4316_v19, %v3574_v30  ;;  %3734 = vadd.xlane.f32.xlu0 %v7157_v25 }
 0x809   :  { %v7161_v11 = vadd.f32 %v3671_v7, %v6975_v26 }
 0x80b   :  { %3736 = vadd.xlane.f32.xlu1 %v7161_v11 }
 0x81f   :  { %v4253_v34 = vpop.f32.mrf.mxu0  ;;  %v4317_v52 = vpop.f32.mrf.mxu1 }
 0x821   :  { %v4254_v21 = vpop.f32.mrf.mxu0  ;;  %v4318_v6 = vpop.f32.mrf.mxu1 }
 0x822   :  { %v4255_v4 = vadd.f32 %v4254_v21, %v4253_v34  ;;  %v4319_v17 = vadd.f32 %v4318_v6, %v4317_v52 }
 0x823   :  { %v4256_v41 = vpop.f32.mrf.mxu0  ;;  %v4320_v33 = vpop.f32.mrf.mxu1 }
 0x824   :  { %v3579_v22 = vadd.f32 %v4255_v4, %v7122_v54 }
 0x825   :  { %v4257_v62 = vpop.f32.mrf.mxu0  ;;  %v4321_v46 = vpop.f32.mrf.mxu1 }
 0x826   :  { %v3676_v47 = vadd.f32 %v4319_v17, %v3579_v22  ;;  %v4258_v57 = vadd.f32 %v4257_v62, %v4256_v41  ;;  %v4322_v1 = vadd.f32 %v4321_v46, %v4320_v33 }
 0x827   :  { %v4259_v63 = vpop.f32.mrf.mxu0  ;;  %v4323_v31 = vpop.f32.mrf.mxu1 }
 0x828   :  { %v3582_v26 = vadd.f32 %v4258_v57, %v7122_v54  ;;  %v7167_v38 = vadd.f32 %v3676_v47, %v6989_v50 }
 0x829   :  { %v4260_v59 = vpop.f32.mrf.mxu0  ;;  %v4324_v45 = vpop.f32.mrf.mxu1 }
 0x82a   :  { %v3679_v53 = vadd.f32 %v4322_v1, %v3582_v26  ;;  %v4261_v36 = vadd.f32 %v4260_v59, %v4259_v63  ;;  %3738 = vadd.xlane.f32.xlu0 %v7167_v38  ;;  %v4325_v3 = vadd.f32 %v4324_v45, %v4323_v31 }
 0x82b   :  { %v4262_v24 = vpop.f32.mrf.mxu0  ;;  %v4326_v61 = vpop.f32.mrf.mxu1 }
 0x82c   :  { %v3587_v35 = vadd.f32 %v4261_v36, %v7122_v54  ;;  %v7172_v49 = vadd.f32 %v3679_v53, %v6992_v10 }
 0x82d   :  { %v4263_v51 = vpop.f32.mrf.mxu0  ;;  %v4327_v32 = vpop.f32.mrf.mxu1 }
 0x82e   :  { %v3684_v42 = vadd.f32 %v4325_v3, %v3587_v35  ;;  %v4264_v16 = vadd.f32 %v4263_v51, %v4262_v24  ;;  %3740 = vadd.xlane.f32.xlu1 %v7172_v49  ;;  %v4328_v29 = vadd.f32 %v4327_v32, %v4326_v61 }
 0x830   :  { %v3590_v50 = vadd.f32 %v4264_v16, %v7122_v54  ;;  %v7177_v8 = vadd.f32 %v3684_v42, %v7006_v5 }
 0x832   :  { %v3687_v20 = vadd.f32 %v4328_v29, %v3590_v50  ;;  %3742 = vadd.xlane.f32.xlu0 %v7177_v8 }
 0x834   :  { %v7181_v0 = vadd.f32 %v3687_v20, %v7003_v27 }
 0x836   :  { %3744 = vadd.xlane.f32.xlu1 %v7181_v0 }
 0x86c   :  { %v4265_v10 = vpop.f32.mrf.mxu0  ;;  %v4329_v60 = vpop.f32.mrf.mxu1 }
 0x86e   :  { %v4266_v18 = vpop.f32.mrf.mxu0  ;;  %v4330_v40 = vpop.f32.mrf.mxu1 }
 0x86f   :  { %v4267_v23 = vadd.f32 %v4266_v18, %v4265_v10  ;;  %v4331_v58 = vadd.f32 %v4330_v40, %v4329_v60 }
 0x870   :  { %v4268_v39 = vpop.f32.mrf.mxu0  ;;  %v4332_v56 = vpop.f32.mrf.mxu1 }
 0x871   :  { %v3595_v15 = vadd.f32 %v4267_v23, %v7122_v54 }
 0x872   :  { %v4269_v5 = vpop.f32.mrf.mxu0  ;;  %v4333_v12 = vpop.f32.mrf.mxu1 }
 0x873   :  { %v3692_v30 = vadd.f32 %v4331_v58, %v3595_v15  ;;  %v4270_v19 = vadd.f32 %v4269_v5, %v4268_v39  ;;  %v4334_v52 = vadd.f32 %v4333_v12, %v4332_v56 }
 0x874   :  { %v4271_v7 = vpop.f32.mrf.mxu0  ;;  %v4335_v34 = vpop.f32.mrf.mxu1 }
 0x875   :  { %v3598_v27 = vadd.f32 %v4270_v19, %v7122_v54  ;;  %v7187_v21 = vadd.f32 %v3692_v30, %v7017_v13 }
 0x876   :  { %v4272_v6 = vpop.f32.mrf.mxu0  ;;  %v4336_v4 = vpop.f32.mrf.mxu1 }
 0x877   :  { %v3695_v41 = vadd.f32 %v4334_v52, %v3598_v27  ;;  %v4273_v33 = vadd.f32 %v4272_v6, %v4271_v7  ;;  %3746 = vadd.xlane.f32.xlu0 %v7187_v21  ;;  %v4337_v46 = vadd.f32 %v4336_v4, %v4335_v34 }
 0x878   :  { %v4338_v22 = vpop.f32.mrf.mxu1  ;;  %v3723_v17 = vpop.xlane.xlu0 %3722 }
 0x879   :  { %v3603_v62 = vadd.f32 %v4273_v33, %v7122_v54  ;;  %v3754_v47 = vmul.f32 0.0078125, %v3723_v17  ;;  %v4274_v57 = vpop.f32.mrf.mxu0  ;;  %v7192_v63 = vadd.f32 %v3695_v41, %v7020_v9 }
 0x87a   :  { %v4339_v13 = vpop.f32.mrf.mxu1 }
 0x87b   :  { %v3700_v31 = vadd.f32 %v4337_v46, %v3603_v62  ;;  %v4275_v26 = vpop.f32.mrf.mxu0  ;;  %3748 = vadd.xlane.f32.xlu1 %v7192_v63  ;;  %v7196_v45 = vsub.f32 %v7127_v28, %v3754_v47  ;;  %v4340_v24 = vadd.f32 %v4339_v13, %v4338_v22 }
 0x87c   :  { %v4276_v1 = vadd.f32 %v4275_v26, %v4274_v57  ;;  %v3725_v59 = vpop.xlane.xlu1 %3724 }
 0x87d   :  { %v7199_v53 = vadd.f32 %v3700_v31, %v7034_v43  ;;  %v3755_v61 = vmul.f32 0.0078125, %v3725_v59  ;;  %v3786_v51 = vmul.f32 %v7196_v45, %v7196_v45 }
 0x87e   :  { %v3606_v36 = vadd.f32 %v4276_v1, %v7122_v54 }
 0x87f   :  { %3750 = vadd.xlane.f32.xlu0 %v7199_v53  ;;  %v7206_v32 = vsub.f32 %v7132_v2, %v3755_v61 }
 0x880   :  { %v3703_v9 = vadd.f32 %v4340_v24, %v3606_v36  ;;  %v3727_v35 = vpop.xlane.xlu0 %3726 }
 0x881   :  { %v3756_v3 = vmul.f32 0.0078125, %v3727_v35  ;;  %v3787_v50 = vmul.f32 %v7206_v32, %v7206_v32 }
 0x882   :  { %v7209_v28 = vadd.f32 %v3703_v9, %v7031_v48 }
 0x883   :  { %v7212_v43 = vsub.f32 %v7137_v44, %v3756_v3  ;;  %3802 = vadd.xlane.f32.xlu0 %v3786_v51 }
 0x884   :  { %3752 = vadd.xlane.f32.xlu1 %v7209_v28  ;;  %v3729_v54 = vpop.xlane.xlu1 %3728 }
 0x885   :  { %v3757_v42 = vmul.f32 0.0078125, %v3729_v54  ;;  %v3788_v16 = vmul.f32 %v7212_v43, %v7212_v43 }
 0x887   :  { %v7220_v2 = vsub.f32 %v7142_v14, %v3757_v42  ;;  %3806 = vadd.xlane.f32.xlu0 %v3788_v16 }
 0x888   :  { %3804 = vadd.xlane.f32.xlu1 %v3787_v50  ;;  %v3731_v48 = vpop.xlane.xlu0 %3730 }
 0x889   :  { %v3758_v29 = vmul.f32 0.0078125, %v3731_v48  ;;  %v3789_v44 = vmul.f32 %v7220_v2, %v7220_v2 }
 0x88b   :  { %v7225_v20 = vsub.f32 %v7147_v37, %v3758_v29 }
 0x88c   :  { %3808 = vadd.xlane.f32.xlu1 %v3789_v44  ;;  %v3733_v10 = vpop.xlane.xlu1 %3732 }
 0x88d   :  { %v3759_v60 = vmul.f32 0.0078125, %v3733_v10  ;;  %v3790_v18 = vmul.f32 %v7225_v20, %v7225_v20 }
 0x88f   :  { %v7230_v40 = vsub.f32 %v7152_v55, %v3759_v60  ;;  %3810 = vadd.xlane.f32.xlu0 %v3790_v18 }
 0x890   :  { %v3735_v14 = vpop.xlane.xlu0 %3734 }
 0x891   :  { %v3760_v23 = vmul.f32 0.0078125, %v3735_v14  ;;  %v3791_v39 = vmul.f32 %v7230_v40, %v7230_v40 }
 0x893   :  { %v7235_v56 = vsub.f32 %v7157_v25, %v3760_v23  ;;  %3812 = vadd.xlane.f32.xlu1 %v3791_v39  ;;  %v7287_v23 = vld [vmem:[%s7402_s12] ss:$0 sm:$0xff] }
 0x894   :  { %v3737_v37 = vpop.xlane.xlu1 %3736 }
 0x895   :  { %v3761_v15 = vmul.f32 0.0078125, %v3737_v37  ;;  %v3792_v58 = vmul.f32 %v7235_v56, %v7235_v56 }
 0x897   :  { %v7240_v5 = vsub.f32 %v7161_v11, %v3761_v15  ;;  %3814 = vadd.xlane.f32.xlu0 %v3792_v58  ;;  %v7293_v15 = vld [vmem:[%s7403_s13] ss:$0 sm:$0xff] }
 0x899   :  { %v3793_v55 = vmul.f32 %v7240_v5, %v7240_v5 }
 0x89b   :  { %3816 = vadd.xlane.f32.xlu1 %v3793_v55 }
 0x8b3   :  { %v3739_v12 = vpop.xlane.xlu0 %3738 }
 0x8b4   :  { %v3762_v30 = vmul.f32 0.0078125, %v3739_v12 }
 0x8b6   :  { %v7245_v19 = vsub.f32 %v7167_v38, %v3762_v30 }
 0x8b7   :  { %v3741_v25 = vpop.xlane.xlu1 %3740 }
 0x8b8   :  { %v3763_v7 = vmul.f32 0.0078125, %v3741_v25  ;;  %v3794_v34 = vmul.f32 %v7245_v19, %v7245_v19 }
 0x8ba   :  { %v7250_v27 = vsub.f32 %v7172_v49, %v3763_v7  ;;  %3818 = vadd.xlane.f32.xlu0 %v3794_v34 }
 0x8bb   :  { %v3743_v11 = vpop.xlane.xlu0 %3742 }
 0x8bc   :  { %v3764_v52 = vmul.f32 0.0078125, %v3743_v11  ;;  %v3795_v6 = vmul.f32 %v7250_v27, %v7250_v27 }
 0x8be   :  { %v7255_v4 = vsub.f32 %v7177_v8, %v3764_v52  ;;  %3820 = vadd.xlane.f32.xlu1 %v3795_v6 }
 0x8bf   :  { %v3745_v38 = vpop.xlane.xlu1 %3744 }
 0x8c0   :  { %v3765_v41 = vmul.f32 0.0078125, %v3745_v38  ;;  %v3796_v33 = vmul.f32 %v7255_v4, %v7255_v4 }
 0x8c2   :  { %v7260_v22 = vsub.f32 %v7181_v0, %v3765_v41  ;;  %3822 = vadd.xlane.f32.xlu0 %v3796_v33 }
 0x8c4   :  { %v3797_v49 = vmul.f32 %v7260_v22, %v7260_v22 }
 0x8c6   :  { %3824 = vadd.xlane.f32.xlu1 %v3797_v49 }
 0x900   :  { %v3747_v17 = vpop.xlane.xlu0 %3746 }
 0x901   :  { %v3766_v62 = vmul.f32 0.0078125, %v3747_v17 }
 0x903   :  { %v7265_v46 = vsub.f32 %v7187_v21, %v3766_v62 }
 0x904   :  { %v3749_v8 = vpop.xlane.xlu1 %3748 }
 0x905   :  { %v3767_v47 = vmul.f32 0.0078125, %v3749_v8  ;;  %v3798_v57 = vmul.f32 %v7265_v46, %v7265_v46 }
 0x907   :  { %v7270_v31 = vsub.f32 %v7192_v63, %v3767_v47  ;;  %3826 = vadd.xlane.f32.xlu0 %v3798_v57 }
 0x908   :  { %v3751_v0 = vpop.xlane.xlu0 %3750 }
 0x909   :  { %v3768_v26 = vmul.f32 0.0078125, %v3751_v0  ;;  %v3799_v13 = vmul.f32 %v7270_v31, %v7270_v31 }
 0x90b   :  { %v7275_v1 = vsub.f32 %v7199_v53, %v3768_v26  ;;  %3828 = vadd.xlane.f32.xlu1 %v3799_v13 }
 0x90c   :  { %v3803_v21 = vpop.xlane.xlu0 %3802 }
 0x90d   :  { %v3753_v59 = vpop.xlane.xlu1 %3752  ;;  %v3834_v36 = vmul.f32 0.0078125, %v3803_v21  ;;  %v3800_v24 = vmul.f32 %v7275_v1, %v7275_v1 }
 0x90e   :  { %v3769_v61 = vmul.f32 0.0078125, %v3753_v59 }
 0x90f   :  { %v3850_v9 = vadd.f32 1e-05, %v3834_v36  ;;  %3830 = vadd.xlane.f32.xlu0 %v3800_v24 }
 0x910   :  { %v7280_v63 = vsub.f32 %v7209_v28, %v3769_v61  ;;  %v3807_v35 = vpop.xlane.xlu0 %3806 }
 0x911   :  { %4983 = vrsqrt.f32 %v3850_v9  ;;  %v3805_v3 = vpop.xlane.xlu1 %3804  ;;  %v3836_v51 = vmul.f32 0.0078125, %v3807_v35 }
 0x912   :  { %v3835_v54 = vmul.f32 0.0078125, %v3805_v3  ;;  %v3801_v53 = vmul.f32 %v7280_v63, %v7280_v63 }
 0x913   :  { %v3852_v42 = vadd.f32 1e-05, %v3836_v51 }
 0x914   :  { %v3851_v16 = vadd.f32 1e-05, %v3835_v54  ;;  %3832 = vadd.xlane.f32.xlu1 %v3801_v53 }
 0x915   :  { %4985 = vrsqrt.f32 %v3852_v42  ;;  %v3809_v50 = vpop.xlane.xlu1 %3808 }
 0x916   :  { %4987 = vrsqrt.f32 %v3851_v16  ;;  %v3837_v48 = vmul.f32 0.0078125, %v3809_v50 }
 0x918   :  { %v3853_v29 = vadd.f32 1e-05, %v3837_v48  ;;  %v3811_v44 = vpop.xlane.xlu0 %3810 }
 0x919   :  { %v3838_v10 = vmul.f32 0.0078125, %v3811_v44 }
 0x91a   :  { %4989 = vrsqrt.f32 %v3853_v29 }
 0x91b   :  { %v3854_v28 = vadd.f32 1e-05, %v3838_v10 }
 0x91c   :  { %v3813_v60 = vpop.xlane.xlu1 %3812 }
 0x91d   :  { %4991 = vrsqrt.f32 %v3854_v28  ;;  %v3839_v18 = vmul.f32 0.0078125, %v3813_v60 }
 0x91e   :  { %v4984_v14 = vpop.eup %4983 }
 0x91f   :  { %v3882_v39 = vmul.f32 %v4984_v14, %v7196_v45  ;;  %v3855_v37 = vadd.f32 1e-05, %v3839_v18 }
 0x920   :  { %v3815_v58 = vpop.xlane.xlu0 %3814 }
 0x921   :  { %v3905_v55 = vmul.f32 %v7287_v23, %v3882_v39  ;;  %4993 = vrsqrt.f32 %v3855_v37  ;;  %v3840_v12 = vmul.f32 0.0078125, %v3815_v58 }
 0x922   :  { %v4986_v30 = vpop.eup %4985 }
 0x923   :  { %v4988_v25 = vpop.eup %4987  ;;  %v3928_v7 = vadd.f32 %v7293_v15, %v3905_v55  ;;  %v3884_v34 = vmul.f32 %v4986_v30, %v7212_v43  ;;  %v3856_v11 = vadd.f32 1e-05, %v3840_v12 }
 0x924   :  { %v3883_v45 = vmul.f32 %v4988_v25, %v7206_v32  ;;  %v3817_v52 = vpop.xlane.xlu1 %3816 }
 0x925   :  { %3944 = vst [vmem:[%s7404_s14] sm:$0xff] %v3928_v7  ;;  %v3907_v6 = vmul.f32 %v7287_v23, %v3884_v34  ;;  %4995 = vrsqrt.f32 %v3856_v11  ;;  %v3841_v38 = vmul.f32 0.0078125, %v3817_v52 }
 0x926   :  { %v3906_v41 = vmul.f32 %v7287_v23, %v3883_v45 }
 0x927   :  { %v4990_v33 = vpop.eup %4989  ;;  %v3930_v49 = vadd.f32 %v7293_v15, %v3907_v6  ;;  %v3857_v17 = vadd.f32 1e-05, %v3841_v38 }
 0x928   :  { %v3929_v43 = vadd.f32 %v7293_v15, %v3906_v41  ;;  %v3885_v62 = vmul.f32 %v4990_v33, %v7220_v2 }
 0x929   :  { %3946 = vst [vmem:[%s7404_s14 + $0x10] sm:$0xff] %v3930_v49  ;;  %4997 = vrsqrt.f32 %v3857_v17 }
 0x92a   :  { %v4992_v32 = vpop.eup %4991  ;;  %3945 = vst [vmem:[%s7404_s14 + $0x8] sm:$0xff] %v3929_v43  ;;  %v3908_v8 = vmul.f32 %v7287_v23, %v3885_v62 }
 0x92b   :  { %v3886_v47 = vmul.f32 %v4992_v32, %v7225_v20 }
 0x92c   :  { %v3931_v57 = vadd.f32 %v7293_v15, %v3908_v8 }
 0x92d   :  { %v3909_v0 = vmul.f32 %v7287_v23, %v3886_v47 }
 0x92e   :  { %v4994_v26 = vpop.eup %4993  ;;  %3947 = vst [vmem:[%s7404_s14 + $0x18] sm:$0xff] %v3931_v57 }
 0x92f   :  { %v3932_v2 = vadd.f32 %v7293_v15, %v3909_v0  ;;  %v3887_v13 = vmul.f32 %v4994_v26, %v7230_v40 }
 0x931   :  { %3948 = vst [vmem:[%s7404_s14 + $0x20] sm:$0xff] %v3932_v2  ;;  %v3910_v21 = vmul.f32 %v7287_v23, %v3887_v13 }
 0x932   :  { %v4996_v20 = vpop.eup %4995 }
 0x933   :  { %v3933_v59 = vadd.f32 %v7293_v15, %v3910_v21  ;;  %v3888_v36 = vmul.f32 %v4996_v20, %v7235_v56 }
 0x935   :  { %3949 = vst [vmem:[%s7404_s14 + $0x28] sm:$0xff] %v3933_v59  ;;  %v3911_v24 = vmul.f32 %v7287_v23, %v3888_v36 }
 0x936   :  { %v4998_v61 = vpop.eup %4997 }
 0x937   :  { %v3934_v40 = vadd.f32 %v7293_v15, %v3911_v24  ;;  %v3889_v9 = vmul.f32 %v4998_v61, %v7240_v5 }
 0x939   :  { %3950 = vst [vmem:[%s7404_s14 + $0x30] sm:$0xff] %v3934_v40  ;;  %v3912_v35 = vmul.f32 %v7287_v23, %v3889_v9 }
 0x93b   :  { %v3935_v3 = vadd.f32 %v7293_v15, %v3912_v35 }
 0x93d   :  { %3951 = vst [vmem:[%s7404_s14 + $0x38] sm:$0xff] %v3935_v3 }
 0x943   :  { %v3819_v56 = vpop.xlane.xlu0 %3818 }
 0x944   :  { %v3842_v51 = vmul.f32 0.0078125, %v3819_v56 }
 0x946   :  { %v3858_v54 = vadd.f32 1e-05, %v3842_v51 }
 0x947   :  { %v3821_v53 = vpop.xlane.xlu1 %3820 }
 0x948   :  { %4999 = vrsqrt.f32 %v3858_v54  ;;  %v3843_v42 = vmul.f32 0.0078125, %v3821_v53 }
 0x94a   :  { %v3859_v16 = vadd.f32 1e-05, %v3843_v42 }
 0x94b   :  { %v3823_v5 = vpop.xlane.xlu0 %3822 }
 0x94c   :  { %5001 = vrsqrt.f32 %v3859_v16  ;;  %v3844_v50 = vmul.f32 0.0078125, %v3823_v5 }
 0x94e   :  { %v3860_v48 = vadd.f32 1e-05, %v3844_v50 }
 0x94f   :  { %v3825_v29 = vpop.xlane.xlu1 %3824 }
 0x950   :  { %5003 = vrsqrt.f32 %v3860_v48  ;;  %v3845_v44 = vmul.f32 0.0078125, %v3825_v29 }
 0x952   :  { %v3861_v10 = vadd.f32 1e-05, %v3845_v44 }
 0x954   :  { %5005 = vrsqrt.f32 %v3861_v10 }
 0x955   :  { %v5000_v28 = vpop.eup %4999 }
 0x956   :  { %v3890_v60 = vmul.f32 %v5000_v28, %v7245_v19 }
 0x958   :  { %v3913_v18 = vmul.f32 %v7287_v23, %v3890_v60 }
 0x959   :  { %v5002_v14 = vpop.eup %5001 }
 0x95a   :  { %v3936_v39 = vadd.f32 %v7293_v15, %v3913_v18  ;;  %v3891_v37 = vmul.f32 %v5002_v14, %v7250_v27 }
 0x95c   :  { %3952 = vst [vmem:[%s7404_s14 + $0x40] sm:$0xff] %v3936_v39  ;;  %v3914_v58 = vmul.f32 %v7287_v23, %v3891_v37 }
 0x95d   :  { %v5004_v55 = vpop.eup %5003 }
 0x95e   :  { %v3937_v12 = vadd.f32 %v7293_v15, %v3914_v58  ;;  %v3892_v30 = vmul.f32 %v5004_v55, %v7255_v4 }
 0x960   :  { %3953 = vst [vmem:[%s7404_s14 + $0x48] sm:$0xff] %v3937_v12  ;;  %v3915_v19 = vmul.f32 %v7287_v23, %v3892_v30 }
 0x961   :  { %v5006_v25 = vpop.eup %5005 }
 0x962   :  { %v3938_v27 = vadd.f32 %v7293_v15, %v3915_v19  ;;  %v3893_v7 = vmul.f32 %v5006_v25, %v7260_v22 }
 0x964   :  { %3954 = vst [vmem:[%s7404_s14 + $0x50] sm:$0xff] %v3938_v27  ;;  %v3916_v34 = vmul.f32 %v7287_v23, %v3893_v7 }
 0x966   :  { %v3939_v11 = vadd.f32 %v7293_v15, %v3916_v34 }
 0x968   :  { %3955 = vst [vmem:[%s7404_s14 + $0x58] sm:$0xff] %v3939_v11 }
 0x990   :  { %v3827_v4 = vpop.xlane.xlu0 %3826 }
 0x991   :  { %v3846_v45 = vmul.f32 0.0078125, %v3827_v4 }
 0x993   :  { %v3862_v52 = vadd.f32 1e-05, %v3846_v45 }
 0x994   :  { %v3829_v6 = vpop.xlane.xlu1 %3828 }
 0x995   :  { %5007 = vrsqrt.f32 %v3862_v52  ;;  %v3847_v38 = vmul.f32 0.0078125, %v3829_v6 }
 0x997   :  { %v3863_v41 = vadd.f32 1e-05, %v3847_v38 }
 0x998   :  { %v3831_v22 = vpop.xlane.xlu0 %3830 }
 0x999   :  { %5009 = vrsqrt.f32 %v3863_v41  ;;  %v3848_v33 = vmul.f32 0.0078125, %v3831_v22 }
 0x99b   :  { %v3864_v49 = vadd.f32 1e-05, %v3848_v33 }
 0x99d   :  { %5011 = vrsqrt.f32 %v3864_v49  ;;  %v3833_v17 = vpop.xlane.xlu1 %3832 }
 0x99e   :  { %v3849_v43 = vmul.f32 0.0078125, %v3833_v17 }
 0x9a0   :  { %v3865_v62 = vadd.f32 1e-05, %v3849_v43 }
 0x9a2   :  { %v5008_v32 = vpop.eup %5007  ;;  %5013 = vrsqrt.f32 %v3865_v62 }
 0x9a3   :  { %v3894_v8 = vmul.f32 %v5008_v32, %v7265_v46 }
 0x9a5   :  { %v3917_v47 = vmul.f32 %v7287_v23, %v3894_v8 }
 0x9a6   :  { %v5010_v57 = vpop.eup %5009 }
 0x9a7   :  { %v3940_v0 = vadd.f32 %v7293_v15, %v3917_v47  ;;  %v3895_v26 = vmul.f32 %v5010_v57, %v7270_v31 }
 0x9a9   :  { %3956 = vst [vmem:[%s7404_s14 + $0x60] sm:$0xff] %v3940_v0  ;;  %v3918_v2 = vmul.f32 %v7287_v23, %v3895_v26 }
 0x9aa   :  { %v5012_v13 = vpop.eup %5011 }
 0x9ab   :  { %v3941_v21 = vadd.f32 %v7293_v15, %v3918_v2  ;;  %v3896_v20 = vmul.f32 %v5012_v13, %v7275_v1 }
 0x9ad   :  { %3957 = vst [vmem:[%s7404_s14 + $0x68] sm:$0xff] %v3941_v21  ;;  %v3919_v46 = vmul.f32 %v7287_v23, %v3896_v20 }
 0x9af   :  { %v5014_v59 = vpop.eup %5013  ;;  %v3942_v31 = vadd.f32 %v7293_v15, %v3919_v46 }
 0x9b0   :  { %v3897_v36 = vmul.f32 %v5014_v59, %v7280_v63 }
 0x9b1   :  { %3958 = vst [vmem:[%s7404_s14 + $0x70] sm:$0xff] %v3942_v31 }
 0x9b2   :  { %v3920_v24 = vmul.f32 %v7287_v23, %v3897_v36 }
 0x9b4   :  { %v3943_v61 = vadd.f32 %v7293_v15, %v3920_v24 }
 0x9b6   :  { %3959 = vst [vmem:[%s7404_s14 + $0x78] sm:$0xff] %v3943_v61 }
 0x9b7   :  { %3964 = vsyncpa [#allocation3], 1 }
 0x9b8   :  { %3965 = vsyncpa [#allocation5], 1 }

// kernel: _lambda_.3
= control target key start
LH: loop header
LB: loop body
LE: loop exit
PB: predicated region body
PF: predicated region fallthrough
CT: control target
= control target key end

     0   :  { %v7468_v1 = vmov 0   ;;  %v106_v49 = vlaneseq  ;;  %v4982_v52 = vmov 1966171168   ;;  %v4983_v59 = vmov 0.0   ;;  %s7452_s1 = inlined_call_operand.vmem [shape: bf16[128,384], index: 1, kind: input, shape index: {}]   ;;  %s7453_s0 = inlined_call_operand.vmem [shape: f32[128,128], index: 0, kind: input, shape index: {}]   ;;  %s7454_s2 = inlined_call_operand.vmem [shape: f32[1,384], index: 2, kind: input, shape index: {}]   ;;  %s7455_s5 = inlined_call_operand.vmem [shape: f32[256,64], index: 5, kind: input, shape index: {}]   ;;  %s7456_s3 = inlined_call_operand.vmem [shape: bf16[128,128], index: 3, kind: input, shape index: {}]   ;;  %s7457_s4 = inlined_call_operand.vmem [shape: f32[1,128], index: 4, kind: input, shape index: {}]   ;;  %s7458_s8 = inlined_call_operand.vmem [shape: bf16[128,512], index: 8, kind: input, shape index: {}]   ;;  %s7459_s6 = inlined_call_operand.vmem [shape: f32[1,128], index: 6, kind: input, shape index: {}]   ;;  %s7460_s7 = inlined_call_operand.vmem [shape: f32[1,128], index: 7, kind: input, shape index: {}]   ;;  %s7461_s10 = inlined_call_operand.vmem [shape: bf16[512,128], index: 10, kind: input, shape index: {}]   ;;  %s7462_s9 = inlined_call_operand.vmem [shape: f32[1,512], index: 9, kind: input, shape index: {}]   ;;  %s7463_s11 = inlined_call_operand.vmem [shape: f32[1,128], index: 11, kind: input, shape index: {}]   ;;  %s7464_s12 = inlined_call_operand.vmem [shape: f32[1,128], index: 12, kind: input, shape index: {}]   ;;  %s7465_s13 = inlined_call_operand.vmem [shape: f32[1,128], index: 13, kind: input, shape index: {}]   ;;  %s7466_s14 = inlined_call_operand.vmem [shape: f32[128,128], index: 14, kind: output, shape index: {}]  }
   0x1   :  { %v4525_v0 = vld [vmem:[%s7452_s1 + $0xac] ss:$12 sps:$4 sm:$0xff]   ;;  %281 = vmatprep.mubr.bf16.mxu0 %v7468_v1  ;;  %v4527_v2 = vld [vmem:[%s7452_s1 + $0xa8] ss:$12 sps:$4 sm:$0xff]   ;;  %v4530_v4 = vld [vmem:[%s7452_s1 + $0x90] ss:$12 sps:$4 sm:$0xff]   ;;  %v513_v53 = vunpack.c.l.s4 %v4982_v52 }
   0x2   :  { %249 = vmatprep.subr.bf16.mxu0 %v4525_v0  ;;  %v4528_v3 = vld [vmem:[%s7452_s1 + $0x94] ss:$12 sps:$4 sm:$0xff]   ;;  %v4531_v5 = vld [vmem:[%s7452_s1 + $0x7c] ss:$12 sps:$4 sm:$0xff]   ;;  %v4533_v6 = vld [vmem:[%s7452_s1 + $0x78] ss:$12 sps:$4 sm:$0xff]  }
   0x3   :  { %250 = vmatpush1.bf16.msra.mxu0 %v4527_v2  ;;  %v4534_v7 = vld [vmem:[%s7452_s1 + $0x64] ss:$12 sps:$4 sm:$0xff]   ;;  %v4536_v9 = vld [vmem:[%s7452_s1 + $0x60] ss:$12 sps:$4 sm:$0xff]   ;;  %v4539_v13 = vld [vmem:[%s7452_s1 + $0x48] ss:$12 sps:$4 sm:$0xff]   ;;  %v514_v57 = vunpack.c.0.s8 %v513_v53 }
   0x4   :  { %251 = vmatprep.subr.bf16.mxu0 %v4528_v3  ;;  %v48_v8 = vld [vmem:[%s7453_s0] sm:$0xff]  ;;  %v49_v10 = vld [vmem:[%s7453_s0 + $0x8] sm:$0xff]  ;;  %v4549_v15 = vld [vmem:[%s7452_s1 + $0xb0] ss:$12 sps:$4 sm:$0xff]   ;;  %v5186_v50 = vshrl.u32 %v106_v49, 7  ;;  %v460_v54 = vand.u32 127, %v106_v49 }
   0x5   :  { %v4537_v11 = vld [vmem:[%s7452_s1 + $0x4c] ss:$12 sps:$4 sm:$0xff]   ;;  %v64_v12 = vpack.c.bf16 %v49_v10, %v48_v8  ;;  %v4540_v14 = vld [vmem:[%s7452_s1 + $0x34] ss:$12 sps:$4 sm:$0xff]   ;;  %v4542_v17 = vld [vmem:[%s7452_s1 + $0x30] ss:$12 sps:$4 sm:$0xff]   ;;  %4298 = vmatprep.subr.bf16.mxu1 %v4549_v15 }
   0x6   :  { %v4550_v16 = vld [vmem:[%s7452_s1 + $0x98] ss:$12 sps:$4 sm:$0xff]   ;;  %v4543_v18 = vld [vmem:[%s7452_s1 + $0x1c] ss:$12 sps:$4 sm:$0xff]   ;;  %4299 = vmatpush3.bf16.msra.mxu1 %v4549_v15  ;;  %v4551_v19 = vld [vmem:[%s7452_s1 + $0x80] ss:$12 sps:$4 sm:$0xff]   ;;  %v517_v58 = vsub.s32 %v514_v57, %v5186_v50 }
   0x7   :  { %252 = vmatpush1.bf16.msra.mxu0 %v4530_v4  ;;  %4314 = vmatprep.mubr.bf16.mxu1 %v64_v12  ;;  %v4545_v20 = vld [vmem:[%s7452_s1 + $0x18] ss:$12 sps:$4 sm:$0xff]   ;;  %v4552_v22 = vld [vmem:[%s7452_s1 + $0x68] ss:$12 sps:$4 sm:$0xff]   ;;  %v4548_v23 = vld [vmem:[%s7452_s1] ss:$12 sps:$4 sm:$0xff]  }
   0x8   :  { %253 = vmatprep.subr.bf16.mxu0 %v4531_v5  ;;  %4300 = vmatprep.subr.bf16.mxu1 %v4550_v16  ;;  %v4546_v21 = vld [vmem:[%s7452_s1 + $0x4] ss:$12 sps:$4 sm:$0xff]   ;;  %v51_v27 = vld [vmem:[%s7453_s0 + $0x18] sm:$0xff]  ;;  %v4555_v28 = vld [vmem:[%s7452_s1 + $0x20] ss:$12 sps:$4 sm:$0xff]   ;;  %7525 = vst [vmem:[#allocation2_spill] sm:$0xff] %v5186_v50 }
   0x9   :  { %v4553_v24 = vld [vmem:[%s7452_s1 + $0x50] ss:$12 sps:$4 sm:$0xff]   ;;  %v4554_v25 = vld [vmem:[%s7452_s1 + $0x38] ss:$12 sps:$4 sm:$0xff]   ;;  %v4556_v30 = vld [vmem:[%s7452_s1 + $0x8] ss:$12 sps:$4 sm:$0xff]  }
   0xa   :  { %4301 = vmatpush3.bf16.msra.mxu1 %v4550_v16  ;;  %v50_v26 = vld [vmem:[%s7453_s0 + $0x10] sm:$0xff]  ;;  %v52_v31 = vld [vmem:[%s7453_s0 + $0x20] sm:$0xff]  ;;  %v53_v32 = vld [vmem:[%s7453_s0 + $0x28] sm:$0xff]  ;;  %v465_v51 = vadd.s32 1, %v5186_v50  ;;  %v463_v55 = vmul.u32 32, %v5186_v50  ;;  %v5193_v0 = vsub.s32 0, %v5186_v50 }
   0xb   :  { %254 = vmatpush1.bf16.msra.mxu0 %v4533_v6  ;;  %4302 = vmatprep.subr.bf16.mxu1 %v4551_v19  ;;  %v65_v29 = vpack.c.bf16 %v51_v27, %v50_v26  ;;  %v66_v33 = vpack.c.bf16 %v53_v32, %v52_v31  ;;  %v54_v34 = vld [vmem:[%s7453_s0 + $0x30] sm:$0xff]  ;;  %v55_v35 = vld [vmem:[%s7453_s0 + $0x38] sm:$0xff]  ;;  %v56_v37 = vld [vmem:[%s7453_s0 + $0x40] sm:$0xff]  ;;  %vm765_vm3 = vcmask 523264  }
   0xc   :  { %255 = vmatprep.subr.bf16.mxu0 %v4534_v7  ;;  %v67_v36 = vpack.c.bf16 %v55_v35, %v54_v34  ;;  %v57_v38 = vld [vmem:[%s7453_s0 + $0x48] sm:$0xff]  ;;  %v58_v40 = vld [vmem:[%s7453_s0 + $0x50] sm:$0xff]  ;;  %v59_v41 = vld [vmem:[%s7453_s0 + $0x58] sm:$0xff]  ;;  %v466_v56 = vmul.u32 32, %v465_v51  ;;  %vm464_vm0 = vcmp.ge.s32.totalorder %v460_v54, %v463_v55  ;;  %7526 = vst [vmem:[#allocation3_spill] sm:$0xff] %v5193_v0 }
   0xd   :  { %v68_v39 = vpack.c.bf16 %v57_v38, %v56_v37  ;;  %v60_v42 = vld [vmem:[%s7453_s0 + $0x60] sm:$0xff]  ;;  %v61_v43 = vld [vmem:[%s7453_s0 + $0x68] sm:$0xff]  ;;  %v69_v44 = vpack.c.bf16 %v59_v41, %v58_v40  ;;  %v62_v46 = vld [vmem:[%s7453_s0 + $0x70] sm:$0xff]  ;;  %v7467_v38 = vsub.s32 1, %v5186_v50 }
   0xe   :  { %4303 = vmatpush3.bf16.msra.mxu1 %v4551_v19  ;;  %v70_v45 = vpack.c.bf16 %v61_v43, %v60_v42  ;;  %v63_v47 = vld [vmem:[%s7453_s0 + $0x78] sm:$0xff]  ;;  %vm467_vm1 = vcmp.lt.s32.totalorder %v460_v54, %v466_v56  ;;  %v5198_v2 = vld [vmem:[%s7454_s2] sm:$0x7] }
   0xf   :  { %256 = vmatpush1.bf16.msra.mxu0 %v4536_v9  ;;  %4304 = vmatprep.subr.bf16.mxu1 %v4552_v22  ;;  %v71_v48 = vpack.c.bf16 %v63_v47, %v62_v46  ;;  %vm468_vm2 = vmand %vm464_vm0, %vm467_vm1  ;;  %v5202_v4 = vrot.slane %v5198_v2, %v5193_v0  ;;  %v5264_v41 = vrot.slane %v5198_v2, %v7467_v38 }
  0x10   :  { %257 = vmatprep.subr.bf16.mxu0 %v4537_v11  ;;  %v3947_v60 = vsel %vm468_vm2, 1.0, %v4983_v59 }
  0x11   :  { %v518_v61 = vrot.slane %v3947_v60, %v517_v58 }
  0x12   :  { %4305 = vmatpush3.bf16.msra.mxu1 %v4552_v22 }
  0x13   :  { %258 = vmatpush1.bf16.msra.mxu0 %v4539_v13  ;;  %4306 = vmatprep.subr.bf16.mxu1 %v4553_v24  ;;  %v519_v62 = vcombine.high %v518_v61, %v518_v61  ;;  %v526_v3 = vrot.slane %v518_v61, %v517_v58 }
  0x14   :  { %259 = vmatprep.subr.bf16.mxu0 %v4540_v14 }
  0x15   :  { %v533_v63 = vrot.slane %v519_v62, %v517_v58  ;;  %v534_v6 = vcombine.high %v526_v3, %v526_v3  ;;  %v5206_v9 = vrot.slane %v526_v3, %v5193_v0 }
  0x16   :  { %4307 = vmatpush3.bf16.msra.mxu1 %v4553_v24 }
  0x17   :  { %260 = vmatpush1.bf16.msra.mxu0 %v4542_v17  ;;  %4308 = vmatprep.subr.bf16.mxu1 %v4554_v25  ;;  %v535_v7 = vcombine.high %v533_v63, %v533_v63  ;;  %7527 = vst [vmem:[#allocation4_spill] sm:$0xff] %v5206_v9  ;;  %v5211_v11 = vrot.slane %v533_v63, %v5193_v0 }
  0x18   :  { %261 = vmatprep.subr.bf16.mxu0 %v4543_v18 }
  0x19   :  { %7528 = vst [vmem:[#allocation5_spill] sm:$0xff] %v5211_v11  ;;  %v5217_v13 = vrot.slane %v535_v7, %v5193_v0 }
  0x1a   :  { %4309 = vmatpush3.bf16.msra.mxu1 %v4554_v25 }
  0x1b   :  { %262 = vmatpush1.bf16.msra.mxu0 %v4545_v20  ;;  %4310 = vmatprep.subr.bf16.mxu1 %v4555_v28  ;;  %7530 = vst [vmem:[#allocation7_spill] sm:$0xff] %v5217_v13 }
  0x1c   :  { %263 = vmatprep.subr.bf16.mxu0 %v4546_v21 }
  0x1e   :  { %4311 = vmatpush3.bf16.msra.mxu1 %v4555_v28 }
  0x1f   :  { %264 = vmatpush1.bf16.msra.mxu0 %v4548_v23  ;;  %4312 = vmatprep.subr.bf16.mxu1 %v4556_v30 }
  0x22   :  { %282 = vmatmul.mubr.bf16.vlgmr.msra.gmra.mxu0 %v64_v12  ;;  %4313 = vmatpush3.bf16.msra.mxu1 %v4556_v30  ;;  %v5214_v12 = vrot.slane %v534_v6, %v5193_v0 }
  0x23   :  { %291 = vmatprep.mubr.bf16.mxu0 %v7468_v1 }
  0x24   :  { %7529 = vst [vmem:[#allocation6_spill] sm:$0xff] %v5214_v12 }
  0x25   :  { %4315 = vmatmul.mubr.bf16.vlgmr.msra.gmra.mxu1 %v65_v29 }
  0x26   :  { %4318 = vmatprep.mubr.bf16.mxu1 %v66_v33 }
  0x2a   :  { %292 = vmatmul.mubr.bf16.gmra.mxu0 %v65_v29 }
  0x2b   :  { %301 = vmatprep.mubr.bf16.mxu0 %v7468_v1 }
  0x2d   :  { %4319 = vmatmul.mubr.bf16.gmra.mxu1 %v67_v36 }
  0x2e   :  { %4322 = vmatprep.mubr.bf16.mxu1 %v68_v39 }
  0x32   :  { %302 = vmatmul.mubr.bf16.gmra.mxu0 %v66_v33 }
  0x33   :  { %311 = vmatprep.mubr.bf16.mxu0 %v7468_v1 }
  0x35   :  { %4323 = vmatmul.mubr.bf16.gmra.mxu1 %v69_v44 }
  0x36   :  { %4326 = vmatprep.mubr.bf16.mxu1 %v70_v45 }
  0x3a   :  { %312 = vmatmul.mubr.bf16.gmra.mxu0 %v67_v36 }
  0x3b   :  { %321 = vmatprep.mubr.bf16.mxu0 %v7468_v1 }
  0x3d   :  { %4327 = vmatmul.mubr.bf16.gmra.mxu1 %v71_v48 }
  0x42   :  { %322 = vmatmul.mubr.bf16.gmra.mxu0 %v68_v39 }
  0x43   :  { %331 = vmatprep.mubr.bf16.mxu0 %v7468_v1 }
  0x4a   :  { %332 = vmatmul.mubr.bf16.gmra.mxu0 %v69_v44 }
  0x4b   :  { %341 = vmatprep.mubr.bf16.mxu0 %v7468_v1 }
  0x52   :  { %342 = vmatmul.mubr.bf16.gmra.mxu0 %v70_v45 }
  0x53   :  { %351 = vmatprep.mubr.bf16.mxu0 %v7468_v1 }
  0x5a   :  { %352 = vmatmul.mubr.bf16.gmra.mxu0 %v71_v48 }
  0xe2   :  { %v283_v5 = vpop.f32.mrf.mxu0 }
  0xe3   :  { %v284_v8 = vadd.f32 %v283_v5, %v5202_v4 }
  0xe4   :  { %v5208_v10 = vpop.f32.mrf.mxu0 }
  0xe5   :  { %v556_v17 = vmul.f32 %v5206_v9, %v284_v8  ;;  %v5225_v19 = vmul.f32 %v5211_v11, %v284_v8  ;;  %v5236_v23 = vmul.f32 %v5214_v12, %v284_v8  ;;  %v5239_v24 = vmul.f32 %v5217_v13, %v284_v8  ;;  %v4316_v8 = vpop.f32.mrf.mxu1 }
  0xe6   :  { %v287_v14 = vpop.f32.mrf.mxu0 }
  0xe7   :  { %v288_v15 = vadd.f32 %v287_v14, %v5202_v4 }
  0xe8   :  { %v5220_v16 = vpop.f32.mrf.mxu0 }
  0xe9   :  { %v557_v18 = vmul.f32 %v5206_v9, %v288_v15  ;;  %v5228_v20 = vmul.f32 %v5211_v11, %v288_v15  ;;  %v5231_v21 = vmul.f32 %v5214_v12, %v288_v15  ;;  %v5242_v25 = vmul.f32 %v5217_v13, %v288_v15 }
  0xea   :  { %v5233_v22 = vpop.f32.mrf.mxu0 }
  0xeb   :  { %v588_v26 = vpack.c.bf16 %v557_v18, %v556_v17 }
  0xec   :  { %v295_v28 = vpop.f32.mrf.mxu0 }
  0xed   :  { %4338 = vmatprep.mubr.bf16.mxu1 %v588_v26  ;;  %v296_v6 = vadd.f32 %v295_v28, %v5264_v41 }
  0xee   :  { %v5250_v31 = vpop.f32.mrf.mxu0 }
  0xef   :  { %v5362_v38 = vadd.f32 %v5250_v31, %v5202_v4 }
  0xf0   :  { %v299_v32 = vpop.f32.mrf.mxu0 }
  0xf1   :  { %v300_v60 = vadd.f32 %v299_v32, %v5264_v41 }
  0xf2   :  { %v5252_v33 = vpop.f32.mrf.mxu0 }
  0xf3   :  { %v504_v26 = vpack.c.bf16 %v300_v60, %v296_v6 }
  0xf4   :  { %v305_v34 = vpop.f32.mrf.mxu0 }
  0xf5   :  { %v306_v47 = vadd.f32 %v305_v34, %v5264_v41 }
  0xf6   :  { %v5254_v35 = vpop.f32.mrf.mxu0 }
  0xf7   :  { %v5395_v14 = vadd.f32 %v5254_v35, %v5202_v4 }
  0xf8   :  { %v309_v36 = vpop.f32.mrf.mxu0 }
  0xf9   :  { %v310_v43 = vadd.f32 %v309_v36, %v5264_v41 }
  0xfa   :  { %v5256_v37 = vpop.f32.mrf.mxu0 }
  0xfb   :  { %v505_v52 = vpack.c.bf16 %v310_v43, %v306_v47 }
  0xfc   :  { %v315_v39 = vpop.f32.mrf.mxu0 }
  0xfd   :  { %v316_v44 = vadd.f32 %v315_v39, %v5264_v41 }
  0xfe   :  { %v5259_v40 = vpop.f32.mrf.mxu0 }
 0x100   :  { %v319_v42 = vpop.f32.mrf.mxu0 }
 0x101   :  { %v320_v45 = vadd.f32 %v319_v42, %v5264_v41 }
 0x102   :  { %v323_v46 = vpop.f32.mrf.mxu0 }
 0x103   :  { %v506_v48 = vpack.c.bf16 %v320_v45, %v316_v44  ;;  %v324_v49 = vadd.f32 %v323_v46, %v5202_v4  ;;  %v290_v44 = vadd.f32 %v5220_v16, %v5264_v41 }
 0x104   :  { %v5271_v51 = vpop.f32.mrf.mxu0 }
 0x105   :  { %4330 = vmatprep.subr.bf16.mxu1 %v506_v48  ;;  %v5275_v55 = vmul.f32 %v5206_v9, %v324_v49  ;;  %v5278_v56 = vmul.f32 %v5211_v11, %v324_v49  ;;  %v5283_v58 = vmul.f32 %v5214_v12, %v324_v49  ;;  %v5286_v59 = vmul.f32 %v5217_v13, %v324_v49 }
 0x106   :  { %v327_v53 = vpop.f32.mrf.mxu0  ;;  %4331 = vmatpush3.bf16.xpose.msra.mxu1 %v506_v48 }
 0x107   :  { %v328_v54 = vadd.f32 %v327_v53, %v5202_v4  ;;  %4332 = vmatprep.subr.bf16.mxu1 %v505_v52  ;;  %7531 = vst [vmem:[#allocation8_spill] sm:$0xff] %v5286_v59 }
 0x108   :  { %v5280_v57 = vpop.f32.mrf.mxu0 }
 0x109   :  { %v5290_v61 = vmul.f32 %v5206_v9, %v328_v54  ;;  %v5293_v62 = vmul.f32 %v5211_v11, %v328_v54  ;;  %v5296_v63 = vmul.f32 %v5214_v12, %v328_v54  ;;  %v5299_v5 = vmul.f32 %v5217_v13, %v328_v54 }
 0x10a   :  { %v333_v3 = vpop.f32.mrf.mxu0  ;;  %v559_v54 = vmul.f32 %v5206_v9, %v5362_v38 }
 0x10b   :  { %7532 = vst [vmem:[#allocation9_spill] sm:$0xff] %v5299_v5  ;;  %v334_v7 = vadd.f32 %v333_v3, %v5202_v4 }
 0x10c   :  { %v5307_v15 = vpop.f32.mrf.mxu0 }
 0x10d   :  { %v5314_v28 = vmul.f32 %v5206_v9, %v334_v7  ;;  %v5318_v36 = vmul.f32 %v5211_v11, %v334_v7  ;;  %v5323_v42 = vmul.f32 %v5214_v12, %v334_v7  ;;  %v5326_v43 = vmul.f32 %v5217_v13, %v334_v7 }
 0x10e   :  { %v337_v32 = vpop.f32.mrf.mxu0  ;;  %4333 = vmatpush3.bf16.xpose.msra.mxu1 %v505_v52  ;;  %v286_v52 = vadd.f32 %v5208_v10, %v5264_v41 }
 0x10f   :  { %v338_v34 = vadd.f32 %v337_v32, %v5202_v4  ;;  %4334 = vmatprep.subr.bf16.mxu1 %v504_v26  ;;  %7533 = vst [vmem:[#allocation10_spill] sm:$0xff] %v5323_v42  ;;  %7534 = vst [vmem:[#allocation11_spill] sm:$0xff] %v5326_v43 }
 0x110   :  { %v5320_v39 = vpop.f32.mrf.mxu0  ;;  %v503_v7 = vpack.c.bf16 %v290_v44, %v286_v52 }
 0x111   :  { %v5331_v45 = vmul.f32 %v5206_v9, %v338_v34  ;;  %v5334_v46 = vmul.f32 %v5211_v11, %v338_v34  ;;  %v5337_v47 = vmul.f32 %v5214_v12, %v338_v34  ;;  %v5340_v49 = vmul.f32 %v5217_v13, %v338_v34 }
 0x112   :  { %v343_v48 = vpop.f32.mrf.mxu0 }
 0x113   :  { %7535 = vst [vmem:[#allocation12_spill] sm:$0xff] %v5337_v47  ;;  %7536 = vst [vmem:[#allocation13_spill] sm:$0xff] %v5340_v49  ;;  %v344_v16 = vadd.f32 %v343_v48, %v5202_v4 }
 0x114   :  { %v345_v60 = vpop.f32.mrf.mxu0 }
 0x115   :  { %v5355_v34 = vmul.f32 %v5206_v9, %v344_v16  ;;  %v5358_v48 = vmul.f32 %v5211_v11, %v344_v16  ;;  %v5365_v18 = vmul.f32 %v5214_v12, %v344_v16  ;;  %v5368_v44 = vmul.f32 %v5217_v13, %v344_v16 }
 0x116   :  { %v347_v32 = vpop.f32.mrf.mxu0  ;;  %4335 = vmatpush3.bf16.xpose.msra.mxu1 %v504_v26  ;;  %v5372_v26 = vadd.f32 %v5233_v22, %v5202_v4  ;;  %v5405_v22 = vadd.f32 %v5252_v33, %v5202_v4  ;;  %v346_v30 = vadd.f32 %v345_v60, %v5264_v41  ;;  %v396_v33 = vpop.f32.mrf.mxu1 }
 0x117   :  { %v348_v10 = vadd.f32 %v347_v32, %v5202_v4  ;;  %4336 = vmatprep.subr.bf16.mxu1 %v503_v7  ;;  %7537 = vst [vmem:[#allocation14_spill] sm:$0xff] %v5365_v18  ;;  %7538 = vst [vmem:[#allocation15_spill] sm:$0xff] %v5368_v44 }
 0x118   :  { %v349_v1 = vpop.f32.mrf.mxu0  ;;  %v558_v17 = vmul.f32 %v5206_v9, %v5372_v26 }
 0x119   :  { %v5375_v52 = vmul.f32 %v5206_v9, %v348_v10  ;;  %v5378_v32 = vmul.f32 %v5211_v11, %v348_v10  ;;  %v5381_v31 = vmul.f32 %v5214_v12, %v348_v10  ;;  %v5384_v3 = vmul.f32 %v5217_v13, %v348_v10 }
 0x11a   :  { %v353_v6 = vpop.f32.mrf.mxu0  ;;  %v350_v35 = vadd.f32 %v349_v1, %v5264_v41  ;;  %v561_v1 = vmul.f32 %v5206_v9, %v5395_v14 }
 0x11b   :  { %7539 = vst [vmem:[#allocation16_spill] sm:$0xff] %v5381_v31  ;;  %7540 = vst [vmem:[#allocation17_spill] sm:$0xff] %v5384_v3  ;;  %v354_v16 = vadd.f32 %v353_v6, %v5202_v4  ;;  %v589_v3 = vpack.c.bf16 %v559_v54, %v558_v17  ;;  %v4317_v17 = vpop.f32.mrf.mxu1  ;;  %v5438_v54 = vadd.f32 %v5259_v40, %v5202_v4 }
 0x11c   :  { %v355_v53 = vpop.f32.mrf.mxu0 }
 0x11d   :  { %v356_v29 = vadd.f32 %v355_v53, %v5264_v41  ;;  %v5412_v6 = vmul.f32 %v5206_v9, %v354_v16  ;;  %v5415_v0 = vmul.f32 %v5211_v11, %v354_v16  ;;  %v5418_v44 = vmul.f32 %v5214_v12, %v354_v16  ;;  %v399_v47 = vpop.f32.mrf.mxu1 }
 0x11e   :  { %v357_v27 = vpop.f32.mrf.mxu0  ;;  %4337 = vmatpush3.bf16.xpose.msra.mxu1 %v503_v7  ;;  %v5423_v53 = vmul.f32 %v5217_v13, %v354_v16  ;;  %v1401_v16 = vpack.c.bf16 %v350_v35, %v346_v30  ;;  %v7541_v35 = vsub.s32 2, %v5186_v50  ;;  %v563_v30 = vmul.f32 %v5206_v9, %v5438_v54 }
 0x11f   :  { %v358_v10 = vadd.f32 %v357_v27, %v5202_v4  ;;  %v560_v27 = vmul.f32 %v5206_v9, %v5405_v22 }
 0x120   :  { %v359_v60 = vpop.f32.mrf.mxu0 }
 0x121   :  { %v360_v7 = vadd.f32 %v359_v60, %v5264_v41  ;;  %v5428_v43 = vmul.f32 %v5206_v9, %v358_v10  ;;  %v5431_v49 = vmul.f32 %v5211_v11, %v358_v10  ;;  %v5434_v59 = vmul.f32 %v5214_v12, %v358_v10 }
 0x122   :  { %v5443_v60 = vmul.f32 %v5217_v13, %v358_v10  ;;  %v590_v40 = vpack.c.bf16 %v561_v1, %v560_v27  ;;  %v5456_v10 = vrot.slane %v5198_v2, %v7541_v35  ;;  %v336_v1 = vadd.f32 %v5307_v15, %v5264_v41 }
 0x123   :  { %v1402_v5 = vpack.c.bf16 %v360_v7, %v356_v29  ;;  %v5460_v29 = vadd.f32 %v5256_v37, %v5202_v4  ;;  %v4320_v7 = vpop.f32.mrf.mxu1  ;;  %v340_v27 = vadd.f32 %v5320_v39, %v5264_v41 }
 0x124   :  { %v421_v35 = vadd.f32 %v4320_v7, %v5456_v10  ;;  %v405_v18 = vadd.f32 %v4316_v8, %v5456_v10  ;;  %v408_v50 = vadd.f32 %v4317_v17, %v5456_v10  ;;  %v567_v8 = vmul.f32 %v5211_v11, %v5362_v38 }
 0x125   :  { %4339 = vmatmul.mubr.bf16.vlgmr.msra.gmra.mxu1 %v589_v3  ;;  %4410 = vmatprep.subr.bf16.mxu1 %v1402_v5  ;;  %v412_v2 = vpop.f32.mrf.mxu1  ;;  %v562_v4 = vmul.f32 %v5206_v9, %v5460_v29  ;;  %v7542_v9 = vpack.c.bf16 %v5228_v20, %v5225_v19  ;;  %v569_v19 = vmul.f32 %v5211_v11, %v5395_v14 }
 0x126   :  { %4342 = vmatprep.mubr.bf16.mxu1 %v590_v40  ;;  %4411 = vmatpush3.bf16.xpose.msra.mxu1 %v1402_v5  ;;  %v413_v3 = vadd.f32 %v412_v2, %v5456_v10  ;;  %v1400_v40 = vpack.c.bf16 %v340_v27, %v336_v1  ;;  %v566_v20 = vmul.f32 %v5211_v11, %v5372_v26 }
 0x127   :  { %4412 = vmatprep.subr.bf16.mxu1 %v1401_v16  ;;  %v4321_v37 = vpop.f32.mrf.mxu1  ;;  %v591_v15 = vpack.c.bf16 %v563_v30, %v562_v4  ;;  %v326_v30 = vadd.f32 %v5271_v51, %v5264_v41  ;;  %v397_v51 = vadd.f32 %v396_v33, %v5456_v10  ;;  %v568_v1 = vmul.f32 %v5211_v11, %v5405_v22 }
 0x128   :  { %v424_v5 = vadd.f32 %v4321_v37, %v5456_v10  ;;  %v593_v4 = vpack.c.bf16 %v567_v8, %v566_v20  ;;  %v571_v33 = vmul.f32 %v5211_v11, %v5438_v54 }
 0x129   :  { %v415_v42 = vpop.f32.mrf.mxu1 }
 0x12a   :  { %v510_v31 = vpack.c.bf16 %v424_v5, %v421_v35  ;;  %v416_v39 = vadd.f32 %v415_v42, %v5456_v10  ;;  %v330_v42 = vadd.f32 %v5280_v57, %v5264_v41  ;;  %v400_v41 = vadd.f32 %v399_v47, %v5456_v10 }
 0x12b   :  { %v4324_v7 = vpop.f32.mrf.mxu1 }
 0x12c   :  { %v509_v2 = vpack.c.bf16 %v416_v39, %v413_v3  ;;  %v437_v37 = vadd.f32 %v4324_v7, %v5456_v10  ;;  %4370 = vmatprep.subr.bf16.mxu0 %v510_v31  ;;  %v1399_v35 = vpack.c.bf16 %v330_v42, %v326_v30  ;;  %v594_v3 = vpack.c.bf16 %v569_v19, %v568_v1 }
 0x12d   :  { %4343 = vmatmul.mubr.bf16.gmra.mxu1 %v591_v15  ;;  %v428_v17 = vpop.f32.mrf.mxu1  ;;  %4371 = vmatpush3.bf16.msra.mxu0 %v510_v31  ;;  %v578_v1 = vmul.f32 %v5214_v12, %v5460_v29 }
 0x12e   :  { %4346 = vmatprep.mubr.bf16.mxu1 %v7542_v9  ;;  %4413 = vmatpush3.bf16.xpose.msra.mxu1 %v1401_v16  ;;  %v429_v9 = vadd.f32 %v428_v17, %v5456_v10  ;;  %v508_v16 = vpack.c.bf16 %v408_v50, %v405_v18  ;;  %v507_v50 = vpack.c.bf16 %v400_v41, %v397_v51 }
 0x12f   :  { %4414 = vmatprep.subr.bf16.mxu1 %v1400_v40  ;;  %4372 = vmatprep.subr.bf16.mxu0 %v509_v2  ;;  %v4325_v57 = vpop.f32.mrf.mxu1  ;;  %v575_v51 = vmul.f32 %v5214_v12, %v5362_v38  ;;  %v574_v41 = vmul.f32 %v5214_v12, %v5372_v26 }
 0x130   :  { %v440_v27 = vadd.f32 %v4325_v57, %v5456_v10 }
 0x131   :  { %v431_v31 = vpop.f32.mrf.mxu1  ;;  %4373 = vmatpush3.bf16.msra.mxu0 %v509_v2  ;;  %v597_v57 = vpack.c.bf16 %v575_v51, %v574_v41 }
 0x132   :  { %v5496_v5 = vpack.c.bf16 %v440_v27, %v437_v37  ;;  %v432_v15 = vadd.f32 %v431_v31, %v5456_v10  ;;  %4374 = vmatprep.subr.bf16.mxu0 %v508_v16  ;;  %v570_v37 = vmul.f32 %v5211_v11, %v5460_v29  ;;  %v585_v31 = vmul.f32 %v5217_v13, %v5395_v14 }
 0x133   :  { %v4328_v18 = vpop.f32.mrf.mxu1 }
 0x134   :  { %7543 = vst [vmem:[#allocation18_spill] sm:$0xff] %v5496_v5  ;;  %v5499_v47 = vpack.c.bf16 %v432_v15, %v429_v9  ;;  %v453_v7 = vadd.f32 %v4328_v18, %v5456_v10  ;;  %v7546_v9 = vpack.c.bf16 %v5231_v21, %v5236_v23  ;;  %v579_v23 = vmul.f32 %v5214_v12, %v5438_v54 }
 0x135   :  { %4347 = vmatmul.mubr.bf16.gmra.mxu1 %v593_v4  ;;  %v444_v39 = vpop.f32.mrf.mxu1  ;;  %4375 = vmatpush3.bf16.msra.mxu0 %v508_v16  ;;  %v577_v16 = vmul.f32 %v5214_v12, %v5395_v14  ;;  %v583_v4 = vmul.f32 %v5217_v13, %v5362_v38  ;;  %v584_v15 = vmul.f32 %v5217_v13, %v5405_v22 }
 0x136   :  { %4350 = vmatprep.mubr.bf16.mxu1 %v594_v3  ;;  %4415 = vmatpush3.bf16.xpose.msra.mxu1 %v1400_v40  ;;  %7544 = vst [vmem:[#allocation19_spill] sm:$0xff] %v5499_v47  ;;  %v445_v2 = vadd.f32 %v444_v39, %v5456_v10  ;;  %v595_v40 = vpack.c.bf16 %v571_v33, %v570_v37  ;;  %v7572_v33 = vld [vmem:[#allocation15_spill] sm:$0xff] }
 0x137   :  { %4416 = vmatprep.subr.bf16.mxu1 %v1399_v35  ;;  %4376 = vmatprep.subr.bf16.mxu0 %v507_v50  ;;  %v4329_v30 = vpop.f32.mrf.mxu1  ;;  %v599_v27 = vpack.c.bf16 %v579_v23, %v578_v1  ;;  %v582_v3 = vmul.f32 %v5217_v13, %v5372_v26  ;;  %v602_v18 = vpack.c.bf16 %v585_v31, %v584_v15  ;;  %v5653_v31 = vld [vmem:[%s7455_s5 + $0x28] sm:$0xff] }
 0x138   :  { %v456_v42 = vadd.f32 %v4329_v30, %v5456_v10  ;;  %v7549_v14 = vpack.c.bf16 %v5290_v61, %v5275_v55  ;;  %v7550_v26 = vpack.c.bf16 %v5331_v45, %v5314_v28  ;;  %v7554_v55 = vpack.c.bf16 %v5334_v46, %v5318_v36  ;;  %v7558_v45 = vld [vmem:[#allocation12_spill] sm:$0xff] }
 0x139   :  { %v447_v8 = vpop.f32.mrf.mxu1  ;;  %4377 = vmatpush3.bf16.msra.mxu0 %v507_v50  ;;  %v601_v50 = vpack.c.bf16 %v583_v4, %v582_v3  ;;  %v7555_v61 = vpack.c.bf16 %v5378_v32, %v5358_v48  ;;  %v7556_v28 = vpack.c.bf16 %v5431_v49, %v5415_v0  ;;  %v7564_v46 = vpack.c.bf16 %v5434_v59, %v5418_v44  ;;  %v7565_v48 = vld [vmem:[#allocation9_spill] sm:$0xff]  ;;  %v7566_v32 = vld [vmem:[#allocation8_spill] sm:$0xff] }
 0x13a   :  { %v5508_v17 = vpack.c.bf16 %v456_v42, %v453_v7  ;;  %v448_v19 = vadd.f32 %v447_v8, %v5456_v10  ;;  %v576_v10 = vmul.f32 %v5214_v12, %v5405_v22  ;;  %v7551_v22 = vpack.c.bf16 %v5375_v52, %v5355_v34  ;;  %v7559_v34 = vld [vmem:[#allocation10_spill] sm:$0xff]  ;;  %v7568_v49 = vld [vmem:[#allocation13_spill] sm:$0xff]  ;;  %v5595_v59 = vld [vmem:[%s7455_s5 + $0x10] sm:$0xff] }
 0x13b   :  { %v7562_v52 = vld [vmem:[#allocation14_spill] sm:$0xff]  ;;  %v7567_v0 = vpack.c.bf16 %v7565_v48, %v7566_v32  ;;  %v7574_v7 = vpack.c.bf16 %v5443_v60, %v5423_v53  ;;  %v5608_v53 = vld [vmem:[%s7455_s5 + $0x18] sm:$0xff]  ;;  %v5618_v8 = vld [vmem:[%s7455_s5 + $0x8] sm:$0xff] }
 0x13c   :  { %7545 = vst [vmem:[#allocation20_spill] sm:$0xff] %v5508_v17  ;;  %v5514_v20 = vpack.c.bf16 %v448_v19, %v445_v2  ;;  %4450 = vmatprep.subr.bf16.mxu0 %v5508_v17  ;;  %v598_v21 = vpack.c.bf16 %v577_v16, %v576_v10  ;;  %v5600_v2 = vld [vmem:[%s7455_s5] sm:$0xff]  ;;  %v5628_v16 = vld [vmem:[%s7455_s5 + $0x30] sm:$0xff] }
 0x13d   :  { %4351 = vmatmul.mubr.bf16.gmra.mxu1 %v595_v40  ;;  %v5881_v17 = vld [vmem:[%s7455_s5 + $0xe0] sm:$0xff] }
 0x13e   :  { %4354 = vmatprep.mubr.bf16.mxu1 %v7546_v9  ;;  %4417 = vmatpush3.bf16.xpose.msra.mxu1 %v1399_v35  ;;  %7547 = vst [vmem:[#allocation21_spill] sm:$0xff] %v5514_v20  ;;  %v7548_v35 = vpack.c.bf16 %v5242_v25, %v5239_v24  ;;  %v587_v24 = vmul.f32 %v5217_v13, %v5438_v54 }
 0x13f   :  { %v586_v25 = vmul.f32 %v5217_v13, %v5460_v29  ;;  %v7552_v54 = vpack.c.bf16 %v5428_v43, %v5412_v6  ;;  %v7553_v29 = vpack.c.bf16 %v5293_v62, %v5278_v56  ;;  %v7557_v43 = vpack.c.bf16 %v5296_v63, %v5283_v58  ;;  %v7561_v62 = vld [vmem:[#allocation16_spill] sm:$0xff]  ;;  %v7569_v6 = vld [vmem:[#allocation11_spill] sm:$0xff]  ;;  %v7571_v63 = vld [vmem:[#allocation17_spill] sm:$0xff] }
 0x140   :  { %v7560_v56 = vpack.c.bf16 %v7558_v45, %v7559_v34  ;;  %v7563_v36 = vpack.c.bf16 %v7561_v62, %v7562_v52  ;;  %v7570_v58 = vpack.c.bf16 %v7568_v49, %v7569_v6  ;;  %v7573_v39 = vpack.c.bf16 %v7571_v63, %v7572_v33  ;;  %v5706_v52 = vld [vmem:[%s7455_s5 + $0x70] sm:$0xff]  ;;  %v5721_v6 = vld [vmem:[%s7455_s5 + $0x60] sm:$0xff] }
 0x141   :  { %v603_v38 = vpack.c.bf16 %v587_v24, %v586_v25  ;;  %v5666_v24 = vld [vmem:[%s7455_s5 + $0x50] sm:$0xff] }
 0x145   :  { %4355 = vmatmul.mubr.bf16.gmra.mxu1 %v597_v57 }
 0x146   :  { %4358 = vmatprep.mubr.bf16.mxu1 %v598_v21 }
 0x14d   :  { %4359 = vmatmul.mubr.bf16.gmra.mxu1 %v599_v27  ;;  %v5643_v27 = vld [vmem:[%s7455_s5 + $0x20] sm:$0xff] }
 0x14e   :  { %4362 = vmatprep.mubr.bf16.mxu1 %v7548_v35  ;;  %v5648_v35 = vld [vmem:[%s7455_s5 + $0x38] sm:$0xff] }
 0x155   :  { %4363 = vmatmul.mubr.bf16.gmra.mxu1 %v601_v50 }
 0x156   :  { %4366 = vmatprep.mubr.bf16.mxu1 %v602_v18 }
 0x15d   :  { %4367 = vmatmul.mubr.bf16.gmra.mxu1 %v603_v38 }
 0x15e   :  { %4418 = vmatprep.mubr.bf16.mxu1 %v7549_v14 }
 0x165   :  { %4419 = vmatmul.mubr.bf16.vlgmr.msra.gmra.mxu1 %v7550_v26 }
 0x166   :  { %4422 = vmatprep.mubr.bf16.mxu1 %v7551_v22 }
 0x16d   :  { %4423 = vmatmul.mubr.bf16.gmra.mxu1 %v7552_v54 }
 0x16e   :  { %4426 = vmatprep.mubr.bf16.mxu1 %v7553_v29  ;;  %v5681_v29 = vld [vmem:[%s7455_s5 + $0x40] sm:$0xff] }
 0x175   :  { %4427 = vmatmul.mubr.bf16.gmra.mxu1 %v7554_v55  ;;  %v5686_v55 = vld [vmem:[%s7455_s5 + $0x58] sm:$0xff] }
 0x176   :  { %4430 = vmatprep.mubr.bf16.mxu1 %v7555_v61 }
 0x17d   :  { %4431 = vmatmul.mubr.bf16.gmra.mxu1 %v7556_v28 }
 0x17e   :  { %4434 = vmatprep.mubr.bf16.mxu1 %v7557_v43  ;;  %v5693_v43 = vld [vmem:[%s7455_s5 + $0x48] sm:$0xff] }
 0x185   :  { %4435 = vmatmul.mubr.bf16.gmra.mxu1 %v7560_v56 }
 0x186   :  { %4438 = vmatprep.mubr.bf16.mxu1 %v7563_v36 }
 0x18d   :  { %4439 = vmatmul.mubr.bf16.gmra.mxu1 %v7564_v46 }
 0x18e   :  { %4442 = vmatprep.mubr.bf16.mxu1 %v7567_v0 }
 0x195   :  { %4443 = vmatmul.mubr.bf16.gmra.mxu1 %v7570_v58  ;;  %v5726_v58 = vld [vmem:[%s7455_s5 + $0x78] sm:$0xff] }
 0x196   :  { %4446 = vmatprep.mubr.bf16.mxu1 %v7573_v39  ;;  %v5733_v39 = vld [vmem:[%s7455_s5 + $0x68] sm:$0xff] }
 0x19d   :  { %4447 = vmatmul.mubr.bf16.gmra.mxu1 %v7574_v7 }
 0x1e5   :  { %v4340_v44 = vpop.f32.mrf.mxu1 }
 0x1e6   :  { %v5603_v37 = vadd.f32 %v4340_v44, %v5595_v59 }
 0x1e7   :  { %v638_v30 = vpop.f32.mrf.mxu1 }
 0x1e8   :  { %v5611_v60 = vadd.f32 %v638_v30, %v5600_v2  ;;  %v772_v42 = vsel %vm765_vm3, %v5603_v37, -inf }
 0x1e9   :  { %773 = vmax.xlane.f32.xlu1 %v772_v42  ;;  %v4341_v40 = vpop.f32.mrf.mxu1 }
 0x1ea   :  { %v5621_v19 = vadd.f32 %v4341_v40, %v5608_v53  ;;  %v766_v9 = vsel %vm765_vm3, %v5611_v60, -inf  ;;  %v5746_v40 = vld [vmem:[%s7455_s5 + $0x90] sm:$0xff] }
 0x1eb   :  { %v641_v51 = vpop.f32.mrf.mxu1  ;;  %767 = vmax.xlane.f32.xlu0 %v766_v9 }
 0x1ec   :  { %v5631_v41 = vadd.f32 %v641_v51, %v5618_v8  ;;  %v775_v10 = vsel %vm765_vm3, %v5621_v19, -inf }
 0x1ed   :  { %776 = vmax.xlane.f32.xlu1 %v775_v10  ;;  %v4344_v57 = vpop.f32.mrf.mxu1 }
 0x1ee   :  { %v5636_v21 = vadd.f32 %v4344_v57, %v5628_v16  ;;  %v769_v23 = vsel %vm765_vm3, %v5631_v41, -inf }
 0x1ef   :  { %v654_v1 = vpop.f32.mrf.mxu1  ;;  %770 = vmax.xlane.f32.xlu0 %v769_v23 }
 0x1f0   :  { %v5656_v3 = vadd.f32 %v654_v1, %v5643_v27  ;;  %v784_v50 = vsel %vm765_vm3, %v5636_v21, -inf }
 0x1f1   :  { %v4345_v4 = vpop.f32.mrf.mxu1 }
 0x1f2   :  { %v5659_v15 = vadd.f32 %v4345_v4, %v5648_v35  ;;  %v778_v22 = vsel %vm765_vm3, %v5656_v3, -inf  ;;  %v5761_v4 = vld [vmem:[%s7455_s5 + $0x80] sm:$0xff] }
 0x1f3   :  { %v657_v18 = vpop.f32.mrf.mxu1  ;;  %785 = vmax.xlane.f32.xlu0 %v784_v50  ;;  %v5766_v50 = vld [vmem:[%s7455_s5 + $0x98] sm:$0xff] }
 0x1f4   :  { %v5669_v25 = vadd.f32 %v657_v18, %v5653_v31  ;;  %v787_v38 = vsel %vm765_vm3, %v5659_v15, -inf }
 0x1f5   :  { %788 = vmax.xlane.f32.xlu1 %v787_v38  ;;  %v4348_v14 = vpop.f32.mrf.mxu1 }
 0x1f6   :  { %v5674_v26 = vadd.f32 %v4348_v14, %v5666_v24  ;;  %v781_v61 = vsel %vm765_vm3, %v5669_v25, -inf  ;;  %v5773_v14 = vld [vmem:[%s7455_s5 + $0x88] sm:$0xff] }
 0x1f7   :  { %v670_v54 = vpop.f32.mrf.mxu1  ;;  %779 = vmax.xlane.f32.xlu0 %v778_v22 }
 0x1f8   :  { %v5696_v45 = vadd.f32 %v670_v54, %v5681_v29  ;;  %v796_v56 = vsel %vm765_vm3, %v5674_v26, -inf }
 0x1f9   :  { %v4349_v28 = vpop.f32.mrf.mxu1  ;;  %782 = vmax.xlane.f32.xlu1 %v781_v61 }
 0x1fa   :  { %v5699_v34 = vadd.f32 %v4349_v28, %v5686_v55  ;;  %v790_v0 = vsel %vm765_vm3, %v5696_v45, -inf }
 0x1fb   :  { %v673_v62 = vpop.f32.mrf.mxu1  ;;  %797 = vmax.xlane.f32.xlu0 %v796_v56  ;;  %v5786_v56 = vld [vmem:[%s7455_s5 + $0xb0] sm:$0xff] }
 0x1fc   :  { %v5709_v36 = vadd.f32 %v673_v62, %v5693_v43  ;;  %v799_v46 = vsel %vm765_vm3, %v5699_v34, -inf }
 0x1fd   :  { %v4352_v48 = vpop.f32.mrf.mxu1  ;;  %800 = vmax.xlane.f32.xlu1 %v799_v46 }
 0x1fe   :  { %v5714_v32 = vadd.f32 %v4352_v48, %v5706_v52  ;;  %v793_v63 = vsel %vm765_vm3, %v5709_v36, -inf }
 0x1ff   :  { %v686_v49 = vpop.f32.mrf.mxu1  ;;  %791 = vmax.xlane.f32.xlu0 %v790_v0 }
 0x200   :  { %v5736_v7 = vadd.f32 %v686_v49, %v5721_v6  ;;  %v808_v30 = vsel %vm765_vm3, %v5714_v32, -inf }
 0x201   :  { %v4353_v33 = vpop.f32.mrf.mxu1  ;;  %794 = vmax.xlane.f32.xlu1 %v793_v63 }
 0x202   :  { %v5739_v44 = vadd.f32 %v4353_v33, %v5726_v58  ;;  %v802_v23 = vsel %vm765_vm3, %v5736_v7, -inf  ;;  %v5801_v33 = vld [vmem:[%s7455_s5 + $0xa0] sm:$0xff] }
 0x203   :  { %v689_v42 = vpop.f32.mrf.mxu1  ;;  %809 = vmax.xlane.f32.xlu0 %v808_v30  ;;  %v5806_v30 = vld [vmem:[%s7455_s5 + $0xb8] sm:$0xff] }
 0x204   :  { %v5749_v9 = vadd.f32 %v689_v42, %v5733_v39  ;;  %v811_v51 = vsel %vm765_vm3, %v5739_v44, -inf }
 0x205   :  { %v4356_v10 = vpop.f32.mrf.mxu1  ;;  %812 = vmax.xlane.f32.xlu1 %v811_v51 }
 0x206   :  { %v5754_v57 = vadd.f32 %v4356_v10, %v5746_v40  ;;  %v805_v18 = vsel %vm765_vm3, %v5749_v9, -inf  ;;  %v5813_v10 = vld [vmem:[%s7455_s5 + $0xa8] sm:$0xff] }
 0x207   :  { %v702_v1 = vpop.f32.mrf.mxu1  ;;  %803 = vmax.xlane.f32.xlu0 %v802_v23 }
 0x208   :  { %v5776_v22 = vadd.f32 %v702_v1, %v5761_v4  ;;  %v820_v61 = vsel %vm765_vm3, %v5754_v57, -inf }
 0x209   :  { %v4357_v38 = vpop.f32.mrf.mxu1  ;;  %806 = vmax.xlane.f32.xlu1 %v805_v18 }
 0x20a   :  { %v5779_v54 = vadd.f32 %v4357_v38, %v5766_v50  ;;  %v814_v49 = vsel %vm765_vm3, %v5776_v22, -inf }
 0x20b   :  { %v705_v28 = vpop.f32.mrf.mxu1  ;;  %821 = vmax.xlane.f32.xlu0 %v820_v61  ;;  %v5826_v61 = vld [vmem:[%s7455_s5 + $0xd0] sm:$0xff] }
 0x20c   :  { %v5789_v62 = vadd.f32 %v705_v28, %v5773_v14  ;;  %v823_v46 = vsel %vm765_vm3, %v5779_v54, -inf }
 0x20d   :  { %v4360_v48 = vpop.f32.mrf.mxu1  ;;  %824 = vmax.xlane.f32.xlu1 %v823_v46 }
 0x20e   :  { %v5794_v0 = vadd.f32 %v4360_v48, %v5786_v56  ;;  %v817_v42 = vsel %vm765_vm3, %v5789_v62, -inf }
 0x20f   :  { %v718_v63 = vpop.f32.mrf.mxu1  ;;  %815 = vmax.xlane.f32.xlu0 %v814_v49 }
 0x210   :  { %v5816_v23 = vadd.f32 %v718_v63, %v5801_v33  ;;  %v832_v18 = vsel %vm765_vm3, %v5794_v0, -inf }
 0x211   :  { %v4361_v51 = vpop.f32.mrf.mxu1  ;;  %818 = vmax.xlane.f32.xlu1 %v817_v42 }
 0x212   :  { %7575 = vst [vmem:[#allocation12_spill] sm:$0xff] %v5816_v23  ;;  %v5819_v1 = vadd.f32 %v4361_v51, %v5806_v30  ;;  %v826_v63 = vsel %vm765_vm3, %v5816_v23, -inf  ;;  %v5841_v51 = vld [vmem:[%s7455_s5 + $0xc0] sm:$0xff] }
 0x213   :  { %v721_v38 = vpop.f32.mrf.mxu1  ;;  %833 = vmax.xlane.f32.xlu0 %v832_v18  ;;  %v5846_v18 = vld [vmem:[%s7455_s5 + $0xd8] sm:$0xff] }
 0x214   :  { %7576 = vst [vmem:[#allocation10_spill] sm:$0xff] %v5819_v1  ;;  %v5829_v28 = vadd.f32 %v721_v38, %v5813_v10  ;;  %v835_v46 = vsel %vm765_vm3, %v5819_v1, -inf }
 0x215   :  { %v4364_v48 = vpop.f32.mrf.mxu1  ;;  %836 = vmax.xlane.f32.xlu1 %v835_v46 }
 0x216   :  { %7577 = vst [vmem:[#allocation16_spill] sm:$0xff] %v5829_v28  ;;  %v5834_v49 = vadd.f32 %v4364_v48, %v5826_v61  ;;  %v829_v38 = vsel %vm765_vm3, %v5829_v28, -inf  ;;  %v5853_v48 = vld [vmem:[%s7455_s5 + $0xc8] sm:$0xff] }
 0x217   :  { %v734_v42 = vpop.f32.mrf.mxu1  ;;  %827 = vmax.xlane.f32.xlu0 %v826_v63 }
 0x218   :  { %7578 = vst [vmem:[#allocation14_spill] sm:$0xff] %v5834_v49  ;;  %v5856_v13 = vadd.f32 %v734_v42, %v5841_v51  ;;  %v844_v12 = vsel %vm765_vm3, %v5834_v49, -inf }
 0x219   :  { %v4365_v46 = vpop.f32.mrf.mxu1  ;;  %830 = vmax.xlane.f32.xlu1 %v829_v38  ;;  %v5866_v38 = vld [vmem:[%s7455_s5 + $0xf0] sm:$0xff] }
 0x21a   :  { %7579 = vst [vmem:[#allocation9_spill] sm:$0xff] %v5856_v13  ;;  %v5859_v63 = vadd.f32 %v4365_v46, %v5846_v18  ;;  %v838_v20 = vsel %vm765_vm3, %v5856_v13, -inf  ;;  %v5893_v13 = vld [vmem:[%s7455_s5 + $0xe8] sm:$0xff] }
 0x21b   :  { %v737_v11 = vpop.f32.mrf.mxu1  ;;  %845 = vmax.xlane.f32.xlu0 %v844_v12 }
 0x21c   :  { %7580 = vst [vmem:[#allocation8_spill] sm:$0xff] %v5859_v63  ;;  %v5869_v47 = vadd.f32 %v737_v11, %v5853_v48  ;;  %v847_v42 = vsel %vm765_vm3, %v5859_v63, -inf  ;;  %v5886_v11 = vld [vmem:[%s7455_s5 + $0xf8] sm:$0xff] }
 0x21d   :  { %v4368_v5 = vpop.f32.mrf.mxu1  ;;  %848 = vmax.xlane.f32.xlu1 %v847_v42 }
 0x21e   :  { %7581 = vst [vmem:[#allocation13_spill] sm:$0xff] %v5869_v47  ;;  %v5874_v46 = vadd.f32 %v4368_v5, %v5866_v38  ;;  %v841_v42 = vsel %vm765_vm3, %v5869_v47, -inf }
 0x21f   :  { %v750_v12 = vpop.f32.mrf.mxu1  ;;  %839 = vmax.xlane.f32.xlu0 %v838_v20 }
 0x220   :  { %7582 = vst [vmem:[#allocation11_spill] sm:$0xff] %v5874_v46  ;;  %v5896_v63 = vadd.f32 %v750_v12, %v5881_v17  ;;  %v856_v49 = vsel %vm765_vm3, %v5874_v46, -inf }
 0x221   :  { %v4369_v5 = vpop.f32.mrf.mxu1  ;;  %842 = vmax.xlane.f32.xlu1 %v841_v42 }
 0x222   :  { %v5899_v20 = vadd.f32 %v4369_v5, %v5886_v11  ;;  %v850_v12 = vsel %vm765_vm3, %v5896_v63, -inf }
 0x223   :  { %v753_v28 = vpop.f32.mrf.mxu1  ;;  %857 = vmax.xlane.f32.xlu0 %v856_v49 }
 0x224   :  { %7583 = vst [vmem:[#allocation17_spill] sm:$0xff] %v5899_v20  ;;  %v5904_v47 = vadd.f32 %v753_v28, %v5893_v13  ;;  %v859_v42 = vsel %vm765_vm3, %v5899_v20, -inf }
 0x225   :  { %v4420_v23 = vpop.f32.mrf.mxu1  ;;  %860 = vmax.xlane.f32.xlu1 %v859_v42 }
 0x226   :  { %7584 = vst [vmem:[#allocation15_spill] sm:$0xff] %v5904_v47  ;;  %v5909_v1 = vadd.f32 %v4420_v23, %v5595_v59  ;;  %v853_v46 = vsel %vm765_vm3, %v5904_v47, -inf }
 0x227   :  { %v1489_v5 = vpop.f32.mrf.mxu1  ;;  %851 = vmax.xlane.f32.xlu0 %v850_v12 }
 0x228   :  { %v5916_v28 = vadd.f32 %v1489_v5, %v5600_v2  ;;  %v1622_v59 = vsel %vm765_vm3, %v5909_v1, -inf }
 0x229   :  { %v4421_v49 = vpop.f32.mrf.mxu1  ;;  %854 = vmax.xlane.f32.xlu1 %v853_v46 }
 0x22a   :  { %v5919_v20 = vadd.f32 %v4421_v49, %v5608_v53  ;;  %v1616_v2 = vsel %vm765_vm3, %v5916_v28, -inf }
 0x22b   :  { %v1492_v23 = vpop.f32.mrf.mxu1  ;;  %1623 = vmax.xlane.f32.xlu0 %v1622_v59 }
 0x22c   :  { %v5924_v42 = vadd.f32 %v1492_v23, %v5618_v8  ;;  %v1625_v12 = vsel %vm765_vm3, %v5919_v20, -inf }
 0x22d   :  { %v4424_v47 = vpop.f32.mrf.mxu1  ;;  %1626 = vmax.xlane.f32.xlu1 %v1625_v12 }
 0x22e   :  { %v5929_v46 = vadd.f32 %v4424_v47, %v5628_v16  ;;  %v1619_v5 = vsel %vm765_vm3, %v5924_v42, -inf }
 0x22f   :  { %v1505_v53 = vpop.f32.mrf.mxu1  ;;  %1617 = vmax.xlane.f32.xlu0 %v1616_v2 }
 0x230   :  { %v5936_v8 = vadd.f32 %v1505_v53, %v5643_v27  ;;  %v1634_v47 = vsel %vm765_vm3, %v5929_v46, -inf }
 0x231   :  { %v4425_v49 = vpop.f32.mrf.mxu1  ;;  %1620 = vmax.xlane.f32.xlu1 %v1619_v5 }
 0x232   :  { %v5939_v59 = vadd.f32 %v4425_v49, %v5648_v35  ;;  %v1628_v27 = vsel %vm765_vm3, %v5936_v8, -inf }
 0x233   :  { %v1508_v16 = vpop.f32.mrf.mxu1  ;;  %1635 = vmax.xlane.f32.xlu0 %v1634_v47 }
 0x234   :  { %v5944_v23 = vadd.f32 %v1508_v16, %v5653_v31  ;;  %v1637_v12 = vsel %vm765_vm3, %v5939_v59, -inf }
 0x235   :  { %v4428_v2 = vpop.f32.mrf.mxu1  ;;  %1638 = vmax.xlane.f32.xlu1 %v1637_v12 }
 0x236   :  { %v5949_v5 = vadd.f32 %v4428_v2, %v5666_v24  ;;  %v1631_v53 = vsel %vm765_vm3, %v5944_v23, -inf }
 0x237   :  { %v1521_v35 = vpop.f32.mrf.mxu1  ;;  %1629 = vmax.xlane.f32.xlu0 %v1628_v27 }
 0x238   :  { %v5956_v31 = vadd.f32 %v1521_v35, %v5681_v29  ;;  %v1646_v24 = vsel %vm765_vm3, %v5949_v5, -inf }
 0x239   :  { %v4429_v49 = vpop.f32.mrf.mxu1  ;;  %1632 = vmax.xlane.f32.xlu1 %v1631_v53 }
 0x23a   :  { %v5959_v47 = vadd.f32 %v4429_v49, %v5686_v55  ;;  %v1640_v29 = vsel %vm765_vm3, %v5956_v31, -inf }
 0x23b   :  { %v1524_v16 = vpop.f32.mrf.mxu1  ;;  %1647 = vmax.xlane.f32.xlu0 %v1646_v24 }
 0x23c   :  { %v5964_v12 = vadd.f32 %v1524_v16, %v5693_v43  ;;  %v1649_v2 = vsel %vm765_vm3, %v5959_v47, -inf }
 0x23d   :  { %v4432_v27 = vpop.f32.mrf.mxu1  ;;  %1650 = vmax.xlane.f32.xlu1 %v1649_v2 }
 0x23e   :  { %v5969_v53 = vadd.f32 %v4432_v27, %v5706_v52  ;;  %v1643_v35 = vsel %vm765_vm3, %v5964_v12, -inf }
 0x23f   :  { %v1537_v55 = vpop.f32.mrf.mxu1  ;;  %1641 = vmax.xlane.f32.xlu0 %v1640_v29 }
 0x240   :  { %v5976_v43 = vadd.f32 %v1537_v55, %v5721_v6  ;;  %v1658_v52 = vsel %vm765_vm3, %v5969_v53, -inf }
 0x241   :  { %v4433_v49 = vpop.f32.mrf.mxu1  ;;  %1644 = vmax.xlane.f32.xlu1 %v1643_v35 }
 0x242   :  { %v5979_v24 = vadd.f32 %v4433_v49, %v5726_v58  ;;  %v1652_v6 = vsel %vm765_vm3, %v5976_v43, -inf }
 0x243   :  { %v1540_v16 = vpop.f32.mrf.mxu1  ;;  %1659 = vmax.xlane.f32.xlu0 %v1658_v52 }
 0x244   :  { %v5984_v2 = vadd.f32 %v1540_v16, %v5733_v39  ;;  %v1661_v27 = vsel %vm765_vm3, %v5979_v24, -inf }
 0x245   :  { %v4436_v29 = vpop.f32.mrf.mxu1  ;;  %1662 = vmax.xlane.f32.xlu1 %v1661_v27 }
 0x246   :  { %v5989_v35 = vadd.f32 %v4436_v29, %v5746_v40  ;;  %v1655_v55 = vsel %vm765_vm3, %v5984_v2, -inf }
 0x247   :  { %v1553_v58 = vpop.f32.mrf.mxu1  ;;  %1653 = vmax.xlane.f32.xlu0 %v1652_v6 }
 0x248   :  { %v5996_v39 = vadd.f32 %v1553_v58, %v5761_v4  ;;  %v1670_v40 = vsel %vm765_vm3, %v5989_v35, -inf }
 0x249   :  { %v4437_v49 = vpop.f32.mrf.mxu1  ;;  %1656 = vmax.xlane.f32.xlu1 %v1655_v55 }
 0x24a   :  { %v5999_v52 = vadd.f32 %v4437_v49, %v5766_v50  ;;  %v1664_v4 = vsel %vm765_vm3, %v5996_v39, -inf }
 0x24b   :  { %v1556_v16 = vpop.f32.mrf.mxu1  ;;  %1671 = vmax.xlane.f32.xlu0 %v1670_v40 }
 0x24c   :  { %v6004_v27 = vadd.f32 %v1556_v16, %v5773_v14  ;;  %v1673_v29 = vsel %vm765_vm3, %v5999_v52, -inf }
 0x24d   :  { %v4440_v6 = vpop.f32.mrf.mxu1  ;;  %1674 = vmax.xlane.f32.xlu1 %v1673_v29 }
 0x24e   :  { %v6009_v55 = vadd.f32 %v4440_v6, %v5786_v56  ;;  %v1667_v58 = vsel %vm765_vm3, %v6004_v27, -inf }
 0x24f   :  { %v1569_v50 = vpop.f32.mrf.mxu1  ;;  %1665 = vmax.xlane.f32.xlu0 %v1664_v4 }
 0x250   :  { %v6016_v14 = vadd.f32 %v1569_v50, %v5801_v33  ;;  %v1682_v56 = vsel %vm765_vm3, %v6009_v55, -inf }
 0x251   :  { %v4441_v49 = vpop.f32.mrf.mxu1  ;;  %1668 = vmax.xlane.f32.xlu1 %v1667_v58 }
 0x252   :  { %v6019_v40 = vadd.f32 %v4441_v49, %v5806_v30  ;;  %v1676_v33 = vsel %vm765_vm3, %v6016_v14, -inf }
 0x253   :  { %v1572_v16 = vpop.f32.mrf.mxu1  ;;  %1683 = vmax.xlane.f32.xlu0 %v1682_v56 }
 0x254   :  { %v6024_v29 = vadd.f32 %v1572_v16, %v5813_v10  ;;  %v1685_v6 = vsel %vm765_vm3, %v6019_v40, -inf }
 0x255   :  { %v4444_v4 = vpop.f32.mrf.mxu1  ;;  %1686 = vmax.xlane.f32.xlu1 %v1685_v6 }
 0x256   :  { %v6029_v58 = vadd.f32 %v4444_v4, %v5826_v61  ;;  %v1679_v50 = vsel %vm765_vm3, %v6024_v29, -inf }
 0x257   :  { %v1585_v30 = vpop.f32.mrf.mxu1  ;;  %1677 = vmax.xlane.f32.xlu0 %v1676_v33 }
 0x258   :  { %v6036_v10 = vadd.f32 %v1585_v30, %v5841_v51  ;;  %v1694_v61 = vsel %vm765_vm3, %v6029_v58, -inf }
 0x259   :  { %v4445_v49 = vpop.f32.mrf.mxu1  ;;  %1680 = vmax.xlane.f32.xlu1 %v1679_v50 }
 0x25a   :  { %v6039_v56 = vadd.f32 %v4445_v49, %v5846_v18  ;;  %v1688_v51 = vsel %vm765_vm3, %v6036_v10, -inf }
 0x25b   :  { %v1588_v16 = vpop.f32.mrf.mxu1  ;;  %1695 = vmax.xlane.f32.xlu0 %v1694_v61 }
 0x25c   :  { %v6044_v6 = vadd.f32 %v1588_v16, %v5853_v48  ;;  %v1697_v4 = vsel %vm765_vm3, %v6039_v56, -inf }
 0x25d   :  { %v4448_v33 = vpop.f32.mrf.mxu1  ;;  %1698 = vmax.xlane.f32.xlu1 %v1697_v4 }
 0x25e   :  { %7585 = vst [vmem:[#allocation22_spill] sm:$0xff] %v6044_v6  ;;  %v6049_v50 = vadd.f32 %v4448_v33, %v5866_v38  ;;  %v1691_v48 = vsel %vm765_vm3, %v6044_v6, -inf }
 0x25f   :  { %v1601_v18 = vpop.f32.mrf.mxu1  ;;  %1689 = vmax.xlane.f32.xlu0 %v1688_v51 }
 0x260   :  { %v6054_v30 = vadd.f32 %v1601_v18, %v5881_v17 }
 0x261   :  { %v4449_v49 = vpop.f32.mrf.mxu1  ;;  %1692 = vmax.xlane.f32.xlu1 %v1691_v48 }
 0x262   :  { %7586 = vst [vmem:[#allocation23_spill] sm:$0xff] %v6054_v30  ;;  %v6059_v61 = vadd.f32 %v4449_v49, %v5886_v11  ;;  %v1700_v38 = vsel %vm765_vm3, %v6054_v30, -inf }
 0x263   :  { %v1604_v16 = vpop.f32.mrf.mxu1  ;;  %1701 = vmax.xlane.f32.xlu0 %v1700_v38 }
 0x264   :  { %v6064_v4 = vadd.f32 %v1604_v16, %v5893_v13 }
 0x266   :  { %7587 = vst [vmem:[#allocation24_spill] sm:$0xff] %v6064_v4  ;;  %v1703_v17 = vsel %vm765_vm3, %v6064_v4, -inf }
 0x267   :  { %1704 = vmax.xlane.f32.xlu1 %v1703_v17 }
 0x272   :  { %v774_v33 = vpop.xlane.xlu1 %773 }
 0x273   :  { %v864_v51 = vsub.f32 %v5603_v37, %v774_v33 }
 0x274   :  { %v768_v18 = vpop.xlane.xlu0 %767 }
 0x275   :  { %v898_v48 = vmul.f32 1.442695, %v864_v51  ;;  %v862_v11 = vsub.f32 %v5611_v60, %v768_v18 }
 0x276   :  { %v777_v49 = vpop.xlane.xlu1 %776 }
 0x277   :  { %4645 = vpow2.f32 %v898_v48  ;;  %v894_v6 = vmul.f32 1.442695, %v862_v11  ;;  %v865_v30 = vsub.f32 %v5621_v19, %v777_v49 }
 0x278   :  { %v771_v38 = vpop.xlane.xlu0 %770 }
 0x279   :  { %4647 = vpow2.f32 %v894_v6  ;;  %v900_v13 = vmul.f32 1.442695, %v865_v30  ;;  %v863_v16 = vsub.f32 %v5631_v41, %v771_v38 }
 0x27b   :  { %4649 = vpow2.f32 %v900_v13  ;;  %v896_v4 = vmul.f32 1.442695, %v863_v16 }
 0x27c   :  { %v786_v17 = vpop.xlane.xlu0 %785 }
 0x27d   :  { %4651 = vpow2.f32 %v896_v4  ;;  %v868_v37 = vsub.f32 %v5636_v21, %v786_v17 }
 0x27e   :  { %v789_v33 = vpop.xlane.xlu1 %788 }
 0x27f   :  { %v906_v51 = vmul.f32 1.442695, %v868_v37  ;;  %v869_v60 = vsub.f32 %v5659_v15, %v789_v33 }
 0x280   :  { %v780_v18 = vpop.xlane.xlu0 %779 }
 0x281   :  { %4653 = vpow2.f32 %v906_v51  ;;  %v908_v48 = vmul.f32 1.442695, %v869_v60  ;;  %v866_v19 = vsub.f32 %v5656_v3, %v780_v18 }
 0x282   :  { %v783_v11 = vpop.xlane.xlu1 %782 }
 0x283   :  { %4655 = vpow2.f32 %v908_v48  ;;  %v902_v6 = vmul.f32 1.442695, %v866_v19  ;;  %v867_v41 = vsub.f32 %v5669_v25, %v783_v11 }
 0x284   :  { %v6076_v30 = vpop.eup %4645  ;;  %v798_v49 = vpop.xlane.xlu0 %797 }
 0x285   :  { %4657 = vpow2.f32 %v902_v6  ;;  %v904_v4 = vmul.f32 1.442695, %v867_v41  ;;  %v872_v21 = vsub.f32 %v5674_v26, %v798_v49  ;;  %v964_v15 = vsel %vm765_vm3, %v6076_v30, 0.0 }
 0x286   :  { %v6081_v38 = vpop.eup %4647  ;;  %v801_v13 = vpop.xlane.xlu1 %800  ;;  %965 = vadd.xlane.f32.xlu0 %v964_v15 }
 0x287   :  { %4659 = vpow2.f32 %v904_v4  ;;  %v914_v3 = vmul.f32 1.442695, %v872_v21  ;;  %v873_v16 = vsub.f32 %v5699_v34, %v801_v13  ;;  %v958_v37 = vsel %vm765_vm3, %v6081_v38, 0.0 }
 0x288   :  { %v6084_v17 = vpop.eup %4649  ;;  %v792_v25 = vpop.xlane.xlu0 %791 }
 0x289   :  { %4661 = vpow2.f32 %v914_v3  ;;  %v916_v33 = vmul.f32 1.442695, %v873_v16  ;;  %v870_v26 = vsub.f32 %v5696_v45, %v792_v25  ;;  %v967_v51 = vsel %vm765_vm3, %v6084_v17, 0.0 }
 0x28a   :  { %v6091_v60 = vpop.eup %4651  ;;  %968 = vadd.xlane.f32.xlu1 %v967_v51  ;;  %v795_v18 = vpop.xlane.xlu1 %794  ;;  %959 = vadd.xlane.f32.xlu0 %v958_v37 }
 0x28b   :  { %4663 = vpow2.f32 %v916_v33  ;;  %v910_v34 = vmul.f32 1.442695, %v870_v26  ;;  %v871_v48 = vsub.f32 %v5709_v36, %v795_v18  ;;  %v961_v45 = vsel %vm765_vm3, %v6091_v60, 0.0 }
 0x28c   :  { %v810_v19 = vpop.xlane.xlu0 %809 }
 0x28d   :  { %4665 = vpow2.f32 %v910_v34  ;;  %v912_v11 = vmul.f32 1.442695, %v871_v48  ;;  %v876_v6 = vsub.f32 %v5714_v32, %v810_v19 }
 0x28e   :  { %v6097_v41 = vpop.eup %4653  ;;  %v813_v49 = vpop.xlane.xlu1 %812  ;;  %962 = vadd.xlane.f32.xlu1 %v961_v45 }
 0x28f   :  { %4667 = vpow2.f32 %v912_v11  ;;  %v922_v4 = vmul.f32 1.442695, %v876_v6  ;;  %v877_v21 = vsub.f32 %v5739_v44, %v813_v49  ;;  %v976_v15 = vsel %vm765_vm3, %v6097_v41, 0.0 }
 0x290   :  { %v6102_v36 = vpop.eup %4655  ;;  %977 = vadd.xlane.f32.xlu0 %v976_v15  ;;  %v804_v13 = vpop.xlane.xlu0 %803 }
 0x291   :  { %4669 = vpow2.f32 %v922_v4  ;;  %v924_v32 = vmul.f32 1.442695, %v877_v21  ;;  %v874_v3 = vsub.f32 %v5736_v7, %v804_v13  ;;  %v979_v16 = vsel %vm765_vm3, %v6102_v36, 0.0 }
 0x292   :  { %v6107_v25 = vpop.eup %4657  ;;  %v807_v37 = vpop.xlane.xlu1 %806  ;;  %980 = vadd.xlane.f32.xlu1 %v979_v16 }
 0x293   :  { %4671 = vpow2.f32 %v924_v32  ;;  %v918_v44 = vmul.f32 1.442695, %v874_v3  ;;  %v875_v33 = vsub.f32 %v5749_v9, %v807_v37  ;;  %v970_v26 = vsel %vm765_vm3, %v6107_v25, 0.0 }
 0x294   :  { %v6112_v51 = vpop.eup %4659  ;;  %971 = vadd.xlane.f32.xlu0 %v970_v26  ;;  %v822_v18 = vpop.xlane.xlu0 %821 }
 0x295   :  { %4673 = vpow2.f32 %v918_v44  ;;  %v920_v7 = vmul.f32 1.442695, %v875_v33  ;;  %v880_v34 = vsub.f32 %v5754_v57, %v822_v18  ;;  %v973_v48 = vsel %vm765_vm3, %v6112_v51, 0.0 }
 0x296   :  { %v6117_v19 = vpop.eup %4661  ;;  %v825_v11 = vpop.xlane.xlu1 %824  ;;  %974 = vadd.xlane.f32.xlu1 %v973_v48 }
 0x297   :  { %4675 = vpow2.f32 %v920_v7  ;;  %v930_v9 = vmul.f32 1.442695, %v880_v34  ;;  %v881_v6 = vsub.f32 %v5779_v54, %v825_v11  ;;  %v988_v45 = vsel %vm765_vm3, %v6117_v19, 0.0  ;;  %v7588_v11 = vld [vmem:[#allocation10_spill] sm:$0xff] }
 0x298   :  { %v6122_v49 = vpop.eup %4663  ;;  %989 = vadd.xlane.f32.xlu0 %v988_v45  ;;  %v816_v4 = vpop.xlane.xlu0 %815 }
 0x299   :  { %4677 = vpow2.f32 %v930_v9  ;;  %v932_v57 = vmul.f32 1.442695, %v881_v6  ;;  %v878_v21 = vsub.f32 %v5776_v22, %v816_v4  ;;  %v991_v15 = vsel %vm765_vm3, %v6122_v49, 0.0  ;;  %v7589_v6 = vld [vmem:[#allocation12_spill] sm:$0xff] }
 0x29a   :  { %v6127_v13 = vpop.eup %4665  ;;  %v819_v32 = vpop.xlane.xlu1 %818  ;;  %992 = vadd.xlane.f32.xlu1 %v991_v15 }
 0x29b   :  { %4679 = vpow2.f32 %v932_v57  ;;  %v926_v54 = vmul.f32 1.442695, %v878_v21  ;;  %v879_v3 = vsub.f32 %v5789_v62, %v819_v32  ;;  %v982_v16 = vsel %vm765_vm3, %v6127_v13, 0.0  ;;  %v7590_v32 = vld [vmem:[#allocation16_spill] sm:$0xff] }
 0x29c   :  { %v6132_v37 = vpop.eup %4667  ;;  %983 = vadd.xlane.f32.xlu0 %v982_v16  ;;  %v834_v44 = vpop.xlane.xlu0 %833 }
 0x29d   :  { %4681 = vpow2.f32 %v926_v54  ;;  %v928_v22 = vmul.f32 1.442695, %v879_v3  ;;  %v985_v33 = vsel %vm765_vm3, %v6132_v37, 0.0  ;;  %v884_v18 = vsub.f32 %v5794_v0, %v834_v44 }
 0x29e   :  { %v6136_v26 = vpop.eup %4669  ;;  %v837_v7 = vpop.xlane.xlu1 %836  ;;  %986 = vadd.xlane.f32.xlu1 %v985_v33 }
 0x29f   :  { %4683 = vpow2.f32 %v928_v22  ;;  %v1000_v62 = vsel %vm765_vm3, %v6136_v26, 0.0  ;;  %v885_v9 = vsub.f32 %v7588_v11, %v837_v7  ;;  %v938_v0 = vmul.f32 1.442695, %v884_v18  ;;  %v7592_v18 = vld [vmem:[#allocation14_spill] sm:$0xff] }
 0x2a0   :  { %v6141_v34 = vpop.eup %4671  ;;  %1001 = vadd.xlane.f32.xlu0 %v1000_v62  ;;  %v828_v48 = vpop.xlane.xlu0 %827 }
 0x2a1   :  { %v882_v45 = vsub.f32 %v7589_v6, %v828_v48  ;;  %v1003_v4 = vsel %vm765_vm3, %v6141_v34, 0.0  ;;  %v940_v22 = vmul.f32 1.442695, %v885_v9 }
 0x2a2   :  { %v6147_v57 = vpop.eup %4673  ;;  %v831_v21 = vpop.xlane.xlu1 %830  ;;  %1004 = vadd.xlane.f32.xlu1 %v1003_v4  ;;  %v7593_v4 = vld [vmem:[#allocation8_spill] sm:$0xff] }
 0x2a3   :  { %v934_v15 = vmul.f32 1.442695, %v882_v45  ;;  %v883_v54 = vsub.f32 %v7590_v32, %v831_v21  ;;  %v994_v3 = vsel %vm765_vm3, %v6147_v57, 0.0 }
 0x2a4   :  { %v6152_v16 = vpop.eup %4675  ;;  %995 = vadd.xlane.f32.xlu0 %v994_v3  ;;  %v846_v44 = vpop.xlane.xlu0 %845 }
 0x2a5   :  { %4685 = vpow2.f32 %v934_v15  ;;  %v936_v33 = vmul.f32 1.442695, %v883_v54  ;;  %v997_v7 = vsel %vm765_vm3, %v6152_v16, 0.0  ;;  %v888_v48 = vsub.f32 %v7592_v18, %v846_v44  ;;  %v7594_v15 = vld [vmem:[#allocation9_spill] sm:$0xff] }
 0x2a6   :  { %v6156_v62 = vpop.eup %4677  ;;  %4687 = vpow2.f32 %v938_v0  ;;  %v849_v11 = vpop.xlane.xlu1 %848  ;;  %998 = vadd.xlane.f32.xlu1 %v997_v7  ;;  %v7595_v7 = vld [vmem:[#allocation13_spill] sm:$0xff] }
 0x2a7   :  { %7591 = vst [vmem:[#allocation10_spill] sm:$0xff] %v6156_v62  ;;  %4689 = vpow2.f32 %v936_v33  ;;  %v1012_v6 = vsel %vm765_vm3, %v6156_v62, 0.0  ;;  %v889_v21 = vsub.f32 %v7593_v4, %v849_v11  ;;  %v946_v3 = vmul.f32 1.442695, %v888_v48  ;;  %v7597_v48 = vld [vmem:[#allocation11_spill] sm:$0xff] }
 0x2a8   :  { %v6161_v45 = vpop.eup %4679  ;;  %1013 = vadd.xlane.f32.xlu0 %v1012_v6  ;;  %v840_v9 = vpop.xlane.xlu0 %839  ;;  %4691 = vpow2.f32 %v940_v22 }
 0x2a9   :  { %v886_v32 = vsub.f32 %v7594_v15, %v840_v9  ;;  %v1015_v0 = vsel %vm765_vm3, %v6161_v45, 0.0  ;;  %v948_v11 = vmul.f32 1.442695, %v889_v21 }
 0x2aa   :  { %v6167_v54 = vpop.eup %4681  ;;  %v843_v44 = vpop.xlane.xlu1 %842  ;;  %1016 = vadd.xlane.f32.xlu1 %v1015_v0 }
 0x2ab   :  { %v942_v33 = vmul.f32 1.442695, %v886_v32  ;;  %v887_v18 = vsub.f32 %v7595_v7, %v843_v44  ;;  %v1006_v6 = vsel %vm765_vm3, %v6167_v54, 0.0  ;;  %v1706_v32 = vsel %vm765_vm3, %v6049_v50, -inf  ;;  %v7598_v7 = vld [vmem:[#allocation17_spill] sm:$0xff] }
 0x2ac   :  { %v6172_v62 = vpop.eup %4683  ;;  %1007 = vadd.xlane.f32.xlu0 %v1006_v6  ;;  %v858_v22 = vpop.xlane.xlu0 %857 }
 0x2ad   :  { %7596 = vst [vmem:[#allocation12_spill] sm:$0xff] %v6172_v62  ;;  %4693 = vpow2.f32 %v942_v33  ;;  %v944_v9 = vmul.f32 1.442695, %v887_v18  ;;  %v1009_v4 = vsel %vm765_vm3, %v6172_v62, 0.0  ;;  %v892_v15 = vsub.f32 %v7597_v48, %v858_v22  ;;  %v7599_v48 = vld [vmem:[#allocation15_spill] sm:$0xff] }
 0x2ae   :  { %4695 = vpow2.f32 %v946_v3  ;;  %v861_v0 = vpop.xlane.xlu1 %860  ;;  %1010 = vadd.xlane.f32.xlu1 %v1009_v4  ;;  %v1709_v33 = vsel %vm765_vm3, %v6059_v61, -inf }
 0x2af   :  { %4697 = vpow2.f32 %v944_v9  ;;  %v893_v6 = vsub.f32 %v7598_v7, %v861_v0  ;;  %v954_v3 = vmul.f32 1.442695, %v892_v15 }
 0x2b0   :  { %1707 = vmax.xlane.f32.xlu0 %v1706_v32  ;;  %v852_v44 = vpop.xlane.xlu0 %851  ;;  %4699 = vpow2.f32 %v948_v11 }
 0x2b1   :  { %v890_v21 = vsub.f32 %v5896_v63, %v852_v44  ;;  %v956_v0 = vmul.f32 1.442695, %v893_v6 }
 0x2b2   :  { %v6183_v18 = vpop.eup %4685  ;;  %v855_v22 = vpop.xlane.xlu1 %854  ;;  %1710 = vmax.xlane.f32.xlu1 %v1709_v33 }
 0x2b3   :  { %v6185_v4 = vpop.eup %4687  ;;  %v950_v9 = vmul.f32 1.442695, %v890_v21  ;;  %v891_v62 = vsub.f32 %v7599_v48, %v855_v22  ;;  %v1018_v11 = vsel %vm765_vm3, %v6183_v18, 0.0 }
 0x2b4   :  { %v6190_v32 = vpop.eup %4689  ;;  %1019 = vadd.xlane.f32.xlu0 %v1018_v11  ;;  %v1624_v63 = vpop.xlane.xlu0 %1623  ;;  %v1024_v22 = vsel %vm765_vm3, %v6185_v4, 0.0 }
 0x2b5   :  { %4701 = vpow2.f32 %v950_v9  ;;  %v952_v44 = vmul.f32 1.442695, %v891_v62  ;;  %v1021_v15 = vsel %vm765_vm3, %v6190_v32, 0.0  ;;  %v6194_v7 = vpop.eup %4691  ;;  %v1714_v21 = vsub.f32 %v5909_v1, %v1624_v63 }
 0x2b6   :  { %4703 = vpow2.f32 %v954_v3  ;;  %v1627_v33 = vpop.xlane.xlu1 %1626  ;;  %1022 = vadd.xlane.f32.xlu1 %v1021_v15  ;;  %v1027_v9 = vsel %vm765_vm3, %v6194_v7, 0.0 }
 0x2b7   :  { %4705 = vpow2.f32 %v952_v44  ;;  %v1715_v6 = vsub.f32 %v5919_v20, %v1627_v33  ;;  %v1748_v3 = vmul.f32 1.442695, %v1714_v21 }
 0x2b8   :  { %1025 = vadd.xlane.f32.xlu0 %v1024_v22  ;;  %v1618_v48 = vpop.xlane.xlu0 %1617  ;;  %4707 = vpow2.f32 %v956_v0 }
 0x2b9   :  { %v1712_v62 = vsub.f32 %v5916_v28, %v1618_v48  ;;  %v1750_v28 = vmul.f32 1.442695, %v1715_v6 }
 0x2ba   :  { %v6203_v11 = vpop.eup %4693  ;;  %v1621_v1 = vpop.xlane.xlu1 %1620  ;;  %1028 = vadd.xlane.f32.xlu1 %v1027_v9 }
 0x2bb   :  { %v6205_v63 = vpop.eup %4695  ;;  %v1744_v44 = vmul.f32 1.442695, %v1712_v62  ;;  %v1713_v15 = vsub.f32 %v5924_v42, %v1621_v1  ;;  %v1030_v0 = vsel %vm765_vm3, %v6203_v11, 0.0 }
 0x2bc   :  { %v6210_v22 = vpop.eup %4697  ;;  %1031 = vadd.xlane.f32.xlu0 %v1030_v0  ;;  %v1636_v20 = vpop.xlane.xlu0 %1635  ;;  %v1036_v42 = vsel %vm765_vm3, %v6205_v63, 0.0 }
 0x2bd   :  { %4709 = vpow2.f32 %v1744_v44  ;;  %v1746_v33 = vmul.f32 1.442695, %v1713_v15  ;;  %v1033_v21 = vsel %vm765_vm3, %v6210_v22, 0.0  ;;  %v6214_v48 = vpop.eup %4699  ;;  %v1718_v62 = vsub.f32 %v5929_v46, %v1636_v20 }
 0x2be   :  { %4711 = vpow2.f32 %v1748_v3  ;;  %v1639_v9 = vpop.xlane.xlu1 %1638  ;;  %1034 = vadd.xlane.f32.xlu1 %v1033_v21  ;;  %v1039_v15 = vsel %vm765_vm3, %v6214_v48, 0.0 }
 0x2bf   :  { %4713 = vpow2.f32 %v1746_v33  ;;  %v1719_v6 = vsub.f32 %v5939_v59, %v1639_v9  ;;  %v1756_v3 = vmul.f32 1.442695, %v1718_v62 }
 0x2c0   :  { %1037 = vadd.xlane.f32.xlu0 %v1036_v42  ;;  %v1630_v1 = vpop.xlane.xlu0 %1629  ;;  %4715 = vpow2.f32 %v1750_v28 }
 0x2c1   :  { %v1716_v44 = vsub.f32 %v5936_v8, %v1630_v1  ;;  %v1758_v59 = vmul.f32 1.442695, %v1719_v6 }
 0x2c2   :  { %v6223_v0 = vpop.eup %4701  ;;  %v1633_v46 = vpop.xlane.xlu1 %1632  ;;  %1040 = vadd.xlane.f32.xlu1 %v1039_v15 }
 0x2c3   :  { %v6225_v20 = vpop.eup %4703  ;;  %v1752_v33 = vmul.f32 1.442695, %v1716_v44  ;;  %v1717_v21 = vsub.f32 %v5944_v23, %v1633_v46  ;;  %v1042_v28 = vsel %vm765_vm3, %v6223_v0, 0.0 }
 0x2c4   :  { %v6230_v42 = vpop.eup %4705  ;;  %1043 = vadd.xlane.f32.xlu0 %v1042_v28  ;;  %v1648_v8 = vpop.xlane.xlu0 %1647  ;;  %v1048_v23 = vsel %vm765_vm3, %v6225_v20, 0.0 }
 0x2c5   :  { %4717 = vpow2.f32 %v1752_v33  ;;  %v1754_v9 = vmul.f32 1.442695, %v1717_v21  ;;  %v1045_v62 = vsel %vm765_vm3, %v6230_v42, 0.0  ;;  %v6234_v1 = vpop.eup %4707  ;;  %v1722_v44 = vsub.f32 %v5949_v5, %v1648_v8 }
 0x2c6   :  { %4719 = vpow2.f32 %v1756_v3  ;;  %v1651_v15 = vpop.xlane.xlu1 %1650  ;;  %1046 = vadd.xlane.f32.xlu1 %v1045_v62  ;;  %v1051_v21 = vsel %vm765_vm3, %v6234_v1, 0.0 }
 0x2c7   :  { %4721 = vpow2.f32 %v1754_v9  ;;  %v1723_v6 = vsub.f32 %v5959_v47, %v1651_v15  ;;  %v1764_v3 = vmul.f32 1.442695, %v1722_v44 }
 0x2c8   :  { %1049 = vadd.xlane.f32.xlu0 %v1048_v23  ;;  %v1642_v46 = vpop.xlane.xlu0 %1641  ;;  %4723 = vpow2.f32 %v1758_v59 }
 0x2c9   :  { %v1720_v33 = vsub.f32 %v5956_v31, %v1642_v46  ;;  %v1766_v47 = vmul.f32 1.442695, %v1723_v6 }
 0x2ca   :  { %v6243_v28 = vpop.eup %4709  ;;  %v1645_v5 = vpop.xlane.xlu1 %1644  ;;  %1052 = vadd.xlane.f32.xlu1 %v1051_v21 }
 0x2cb   :  { %v6245_v8 = vpop.eup %4711  ;;  %v1760_v9 = vmul.f32 1.442695, %v1720_v33  ;;  %v1721_v62 = vsub.f32 %v5964_v12, %v1645_v5  ;;  %v1808_v59 = vsel %vm765_vm3, %v6243_v28, 0.0 }
 0x2cc   :  { %v6250_v23 = vpop.eup %4713  ;;  %1809 = vadd.xlane.f32.xlu0 %v1808_v59  ;;  %v1660_v31 = vpop.xlane.xlu0 %1659  ;;  %v1814_v12 = vsel %vm765_vm3, %v6245_v8, 0.0 }
 0x2cd   :  { %4725 = vpow2.f32 %v1760_v9  ;;  %v1762_v15 = vmul.f32 1.442695, %v1721_v62  ;;  %v1811_v44 = vsel %vm765_vm3, %v6250_v23, 0.0  ;;  %v6254_v46 = vpop.eup %4715  ;;  %v1726_v33 = vsub.f32 %v5969_v53, %v1660_v31 }
 0x2ce   :  { %4727 = vpow2.f32 %v1764_v3  ;;  %v1663_v21 = vpop.xlane.xlu1 %1662  ;;  %1812 = vadd.xlane.f32.xlu1 %v1811_v44  ;;  %v1817_v62 = vsel %vm765_vm3, %v6254_v46, 0.0 }
 0x2cf   :  { %4729 = vpow2.f32 %v1762_v15  ;;  %v1727_v6 = vsub.f32 %v5979_v24, %v1663_v21  ;;  %v1772_v3 = vmul.f32 1.442695, %v1726_v33 }
 0x2d0   :  { %1815 = vadd.xlane.f32.xlu0 %v1814_v12  ;;  %v1654_v5 = vpop.xlane.xlu0 %1653  ;;  %4731 = vpow2.f32 %v1766_v47 }
 0x2d1   :  { %v1724_v9 = vsub.f32 %v5976_v43, %v1654_v5  ;;  %v1774_v24 = vmul.f32 1.442695, %v1727_v6 }
 0x2d2   :  { %v6263_v59 = vpop.eup %4717  ;;  %v1657_v53 = vpop.xlane.xlu1 %1656  ;;  %1818 = vadd.xlane.f32.xlu1 %v1817_v62 }
 0x2d3   :  { %v6265_v31 = vpop.eup %4719  ;;  %v1768_v15 = vmul.f32 1.442695, %v1724_v9  ;;  %v1725_v44 = vsub.f32 %v5984_v2, %v1657_v53  ;;  %v1820_v47 = vsel %vm765_vm3, %v6263_v59, 0.0 }
 0x2d4   :  { %v6270_v12 = vpop.eup %4721  ;;  %1821 = vadd.xlane.f32.xlu0 %v1820_v47  ;;  %v1672_v43 = vpop.xlane.xlu0 %1671  ;;  %v1826_v2 = vsel %vm765_vm3, %v6265_v31, 0.0 }
 0x2d5   :  { %4733 = vpow2.f32 %v1768_v15  ;;  %v1770_v21 = vmul.f32 1.442695, %v1725_v44  ;;  %v1823_v33 = vsel %vm765_vm3, %v6270_v12, 0.0  ;;  %v6274_v5 = vpop.eup %4723  ;;  %v1730_v9 = vsub.f32 %v5989_v35, %v1672_v43 }
 0x2d6   :  { %4735 = vpow2.f32 %v1772_v3  ;;  %v1675_v62 = vpop.xlane.xlu1 %1674  ;;  %1824 = vadd.xlane.f32.xlu1 %v1823_v33  ;;  %v1829_v44 = vsel %vm765_vm3, %v6274_v5, 0.0 }
 0x2d7   :  { %4737 = vpow2.f32 %v1770_v21  ;;  %v1731_v6 = vsub.f32 %v5999_v52, %v1675_v62  ;;  %v1780_v3 = vmul.f32 1.442695, %v1730_v9 }
 0x2d8   :  { %1827 = vadd.xlane.f32.xlu0 %v1826_v2  ;;  %v1666_v53 = vpop.xlane.xlu0 %1665  ;;  %4739 = vpow2.f32 %v1774_v24 }
 0x2d9   :  { %v1728_v15 = vsub.f32 %v5996_v39, %v1666_v53  ;;  %v1782_v52 = vmul.f32 1.442695, %v1731_v6 }
 0x2da   :  { %v6283_v47 = vpop.eup %4725  ;;  %v1669_v35 = vpop.xlane.xlu1 %1668  ;;  %1830 = vadd.xlane.f32.xlu1 %v1829_v44 }
 0x2db   :  { %v6285_v43 = vpop.eup %4727  ;;  %v1776_v21 = vmul.f32 1.442695, %v1728_v15  ;;  %v1729_v33 = vsub.f32 %v6004_v27, %v1669_v35  ;;  %v1832_v24 = vsel %vm765_vm3, %v6283_v47, 0.0 }
 0x2dc   :  { %v6290_v2 = vpop.eup %4729  ;;  %1833 = vadd.xlane.f32.xlu0 %v1832_v24  ;;  %v1684_v39 = vpop.xlane.xlu0 %1683  ;;  %v1838_v27 = vsel %vm765_vm3, %v6285_v43, 0.0 }
 0x2dd   :  { %4741 = vpow2.f32 %v1776_v21  ;;  %v1778_v62 = vmul.f32 1.442695, %v1729_v33  ;;  %v1835_v9 = vsel %vm765_vm3, %v6290_v2, 0.0  ;;  %v6294_v53 = vpop.eup %4731  ;;  %v1734_v15 = vsub.f32 %v6009_v55, %v1684_v39 }
 0x2de   :  { %4743 = vpow2.f32 %v1780_v3  ;;  %v1687_v44 = vpop.xlane.xlu1 %1686  ;;  %1836 = vadd.xlane.f32.xlu1 %v1835_v9  ;;  %v1841_v33 = vsel %vm765_vm3, %v6294_v53, 0.0 }
 0x2df   :  { %4745 = vpow2.f32 %v1778_v62  ;;  %v1735_v6 = vsub.f32 %v6019_v40, %v1687_v44  ;;  %v1788_v3 = vmul.f32 1.442695, %v1734_v15 }
 0x2e0   :  { %1839 = vadd.xlane.f32.xlu0 %v1838_v27  ;;  %v1678_v35 = vpop.xlane.xlu0 %1677  ;;  %4747 = vpow2.f32 %v1782_v52 }
 0x2e1   :  { %v1732_v21 = vsub.f32 %v6016_v14, %v1678_v35  ;;  %v1790_v40 = vmul.f32 1.442695, %v1735_v6 }
 0x2e2   :  { %v6303_v24 = vpop.eup %4733  ;;  %v1681_v55 = vpop.xlane.xlu1 %1680  ;;  %1842 = vadd.xlane.f32.xlu1 %v1841_v33 }
 0x2e3   :  { %v6305_v39 = vpop.eup %4735  ;;  %v1784_v62 = vmul.f32 1.442695, %v1732_v21  ;;  %v1733_v9 = vsub.f32 %v6024_v29, %v1681_v55  ;;  %v1844_v52 = vsel %vm765_vm3, %v6303_v24, 0.0 }
 0x2e4   :  { %7600 = vst [vmem:[#allocation16_spill] sm:$0xff] %v6305_v39  ;;  %v6310_v27 = vpop.eup %4737  ;;  %1845 = vadd.xlane.f32.xlu0 %v1844_v52  ;;  %v1696_v14 = vpop.xlane.xlu0 %1695  ;;  %v1850_v29 = vsel %vm765_vm3, %v6305_v39, 0.0 }
 0x2e5   :  { %4749 = vpow2.f32 %v1784_v62  ;;  %v1786_v44 = vmul.f32 1.442695, %v1733_v9  ;;  %v1847_v15 = vsel %vm765_vm3, %v6310_v27, 0.0  ;;  %v6314_v35 = vpop.eup %4739  ;;  %v1738_v21 = vsub.f32 %v6029_v58, %v1696_v14 }
 0x2e6   :  { %7601 = vst [vmem:[#allocation14_spill] sm:$0xff] %v6314_v35  ;;  %4751 = vpow2.f32 %v1788_v3  ;;  %v1699_v33 = vpop.xlane.xlu1 %1698  ;;  %1848 = vadd.xlane.f32.xlu1 %v1847_v15  ;;  %v1853_v9 = vsel %vm765_vm3, %v6314_v35, 0.0  ;;  %v7603_v15 = vld [vmem:[#allocation22_spill] sm:$0xff] }
 0x2e7   :  { %4753 = vpow2.f32 %v1786_v44  ;;  %v1739_v55 = vsub.f32 %v6039_v56, %v1699_v33  ;;  %v1796_v3 = vmul.f32 1.442695, %v1738_v21 }
 0x2e8   :  { %1851 = vadd.xlane.f32.xlu0 %v1850_v29  ;;  %v1690_v6 = vpop.xlane.xlu0 %1689  ;;  %4755 = vpow2.f32 %v1790_v40 }
 0x2e9   :  { %v1736_v62 = vsub.f32 %v6036_v10, %v1690_v6  ;;  %v1798_v40 = vmul.f32 1.442695, %v1739_v55  ;;  %v7605_v6 = vld [vmem:[#allocation23_spill] sm:$0xff]  ;;  %v7607_v55 = vld [vmem:[#allocation24_spill] sm:$0xff] }
 0x2ea   :  { %v6323_v52 = vpop.eup %4741  ;;  %v1693_v58 = vpop.xlane.xlu1 %1692  ;;  %1854 = vadd.xlane.f32.xlu1 %v1853_v9 }
 0x2eb   :  { %v6325_v14 = vpop.eup %4743  ;;  %v1792_v44 = vmul.f32 1.442695, %v1736_v62  ;;  %v1737_v39 = vsub.f32 %v7603_v15, %v1693_v58  ;;  %v1856_v56 = vsel %vm765_vm3, %v6323_v52, 0.0 }
 0x2ec   :  { %7602 = vst [vmem:[#allocation8_spill] sm:$0xff] %v6325_v14  ;;  %v6330_v33 = vpop.eup %4745  ;;  %1857 = vadd.xlane.f32.xlu0 %v1856_v56  ;;  %v1702_v10 = vpop.xlane.xlu0 %1701  ;;  %v1862_v58 = vsel %vm765_vm3, %v6325_v14, 0.0 }
 0x2ed   :  { %7604 = vst [vmem:[#allocation9_spill] sm:$0xff] %v6330_v33  ;;  %4757 = vpow2.f32 %v1792_v44  ;;  %v1794_v29 = vmul.f32 1.442695, %v1737_v39  ;;  %v1740_v35 = vsub.f32 %v7605_v6, %v1702_v10  ;;  %v1859_v21 = vsel %vm765_vm3, %v6330_v33, 0.0  ;;  %v6335_v9 = vpop.eup %4747 }
 0x2ee   :  { %7606 = vst [vmem:[#allocation13_spill] sm:$0xff] %v6335_v9  ;;  %4759 = vpow2.f32 %v1796_v3  ;;  %1860 = vadd.xlane.f32.xlu1 %v1859_v21  ;;  %v1865_v39 = vsel %vm765_vm3, %v6335_v9, 0.0 }
 0x2ef   :  { %4761 = vpow2.f32 %v1794_v29  ;;  %v1800_v62 = vmul.f32 1.442695, %v1740_v35 }
 0x2f0   :  { %v1705_v15 = vpop.xlane.xlu1 %1704  ;;  %1863 = vadd.xlane.f32.xlu0 %v1862_v58  ;;  %4763 = vpow2.f32 %v1798_v40 }
 0x2f1   :  { %v1741_v44 = vsub.f32 %v7607_v55, %v1705_v15  ;;  %4765 = vpow2.f32 %v1800_v62 }
 0x2f2   :  { %v6342_v56 = vpop.eup %4749  ;;  %1866 = vadd.xlane.f32.xlu1 %v1865_v39 }
 0x2f3   :  { %7608 = vst [vmem:[#allocation11_spill] sm:$0xff] %v6342_v56  ;;  %v6344_v10 = vpop.eup %4751  ;;  %v1802_v3 = vmul.f32 1.442695, %v1741_v44  ;;  %v1868_v35 = vsel %vm765_vm3, %v6342_v56, 0.0 }
 0x2f4   :  { %7609 = vst [vmem:[#allocation17_spill] sm:$0xff] %v6344_v10  ;;  %v6348_v29 = vpop.eup %4753  ;;  %1869 = vadd.xlane.f32.xlu0 %v1868_v35  ;;  %v1874_v21 = vsel %vm765_vm3, %v6344_v10, 0.0 }
 0x2f5   :  { %7610 = vst [vmem:[#allocation15_spill] sm:$0xff] %v6348_v29  ;;  %4767 = vpow2.f32 %v1802_v3  ;;  %v1871_v40 = vsel %vm765_vm3, %v6348_v29, 0.0  ;;  %v6352_v6 = vpop.eup %4755 }
 0x2f6   :  { %7611 = vst [vmem:[#allocation22_spill] sm:$0xff] %v6352_v6  ;;  %1872 = vadd.xlane.f32.xlu1 %v1871_v40  ;;  %v1877_v62 = vsel %vm765_vm3, %v6352_v6, 0.0 }
 0x2f8   :  { %1875 = vadd.xlane.f32.xlu0 %v1874_v21 }
 0x2fa   :  { %v6358_v58 = vpop.eup %4757  ;;  %1878 = vadd.xlane.f32.xlu1 %v1877_v62 }
 0x2fb   :  { %7612 = vst [vmem:[#allocation23_spill] sm:$0xff] %v6358_v58  ;;  %v6360_v15 = vpop.eup %4759  ;;  %v1880_v55 = vsel %vm765_vm3, %v6358_v58, 0.0 }
 0x2fc   :  { %7613 = vst [vmem:[#allocation24_spill] sm:$0xff] %v6360_v15  ;;  %v6364_v44 = vpop.eup %4761  ;;  %1881 = vadd.xlane.f32.xlu0 %v1880_v55  ;;  %v1886_v35 = vsel %vm765_vm3, %v6360_v15, 0.0 }
 0x2fd   :  { %7614 = vst [vmem:[#allocation25_spill] sm:$0xff] %v6364_v44  ;;  %v1883_v39 = vsel %vm765_vm3, %v6364_v44, 0.0  ;;  %v6368_v3 = vpop.eup %4763 }
 0x2fe   :  { %7615 = vst [vmem:[#allocation26_spill] sm:$0xff] %v6368_v3  ;;  %1884 = vadd.xlane.f32.xlu1 %v1883_v39  ;;  %v6372_v40 = vpop.eup %4765  ;;  %v1889_v21 = vsel %vm765_vm3, %v6368_v3, 0.0 }
 0x2ff   :  { %7616 = vst [vmem:[#allocation27_spill] sm:$0xff] %v6372_v40  ;;  %v1892_v55 = vsel %vm765_vm3, %v6372_v40, 0.0 }
 0x300   :  { %1887 = vadd.xlane.f32.xlu0 %v1886_v35 }
 0x302   :  { %v6376_v62 = vpop.eup %4767  ;;  %1890 = vadd.xlane.f32.xlu1 %v1889_v21 }
 0x303   :  { %7617 = vst [vmem:[#allocation28_spill] sm:$0xff] %v6376_v62  ;;  %v1895_v44 = vsel %vm765_vm3, %v6376_v62, 0.0 }
 0x304   :  { %1893 = vadd.xlane.f32.xlu0 %v1892_v55 }
 0x306   :  { %1896 = vadd.xlane.f32.xlu1 %v1895_v44 }
 0x30f   :  { %v966_v39 = vpop.xlane.xlu0 %965 }
 0x313   :  { %v969_v58 = vpop.xlane.xlu1 %968  ;;  %v960_v15 = vpop.xlane.xlu0 %959 }
 0x314   :  { %4769 = vrcp.f32 %v969_v58 }
 0x315   :  { %4771 = vrcp.f32 %v960_v15 }
 0x316   :  { %4773 = vrcp.f32 %v966_v39 }
 0x317   :  { %v963_v35 = vpop.xlane.xlu1 %962 }
 0x318   :  { %4775 = vrcp.f32 %v963_v35 }
 0x319   :  { %v978_v3 = vpop.xlane.xlu0 %977 }
 0x31b   :  { %v981_v6 = vpop.xlane.xlu1 %980 }
 0x31c   :  { %4777 = vrcp.f32 %v981_v6 }
 0x31d   :  { %v972_v21 = vpop.xlane.xlu0 %971 }
 0x31e   :  { %4779 = vrcp.f32 %v972_v21 }
 0x31f   :  { %4781 = vrcp.f32 %v978_v3  ;;  %v975_v40 = vpop.xlane.xlu1 %974 }
 0x320   :  { %4783 = vrcp.f32 %v975_v40 }
 0x321   :  { %v990_v55 = vpop.xlane.xlu0 %989  ;;  %v4770_v10 = vpop.eup %4769 }
 0x322   :  { %v4772_v62 = vpop.eup %4771  ;;  %v1089_v58 = vmul.f32 %v4770_v10, %v6084_v17 }
 0x323   :  { %v993_v44 = vpop.xlane.xlu1 %992  ;;  %v4774_v29 = vpop.eup %4773  ;;  %v1086_v39 = vmul.f32 %v4772_v62, %v6081_v38 }
 0x324   :  { %4785 = vrcp.f32 %v993_v44  ;;  %v1088_v35 = vmul.f32 %v4774_v29, %v6076_v30  ;;  %v7618_v44 = vld [vmem:[#allocation20_spill] sm:$0xff] }
 0x325   :  { %v4776_v56 = vpop.eup %4775  ;;  %v984_v15 = vpop.xlane.xlu0 %983 }
 0x326   :  { %4787 = vrcp.f32 %v984_v15  ;;  %v1087_v6 = vmul.f32 %v4776_v56, %v6091_v60  ;;  %v1119_v9 = vpack.c.bf16 %v1089_v58, %v1088_v35  ;;  %v7619_v60 = vld [vmem:[#allocation21_spill] sm:$0xff]  ;;  %v7620_v15 = vld [vmem:[#allocation18_spill] sm:$0xff] }
 0x327   :  { %4789 = vrcp.f32 %v990_v55  ;;  %v987_v3 = vpop.xlane.xlu1 %986 }
 0x328   :  { %4791 = vrcp.f32 %v987_v3  ;;  %v1118_v40 = vpack.c.bf16 %v1087_v6, %v1086_v39 }
 0x329   :  { %v1002_v21 = vpop.xlane.xlu0 %1001  ;;  %v4778_v14 = vpop.eup %4777 }
 0x32a   :  { %4378 = vmatprep.mubr.msk.bf16.mxu0 %vm765_vm3, %v1118_v40  ;;  %v1093_v56 = vmul.f32 %v4778_v14, %v6102_v36 }
 0x32b   :  { %v4780_v33 = vpop.eup %4779  ;;  %v1005_v17 = vpop.xlane.xlu1 %1004  ;;  %4379 = vmatmul.mubr.msk.bf16.vlgmr.msra.gmra.mxu0 %vm765_vm3, %v1119_v9 }
 0x32c   :  { %v4782_v10 = vpop.eup %4781  ;;  %4451 = vmatpush3.bf16.msra.mxu0 %v7618_v44  ;;  %4793 = vrcp.f32 %v1005_v17  ;;  %v1090_v29 = vmul.f32 %v4780_v33, %v6107_v25 }
 0x32d   :  { %v4784_v38 = vpop.eup %4783  ;;  %4452 = vmatprep.subr.bf16.mxu0 %v7619_v60  ;;  %v996_v30 = vpop.xlane.xlu0 %995  ;;  %v1092_v58 = vmul.f32 %v4782_v10, %v6097_v41  ;;  %v7621_v41 = vld [vmem:[#allocation19_spill] sm:$0xff] }
 0x32e   :  { %4795 = vrcp.f32 %v996_v30  ;;  %v1091_v62 = vmul.f32 %v4784_v38, %v6112_v51 }
 0x32f   :  { %4797 = vrcp.f32 %v1002_v21  ;;  %v999_v55 = vpop.xlane.xlu1 %998  ;;  %v1121_v6 = vpack.c.bf16 %v1093_v56, %v1092_v58 }
 0x330   :  { %4799 = vrcp.f32 %v999_v55  ;;  %4453 = vmatpush3.bf16.msra.mxu0 %v7619_v60  ;;  %v1120_v9 = vpack.c.bf16 %v1091_v62, %v1090_v29 }
 0x331   :  { %4454 = vmatprep.subr.bf16.mxu0 %v7620_v15  ;;  %v1014_v39 = vpop.xlane.xlu0 %1013  ;;  %v4786_v35 = vpop.eup %4785 }
 0x332   :  { %4382 = vmatprep.mubr.msk.bf16.mxu0 %vm765_vm3, %v1120_v9  ;;  %v1097_v3 = vmul.f32 %v4786_v35, %v6122_v49 }
 0x333   :  { %v4788_v36 = vpop.eup %4787  ;;  %v1017_v14 = vpop.xlane.xlu1 %1016  ;;  %4383 = vmatmul.mubr.msk.bf16.gmra.mxu0 %vm765_vm3, %v1121_v6 }
 0x334   :  { %v4790_v25 = vpop.eup %4789  ;;  %4455 = vmatpush3.bf16.msra.mxu0 %v7620_v15  ;;  %4801 = vrcp.f32 %v1017_v14  ;;  %v1094_v40 = vmul.f32 %v4788_v36, %v6127_v13 }
 0x335   :  { %v4792_v51 = vpop.eup %4791  ;;  %4456 = vmatprep.subr.bf16.mxu0 %v7621_v41  ;;  %v1008_v33 = vpop.xlane.xlu0 %1007  ;;  %v1096_v10 = vmul.f32 %v4790_v25, %v6117_v19 }
 0x336   :  { %4803 = vrcp.f32 %v1008_v33  ;;  %v1095_v21 = vmul.f32 %v4792_v51, %v6132_v37  ;;  %v7622_v33 = vld [vmem:[#allocation12_spill] sm:$0xff] }
 0x337   :  { %4805 = vrcp.f32 %v1014_v39  ;;  %v1011_v17 = vpop.xlane.xlu1 %1010  ;;  %v1123_v60 = vpack.c.bf16 %v1097_v3, %v1096_v10 }
 0x338   :  { %4807 = vrcp.f32 %v1011_v17  ;;  %4457 = vmatpush3.bf16.msra.mxu0 %v7621_v41  ;;  %v1122_v44 = vpack.c.bf16 %v1095_v21, %v1094_v40  ;;  %v7623_v21 = vld [vmem:[#allocation10_spill] sm:$0xff] }
 0x339   :  { %v1708_v38 = vpop.xlane.xlu0 %1707  ;;  %v4794_v30 = vpop.eup %4793 }
 0x33a   :  { %v1742_v56 = vsub.f32 %v6049_v50, %v1708_v38  ;;  %4386 = vmatprep.mubr.msk.bf16.mxu0 %vm765_vm3, %v1122_v44  ;;  %v1101_v58 = vmul.f32 %v4794_v30, %v6141_v34 }
 0x33b   :  { %v4796_v49 = vpop.eup %4795  ;;  %v1711_v29 = vpop.xlane.xlu1 %1710  ;;  %4387 = vmatmul.mubr.msk.bf16.gmra.mxu0 %vm765_vm3, %v1123_v60 }
 0x33c   :  { %v4798_v13 = vpop.eup %4797  ;;  %v1804_v37 = vmul.f32 1.442695, %v1742_v56  ;;  %v1743_v62 = vsub.f32 %v6059_v61, %v1711_v29  ;;  %v1098_v15 = vmul.f32 %v4796_v49, %v6147_v57 }
 0x33d   :  { %v4800_v19 = vpop.eup %4799  ;;  %v1020_v55 = vpop.xlane.xlu0 %1019  ;;  %v1100_v6 = vmul.f32 %v4798_v13, %v6136_v26 }
 0x33e   :  { %4809 = vpow2.f32 %v1804_v37  ;;  %v1806_v9 = vmul.f32 1.442695, %v1743_v62  ;;  %v1099_v50 = vmul.f32 %v4800_v19, %v6152_v16 }
 0x33f   :  { %4811 = vrcp.f32 %v1020_v55  ;;  %v1023_v39 = vpop.xlane.xlu1 %1022  ;;  %v1125_v14 = vpack.c.bf16 %v1101_v58, %v1100_v6 }
 0x340   :  { %4813 = vpow2.f32 %v1806_v9  ;;  %v1124_v35 = vpack.c.bf16 %v1099_v50, %v1098_v15 }
 0x341   :  { %4815 = vrcp.f32 %v1023_v39  ;;  %v1026_v36 = vpop.xlane.xlu0 %1025  ;;  %v4802_v61 = vpop.eup %4801 }
 0x342   :  { %4817 = vrcp.f32 %v1026_v36  ;;  %4390 = vmatprep.mubr.msk.bf16.mxu0 %vm765_vm3, %v1124_v35  ;;  %v1105_v41 = vmul.f32 %v4802_v61, %v6161_v45 }
 0x343   :  { %v4804_v34 = vpop.eup %4803  ;;  %v1029_v25 = vpop.xlane.xlu1 %1028  ;;  %4391 = vmatmul.mubr.msk.bf16.gmra.mxu0 %vm765_vm3, %v1125_v14 }
 0x344   :  { %v4806_v57 = vpop.eup %4805  ;;  %4819 = vrcp.f32 %v1029_v25  ;;  %v1102_v26 = vmul.f32 %v4804_v34, %v6167_v54 }
 0x345   :  { %v4808_v16 = vpop.eup %4807  ;;  %v1032_v51 = vpop.xlane.xlu0 %1031  ;;  %v1104_v17 = vmul.f32 %v4806_v57, %v7623_v21 }
 0x346   :  { %4821 = vrcp.f32 %v1032_v51  ;;  %v1103_v3 = vmul.f32 %v4808_v16, %v7622_v33 }
 0x347   :  { %v1035_v40 = vpop.xlane.xlu1 %1034  ;;  %v1127_v38 = vpack.c.bf16 %v1105_v41, %v1104_v17 }
 0x348   :  { %4823 = vrcp.f32 %v1035_v40  ;;  %v1126_v10 = vpack.c.bf16 %v1103_v3, %v1102_v26 }
 0x349   :  { %v1038_v44 = vpop.xlane.xlu0 %1037 }
 0x34a   :  { %4825 = vrcp.f32 %v1038_v44  ;;  %4394 = vmatprep.mubr.msk.bf16.mxu0 %vm765_vm3, %v1126_v10 }
 0x34b   :  { %v6420_v60 = vpop.eup %4809  ;;  %v1041_v30 = vpop.xlane.xlu1 %1040  ;;  %4395 = vmatmul.mubr.msk.bf16.gmra.mxu0 %vm765_vm3, %v1127_v38 }
 0x34c   :  { %v4812_v45 = vpop.eup %4811  ;;  %4827 = vrcp.f32 %v1041_v30  ;;  %v1898_v54 = vsel %vm765_vm3, %v6420_v60, 0.0 }
 0x34d   :  { %v6425_v56 = vpop.eup %4813  ;;  %1899 = vadd.xlane.f32.xlu0 %v1898_v54  ;;  %v1044_v49 = vpop.xlane.xlu0 %1043  ;;  %v1106_v19 = vmul.f32 %v4812_v45, %v6183_v18 }
 0x34e   :  { %v4816_v29 = vpop.eup %4815  ;;  %4829 = vrcp.f32 %v1044_v49  ;;  %v1901_v13 = vsel %vm765_vm3, %v6425_v56, 0.0 }
 0x34f   :  { %v4818_v37 = vpop.eup %4817  ;;  %1902 = vadd.xlane.f32.xlu1 %v1901_v13  ;;  %v1047_v62 = vpop.xlane.xlu1 %1046  ;;  %v1107_v55 = vmul.f32 %v4816_v29, %v6190_v32 }
 0x350   :  { %4831 = vrcp.f32 %v1047_v62  ;;  %v1108_v50 = vmul.f32 %v4818_v37, %v6185_v4 }
 0x351   :  { %v4820_v58 = vpop.eup %4819  ;;  %v1050_v9 = vpop.xlane.xlu0 %1049  ;;  %v1128_v15 = vpack.c.bf16 %v1107_v55, %v1106_v19 }
 0x352   :  { %4833 = vrcp.f32 %v1050_v9  ;;  %v1109_v39 = vmul.f32 %v4820_v58, %v6194_v7 }
 0x353   :  { %v4822_v6 = vpop.eup %4821  ;;  %4398 = vmatprep.mubr.msk.bf16.mxu0 %vm765_vm3, %v1128_v15  ;;  %v1053_v35 = vpop.xlane.xlu1 %1052 }
 0x354   :  { %4835 = vrcp.f32 %v1053_v35  ;;  %v1129_v36 = vpack.c.bf16 %v1109_v39, %v1108_v50  ;;  %v1110_v18 = vmul.f32 %v4822_v6, %v6203_v11 }
 0x355   :  { %v4824_v14 = vpop.eup %4823  ;;  %v1810_v61 = vpop.xlane.xlu0 %1809 }
 0x356   :  { %4837 = vrcp.f32 %v1810_v61  ;;  %4399 = vmatmul.mubr.msk.bf16.gmra.mxu0 %vm765_vm3, %v1129_v36  ;;  %v1111_v32 = vmul.f32 %v4824_v14, %v6210_v22 }
 0x357   :  { %v4826_v34 = vpop.eup %4825  ;;  %v1813_v25 = vpop.xlane.xlu1 %1812 }
 0x358   :  { %4839 = vrcp.f32 %v1813_v25  ;;  %v1130_v4 = vpack.c.bf16 %v1111_v32, %v1110_v18  ;;  %v1112_v16 = vmul.f32 %v4826_v34, %v6205_v63 }
 0x359   :  { %v4828_v7 = vpop.eup %4827  ;;  %v1816_v57 = vpop.xlane.xlu0 %1815 }
 0x35a   :  { %4841 = vrcp.f32 %v1816_v57  ;;  %4402 = vmatprep.mubr.msk.bf16.mxu0 %vm765_vm3, %v1130_v4  ;;  %v1113_v51 = vmul.f32 %v4828_v7, %v6214_v48 }
 0x35b   :  { %v4830_v41 = vpop.eup %4829  ;;  %v1819_v26 = vpop.xlane.xlu1 %1818 }
 0x35c   :  { %4843 = vrcp.f32 %v1819_v26  ;;  %v1131_v33 = vpack.c.bf16 %v1113_v51, %v1112_v16  ;;  %v1114_v22 = vmul.f32 %v4830_v41, %v6223_v0 }
 0x35d   :  { %v4832_v11 = vpop.eup %4831  ;;  %v1822_v3 = vpop.xlane.xlu0 %1821 }
 0x35e   :  { %4845 = vrcp.f32 %v1822_v3  ;;  %4403 = vmatmul.mubr.msk.bf16.gmra.mxu0 %vm765_vm3, %v1131_v33  ;;  %v1115_v40 = vmul.f32 %v4832_v11, %v6230_v42 }
 0x35f   :  { %v4834_v21 = vpop.eup %4833  ;;  %v1825_v17 = vpop.xlane.xlu1 %1824 }
 0x360   :  { %4847 = vrcp.f32 %v1825_v17  ;;  %v1132_v10 = vpack.c.bf16 %v1115_v40, %v1114_v22  ;;  %v1116_v48 = vmul.f32 %v4834_v21, %v6225_v20 }
 0x361   :  { %v4836_v63 = vpop.eup %4835  ;;  %v1828_v44 = vpop.xlane.xlu0 %1827 }
 0x362   :  { %4849 = vrcp.f32 %v1828_v44  ;;  %4406 = vmatprep.mubr.msk.bf16.mxu0 %vm765_vm3, %v1132_v10  ;;  %v1117_v38 = vmul.f32 %v4836_v63, %v6234_v1  ;;  %v7625_v44 = vld [vmem:[#allocation14_spill] sm:$0xff] }
 0x363   :  { %v4838_v30 = vpop.eup %4837  ;;  %v1831_v45 = vpop.xlane.xlu1 %1830 }
 0x364   :  { %4851 = vrcp.f32 %v1831_v45  ;;  %v1133_v54 = vpack.c.bf16 %v1117_v38, %v1116_v48  ;;  %v1936_v42 = vmul.f32 %v4838_v30, %v6243_v28 }
 0x365   :  { %v4840_v0 = vpop.eup %4839  ;;  %v1834_v49 = vpop.xlane.xlu0 %1833 }
 0x366   :  { %4853 = vrcp.f32 %v1834_v49  ;;  %4407 = vmatmul.mubr.msk.bf16.gmra.mxu0 %vm765_vm3, %v1133_v54  ;;  %v1937_v29 = vmul.f32 %v4840_v0, %v6250_v23  ;;  %v7626_v0 = vld [vmem:[#allocation9_spill] sm:$0xff] }
 0x367   :  { %v4842_v13 = vpop.eup %4841  ;;  %v1837_v37 = vpop.xlane.xlu1 %1836 }
 0x368   :  { %4855 = vrcp.f32 %v1837_v37  ;;  %v1968_v62 = vpack.c.bf16 %v1937_v29, %v1936_v42  ;;  %v1938_v1 = vmul.f32 %v4842_v13, %v6245_v8 }
 0x369   :  { %v4844_v20 = vpop.eup %4843  ;;  %v1840_v19 = vpop.xlane.xlu0 %1839 }
 0x36a   :  { %v1939_v55 = vmul.f32 %v4844_v20, %v6254_v46  ;;  %4857 = vrcp.f32 %v1840_v19  ;;  %4458 = vmatprep.mubr.msk.bf16.mxu0 %vm765_vm3, %v1968_v62  ;;  %v7627_v20 = vld [vmem:[#allocation8_spill] sm:$0xff] }
 0x36b   :  { %v4846_v58 = vpop.eup %4845  ;;  %v1843_v9 = vpop.xlane.xlu1 %1842 }
 0x36c   :  { %v1969_v15 = vpack.c.bf16 %v1939_v55, %v1938_v1  ;;  %4859 = vrcp.f32 %v1843_v9  ;;  %v1940_v23 = vmul.f32 %v4846_v58, %v6263_v59  ;;  %v7628_v1 = vld [vmem:[#allocation13_spill] sm:$0xff] }
 0x36d   :  { %v4848_v28 = vpop.eup %4847  ;;  %v1846_v50 = vpop.xlane.xlu0 %1845 }
 0x36e   :  { %4861 = vrcp.f32 %v1846_v50  ;;  %4459 = vmatmul.mubr.msk.bf16.vlgmr.msra.gmra.mxu0 %vm765_vm3, %v1969_v15  ;;  %v1941_v39 = vmul.f32 %v4848_v28, %v6270_v12 }
 0x36f   :  { %v4850_v6 = vpop.eup %4849  ;;  %v1849_v8 = vpop.xlane.xlu1 %1848 }
 0x370   :  { %4863 = vrcp.f32 %v1849_v8  ;;  %v1970_v46 = vpack.c.bf16 %v1941_v39, %v1940_v23  ;;  %v1942_v14 = vmul.f32 %v4850_v6, %v6265_v31  ;;  %v7629_v23 = vld [vmem:[#allocation11_spill] sm:$0xff] }
 0x371   :  { %v4852_v35 = vpop.eup %4851  ;;  %v1852_v36 = vpop.xlane.xlu0 %1851  ;;  %v7630_v6 = vld [vmem:[#allocation15_spill] sm:$0xff] }
 0x372   :  { %4865 = vrcp.f32 %v1852_v36  ;;  %4462 = vmatprep.mubr.msk.bf16.mxu0 %vm765_vm3, %v1970_v46  ;;  %v1943_v61 = vmul.f32 %v4852_v35, %v6274_v5  ;;  %v4558_v36 = vld [vmem:[%s7456_s3 + $0x30] sm:$0xff]  }
 0x373   :  { %v4854_v18 = vpop.eup %4853  ;;  %v1855_v32 = vpop.xlane.xlu1 %1854 }
 0x374   :  { %4867 = vrcp.f32 %v1855_v32  ;;  %v1971_v34 = vpack.c.bf16 %v1943_v61, %v1942_v14  ;;  %v1944_v12 = vmul.f32 %v4854_v18, %v6283_v47  ;;  %v7631_v18 = vld [vmem:[#allocation17_spill] sm:$0xff] }
 0x375   :  { %v4856_v59 = vpop.eup %4855  ;;  %v1858_v25 = vpop.xlane.xlu0 %1857 }
 0x376   :  { %4869 = vrcp.f32 %v1858_v25  ;;  %4463 = vmatmul.mubr.msk.bf16.gmra.mxu0 %vm765_vm3, %v1971_v34  ;;  %v1945_v4 = vmul.f32 %v4856_v59, %v6290_v2  ;;  %v7632_v34 = vld [vmem:[#allocation22_spill] sm:$0xff] }
 0x377   :  { %v4858_v7 = vpop.eup %4857  ;;  %v1861_v57 = vpop.xlane.xlu1 %1860 }
 0x378   :  { %4871 = vrcp.f32 %v1861_v57  ;;  %v1972_v16 = vpack.c.bf16 %v1945_v4, %v1944_v12  ;;  %v1946_v5 = vmul.f32 %v4858_v7, %v6285_v43  ;;  %v4559_v12 = vld [vmem:[%s7456_s3 + $0x28] sm:$0xff]  }
 0x379   :  { %v4860_v31 = vpop.eup %4859  ;;  %v1864_v51 = vpop.xlane.xlu0 %1863  ;;  %v7633_v57 = vld [vmem:[#allocation23_spill] sm:$0xff] }
 0x37a   :  { %4873 = vrcp.f32 %v1864_v51  ;;  %4466 = vmatprep.mubr.msk.bf16.mxu0 %vm765_vm3, %v1972_v16  ;;  %v1947_v41 = vmul.f32 %v4860_v31, %v6294_v53  ;;  %v7624_v53 = vld [vmem:[#allocation16_spill] sm:$0xff]  ;;  %v7634_v31 = vld [vmem:[#allocation25_spill] sm:$0xff] }
 0x37b   :  { %v4862_v26 = vpop.eup %4861  ;;  %v1867_v33 = vpop.xlane.xlu1 %1866 }
 0x37c   :  { %4875 = vrcp.f32 %v1867_v33  ;;  %v1973_v11 = vpack.c.bf16 %v1947_v41, %v1946_v5  ;;  %v1948_v2 = vmul.f32 %v4862_v26, %v6303_v24  ;;  %v4560_v41 = vld [vmem:[%s7456_s3 + $0x20] sm:$0xff]  }
 0x37d   :  { %v4864_v47 = vpop.eup %4863  ;;  %v1870_v3 = vpop.xlane.xlu0 %1869 }
 0x37e   :  { %4877 = vrcp.f32 %v1870_v3  ;;  %4467 = vmatmul.mubr.msk.bf16.gmra.mxu0 %vm765_vm3, %v1973_v11  ;;  %v1949_v22 = vmul.f32 %v4864_v47, %v6310_v27  ;;  %v7635_v11 = vld [vmem:[#allocation24_spill] sm:$0xff]  ;;  %v7636_v3 = vld [vmem:[#allocation26_spill] sm:$0xff] }
 0x37f   :  { %v4866_v40 = vpop.eup %4865  ;;  %v1873_v21 = vpop.xlane.xlu1 %1872 }
 0x380   :  { %4879 = vrcp.f32 %v1873_v21  ;;  %v1974_v17 = vpack.c.bf16 %v1949_v22, %v1948_v2  ;;  %v1950_v63 = vmul.f32 %v4866_v40, %v7624_v53  ;;  %v4561_v40 = vld [vmem:[%s7456_s3 + $0x18] sm:$0xff]   ;;  %v7638_v53 = vld [vmem:[#allocation28_spill] sm:$0xff] }
 0x381   :  { %v4868_v43 = vpop.eup %4867  ;;  %v1876_v10 = vpop.xlane.xlu0 %1875 }
 0x382   :  { %4881 = vrcp.f32 %v1876_v10  ;;  %4470 = vmatprep.mubr.msk.bf16.mxu0 %vm765_vm3, %v1974_v17  ;;  %v1951_v48 = vmul.f32 %v4868_v43, %v7625_v44  ;;  %v7637_v43 = vld [vmem:[#allocation27_spill] sm:$0xff]  ;;  %v4562_v44 = vld [vmem:[%s7456_s3 + $0x10] sm:$0xff]  }
 0x383   :  { %v4870_v38 = vpop.eup %4869  ;;  %v1879_v30 = vpop.xlane.xlu1 %1878 }
 0x384   :  { %4883 = vrcp.f32 %v1879_v30  ;;  %v1975_v45 = vpack.c.bf16 %v1951_v48, %v1950_v63  ;;  %v1952_v27 = vmul.f32 %v4870_v38, %v6323_v52  ;;  %v4557_v52 = vld [vmem:[%s7456_s3 + $0x38] sm:$0xff]   ;;  %v4563_v38 = vld [vmem:[%s7456_s3 + $0x8] sm:$0xff]   ;;  %v4564_v30 = vld [vmem:[%s7456_s3] sm:$0xff]  }
 0x385   :  { %v4872_v24 = vpop.eup %4871  ;;  %v1882_v54 = vpop.xlane.xlu0 %1881  ;;  %4490 = vmatprep.subr.bf16.mxu1 %v4557_v52 }
 0x386   :  { %4885 = vrcp.f32 %v1882_v54  ;;  %4471 = vmatmul.mubr.msk.bf16.gmra.mxu0 %vm765_vm3, %v1975_v45  ;;  %v1953_v49 = vmul.f32 %v4872_v24, %v7626_v0  ;;  %4491 = vmatpush3.bf16.msra.mxu1 %v4557_v52 }
 0x387   :  { %v4874_v42 = vpop.eup %4873  ;;  %v1885_v29 = vpop.xlane.xlu1 %1884  ;;  %4492 = vmatprep.subr.bf16.mxu1 %v4558_v36 }
 0x388   :  { %4887 = vrcp.f32 %v1885_v29  ;;  %v1976_v13 = vpack.c.bf16 %v1953_v49, %v1952_v27  ;;  %v1954_v19 = vmul.f32 %v4874_v42, %v7627_v20 }
 0x389   :  { %v4876_v37 = vpop.eup %4875  ;;  %v1888_v62 = vpop.xlane.xlu0 %1887 }
 0x38a   :  { %4889 = vrcp.f32 %v1888_v62  ;;  %4474 = vmatprep.mubr.msk.bf16.mxu0 %vm765_vm3, %v1976_v13  ;;  %v1955_v55 = vmul.f32 %v4876_v37, %v7628_v1  ;;  %4493 = vmatpush3.bf16.msra.mxu1 %v4558_v36  ;;  %v7639_v13 = vmov 0  }
 0x38b   :  { %v4878_v58 = vpop.eup %4877  ;;  %v1891_v9 = vpop.xlane.xlu1 %1890  ;;  %4494 = vmatprep.subr.bf16.mxu1 %v4559_v12 }
 0x38c   :  { %4891 = vrcp.f32 %v1891_v9  ;;  %v1977_v15 = vpack.c.bf16 %v1955_v55, %v1954_v19  ;;  %v1956_v39 = vmul.f32 %v4878_v58, %v7629_v23 }
 0x38d   :  { %v4880_v28 = vpop.eup %4879  ;;  %v1894_v50 = vpop.xlane.xlu0 %1893 }
 0x38e   :  { %4893 = vrcp.f32 %v1894_v50  ;;  %4475 = vmatmul.mubr.msk.bf16.gmra.mxu0 %vm765_vm3, %v1977_v15  ;;  %v1957_v8 = vmul.f32 %v4880_v28, %v7630_v6  ;;  %4495 = vmatpush3.bf16.msra.mxu1 %v4559_v12  ;;  %v7641_v12 = vld [vmem:[#allocation4_spill] sm:$0xff] }
 0x38f   :  { %v4882_v46 = vpop.eup %4881  ;;  %v1897_v35 = vpop.xlane.xlu1 %1896  ;;  %4496 = vmatprep.subr.bf16.mxu1 %v4560_v41 }
 0x390   :  { %4895 = vrcp.f32 %v1897_v35  ;;  %v1978_v14 = vpack.c.bf16 %v1957_v8, %v1956_v39  ;;  %v1958_v32 = vmul.f32 %v4882_v46, %v7631_v18  ;;  %v7640_v18 = vld [vmem:[#allocation5_spill] sm:$0xff] }
 0x391   :  { %v4884_v61 = vpop.eup %4883 }
 0x392   :  { %4478 = vmatprep.mubr.msk.bf16.mxu0 %vm765_vm3, %v1978_v14  ;;  %v1959_v59 = vmul.f32 %v4884_v61, %v7632_v34  ;;  %4497 = vmatpush3.bf16.msra.mxu1 %v4560_v41 }
 0x393   :  { %v4886_v25 = vpop.eup %4885  ;;  %4498 = vmatprep.subr.bf16.mxu1 %v4561_v40 }
 0x394   :  { %v1979_v4 = vpack.c.bf16 %v1959_v59, %v1958_v32  ;;  %v1960_v16 = vmul.f32 %v4886_v25, %v7633_v57  ;;  %v7642_v57 = vld [vmem:[#allocation6_spill] sm:$0xff] }
 0x395   :  { %v4888_v7 = vpop.eup %4887 }
 0x396   :  { %4479 = vmatmul.mubr.msk.bf16.gmra.mxu0 %vm765_vm3, %v1979_v4  ;;  %v1961_v51 = vmul.f32 %v4888_v7, %v7634_v31  ;;  %4499 = vmatpush3.bf16.msra.mxu1 %v4561_v40  ;;  %v7643_v40 = vld [vmem:[#allocation7_spill] sm:$0xff] }
 0x397   :  { %v4890_v5 = vpop.eup %4889  ;;  %4500 = vmatprep.subr.bf16.mxu1 %v4562_v44 }
 0x398   :  { %v1980_v26 = vpack.c.bf16 %v1961_v51, %v1960_v16  ;;  %v1962_v47 = vmul.f32 %v4890_v5, %v7635_v11 }
 0x399   :  { %v4892_v33 = vpop.eup %4891 }
 0x39a   :  { %4482 = vmatprep.mubr.msk.bf16.mxu0 %vm765_vm3, %v1980_v26  ;;  %v1963_v2 = vmul.f32 %v4892_v33, %v7636_v3  ;;  %4501 = vmatpush3.bf16.msra.mxu1 %v4562_v44 }
 0x39b   :  { %v4894_v22 = vpop.eup %4893  ;;  %4502 = vmatprep.subr.bf16.mxu1 %v4563_v38 }
 0x39c   :  { %v1981_v21 = vpack.c.bf16 %v1963_v2, %v1962_v47  ;;  %v1964_v10 = vmul.f32 %v4894_v22, %v7637_v43 }
 0x39d   :  { %v4896_v17 = vpop.eup %4895 }
 0x39e   :  { %4483 = vmatmul.mubr.msk.bf16.gmra.mxu0 %vm765_vm3, %v1981_v21  ;;  %v1965_v63 = vmul.f32 %v4896_v17, %v7638_v53  ;;  %4503 = vmatpush3.bf16.msra.mxu1 %v4563_v38 }
 0x39f   :  { %4504 = vmatprep.subr.bf16.mxu1 %v4564_v30 }
 0x3a0   :  { %v1982_v48 = vpack.c.bf16 %v1965_v63, %v1964_v10 }
 0x3a2   :  { %4486 = vmatprep.mubr.msk.bf16.mxu0 %vm765_vm3, %v1982_v48  ;;  %4505 = vmatpush3.bf16.msra.mxu1 %v4564_v30 }
 0x3d6   :  { %v1900_v45 = vpop.xlane.xlu0 %1899 }
 0x3d7   :  { %4897 = vrcp.f32 %v1900_v45 }
 0x3d8   :  { %v1903_v24 = vpop.xlane.xlu1 %1902 }
 0x3d9   :  { %4899 = vrcp.f32 %v1903_v24 }
 0x3e4   :  { %v4898_v54 = vpop.eup %4897 }
 0x3e5   :  { %v1966_v0 = vmul.f32 %v4898_v54, %v6420_v60 }
 0x3e6   :  { %v4900_v27 = vpop.eup %4899 }
 0x3e7   :  { %v1967_v49 = vmul.f32 %v4900_v27, %v6425_v56 }
 0x3e9   :  { %v1983_v42 = vpack.c.bf16 %v1967_v49, %v1966_v0 }
 0x3eb   :  { %v4380_v29 = vpop.f32.mrf.mxu0  ;;  %4487 = vmatmul.mubr.msk.bf16.gmra.mxu0 %vm765_vm3, %v1983_v42 }
 0x3ec   :  { %2918 = vmatprep.mubr.bf16.mxu0 %v7639_v13  ;;  %v1345_v33 = vmul.f32 %v4380_v29, %v7641_v12 }
 0x3ed   :  { %v1216_v37 = vpop.f32.mrf.mxu0 }
 0x3ee   :  { %v1343_v51 = vmul.f32 %v1216_v37, %v7641_v12 }
 0x3ef   :  { %v4381_v62 = vpop.f32.mrf.mxu0 }
 0x3f0   :  { %v1346_v4 = vmul.f32 %v4381_v62, %v7641_v12 }
 0x3f1   :  { %v1219_v20 = vpop.f32.mrf.mxu0 }
 0x3f2   :  { %v1344_v5 = vmul.f32 %v1219_v20, %v7641_v12 }
 0x3f3   :  { %v6520_v19 = vpop.f32.mrf.mxu0 }
 0x3f5   :  { %v1232_v1 = vpop.f32.mrf.mxu0 }
 0x3f6   :  { %v1347_v30 = vmul.f32 %v1232_v1, %v7641_v12 }
 0x3f7   :  { %v4385_v55 = vpop.f32.mrf.mxu0 }
 0x3f8   :  { %v1350_v37 = vmul.f32 %v4385_v55, %v7641_v12 }
 0x3f9   :  { %v1235_v58 = vpop.f32.mrf.mxu0 }
 0x3fa   :  { %v1348_v1 = vmul.f32 %v1235_v58, %v7641_v12 }
 0x3fb   :  { %v4388_v9 = vpop.f32.mrf.mxu0 }
 0x3fc   :  { %v1353_v7 = vmul.f32 %v4388_v9, %v7640_v18 }
 0x3fd   :  { %v1248_v52 = vpop.f32.mrf.mxu0 }
 0x3fe   :  { %v1351_v59 = vmul.f32 %v1248_v52, %v7640_v18  ;;  %v1381_v43 = vadd.f32 %v1353_v7, %v1345_v33 }
 0x3ff   :  { %v4389_v15 = vpop.f32.mrf.mxu0 }
 0x400   :  { %v1354_v32 = vmul.f32 %v4389_v15, %v7640_v18  ;;  %v1375_v2 = vadd.f32 %v1351_v59, %v1343_v51 }
 0x401   :  { %v1251_v60 = vpop.f32.mrf.mxu0 }
 0x402   :  { %v1352_v25 = vmul.f32 %v1251_v60, %v7640_v18  ;;  %v1384_v11 = vadd.f32 %v1354_v32, %v1346_v4 }
 0x403   :  { %v4392_v28 = vpop.f32.mrf.mxu0 }
 0x404   :  { %v1378_v22 = vadd.f32 %v1352_v25, %v1344_v5  ;;  %v1357_v62 = vmul.f32 %v4392_v28, %v7640_v18 }
 0x405   :  { %v1264_v56 = vpop.f32.mrf.mxu0 }
 0x406   :  { %v1355_v0 = vmul.f32 %v1264_v56, %v7640_v18  ;;  %v1349_v56 = vmul.f32 %v6520_v19, %v7641_v12 }
 0x407   :  { %v4393_v50 = vpop.f32.mrf.mxu0 }
 0x408   :  { %v1358_v45 = vmul.f32 %v4393_v50, %v7640_v18  ;;  %v1387_v28 = vadd.f32 %v1355_v0, %v1347_v30  ;;  %v1393_v58 = vadd.f32 %v1357_v62, %v1349_v56 }
 0x409   :  { %v1267_v23 = vpop.f32.mrf.mxu0 }
 0x40a   :  { %v1356_v49 = vmul.f32 %v1267_v23, %v7640_v18  ;;  %v1396_v23 = vadd.f32 %v1358_v45, %v1350_v37 }
 0x40b   :  { %v4396_v39 = vpop.f32.mrf.mxu0 }
 0x40c   :  { %v1361_v47 = vmul.f32 %v4396_v39, %v7642_v57 }
 0x40d   :  { %v1280_v6 = vpop.f32.mrf.mxu0 }
 0x40e   :  { %v1359_v41 = vmul.f32 %v1280_v6, %v7642_v57  ;;  %v1382_v24 = vadd.f32 %v1381_v43, %v1361_v47 }
 0x40f   :  { %v4397_v8 = vpop.f32.mrf.mxu0 }
 0x410   :  { %v1362_v16 = vmul.f32 %v4397_v8, %v7642_v57  ;;  %v1376_v44 = vadd.f32 %v1375_v2, %v1359_v41  ;;  %v1390_v8 = vadd.f32 %v1356_v49, %v1348_v1 }
 0x411   :  { %v1283_v46 = vpop.f32.mrf.mxu0 }
 0x412   :  { %v1360_v26 = vmul.f32 %v1283_v46, %v7642_v57  ;;  %v1385_v10 = vadd.f32 %v1384_v11, %v1362_v16 }
 0x414   :  { %v1379_v48 = vadd.f32 %v1378_v22, %v1360_v26 }
 0x416   :  { %v4400_v35 = vpop.f32.mrf.mxu0 }
 0x417   :  { %v1365_v39 = vmul.f32 %v4400_v35, %v7642_v57 }
 0x418   :  { %v1296_v36 = vpop.f32.mrf.mxu0 }
 0x419   :  { %v1363_v15 = vmul.f32 %v1296_v36, %v7642_v57  ;;  %v1394_v35 = vadd.f32 %v1393_v58, %v1365_v39 }
 0x41a   :  { %v4401_v14 = vpop.f32.mrf.mxu0 }
 0x41b   :  { %v1366_v20 = vmul.f32 %v4401_v14, %v7642_v57 }
 0x41c   :  { %v1299_v61 = vpop.f32.mrf.mxu0 }
 0x41d   :  { %v1364_v60 = vmul.f32 %v1299_v61, %v7642_v57  ;;  %v1397_v36 = vadd.f32 %v1396_v23, %v1366_v20 }
 0x41e   :  { %v4404_v34 = vpop.f32.mrf.mxu0 }
 0x41f   :  { %v1369_v53 = vmul.f32 %v4404_v34, %v7643_v40  ;;  %v1388_v34 = vadd.f32 %v1387_v28, %v1363_v15  ;;  %v1391_v19 = vadd.f32 %v1390_v8, %v1364_v60 }
 0x420   :  { %v1312_v31 = vpop.f32.mrf.mxu0 }
 0x421   :  { %v1367_v21 = vmul.f32 %v1312_v31, %v7643_v40  ;;  %v1383_v9 = vadd.f32 %v1382_v24, %v1369_v53 }
 0x422   :  { %v4405_v3 = vpop.f32.mrf.mxu0 }
 0x423   :  { %v1370_v17 = vmul.f32 %v4405_v3, %v7643_v40  ;;  %v1377_v42 = vadd.f32 %v1376_v44, %v1367_v21 }
 0x424   :  { %v1315_v63 = vpop.f32.mrf.mxu0 }
 0x425   :  { %v1368_v38 = vmul.f32 %v1315_v63, %v7643_v40  ;;  %v1386_v54 = vadd.f32 %v1385_v10, %v1370_v17 }
 0x426   :  { %v4408_v27 = vpop.f32.mrf.mxu0 }
 0x427   :  { %v1380_v29 = vadd.f32 %v1379_v48, %v1368_v38  ;;  %v2250_v55 = vpack.c.bf16 %v1386_v54, %v1383_v9  ;;  %v1373_v61 = vmul.f32 %v4408_v27, %v7643_v40 }
 0x428   :  { %v1328_v52 = vpop.f32.mrf.mxu0 }
 0x429   :  { %v2249_v50 = vpack.c.bf16 %v1380_v29, %v1377_v42  ;;  %v1371_v46 = vmul.f32 %v1328_v52, %v7643_v40  ;;  %v1395_v31 = vadd.f32 %v1394_v35, %v1373_v61 }
 0x42a   :  { %v4409_v6 = vpop.f32.mrf.mxu0 }
 0x42b   :  { %v1374_v14 = vmul.f32 %v4409_v6, %v7643_v40  ;;  %4506 = vmatprep.mubr.bf16.mxu1 %v2249_v50  ;;  %v1389_v7 = vadd.f32 %v1388_v34, %v1371_v46 }
 0x42c   :  { %v1331_v32 = vpop.f32.mrf.mxu0  ;;  %4507 = vmatmul.mubr.bf16.vlgmr.msra.gmra.mxu1 %v2250_v55 }
 0x42d   :  { %v1372_v59 = vmul.f32 %v1331_v32, %v7643_v40  ;;  %v1398_v25 = vadd.f32 %v1397_v36, %v1374_v14 }
 0x42e   :  { %v6555_v4 = vpop.f32.mrf.mxu0 }
 0x42f   :  { %v1392_v16 = vadd.f32 %v1391_v19, %v1372_v59  ;;  %v2252_v26 = vpack.c.bf16 %v1398_v25, %v1395_v31  ;;  %v2195_v31 = vmul.f32 %v6555_v4, %v7641_v12 }
 0x430   :  { %v2066_v51 = vpop.f32.mrf.mxu0 }
 0x431   :  { %v2251_v5 = vpack.c.bf16 %v1392_v16, %v1389_v7  ;;  %v2193_v35 = vmul.f32 %v2066_v51, %v7641_v12 }
 0x432   :  { %v4461_v41 = vpop.f32.mrf.mxu0 }
 0x433   :  { %4510 = vmatprep.mubr.bf16.mxu1 %v2251_v5  ;;  %v2196_v32 = vmul.f32 %v4461_v41, %v7641_v12 }
 0x434   :  { %v2069_v33 = vpop.f32.mrf.mxu0  ;;  %4511 = vmatmul.mubr.bf16.gmra.mxu1 %v2252_v26 }
 0x435   :  { %v2194_v25 = vmul.f32 %v2069_v33, %v7641_v12 }
 0x436   :  { %v4464_v11 = vpop.f32.mrf.mxu0 }
 0x437   :  { %v2199_v53 = vmul.f32 %v4464_v11, %v7641_v12 }
 0x438   :  { %v2082_v47 = vpop.f32.mrf.mxu0 }
 0x439   :  { %v2197_v48 = vmul.f32 %v2082_v47, %v7641_v12 }
 0x43a   :  { %v4465_v3 = vpop.f32.mrf.mxu0 }
 0x43b   :  { %v2200_v24 = vmul.f32 %v4465_v3, %v7641_v12 }
 0x43c   :  { %v2085_v2 = vpop.f32.mrf.mxu0 }
 0x43d   :  { %v2198_v49 = vmul.f32 %v2085_v2, %v7641_v12 }
 0x43e   :  { %v4468_v22 = vpop.f32.mrf.mxu0 }
 0x43f   :  { %v2203_v34 = vmul.f32 %v4468_v22, %v7640_v18 }
 0x440   :  { %v2098_v21 = vpop.f32.mrf.mxu0 }
 0x441   :  { %v2201_v58 = vmul.f32 %v2098_v21, %v7640_v18  ;;  %v2231_v51 = vadd.f32 %v2203_v34, %v2195_v31 }
 0x442   :  { %v4469_v17 = vpop.f32.mrf.mxu0 }
 0x443   :  { %v2204_v46 = vmul.f32 %v4469_v17, %v7640_v18  ;;  %v2225_v11 = vadd.f32 %v2201_v58, %v2193_v35 }
 0x444   :  { %v2101_v43 = vpop.f32.mrf.mxu0 }
 0x445   :  { %v2202_v36 = vmul.f32 %v2101_v43, %v7640_v18  ;;  %v2234_v5 = vadd.f32 %v2204_v46, %v2196_v32  ;;  %v4967_v46 = vld [vmem:[%s7453_s0 + $0x8] sm:$0xff]  ;;  %v4968_v32 = vld [vmem:[%s7453_s0 + $0x18] sm:$0xff] }
 0x446   :  { %v4472_v10 = vpop.f32.mrf.mxu0 }
 0x447   :  { %v2207_v63 = vmul.f32 %v4472_v10, %v7640_v18 }
 0x448   :  { %v2114_v44 = vpop.f32.mrf.mxu0 }
 0x449   :  { %v2243_v38 = vadd.f32 %v2207_v63, %v2199_v53  ;;  %v2205_v30 = vmul.f32 %v2114_v44, %v7640_v18 }
 0x44a   :  { %v4473_v45 = vpop.f32.mrf.mxu0 }
 0x44b   :  { %v2237_v54 = vadd.f32 %v2205_v30, %v2197_v48  ;;  %v2208_v27 = vmul.f32 %v4473_v45, %v7640_v18 }
 0x44c   :  { %v2117_v0 = vpop.f32.mrf.mxu0 }
 0x44d   :  { %v2246_v42 = vadd.f32 %v2208_v27, %v2200_v24  ;;  %v2206_v29 = vmul.f32 %v2117_v0, %v7640_v18  ;;  %v2228_v18 = vadd.f32 %v2202_v36, %v2194_v25 }
 0x44e   :  { %v4476_v37 = vpop.f32.mrf.mxu0 }
 0x44f   :  { %v2240_v62 = vadd.f32 %v2206_v29, %v2198_v49  ;;  %v2211_v26 = vmul.f32 %v4476_v37, %v7642_v57 }
 0x450   :  { %v2130_v20 = vpop.f32.mrf.mxu0 }
 0x451   :  { %v2209_v7 = vmul.f32 %v2130_v20, %v7642_v57  ;;  %v2232_v12 = vadd.f32 %v2231_v51, %v2211_v26  ;;  %v4971_v26 = vld [vmem:[%s7453_s0 + $0x28] sm:$0xff] }
 0x452   :  { %v4477_v9 = vpop.f32.mrf.mxu0 }
 0x453   :  { %v2212_v19 = vmul.f32 %v4477_v9, %v7642_v57  ;;  %v2226_v21 = vadd.f32 %v2225_v11, %v2209_v7  ;;  %v4972_v11 = vld [vmem:[%s7453_s0 + $0x38] sm:$0xff] }
 0x454   :  { %v2133_v52 = vpop.f32.mrf.mxu0 }
 0x455   :  { %v2210_v16 = vmul.f32 %v2133_v52, %v7642_v57  ;;  %v2235_v2 = vadd.f32 %v2234_v5, %v2212_v19  ;;  %v6594_v52 = vld [vmem:[%s7457_s4] ss:$0 sm:$0xff] }
 0x456   :  { %v4480_v1 = vpop.f32.mrf.mxu0 }
 0x457   :  { %v2215_v15 = vmul.f32 %v4480_v1, %v7642_v57  ;;  %v2229_v17 = vadd.f32 %v2228_v18, %v2210_v16  ;;  %v4970_v16 = vld [vmem:[%s7453_s0 + $0x30] sm:$0xff] }
 0x458   :  { %v2146_v60 = vpop.f32.mrf.mxu0 }
 0x459   :  { %v2244_v50 = vadd.f32 %v2243_v38, %v2215_v15  ;;  %v2213_v56 = vmul.f32 %v2146_v60, %v7642_v57 }
 0x45a   :  { %v4481_v23 = vpop.f32.mrf.mxu0 }
 0x45b   :  { %v2238_v39 = vadd.f32 %v2237_v54, %v2213_v56  ;;  %v2216_v55 = vmul.f32 %v4481_v23, %v7642_v57 }
 0x45c   :  { %v2149_v6 = vpop.f32.mrf.mxu0 }
 0x45d   :  { %v2247_v28 = vadd.f32 %v2246_v42, %v2216_v55  ;;  %v2214_v8 = vmul.f32 %v2149_v6, %v7642_v57  ;;  %v4966_v6 = vld [vmem:[%s7453_s0 + $0x10] sm:$0xff] }
 0x45e   :  { %v4484_v14 = vpop.f32.mrf.mxu0 }
 0x45f   :  { %v2241_v61 = vadd.f32 %v2240_v62, %v2214_v8  ;;  %v2219_v33 = vmul.f32 %v4484_v14, %v7643_v40 }
 0x460   :  { %v2162_v59 = vpop.f32.mrf.mxu0 }
 0x461   :  { %v2217_v47 = vmul.f32 %v2162_v59, %v7643_v40  ;;  %v2233_v53 = vadd.f32 %v2232_v12, %v2219_v33  ;;  %v4969_v59 = vld [vmem:[%s7453_s0 + $0x20] sm:$0xff]  ;;  %v4974_v12 = vld [vmem:[%s7453_s0 + $0x50] sm:$0xff] }
 0x462   :  { %v4485_v41 = vpop.f32.mrf.mxu0 }
 0x463   :  { %v2220_v3 = vmul.f32 %v4485_v41, %v7643_v40  ;;  %v2227_v10 = vadd.f32 %v2226_v21, %v2217_v47 }
 0x464   :  { %v2165_v22 = vpop.f32.mrf.mxu0 }
 0x465   :  { %v2218_v43 = vmul.f32 %v2165_v22, %v7643_v40  ;;  %v2236_v4 = vadd.f32 %v2235_v2, %v2220_v3  ;;  %v4973_v22 = vld [vmem:[%s7453_s0 + $0x40] sm:$0xff] }
 0x467   :  { %v2230_v57 = vadd.f32 %v2229_v17, %v2218_v43  ;;  %v2254_v44 = vpack.c.bf16 %v2236_v4, %v2233_v53 }
 0x469   :  { %v2253_v63 = vpack.c.bf16 %v2230_v57, %v2227_v10  ;;  %v4975_v57 = vld [vmem:[%s7453_s0 + $0x48] sm:$0xff] }
 0x46b   :  { %4514 = vmatprep.mubr.bf16.mxu1 %v2253_v63  ;;  %v4976_v63 = vld [vmem:[%s7453_s0 + $0x58] sm:$0xff] }
 0x46c   :  { %4515 = vmatmul.mubr.bf16.gmra.mxu1 %v2254_v44 }
 0x4ab   :  { %v4488_v48 = vpop.f32.mrf.mxu0 }
 0x4ac   :  { %v2223_v30 = vmul.f32 %v4488_v48, %v7643_v40 }
 0x4ad   :  { %v2178_v38 = vpop.f32.mrf.mxu0 }
 0x4ae   :  { %v2221_v24 = vmul.f32 %v2178_v38, %v7643_v40  ;;  %v2245_v0 = vadd.f32 %v2244_v50, %v2223_v30  ;;  %v4965_v50 = vld [vmem:[%s7453_s0] sm:$0xff] }
 0x4af   :  { %v4489_v45 = vpop.f32.mrf.mxu0 }
 0x4b0   :  { %v2224_v54 = vmul.f32 %v4489_v45, %v7643_v40  ;;  %v2239_v29 = vadd.f32 %v2238_v39, %v2221_v24 }
 0x4b1   :  { %v2181_v27 = vpop.f32.mrf.mxu0 }
 0x4b2   :  { %v2248_v49 = vadd.f32 %v2247_v28, %v2224_v54  ;;  %v2222_v42 = vmul.f32 %v2181_v27, %v7643_v40  ;;  %v4977_v27 = vld [vmem:[%s7453_s0 + $0x60] sm:$0xff] }
 0x4b4   :  { %v2242_v37 = vadd.f32 %v2241_v61, %v2222_v42  ;;  %v2256_v62 = vpack.c.bf16 %v2248_v49, %v2245_v0 }
 0x4b6   :  { %v2255_v20 = vpack.c.bf16 %v2242_v37, %v2239_v29 }
 0x4b8   :  { %4518 = vmatprep.mubr.bf16.mxu1 %v2255_v20  ;;  %v4978_v20 = vld [vmem:[%s7453_s0 + $0x70] sm:$0xff] }
 0x4b9   :  { %4519 = vmatmul.mubr.bf16.gmra.mxu1 %v2256_v62 }
 0x4ba   :  { %3031 = vmatprep.mubr.bf16.mxu1 %v7639_v13 }
 0x4ec   :  { %v4508_v9 = vpop.f32.mrf.mxu1 }
 0x4ed   :  { %v2371_v40 = vadd.f32 %v4508_v9, %v6594_v52 }
 0x4ee   :  { %v2362_v1 = vpop.f32.mrf.mxu1 }
 0x4ef   :  { %v2363_v15 = vadd.f32 %v6594_v52, %v2362_v1  ;;  %v6608_v28 = vadd.f32 %v4966_v6, %v2371_v40  ;;  %v4979_v40 = vld [vmem:[%s7453_s0 + $0x68] sm:$0xff] }
 0x4f0   :  { %v4509_v60 = vpop.f32.mrf.mxu1 }
 0x4f1   :  { %v6601_v56 = vadd.f32 %v4965_v50, %v2363_v15  ;;  %v2374_v8 = vadd.f32 %v4509_v60, %v6594_v52 }
 0x4f2   :  { %v2365_v23 = vpop.f32.mrf.mxu1 }
 0x4f3   :  { %v2366_v39 = vadd.f32 %v6594_v52, %v2365_v23  ;;  %2441 = vadd.xlane.f32.xlu0 %v6601_v56  ;;  %v6622_v34 = vadd.f32 %v4968_v32, %v2374_v8 }
 0x4f4   :  { %v4512_v55 = vpop.f32.mrf.mxu1 }
 0x4f5   :  { %v6614_v14 = vadd.f32 %v4967_v46, %v2366_v39  ;;  %v2387_v19 = vadd.f32 %v4512_v55, %v6594_v52 }
 0x4f6   :  { %v2378_v58 = vpop.f32.mrf.mxu1 }
 0x4f7   :  { %v2379_v36 = vadd.f32 %v6594_v52, %v2378_v58  ;;  %2443 = vadd.xlane.f32.xlu1 %v6614_v14  ;;  %2445 = vadd.xlane.f32.xlu0 %v6608_v28  ;;  %v6636_v31 = vadd.f32 %v4970_v16, %v2387_v19 }
 0x4f8   :  { %v4513_v61 = vpop.f32.mrf.mxu1 }
 0x4f9   :  { %v6628_v35 = vadd.f32 %v4969_v59, %v2379_v36  ;;  %v2390_v5 = vadd.f32 %v4513_v61, %v6594_v52 }
 0x4fa   :  { %v2381_v25 = vpop.f32.mrf.mxu1 }
 0x4fb   :  { %v2382_v7 = vadd.f32 %v6594_v52, %v2381_v25  ;;  %2447 = vadd.xlane.f32.xlu1 %v6622_v34  ;;  %2449 = vadd.xlane.f32.xlu0 %v6628_v35  ;;  %v6649_v18 = vadd.f32 %v4972_v11, %v2390_v5 }
 0x4fd   :  { %v6642_v41 = vadd.f32 %v4971_v26, %v2382_v7 }
 0x4ff   :  { %2451 = vadd.xlane.f32.xlu1 %v6642_v41  ;;  %2453 = vadd.xlane.f32.xlu0 %v6636_v31 }
 0x503   :  { %2455 = vadd.xlane.f32.xlu1 %v6649_v18 }
 0x52c   :  { %v4516_v47 = vpop.f32.mrf.mxu1 }
 0x52d   :  { %v2403_v33 = vadd.f32 %v4516_v47, %v6594_v52  ;;  %v4567_v47 = vld [vmem:[%s7458_s8 + $0xe4] ss:$16 sps:$4 sm:$0xff]  }
 0x52e   :  { %v2394_v3 = vpop.f32.mrf.mxu1  ;;  %2886 = vmatprep.subr.bf16.mxu0 %v4567_v47 }
 0x52f   :  { %v2395_v51 = vadd.f32 %v6594_v52, %v2394_v3  ;;  %v6664_v4 = vadd.f32 %v4974_v12, %v2403_v33  ;;  %v4565_v3 = vld [vmem:[%s7458_s8 + $0xe0] ss:$16 sps:$4 sm:$0xff]  }
 0x530   :  { %v4517_v2 = vpop.f32.mrf.mxu1  ;;  %2887 = vmatpush1.bf16.msra.mxu0 %v4565_v3 }
 0x531   :  { %v6657_v21 = vadd.f32 %v4973_v22, %v2395_v51  ;;  %v2406_v10 = vadd.f32 %v4517_v2, %v6594_v52  ;;  %v4573_v22 = vld [vmem:[%s7458_s8 + $0xc4] ss:$16 sps:$4 sm:$0xff]  }
 0x532   :  { %v2397_v17 = vpop.f32.mrf.mxu1  ;;  %2888 = vmatprep.subr.bf16.mxu0 %v4573_v22 }
 0x533   :  { %v2398_v43 = vadd.f32 %v6594_v52, %v2397_v17  ;;  %2457 = vadd.xlane.f32.xlu0 %v6657_v21  ;;  %v6677_v44 = vadd.f32 %v4976_v63, %v2406_v10  ;;  %v4576_v17 = vld [vmem:[%s7458_s8 + $0xcc] ss:$16 sps:$4 sm:$0xff]   ;;  %v4579_v10 = vld [vmem:[%s7458_s8 + $0xa4] ss:$16 sps:$4 sm:$0xff]   ;;  %v4577_v63 = vld [vmem:[%s7458_s8 + $0xa0] ss:$16 sps:$4 sm:$0xff]  }
 0x535   :  { %v6670_v53 = vadd.f32 %v4975_v57, %v2398_v43  ;;  %v4574_v43 = vld [vmem:[%s7458_s8 + $0xc8] ss:$16 sps:$4 sm:$0xff]   ;;  %v4582_v57 = vld [vmem:[%s7458_s8 + $0xac] ss:$16 sps:$4 sm:$0xff]  }
 0x537   :  { %2459 = vadd.xlane.f32.xlu1 %v6670_v53  ;;  %2461 = vadd.xlane.f32.xlu0 %v6664_v4 }
 0x53b   :  { %2463 = vadd.xlane.f32.xlu1 %v6677_v44 }
 0x579   :  { %v4520_v48 = vpop.f32.mrf.mxu1 }
 0x57a   :  { %v2419_v24 = vadd.f32 %v4520_v48, %v6594_v52  ;;  %v4580_v48 = vld [vmem:[%s7458_s8 + $0xa8] ss:$16 sps:$4 sm:$0xff]  }
 0x57b   :  { %v2410_v38 = vpop.f32.mrf.mxu1 }
 0x57c   :  { %v2411_v30 = vadd.f32 %v6594_v52, %v2410_v38  ;;  %v2442_v45 = vpop.xlane.xlu0 %2441  ;;  %v6692_v9 = vadd.f32 %v4978_v20, %v2419_v24  ;;  %v4585_v38 = vld [vmem:[%s7458_s8 + $0x84] ss:$16 sps:$4 sm:$0xff]   ;;  %v4586_v24 = vld [vmem:[%s7458_s8 + $0x88] ss:$16 sps:$4 sm:$0xff]  }
 0x57d   :  { %v4521_v54 = vpop.f32.mrf.mxu1  ;;  %v2474_v49 = vmul.f32 0.0078125, %v2442_v45  ;;  %v4583_v45 = vld [vmem:[%s7458_s8 + $0x80] ss:$16 sps:$4 sm:$0xff]   ;;  %v4598_v20 = vld [vmem:[%s7458_s8 + $0x48] ss:$16 sps:$4 sm:$0xff]  }
 0x57e   :  { %v6685_v0 = vadd.f32 %v4977_v27, %v2411_v30  ;;  %v2422_v60 = vadd.f32 %v4521_v54, %v6594_v52  ;;  %v4588_v30 = vld [vmem:[%s7458_s8 + $0x8c] ss:$16 sps:$4 sm:$0xff]   ;;  %v4591_v54 = vld [vmem:[%s7458_s8 + $0x64] ss:$16 sps:$4 sm:$0xff]  }
 0x57f   :  { %v2413_v42 = vpop.f32.mrf.mxu1  ;;  %v6695_v15 = vsub.f32 %v6601_v56, %v2474_v49  ;;  %v4594_v27 = vld [vmem:[%s7458_s8 + $0x6c] ss:$16 sps:$4 sm:$0xff]   ;;  %v4589_v49 = vld [vmem:[%s7458_s8 + $0x60] ss:$16 sps:$4 sm:$0xff]  }
 0x580   :  { %v2414_v29 = vadd.f32 %v6594_v52, %v2413_v42  ;;  %v2444_v37 = vpop.xlane.xlu1 %2443  ;;  %2465 = vadd.xlane.f32.xlu0 %v6685_v0  ;;  %v2446_v62 = vpop.xlane.xlu0 %2445  ;;  %v4980_v52 = vld [vmem:[%s7453_s0 + $0x78] sm:$0xff] }
 0x581   :  { %v2475_v1 = vmul.f32 0.0078125, %v2444_v37  ;;  %v2476_v23 = vmul.f32 0.0078125, %v2446_v62  ;;  %v6711_v8 = vadd.f32 %v4980_v52, %v2422_v60  ;;  %v2506_v36 = vmul.f32 %v6695_v15, %v6695_v15  ;;  %v4592_v42 = vld [vmem:[%s7458_s8 + $0x68] ss:$16 sps:$4 sm:$0xff]   ;;  %v4600_v37 = vld [vmem:[%s7458_s8 + $0x4c] ss:$16 sps:$4 sm:$0xff]  }
 0x582   :  { %v6701_v50 = vadd.f32 %v4979_v40, %v2414_v29  ;;  %v4597_v29 = vld [vmem:[%s7458_s8 + $0x44] ss:$16 sps:$4 sm:$0xff]   ;;  %v4595_v62 = vld [vmem:[%s7458_s8 + $0x40] ss:$16 sps:$4 sm:$0xff]   ;;  %v4606_v60 = vld [vmem:[%s7458_s8 + $0x2c] ss:$16 sps:$4 sm:$0xff]  }
 0x583   :  { %v6706_v6 = vsub.f32 %v6614_v14, %v2475_v1  ;;  %v6714_v46 = vsub.f32 %v6608_v28, %v2476_v23  ;;  %v4603_v1 = vld [vmem:[%s7458_s8 + $0x24] ss:$16 sps:$4 sm:$0xff]   ;;  %v4601_v40 = vld [vmem:[%s7458_s8 + $0x20] ss:$16 sps:$4 sm:$0xff]   ;;  %v4604_v23 = vld [vmem:[%s7458_s8 + $0x28] ss:$16 sps:$4 sm:$0xff]  }
 0x584   :  { %v2448_v39 = vpop.xlane.xlu1 %2447  ;;  %2467 = vadd.xlane.f32.xlu1 %v6701_v50  ;;  %2469 = vadd.xlane.f32.xlu0 %v6692_v9  ;;  %v2450_v55 = vpop.xlane.xlu0 %2449  ;;  %v4610_v52 = vld [vmem:[%s7458_s8 + $0x8] ss:$16 sps:$4 sm:$0xff]  }
 0x585   :  { %v2477_v56 = vmul.f32 0.0078125, %v2448_v39  ;;  %v2478_v58 = vmul.f32 0.0078125, %v2450_v55  ;;  %v2507_v19 = vmul.f32 %v6706_v6, %v6706_v6  ;;  %v2508_v7 = vmul.f32 %v6714_v46, %v6714_v46  ;;  %v4609_v39 = vld [vmem:[%s7458_s8 + $0x4] ss:$16 sps:$4 sm:$0xff]   ;;  %v4607_v55 = vld [vmem:[%s7458_s8] ss:$16 sps:$4 sm:$0xff]  }
 0x587   :  { %v6720_v32 = vsub.f32 %v6622_v34, %v2477_v56  ;;  %v6725_v59 = vsub.f32 %v6628_v35, %v2478_v58  ;;  %v4612_v56 = vld [vmem:[%s7458_s8 + $0xc] ss:$16 sps:$4 sm:$0xff]  }
 0x588   :  { %v2452_v61 = vpop.xlane.xlu1 %2451  ;;  %2471 = vadd.xlane.f32.xlu1 %v6711_v8  ;;  %2522 = vadd.xlane.f32.xlu0 %v2506_v36  ;;  %v2454_v14 = vpop.xlane.xlu0 %2453 }
 0x589   :  { %v2479_v28 = vmul.f32 0.0078125, %v2452_v61  ;;  %v2480_v25 = vmul.f32 0.0078125, %v2454_v14  ;;  %v2509_v5 = vmul.f32 %v6720_v32, %v6720_v32  ;;  %v2510_v35 = vmul.f32 %v6725_v59, %v6725_v59 }
 0x58b   :  { %v6732_v34 = vsub.f32 %v6642_v41, %v2479_v28  ;;  %v6735_v26 = vsub.f32 %v6636_v31, %v2480_v25  ;;  %v4568_v31 = vld [vmem:[%s7458_s8 + $0xe8] ss:$16 sps:$4 sm:$0xff]   ;;  %v4570_v41 = vld [vmem:[%s7458_s8 + $0xec] ss:$16 sps:$4 sm:$0xff]  }
 0x58c   :  { %v2456_v16 = vpop.xlane.xlu1 %2455  ;;  %2524 = vadd.xlane.f32.xlu1 %v2507_v19  ;;  %2526 = vadd.xlane.f32.xlu0 %v2508_v7 }
 0x58d   :  { %v2481_v11 = vmul.f32 0.0078125, %v2456_v16  ;;  %v2511_v2 = vmul.f32 %v6732_v34, %v6732_v34  ;;  %v2512_v33 = vmul.f32 %v6735_v26, %v6735_v26  ;;  %2999 = vmatprep.subr.bf16.mxu1 %v4570_v41 }
 0x58e   :  { %3000 = vmatpush1.bf16.msra.mxu1 %v4568_v31 }
 0x58f   :  { %v6752_v51 = vsub.f32 %v6649_v18, %v2481_v11  ;;  %v4571_v18 = vld [vmem:[%s7458_s8 + $0xc0] ss:$16 sps:$4 sm:$0xff]   ;;  %3001 = vmatprep.subr.bf16.mxu1 %v4576_v17 }
 0x590   :  { %2528 = vadd.xlane.f32.xlu1 %v2509_v5  ;;  %2530 = vadd.xlane.f32.xlu0 %v2510_v35 }
 0x591   :  { %v2513_v12 = vmul.f32 %v6752_v51, %v6752_v51  ;;  %2889 = vmatpush1.bf16.msra.mxu0 %v4571_v18 }
 0x592   :  { %3002 = vmatpush1.bf16.msra.mxu1 %v4574_v43  ;;  %2890 = vmatprep.subr.bf16.mxu0 %v4579_v10 }
 0x593   :  { %3003 = vmatprep.subr.bf16.mxu1 %v4582_v57 }
 0x594   :  { %2532 = vadd.xlane.f32.xlu1 %v2511_v2  ;;  %2534 = vadd.xlane.f32.xlu0 %v2512_v33 }
 0x595   :  { %2891 = vmatpush1.bf16.msra.mxu0 %v4577_v63 }
 0x596   :  { %3004 = vmatpush1.bf16.msra.mxu1 %v4580_v48  ;;  %2892 = vmatprep.subr.bf16.mxu0 %v4585_v38 }
 0x597   :  { %3005 = vmatprep.subr.bf16.mxu1 %v4588_v30 }
 0x598   :  { %2536 = vadd.xlane.f32.xlu1 %v2513_v12 }
 0x599   :  { %2893 = vmatpush1.bf16.msra.mxu0 %v4583_v45 }
 0x59a   :  { %3006 = vmatpush1.bf16.msra.mxu1 %v4586_v24  ;;  %2894 = vmatprep.subr.bf16.mxu0 %v4591_v54 }
 0x59b   :  { %3007 = vmatprep.subr.bf16.mxu1 %v4594_v27 }
 0x59d   :  { %2895 = vmatpush1.bf16.msra.mxu0 %v4589_v49 }
 0x59e   :  { %3008 = vmatpush1.bf16.msra.mxu1 %v4592_v42  ;;  %2896 = vmatprep.subr.bf16.mxu0 %v4597_v29 }
 0x59f   :  { %3009 = vmatprep.subr.bf16.mxu1 %v4600_v37 }
 0x5a1   :  { %2897 = vmatpush1.bf16.msra.mxu0 %v4595_v62 }
 0x5a2   :  { %3010 = vmatpush1.bf16.msra.mxu1 %v4598_v20  ;;  %2898 = vmatprep.subr.bf16.mxu0 %v4603_v1 }
 0x5a3   :  { %3011 = vmatprep.subr.bf16.mxu1 %v4606_v60 }
 0x5a5   :  { %2899 = vmatpush1.bf16.msra.mxu0 %v4601_v40 }
 0x5a6   :  { %2900 = vmatprep.subr.bf16.mxu0 %v4609_v39  ;;  %3012 = vmatpush1.bf16.msra.mxu1 %v4604_v23 }
 0x5a7   :  { %3013 = vmatprep.subr.bf16.mxu1 %v4612_v56 }
 0x5a9   :  { %2901 = vmatpush1.bf16.msra.mxu0 %v4607_v55 }
 0x5aa   :  { %3014 = vmatpush1.bf16.msra.mxu1 %v4610_v52 }
 0x5bc   :  { %v2458_v58 = vpop.xlane.xlu0 %2457 }
 0x5bd   :  { %v2482_v36 = vmul.f32 0.0078125, %v2458_v58 }
 0x5bf   :  { %v6845_v61 = vsub.f32 %v6657_v21, %v2482_v36  ;;  %v6888_v36 = vld [vmem:[%s7459_s6] ss:$0 sm:$0xff] }
 0x5c0   :  { %v2460_v14 = vpop.xlane.xlu1 %2459  ;;  %v2462_v19 = vpop.xlane.xlu0 %2461 }
 0x5c1   :  { %v2483_v28 = vmul.f32 0.0078125, %v2460_v14  ;;  %v2484_v25 = vmul.f32 0.0078125, %v2462_v19  ;;  %v2514_v7 = vmul.f32 %v6845_v61, %v6845_v61 }
 0x5c3   :  { %v6850_v16 = vsub.f32 %v6670_v53, %v2483_v28  ;;  %v6853_v5 = vsub.f32 %v6664_v4, %v2484_v25  ;;  %2538 = vadd.xlane.f32.xlu0 %v2514_v7 }
 0x5c4   :  { %v2464_v11 = vpop.xlane.xlu1 %2463 }
 0x5c5   :  { %v2485_v35 = vmul.f32 0.0078125, %v2464_v11  ;;  %v2515_v21 = vmul.f32 %v6850_v16, %v6850_v16  ;;  %v2516_v47 = vmul.f32 %v6853_v5, %v6853_v5 }
 0x5c7   :  { %v6860_v3 = vsub.f32 %v6677_v44, %v2485_v35  ;;  %2540 = vadd.xlane.f32.xlu1 %v2515_v21  ;;  %2542 = vadd.xlane.f32.xlu0 %v2516_v47  ;;  %v6895_v35 = vld [vmem:[%s7460_s7] ss:$0 sm:$0xff] }
 0x5c9   :  { %v2517_v53 = vmul.f32 %v6860_v3, %v6860_v3 }
 0x5cb   :  { %2544 = vadd.xlane.f32.xlu1 %v2517_v53 }
 0x609   :  { %v2466_v4 = vpop.xlane.xlu0 %2465 }
 0x60a   :  { %v2486_v31 = vmul.f32 0.0078125, %v2466_v4 }
 0x60c   :  { %v6865_v41 = vsub.f32 %v6685_v0, %v2486_v31 }
 0x60d   :  { %v2468_v2 = vpop.xlane.xlu1 %2467  ;;  %v2470_v33 = vpop.xlane.xlu0 %2469 }
 0x60e   :  { %v2487_v22 = vmul.f32 0.0078125, %v2468_v2  ;;  %v2488_v17 = vmul.f32 0.0078125, %v2470_v33  ;;  %v2518_v18 = vmul.f32 %v6865_v41, %v6865_v41 }
 0x610   :  { %v6870_v44 = vsub.f32 %v6701_v50, %v2487_v22  ;;  %v6873_v43 = vsub.f32 %v6692_v9, %v2488_v17  ;;  %2546 = vadd.xlane.f32.xlu0 %v2518_v18 }
 0x611   :  { %v2472_v12 = vpop.xlane.xlu1 %2471  ;;  %v2523_v10 = vpop.xlane.xlu0 %2522 }
 0x612   :  { %v2489_v57 = vmul.f32 0.0078125, %v2472_v12  ;;  %v2554_v63 = vmul.f32 0.0078125, %v2523_v10  ;;  %v2519_v0 = vmul.f32 %v6870_v44, %v6870_v44  ;;  %v2520_v48 = vmul.f32 %v6873_v43, %v6873_v43 }
 0x614   :  { %v6880_v38 = vsub.f32 %v6711_v8, %v2489_v57  ;;  %v2570_v30 = vadd.f32 1e-05, %v2554_v63  ;;  %2548 = vadd.xlane.f32.xlu1 %v2519_v0  ;;  %2550 = vadd.xlane.f32.xlu0 %v2520_v48 }
 0x615   :  { %v2525_v50 = vpop.xlane.xlu1 %2524  ;;  %v2527_v9 = vpop.xlane.xlu0 %2526 }
 0x616   :  { %4901 = vrsqrt.f32 %v2570_v30  ;;  %v2555_v45 = vmul.f32 0.0078125, %v2525_v50  ;;  %v2556_v24 = vmul.f32 0.0078125, %v2527_v9  ;;  %v2521_v54 = vmul.f32 %v6880_v38, %v6880_v38 }
 0x618   :  { %v2571_v27 = vadd.f32 1e-05, %v2555_v45  ;;  %v2572_v49 = vadd.f32 1e-05, %v2556_v24  ;;  %2552 = vadd.xlane.f32.xlu1 %v2521_v54 }
 0x619   :  { %v2529_v42 = vpop.xlane.xlu1 %2528  ;;  %v2531_v29 = vpop.xlane.xlu0 %2530 }
 0x61a   :  { %4903 = vrsqrt.f32 %v2571_v27  ;;  %v2557_v37 = vmul.f32 0.0078125, %v2529_v42  ;;  %v2558_v62 = vmul.f32 0.0078125, %v2531_v29  ;;  %v4615_v27 = vld [vmem:[%s7461_s10 + $0x38] sm:$0xff]   ;;  %v4617_v29 = vld [vmem:[%s7461_s10 + $0x70] sm:$0xff]  }
 0x61b   :  { %4905 = vrsqrt.f32 %v2572_v49  ;;  %v4616_v42 = vld [vmem:[%s7461_s10 + $0xb8] sm:$0xff]  }
 0x61c   :  { %v2573_v8 = vadd.f32 1e-05, %v2557_v37  ;;  %v2574_v60 = vadd.f32 1e-05, %v2558_v62  ;;  %v4619_v62 = vld [vmem:[%s7461_s10 + $0x30] sm:$0xff]  }
 0x61d   :  { %v2533_v20 = vpop.xlane.xlu1 %2532  ;;  %v2535_v23 = vpop.xlane.xlu0 %2534 }
 0x61e   :  { %4907 = vrsqrt.f32 %v2573_v8  ;;  %v2559_v1 = vmul.f32 0.0078125, %v2533_v20  ;;  %v2560_v52 = vmul.f32 0.0078125, %v2535_v23  ;;  %v4618_v8 = vld [vmem:[%s7461_s10 + $0xf0] sm:$0xff]  }
 0x61f   :  { %v4620_v20 = vld [vmem:[%s7461_s10 + $0xb0] sm:$0xff]  }
 0x620   :  { %v2575_v40 = vadd.f32 1e-05, %v2559_v1  ;;  %v2576_v28 = vadd.f32 1e-05, %v2560_v52  ;;  %v4621_v1 = vld [vmem:[%s7461_s10 + $0x68] sm:$0xff]   ;;  %v4626_v52 = vld [vmem:[%s7461_s10 + $0xe0] sm:$0xff]  }
 0x621   :  { %v2537_v39 = vpop.xlane.xlu1 %2536 }
 0x622   :  { %4909 = vrsqrt.f32 %v2575_v40  ;;  %v2561_v55 = vmul.f32 0.0078125, %v2537_v39  ;;  %v4623_v40 = vld [vmem:[%s7461_s10 + $0x28] sm:$0xff]  }
 0x623   :  { %v4902_v56 = vpop.eup %4901  ;;  %4911 = vrsqrt.f32 %v2574_v60  ;;  %v4622_v60 = vld [vmem:[%s7461_s10 + $0xe8] sm:$0xff]  }
 0x624   :  { %v2602_v58 = vmul.f32 %v4902_v56, %v6695_v15  ;;  %v2577_v14 = vadd.f32 1e-05, %v2561_v55  ;;  %v4624_v39 = vld [vmem:[%s7461_s10 + $0xa8] sm:$0xff]   ;;  %v4625_v56 = vld [vmem:[%s7461_s10 + $0x60] sm:$0xff]  }
 0x626   :  { %v2625_v7 = vmul.f32 %v6888_v36, %v2602_v58  ;;  %4913 = vrsqrt.f32 %v2577_v14 }
 0x627   :  { %v4904_v19 = vpop.eup %4903  ;;  %4915 = vrsqrt.f32 %v2576_v28  ;;  %v4627_v28 = vld [vmem:[%s7461_s10 + $0x20] sm:$0xff]  }
 0x628   :  { %v2603_v25 = vmul.f32 %v4904_v19, %v6706_v6  ;;  %v4906_v11 = vpop.eup %4905  ;;  %v6899_v47 = vadd.f32 %v6895_v35, %v2625_v7 }
 0x629   :  { %v2604_v6 = vmul.f32 %v4906_v11, %v6714_v46  ;;  %v4628_v11 = vld [vmem:[%s7461_s10 + $0xa0] sm:$0xff]  }
 0x62a   :  { %v2626_v15 = vmul.f32 %v6888_v36, %v2603_v25 }
 0x62b   :  { %v4908_v21 = vpop.eup %4907  ;;  %v2627_v22 = vmul.f32 %v6888_v36, %v2604_v6 }
 0x62c   :  { %v6902_v53 = vadd.f32 %v6895_v35, %v2626_v15  ;;  %v2605_v4 = vmul.f32 %v4908_v21, %v6720_v32  ;;  %v4629_v15 = vld [vmem:[%s7461_s10 + $0x58] sm:$0xff]  }
 0x62d   :  { %v6917_v32 = vadd.f32 %v6895_v35, %v2627_v22  ;;  %v4632_v22 = vld [vmem:[%s7461_s10 + $0x98] sm:$0xff]  }
 0x62e   :  { %v2664_v31 = vpack.c.bf16 %v6902_v53, %v6899_v47  ;;  %v2628_v2 = vmul.f32 %v6888_v36, %v2605_v4  ;;  %v4630_v4 = vld [vmem:[%s7461_s10 + $0xd8] sm:$0xff]  }
 0x62f   :  { %v4910_v33 = vpop.eup %4909 }
 0x630   :  { %2919 = vmatmul.mubr.bf16.vlgmr.msra.gmra.mxu0 %v2664_v31  ;;  %3032 = vmatmul.mubr.bf16.vlgmr.msra.gmra.mxu1 %v2664_v31  ;;  %v4912_v17 = vpop.eup %4911  ;;  %v6913_v18 = vadd.f32 %v6895_v35, %v2628_v2  ;;  %v2607_v46 = vmul.f32 %v4910_v33, %v6732_v34  ;;  %v4631_v31 = vld [vmem:[%s7461_s10 + $0x18] sm:$0xff]  }
 0x631   :  { %2928 = vmatprep.mubr.bf16.mxu0 %v7639_v13  ;;  %3041 = vmatprep.mubr.bf16.mxu1 %v7639_v13  ;;  %v2606_v12 = vmul.f32 %v4912_v17, %v6725_v59 }
 0x632   :  { %v2665_v10 = vpack.c.bf16 %v6913_v18, %v6917_v32  ;;  %v2630_v57 = vmul.f32 %v6888_v36, %v2607_v46 }
 0x633   :  { %v4914_v63 = vpop.eup %4913  ;;  %v2629_v48 = vmul.f32 %v6888_v36, %v2606_v12 }
 0x634   :  { %v4916_v0 = vpop.eup %4915  ;;  %v6927_v34 = vadd.f32 %v6895_v35, %v2630_v57  ;;  %v2609_v59 = vmul.f32 %v4914_v63, %v6752_v51  ;;  %v4613_v51 = vld [vmem:[%s7461_s10 + $0x78] sm:$0xff]  }
 0x635   :  { %v6931_v30 = vadd.f32 %v6895_v35, %v2629_v48  ;;  %v2608_v50 = vmul.f32 %v4916_v0, %v6735_v26  ;;  %v4614_v26 = vld [vmem:[%s7461_s10 + $0xf8] sm:$0xff]   ;;  %4170 = vmatprep.subr.bf16.mxu0 %v4613_v51 }
 0x636   :  { %v2632_v45 = vmul.f32 %v6888_v36, %v2609_v59  ;;  %4234 = vmatprep.subr.bf16.mxu1 %v4614_v26  ;;  %4171 = vmatpush3.bf16.msra.mxu0 %v4615_v27  ;;  %v4633_v27 = vld [vmem:[%s7461_s10 + $0x50] sm:$0xff]  }
 0x637   :  { %v2666_v9 = vpack.c.bf16 %v6927_v34, %v6931_v30  ;;  %v2631_v24 = vmul.f32 %v6888_v36, %v2608_v50  ;;  %4235 = vmatpush3.bf16.msra.mxu1 %v4616_v42  ;;  %4172 = vmatprep.subr.bf16.mxu0 %v4617_v29  ;;  %v4634_v42 = vld [vmem:[%s7461_s10 + $0xd0] sm:$0xff]  }
 0x638   :  { %2929 = vmatmul.mubr.bf16.gmra.mxu0 %v2665_v10  ;;  %3042 = vmatmul.mubr.bf16.gmra.mxu1 %v2665_v10  ;;  %v6944_v54 = vadd.f32 %v6895_v35, %v2632_v45  ;;  %v4635_v29 = vld [vmem:[%s7461_s10 + $0x10] sm:$0xff]  }
 0x639   :  { %2938 = vmatprep.mubr.bf16.mxu0 %v7639_v13  ;;  %3051 = vmatprep.mubr.bf16.mxu1 %v7639_v13  ;;  %v6953_v49 = vadd.f32 %v6895_v35, %v2631_v24 }
 0x63a   :  { %4236 = vmatprep.subr.bf16.mxu1 %v4618_v8  ;;  %4173 = vmatpush3.bf16.msra.mxu0 %v4619_v62  ;;  %v4637_v8 = vld [vmem:[%s7461_s10 + $0x48] sm:$0xff]  }
 0x63b   :  { %v2667_v37 = vpack.c.bf16 %v6944_v54, %v6953_v49  ;;  %4237 = vmatpush3.bf16.msra.mxu1 %v4620_v20  ;;  %4174 = vmatprep.subr.bf16.mxu0 %v4621_v1  ;;  %v4638_v62 = vld [vmem:[%s7461_s10 + $0xc8] sm:$0xff]  }
 0x63c   :  { %4238 = vmatprep.subr.bf16.mxu1 %v4622_v60  ;;  %v4639_v20 = vld [vmem:[%s7461_s10 + $0x8] sm:$0xff]   ;;  %v4641_v60 = vld [vmem:[%s7461_s10 + $0x40] sm:$0xff]  }
 0x63d   :  { %v4640_v1 = vld [vmem:[%s7461_s10 + $0x88] sm:$0xff]  }
 0x63e   :  { %4175 = vmatpush3.bf16.msra.mxu0 %v4623_v40  ;;  %v4642_v40 = vld [vmem:[%s7461_s10 + $0xc0] sm:$0xff]  }
 0x63f   :  { %4239 = vmatpush3.bf16.msra.mxu1 %v4624_v39  ;;  %4176 = vmatprep.subr.bf16.mxu0 %v4625_v56  ;;  %v4644_v39 = vld [vmem:[%s7461_s10 + $0x80] sm:$0xff]  }
 0x640   :  { %2939 = vmatmul.mubr.bf16.gmra.mxu0 %v2666_v9  ;;  %3052 = vmatmul.mubr.bf16.gmra.mxu1 %v2666_v9 }
 0x641   :  { %2948 = vmatprep.mubr.bf16.mxu0 %v7639_v13  ;;  %3061 = vmatprep.mubr.bf16.mxu1 %v7639_v13 }
 0x642   :  { %4240 = vmatprep.subr.bf16.mxu1 %v4626_v52  ;;  %4177 = vmatpush3.bf16.msra.mxu0 %v4627_v28 }
 0x643   :  { %4241 = vmatpush3.bf16.msra.mxu1 %v4628_v11  ;;  %4178 = vmatprep.subr.bf16.mxu0 %v4629_v15 }
 0x644   :  { %4242 = vmatprep.subr.bf16.mxu1 %v4630_v4 }
 0x646   :  { %4179 = vmatpush3.bf16.msra.mxu0 %v4631_v31 }
 0x647   :  { %4243 = vmatpush3.bf16.msra.mxu1 %v4632_v22  ;;  %4180 = vmatprep.subr.bf16.mxu0 %v4633_v27 }
 0x648   :  { %2949 = vmatmul.mubr.bf16.gmra.mxu0 %v2667_v37  ;;  %3062 = vmatmul.mubr.bf16.gmra.mxu1 %v2667_v37  ;;  %v4636_v37 = vld [vmem:[%s7461_s10 + $0x90] sm:$0xff]  }
 0x649   :  { %2958 = vmatprep.mubr.bf16.mxu0 %v7639_v13  ;;  %3071 = vmatprep.mubr.bf16.mxu1 %v7639_v13 }
 0x64a   :  { %4244 = vmatprep.subr.bf16.mxu1 %v4634_v42  ;;  %4181 = vmatpush3.bf16.msra.mxu0 %v4635_v29 }
 0x64b   :  { %4245 = vmatpush3.bf16.msra.mxu1 %v4636_v37  ;;  %4182 = vmatprep.subr.bf16.mxu0 %v4637_v8 }
 0x64c   :  { %v2539_v23 = vpop.xlane.xlu0 %2538  ;;  %4246 = vmatprep.subr.bf16.mxu1 %v4638_v62 }
 0x64d   :  { %v2562_v55 = vmul.f32 0.0078125, %v2539_v23  ;;  %v4643_v23 = vld [vmem:[%s7461_s10] sm:$0xff]  }
 0x64e   :  { %4183 = vmatpush3.bf16.msra.mxu0 %v4639_v20 }
 0x64f   :  { %v2578_v58 = vadd.f32 1e-05, %v2562_v55  ;;  %4247 = vmatpush3.bf16.msra.mxu1 %v4640_v1  ;;  %4184 = vmatprep.subr.bf16.mxu0 %v4641_v60 }
 0x650   :  { %v2541_v14 = vpop.xlane.xlu1 %2540  ;;  %v2543_v19 = vpop.xlane.xlu0 %2542  ;;  %4248 = vmatprep.subr.bf16.mxu1 %v4642_v40 }
 0x651   :  { %4917 = vrsqrt.f32 %v2578_v58  ;;  %v2563_v25 = vmul.f32 0.0078125, %v2541_v14  ;;  %v2564_v7 = vmul.f32 0.0078125, %v2543_v19 }
 0x652   :  { %4185 = vmatpush3.bf16.msra.mxu0 %v4643_v23 }
 0x653   :  { %v2579_v21 = vadd.f32 1e-05, %v2563_v25  ;;  %v2580_v6 = vadd.f32 1e-05, %v2564_v7  ;;  %4249 = vmatpush3.bf16.msra.mxu1 %v4644_v39 }
 0x654   :  { %v2545_v2 = vpop.xlane.xlu1 %2544 }
 0x655   :  { %4919 = vrsqrt.f32 %v2579_v21  ;;  %v2565_v33 = vmul.f32 0.0078125, %v2545_v2 }
 0x656   :  { %4921 = vrsqrt.f32 %v2580_v6 }
 0x657   :  { %v2581_v17 = vadd.f32 1e-05, %v2565_v33 }
 0x659   :  { %4923 = vrsqrt.f32 %v2581_v17 }
 0x65e   :  { %v4918_v46 = vpop.eup %4917 }
 0x65f   :  { %v2610_v12 = vmul.f32 %v4918_v46, %v6845_v61 }
 0x661   :  { %v2633_v63 = vmul.f32 %v6888_v36, %v2610_v12 }
 0x662   :  { %v4920_v10 = vpop.eup %4919 }
 0x663   :  { %v2611_v57 = vmul.f32 %v4920_v10, %v6850_v16  ;;  %v4922_v0 = vpop.eup %4921  ;;  %v7015_v50 = vadd.f32 %v6895_v35, %v2633_v63 }
 0x664   :  { %v2612_v45 = vmul.f32 %v4922_v0, %v6853_v5 }
 0x665   :  { %v2634_v48 = vmul.f32 %v6888_v36, %v2611_v57 }
 0x666   :  { %v4924_v59 = vpop.eup %4923  ;;  %v2635_v51 = vmul.f32 %v6888_v36, %v2612_v45 }
 0x667   :  { %v7018_v9 = vadd.f32 %v6895_v35, %v2634_v48  ;;  %v2613_v24 = vmul.f32 %v4924_v59, %v6860_v3  ;;  %v7644_v59 = vld [vmem:[#allocation2_spill] sm:$0xff] }
 0x668   :  { %v7032_v5 = vadd.f32 %v6895_v35, %v2635_v51  ;;  %v2720_v45 = vsub.s32 3, %v7644_v59  ;;  %v7647_v27 = vsub.s32 2, %v7644_v59 }
 0x669   :  { %v2668_v61 = vpack.c.bf16 %v7018_v9, %v7015_v50  ;;  %v2636_v16 = vmul.f32 %v6888_v36, %v2613_v24 }
 0x66b   :  { %2959 = vmatmul.mubr.bf16.gmra.mxu0 %v2668_v61  ;;  %3072 = vmatmul.mubr.bf16.gmra.mxu1 %v2668_v61  ;;  %v7029_v26 = vadd.f32 %v6895_v35, %v2636_v16 }
 0x66c   :  { %2968 = vmatprep.mubr.bf16.mxu0 %v7639_v13  ;;  %3081 = vmatprep.mubr.bf16.mxu1 %v7639_v13 }
 0x66d   :  { %v2669_v3 = vpack.c.bf16 %v7029_v26, %v7032_v5 }
 0x673   :  { %2969 = vmatmul.mubr.bf16.gmra.mxu0 %v2669_v3  ;;  %3082 = vmatmul.mubr.bf16.gmra.mxu1 %v2669_v3 }
 0x674   :  { %2978 = vmatprep.mubr.bf16.mxu0 %v7639_v13  ;;  %3091 = vmatprep.mubr.bf16.mxu1 %v7639_v13 }
 0x699   :  { %v2547_v55 = vpop.xlane.xlu0 %2546 }
 0x69a   :  { %v2566_v56 = vmul.f32 0.0078125, %v2547_v55 }
 0x69c   :  { %v2582_v52 = vadd.f32 1e-05, %v2566_v56 }
 0x69d   :  { %v2549_v58 = vpop.xlane.xlu1 %2548  ;;  %v2551_v14 = vpop.xlane.xlu0 %2550 }
 0x69e   :  { %4925 = vrsqrt.f32 %v2582_v52  ;;  %v2567_v19 = vmul.f32 0.0078125, %v2549_v58  ;;  %v2568_v28 = vmul.f32 0.0078125, %v2551_v14 }
 0x6a0   :  { %v2583_v25 = vadd.f32 1e-05, %v2567_v19  ;;  %v2584_v7 = vadd.f32 1e-05, %v2568_v28 }
 0x6a1   :  { %v2553_v11 = vpop.xlane.xlu1 %2552 }
 0x6a2   :  { %4927 = vrsqrt.f32 %v2583_v25  ;;  %v2569_v15 = vmul.f32 0.0078125, %v2553_v11 }
 0x6a3   :  { %4929 = vrsqrt.f32 %v2584_v7 }
 0x6a4   :  { %v2585_v21 = vadd.f32 1e-05, %v2569_v15 }
 0x6a6   :  { %4931 = vrsqrt.f32 %v2585_v21 }
 0x6ab   :  { %v4926_v6 = vpop.eup %4925 }
 0x6ac   :  { %v2614_v4 = vmul.f32 %v4926_v6, %v6865_v41 }
 0x6ae   :  { %v2637_v33 = vmul.f32 %v6888_v36, %v2614_v4 }
 0x6af   :  { %v4928_v31 = vpop.eup %4927 }
 0x6b0   :  { %v2615_v2 = vmul.f32 %v4928_v31, %v6870_v44  ;;  %v4930_v22 = vpop.eup %4929  ;;  %v7079_v12 = vadd.f32 %v6895_v35, %v2637_v33 }
 0x6b1   :  { %v2616_v57 = vmul.f32 %v4930_v22, %v6873_v43 }
 0x6b2   :  { %v2638_v17 = vmul.f32 %v6888_v36, %v2615_v2 }
 0x6b3   :  { %v4932_v46 = vpop.eup %4931  ;;  %v2639_v0 = vmul.f32 %v6888_v36, %v2616_v57 }
 0x6b4   :  { %v7082_v10 = vadd.f32 %v6895_v35, %v2638_v17  ;;  %v2617_v63 = vmul.f32 %v4932_v46, %v6880_v38 }
 0x6b5   :  { %v7096_v43 = vadd.f32 %v6895_v35, %v2639_v0 }
 0x6b6   :  { %v2670_v41 = vpack.c.bf16 %v7082_v10, %v7079_v12  ;;  %v2640_v44 = vmul.f32 %v6888_v36, %v2617_v63  ;;  %v2704_v36 = vld [vmem:[%s7462_s9] sm:$0xf] }
 0x6b7   :  { %v7108_v51 = vrot.slane %v2704_v36, %v2720_v45  ;;  %v7115_v42 = vrot.slane %v2704_v36, %v7647_v27 }
 0x6b8   :  { %2979 = vmatmul.mubr.bf16.gmra.mxu0 %v2670_v41  ;;  %3092 = vmatmul.mubr.bf16.gmra.mxu1 %v2670_v41  ;;  %v7093_v48 = vadd.f32 %v6895_v35, %v2640_v44  ;;  %v7646_v35 = vld [vmem:[#allocation3_spill] sm:$0xff] }
 0x6b9   :  { %2988 = vmatprep.mubr.bf16.mxu0 %v7639_v13  ;;  %3101 = vmatprep.mubr.bf16.mxu1 %v7639_v13  ;;  %v7645_v13 = vsub.s32 1, %v7644_v59  ;;  %v7111_v3 = vrot.slane %v2704_v36, %v7646_v35 }
 0x6ba   :  { %v2671_v38 = vpack.c.bf16 %v7093_v48, %v7096_v43 }
 0x6bb   :  { %v7106_v16 = vrot.slane %v2704_v36, %v7645_v13 }
 0x6c0   :  { %2989 = vmatmul.mubr.bf16.gmra.mxu0 %v2671_v38  ;;  %3102 = vmatmul.mubr.bf16.gmra.mxu1 %v2671_v38 }
 0x6f0   :  { %v2920_v24 = vpop.f32.mrf.mxu0  ;;  %v3033_v61 = vpop.f32.mrf.mxu1 }
 0x6f1   :  { %v2921_v23 = vadd.f32 %v2920_v24, %v7111_v3  ;;  %v3034_v39 = vadd.f32 %v3033_v61, %v7115_v42 }
 0x6f2   :  { %v2922_v29 = vpop.f32.mrf.mxu0  ;;  %v3035_v37 = vpop.f32.mrf.mxu1 }
 0x6f3   :  { %v2923_v20 = vadd.f32 %v2922_v29, %v7106_v16  ;;  %v3036_v1 = vadd.f32 %v3035_v37, %v7108_v51  ;;  %v3112_v6 = vmax.f32 %v2921_v23, 0.0  ;;  %v3114_v4 = vmax.f32 %v3034_v39, 0.0 }
 0x6f4   :  { %v2924_v8 = vpop.f32.mrf.mxu0  ;;  %v3037_v62 = vpop.f32.mrf.mxu1 }
 0x6f5   :  { %v2925_v60 = vadd.f32 %v2924_v8, %v7111_v3  ;;  %v3038_v40 = vadd.f32 %v3037_v62, %v7115_v42  ;;  %v3113_v7 = vmax.f32 %v2923_v20, 0.0  ;;  %v3115_v11 = vmax.f32 %v3036_v1, 0.0 }
 0x6f6   :  { %v2926_v55 = vpop.f32.mrf.mxu0  ;;  %v3039_v56 = vpop.f32.mrf.mxu1 }
 0x6f7   :  { %v2927_v52 = vadd.f32 %v2926_v55, %v7106_v16  ;;  %v3040_v58 = vadd.f32 %v3039_v56, %v7108_v51  ;;  %v3116_v14 = vmax.f32 %v2925_v60, 0.0  ;;  %v3118_v19 = vmax.f32 %v3038_v40, 0.0 }
 0x6f8   :  { %v2930_v28 = vpop.f32.mrf.mxu0  ;;  %v3043_v25 = vpop.f32.mrf.mxu1 }
 0x6f9   :  { %v3117_v15 = vmax.f32 %v2927_v52, 0.0  ;;  %v3119_v21 = vmax.f32 %v3040_v58, 0.0  ;;  %v3176_v17 = vpack.c.bf16 %v3116_v14, %v3112_v6  ;;  %v3178_v46 = vpack.c.bf16 %v3118_v19, %v3114_v4 }
 0x6fa   :  { %v2932_v31 = vpop.f32.mrf.mxu0  ;;  %v3045_v2 = vpop.f32.mrf.mxu1  ;;  %v2931_v59 = vadd.f32 %v2930_v28, %v7111_v3  ;;  %v3044_v45 = vadd.f32 %v3043_v25, %v7115_v42 }
 0x6fb   :  { %v3177_v33 = vpack.c.bf16 %v3117_v15, %v3113_v7  ;;  %v3179_v22 = vpack.c.bf16 %v3119_v21, %v3115_v11  ;;  %v2933_v57 = vadd.f32 %v2932_v31, %v7106_v16  ;;  %v3046_v44 = vadd.f32 %v3045_v2, %v7108_v51 }
 0x6fc   :  { %v2934_v63 = vpop.f32.mrf.mxu0  ;;  %v3047_v41 = vpop.f32.mrf.mxu1  ;;  %v3120_v60 = vmax.f32 %v2931_v59, 0.0  ;;  %v3122_v40 = vmax.f32 %v3044_v45, 0.0 }
 0x6fd   :  { %v2935_v0 = vadd.f32 %v2934_v63, %v7111_v3  ;;  %v3048_v38 = vadd.f32 %v3047_v41, %v7115_v42  ;;  %3503 = vmatprep.mubr.bf16.mxu0 %v3177_v33  ;;  %3600 = vmatprep.mubr.bf16.mxu1 %v3179_v22  ;;  %v3121_v8 = vmax.f32 %v2933_v57, 0.0  ;;  %v3123_v62 = vmax.f32 %v3046_v44, 0.0 }
 0x6fe   :  { %v2936_v36 = vpop.f32.mrf.mxu0  ;;  %v3049_v24 = vpop.f32.mrf.mxu1  ;;  %3504 = vmatmul.mubr.bf16.vlgmr.msra.gmra.mxu0 %v3176_v17  ;;  %3601 = vmatmul.mubr.bf16.vlgmr.msra.gmra.mxu1 %v3178_v46 }
 0x6ff   :  { %v2937_v61 = vadd.f32 %v2936_v36, %v7106_v16  ;;  %v3050_v13 = vadd.f32 %v3049_v24, %v7108_v51  ;;  %v3124_v35 = vmax.f32 %v2935_v0, 0.0  ;;  %v3126_v27 = vmax.f32 %v3048_v38, 0.0 }
 0x700   :  { %v2940_v29 = vpop.f32.mrf.mxu0  ;;  %v3053_v37 = vpop.f32.mrf.mxu1 }
 0x701   :  { %v3125_v20 = vmax.f32 %v2937_v61, 0.0  ;;  %v3127_v1 = vmax.f32 %v3050_v13, 0.0  ;;  %v3180_v52 = vpack.c.bf16 %v3124_v35, %v3120_v60  ;;  %v3182_v58 = vpack.c.bf16 %v3126_v27, %v3122_v40 }
 0x702   :  { %v2942_v23 = vpop.f32.mrf.mxu0  ;;  %v3055_v39 = vpop.f32.mrf.mxu1  ;;  %v2941_v15 = vadd.f32 %v2940_v29, %v7111_v3  ;;  %v3054_v21 = vadd.f32 %v3053_v37, %v7115_v42 }
 0x703   :  { %v3181_v55 = vpack.c.bf16 %v3125_v20, %v3121_v8  ;;  %v3183_v56 = vpack.c.bf16 %v3127_v1, %v3123_v62  ;;  %v2943_v14 = vadd.f32 %v2942_v23, %v7106_v16  ;;  %v3056_v25 = vadd.f32 %v3055_v39, %v7108_v51 }
 0x704   :  { %v2944_v19 = vpop.f32.mrf.mxu0  ;;  %v3057_v28 = vpop.f32.mrf.mxu1  ;;  %v3128_v0 = vmax.f32 %v2941_v15, 0.0  ;;  %v3130_v38 = vmax.f32 %v3054_v21, 0.0 }
 0x705   :  { %v2945_v7 = vadd.f32 %v2944_v19, %v7111_v3  ;;  %v3058_v11 = vadd.f32 %v3057_v28, %v7115_v42  ;;  %3511 = vmatprep.mubr.bf16.mxu0 %v3181_v55  ;;  %3608 = vmatprep.mubr.bf16.mxu1 %v3183_v56  ;;  %v3129_v57 = vmax.f32 %v2943_v14, 0.0  ;;  %v3131_v63 = vmax.f32 %v3056_v25, 0.0 }
 0x706   :  { %v2946_v6 = vpop.f32.mrf.mxu0  ;;  %v3059_v4 = vpop.f32.mrf.mxu1  ;;  %3512 = vmatmul.mubr.bf16.gmra.mxu0 %v3180_v52  ;;  %3609 = vmatmul.mubr.bf16.gmra.mxu1 %v3182_v58 }
 0x707   :  { %v2947_v31 = vadd.f32 %v2946_v6, %v7106_v16  ;;  %v3060_v2 = vadd.f32 %v3059_v4, %v7108_v51  ;;  %v3132_v33 = vmax.f32 %v2945_v7, 0.0  ;;  %v3134_v22 = vmax.f32 %v3058_v11, 0.0 }
 0x708   :  { %v2950_v17 = vpop.f32.mrf.mxu0  ;;  %v3063_v46 = vpop.f32.mrf.mxu1 }
 0x709   :  { %v3133_v41 = vmax.f32 %v2947_v31, 0.0  ;;  %v3135_v44 = vmax.f32 %v3060_v2, 0.0  ;;  %v3184_v61 = vpack.c.bf16 %v3132_v33, %v3128_v0  ;;  %v3186_v13 = vpack.c.bf16 %v3134_v22, %v3130_v38 }
 0x70a   :  { %v2952_v59 = vpop.f32.mrf.mxu0  ;;  %v3065_v45 = vpop.f32.mrf.mxu1  ;;  %v2951_v20 = vadd.f32 %v2950_v17, %v7111_v3  ;;  %v3064_v1 = vadd.f32 %v3063_v46, %v7115_v42 }
 0x70b   :  { %v3185_v36 = vpack.c.bf16 %v3133_v41, %v3129_v57  ;;  %v3187_v24 = vpack.c.bf16 %v3135_v44, %v3131_v63  ;;  %v2953_v35 = vadd.f32 %v2952_v59, %v7106_v16  ;;  %v3066_v37 = vadd.f32 %v3065_v45, %v7108_v51 }
 0x70c   :  { %v2954_v27 = vpop.f32.mrf.mxu0  ;;  %v3067_v29 = vpop.f32.mrf.mxu1  ;;  %v3136_v28 = vmax.f32 %v2951_v20, 0.0  ;;  %v3138_v25 = vmax.f32 %v3064_v1, 0.0 }
 0x70d   :  { %v2955_v8 = vadd.f32 %v2954_v27, %v7111_v3  ;;  %v3068_v62 = vadd.f32 %v3067_v29, %v7115_v42  ;;  %3519 = vmatprep.mubr.bf16.mxu0 %v3185_v36  ;;  %3616 = vmatprep.mubr.bf16.mxu1 %v3187_v24  ;;  %v3137_v52 = vmax.f32 %v2953_v35, 0.0  ;;  %v3139_v58 = vmax.f32 %v3066_v37, 0.0 }
 0x70e   :  { %v2956_v60 = vpop.f32.mrf.mxu0  ;;  %v3069_v40 = vpop.f32.mrf.mxu1  ;;  %3520 = vmatmul.mubr.bf16.gmra.mxu0 %v3184_v61  ;;  %3617 = vmatmul.mubr.bf16.gmra.mxu1 %v3186_v13 }
 0x70f   :  { %v2957_v23 = vadd.f32 %v2956_v60, %v7106_v16  ;;  %v3070_v39 = vadd.f32 %v3069_v40, %v7108_v51  ;;  %v3140_v55 = vmax.f32 %v2955_v8, 0.0  ;;  %v3142_v56 = vmax.f32 %v3068_v62, 0.0 }
 0x711   :  { %v3141_v14 = vmax.f32 %v2957_v23, 0.0  ;;  %v3143_v19 = vmax.f32 %v3070_v39, 0.0  ;;  %v3188_v15 = vpack.c.bf16 %v3140_v55, %v3136_v28  ;;  %v3190_v21 = vpack.c.bf16 %v3142_v56, %v3138_v25 }
 0x713   :  { %v3189_v7 = vpack.c.bf16 %v3141_v14, %v3137_v52  ;;  %v3191_v11 = vpack.c.bf16 %v3143_v19, %v3139_v58 }
 0x715   :  { %3527 = vmatprep.mubr.bf16.mxu0 %v3189_v7  ;;  %3624 = vmatprep.mubr.bf16.mxu1 %v3191_v11 }
 0x716   :  { %3528 = vmatmul.mubr.bf16.gmra.mxu0 %v3188_v15  ;;  %3625 = vmatmul.mubr.bf16.gmra.mxu1 %v3190_v21 }
 0x72b   :  { %v2960_v6 = vpop.f32.mrf.mxu0  ;;  %v3073_v4 = vpop.f32.mrf.mxu1 }
 0x72c   :  { %v2961_v41 = vadd.f32 %v2960_v6, %v7111_v3  ;;  %v3074_v44 = vadd.f32 %v3073_v4, %v7115_v42 }
 0x72d   :  { %v2962_v31 = vpop.f32.mrf.mxu0  ;;  %v3075_v2 = vpop.f32.mrf.mxu1 }
 0x72e   :  { %v2963_v17 = vadd.f32 %v2962_v31, %v7106_v16  ;;  %v3076_v46 = vadd.f32 %v3075_v2, %v7108_v51  ;;  %v3144_v8 = vmax.f32 %v2961_v41, 0.0  ;;  %v3146_v62 = vmax.f32 %v3074_v44, 0.0 }
 0x72f   :  { %v2964_v33 = vpop.f32.mrf.mxu0  ;;  %v3077_v22 = vpop.f32.mrf.mxu1 }
 0x730   :  { %v2965_v57 = vadd.f32 %v2964_v33, %v7111_v3  ;;  %v3078_v63 = vadd.f32 %v3077_v22, %v7115_v42  ;;  %v3145_v35 = vmax.f32 %v2963_v17, 0.0  ;;  %v3147_v27 = vmax.f32 %v3076_v46, 0.0 }
 0x731   :  { %v2966_v0 = vpop.f32.mrf.mxu0  ;;  %v3079_v38 = vpop.f32.mrf.mxu1 }
 0x732   :  { %v2967_v59 = vadd.f32 %v2966_v0, %v7106_v16  ;;  %v3080_v45 = vadd.f32 %v3079_v38, %v7108_v51  ;;  %v3148_v36 = vmax.f32 %v2965_v57, 0.0  ;;  %v3150_v24 = vmax.f32 %v3078_v63, 0.0 }
 0x733   :  { %v2970_v61 = vpop.f32.mrf.mxu0  ;;  %v3083_v13 = vpop.f32.mrf.mxu1 }
 0x734   :  { %v3149_v29 = vmax.f32 %v2967_v59, 0.0  ;;  %v3151_v37 = vmax.f32 %v3080_v45, 0.0  ;;  %v3192_v23 = vpack.c.bf16 %v3148_v36, %v3144_v8  ;;  %v3194_v39 = vpack.c.bf16 %v3150_v24, %v3146_v62 }
 0x735   :  { %v2972_v20 = vpop.f32.mrf.mxu0  ;;  %v3085_v1 = vpop.f32.mrf.mxu1  ;;  %v2971_v28 = vadd.f32 %v2970_v61, %v7111_v3  ;;  %v3084_v25 = vadd.f32 %v3083_v13, %v7115_v42 }
 0x736   :  { %v3193_v60 = vpack.c.bf16 %v3149_v29, %v3145_v35  ;;  %v3195_v40 = vpack.c.bf16 %v3151_v37, %v3147_v27  ;;  %v2973_v55 = vadd.f32 %v2972_v20, %v7106_v16  ;;  %v3086_v58 = vadd.f32 %v3085_v1, %v7108_v51 }
 0x737   :  { %v2974_v56 = vpop.f32.mrf.mxu0  ;;  %v3087_v52 = vpop.f32.mrf.mxu1  ;;  %v3152_v17 = vmax.f32 %v2971_v28, 0.0  ;;  %v3154_v46 = vmax.f32 %v3084_v25, 0.0 }
 0x738   :  { %v2975_v14 = vadd.f32 %v2974_v56, %v7111_v3  ;;  %v3088_v19 = vadd.f32 %v3087_v52, %v7115_v42  ;;  %3535 = vmatprep.mubr.bf16.mxu0 %v3193_v60  ;;  %3632 = vmatprep.mubr.bf16.mxu1 %v3195_v40  ;;  %v3153_v31 = vmax.f32 %v2973_v55, 0.0  ;;  %v3155_v2 = vmax.f32 %v3086_v58, 0.0 }
 0x739   :  { %v2976_v7 = vpop.f32.mrf.mxu0  ;;  %v3089_v11 = vpop.f32.mrf.mxu1  ;;  %3536 = vmatmul.mubr.bf16.gmra.mxu0 %v3192_v23  ;;  %3633 = vmatmul.mubr.bf16.gmra.mxu1 %v3194_v39 }
 0x73a   :  { %v2977_v15 = vadd.f32 %v2976_v7, %v7106_v16  ;;  %v3090_v21 = vadd.f32 %v3089_v11, %v7108_v51  ;;  %v3156_v6 = vmax.f32 %v2975_v14, 0.0  ;;  %v3158_v4 = vmax.f32 %v3088_v19, 0.0 }
 0x73c   :  { %v3157_v33 = vmax.f32 %v2977_v15, 0.0  ;;  %v3159_v22 = vmax.f32 %v3090_v21, 0.0  ;;  %v3196_v41 = vpack.c.bf16 %v3156_v6, %v3152_v17  ;;  %v3198_v44 = vpack.c.bf16 %v3158_v4, %v3154_v46 }
 0x73e   :  { %v3197_v57 = vpack.c.bf16 %v3157_v33, %v3153_v31  ;;  %v3199_v63 = vpack.c.bf16 %v3159_v22, %v3155_v2 }
 0x740   :  { %3543 = vmatprep.mubr.bf16.mxu0 %v3197_v57  ;;  %3640 = vmatprep.mubr.bf16.mxu1 %v3199_v63 }
 0x741   :  { %3544 = vmatmul.mubr.bf16.gmra.mxu0 %v3196_v41  ;;  %3641 = vmatmul.mubr.bf16.gmra.mxu1 %v3198_v44 }
 0x778   :  { %v2980_v0 = vpop.f32.mrf.mxu0  ;;  %v3093_v38 = vpop.f32.mrf.mxu1 }
 0x779   :  { %v2981_v29 = vadd.f32 %v2980_v0, %v7111_v3  ;;  %v3094_v37 = vadd.f32 %v3093_v38, %v7115_v42 }
 0x77a   :  { %v2982_v59 = vpop.f32.mrf.mxu0  ;;  %v3095_v45 = vpop.f32.mrf.mxu1 }
 0x77b   :  { %v2983_v61 = vadd.f32 %v2982_v59, %v7106_v16  ;;  %v3096_v13 = vadd.f32 %v3095_v45, %v7108_v51  ;;  %v3160_v14 = vmax.f32 %v2981_v29, 0.0  ;;  %v3162_v19 = vmax.f32 %v3094_v37, 0.0 }
 0x77c   :  { %v2984_v36 = vpop.f32.mrf.mxu0  ;;  %v3097_v24 = vpop.f32.mrf.mxu1 }
 0x77d   :  { %v2985_v35 = vadd.f32 %v2984_v36, %v7111_v3  ;;  %v3098_v27 = vadd.f32 %v3097_v24, %v7115_v42  ;;  %v3161_v55 = vmax.f32 %v2983_v61, 0.0  ;;  %v3163_v56 = vmax.f32 %v3096_v13, 0.0 }
 0x77e   :  { %v2986_v8 = vpop.f32.mrf.mxu0  ;;  %v3099_v62 = vpop.f32.mrf.mxu1 }
 0x77f   :  { %v2987_v20 = vadd.f32 %v2986_v8, %v7106_v16  ;;  %v3100_v1 = vadd.f32 %v3099_v62, %v7108_v51  ;;  %v3164_v60 = vmax.f32 %v2985_v35, 0.0  ;;  %v3166_v40 = vmax.f32 %v3098_v27, 0.0 }
 0x780   :  { %v2990_v23 = vpop.f32.mrf.mxu0  ;;  %v3103_v39 = vpop.f32.mrf.mxu1 }
 0x781   :  { %v3165_v52 = vmax.f32 %v2987_v20, 0.0  ;;  %v3167_v58 = vmax.f32 %v3100_v1, 0.0  ;;  %v3200_v15 = vpack.c.bf16 %v3164_v60, %v3160_v14  ;;  %v3202_v21 = vpack.c.bf16 %v3166_v40, %v3162_v19 }
 0x782   :  { %v2992_v28 = vpop.f32.mrf.mxu0  ;;  %v3105_v25 = vpop.f32.mrf.mxu1  ;;  %v2991_v17 = vadd.f32 %v2990_v23, %v7111_v3  ;;  %v3104_v46 = vadd.f32 %v3103_v39, %v7115_v42 }
 0x783   :  { %v3201_v7 = vpack.c.bf16 %v3165_v52, %v3161_v55  ;;  %v3203_v11 = vpack.c.bf16 %v3167_v58, %v3163_v56  ;;  %v2993_v6 = vadd.f32 %v2992_v28, %v7106_v16  ;;  %v3106_v2 = vadd.f32 %v3105_v25, %v7108_v51 }
 0x784   :  { %v2994_v4 = vpop.f32.mrf.mxu0  ;;  %v3107_v31 = vpop.f32.mrf.mxu1  ;;  %v3168_v61 = vmax.f32 %v2991_v17, 0.0  ;;  %v3170_v13 = vmax.f32 %v3104_v46, 0.0 }
 0x785   :  { %v2995_v33 = vadd.f32 %v2994_v4, %v7111_v3  ;;  %v3108_v22 = vadd.f32 %v3107_v31, %v7115_v42  ;;  %3551 = vmatprep.mubr.bf16.mxu0 %v3201_v7  ;;  %3648 = vmatprep.mubr.bf16.mxu1 %v3203_v11  ;;  %v3169_v59 = vmax.f32 %v2993_v6, 0.0  ;;  %v3171_v45 = vmax.f32 %v3106_v2, 0.0 }
 0x786   :  { %v2996_v57 = vpop.f32.mrf.mxu0  ;;  %v3109_v63 = vpop.f32.mrf.mxu1  ;;  %3552 = vmatmul.mubr.bf16.gmra.mxu0 %v3200_v15  ;;  %3649 = vmatmul.mubr.bf16.gmra.mxu1 %v3202_v21 }
 0x787   :  { %v2997_v41 = vadd.f32 %v2996_v57, %v7106_v16  ;;  %v3110_v44 = vadd.f32 %v3109_v63, %v7108_v51  ;;  %v3172_v0 = vmax.f32 %v2995_v33, 0.0  ;;  %v3174_v38 = vmax.f32 %v3108_v22, 0.0  ;;  %v7184_v51 = vld [vmem:[%s7463_s11] ss:$0 sm:$0xff] }
 0x789   :  { %v3173_v36 = vmax.f32 %v2997_v41, 0.0  ;;  %v3175_v24 = vmax.f32 %v3110_v44, 0.0  ;;  %v3204_v27 = vpack.c.bf16 %v3172_v0, %v3168_v61  ;;  %v3206_v42 = vpack.c.bf16 %v3174_v38, %v3170_v13 }
 0x78b   :  { %v3205_v35 = vpack.c.bf16 %v3173_v36, %v3169_v59  ;;  %v3207_v3 = vpack.c.bf16 %v3175_v24, %v3171_v45 }
 0x78d   :  { %3559 = vmatprep.mubr.bf16.mxu0 %v3205_v35  ;;  %3656 = vmatprep.mubr.bf16.mxu1 %v3207_v3 }
 0x78e   :  { %3560 = vmatmul.mubr.bf16.gmra.mxu0 %v3204_v27  ;;  %3657 = vmatmul.mubr.bf16.gmra.mxu1 %v3206_v42 }
 0x7be   :  { %v4186_v29 = vpop.f32.mrf.mxu0  ;;  %v4250_v16 = vpop.f32.mrf.mxu1 }
 0x7c0   :  { %v4187_v37 = vpop.f32.mrf.mxu0  ;;  %v4251_v8 = vpop.f32.mrf.mxu1 }
 0x7c1   :  { %v4188_v62 = vadd.f32 %v4187_v37, %v4186_v29  ;;  %v4252_v40 = vadd.f32 %v4251_v8, %v4250_v16 }
 0x7c2   :  { %v4189_v20 = vpop.f32.mrf.mxu0  ;;  %v4253_v1 = vpop.f32.mrf.mxu1 }
 0x7c3   :  { %v3506_v60 = vadd.f32 %v4188_v62, %v7184_v51 }
 0x7c4   :  { %v4190_v23 = vpop.f32.mrf.mxu0  ;;  %v4254_v39 = vpop.f32.mrf.mxu1 }
 0x7c5   :  { %v3603_v55 = vadd.f32 %v4252_v40, %v3506_v60  ;;  %v4191_v56 = vadd.f32 %v4190_v23, %v4189_v20  ;;  %v4255_v19 = vadd.f32 %v4254_v39, %v4253_v1 }
 0x7c6   :  { %v4192_v52 = vpop.f32.mrf.mxu0  ;;  %v4256_v58 = vpop.f32.mrf.mxu1 }
 0x7c7   :  { %v3509_v14 = vadd.f32 %v4191_v56, %v7184_v51  ;;  %v7189_v28 = vadd.f32 %v3603_v55, %v6899_v47 }
 0x7c8   :  { %v4193_v25 = vpop.f32.mrf.mxu0  ;;  %v4257_v7 = vpop.f32.mrf.mxu1 }
 0x7c9   :  { %v3606_v11 = vadd.f32 %v4255_v19, %v3509_v14  ;;  %v4194_v15 = vadd.f32 %v4193_v25, %v4192_v52  ;;  %3681 = vadd.xlane.f32.xlu0 %v7189_v28  ;;  %v4258_v31 = vadd.f32 %v4257_v7, %v4256_v58 }
 0x7ca   :  { %v4195_v21 = vpop.f32.mrf.mxu0  ;;  %v4259_v6 = vpop.f32.mrf.mxu1 }
 0x7cb   :  { %v3514_v4 = vadd.f32 %v4194_v15, %v7184_v51  ;;  %v7194_v2 = vadd.f32 %v3606_v11, %v6902_v53 }
 0x7cc   :  { %v4196_v33 = vpop.f32.mrf.mxu0  ;;  %v4260_v22 = vpop.f32.mrf.mxu1 }
 0x7cd   :  { %v3611_v17 = vadd.f32 %v4258_v31, %v3514_v4  ;;  %v4197_v46 = vadd.f32 %v4196_v33, %v4195_v21  ;;  %3683 = vadd.xlane.f32.xlu1 %v7194_v2  ;;  %v4261_v41 = vadd.f32 %v4260_v22, %v4259_v6 }
 0x7ce   :  { %v4198_v47 = vpop.f32.mrf.mxu0  ;;  %v4262_v57 = vpop.f32.mrf.mxu1 }
 0x7cf   :  { %v3517_v63 = vadd.f32 %v4197_v46, %v7184_v51  ;;  %v7199_v44 = vadd.f32 %v3611_v17, %v6917_v32 }
 0x7d0   :  { %v4199_v0 = vpop.f32.mrf.mxu0  ;;  %v4263_v38 = vpop.f32.mrf.mxu1 }
 0x7d1   :  { %v3614_v59 = vadd.f32 %v4261_v41, %v3517_v63  ;;  %v4200_v45 = vadd.f32 %v4199_v0, %v4198_v47  ;;  %3685 = vadd.xlane.f32.xlu0 %v7199_v44  ;;  %v4264_v61 = vadd.f32 %v4263_v38, %v4262_v57 }
 0x7d2   :  { %v4201_v53 = vpop.f32.mrf.mxu0  ;;  %v4265_v36 = vpop.f32.mrf.mxu1 }
 0x7d3   :  { %v3522_v24 = vadd.f32 %v4200_v45, %v7184_v51  ;;  %v7204_v13 = vadd.f32 %v3614_v59, %v6913_v18 }
 0x7d4   :  { %v4202_v35 = vpop.f32.mrf.mxu0  ;;  %v4266_v3 = vpop.f32.mrf.mxu1 }
 0x7d5   :  { %v3619_v27 = vadd.f32 %v4264_v61, %v3522_v24  ;;  %v4203_v42 = vadd.f32 %v4202_v35, %v4201_v53  ;;  %3687 = vadd.xlane.f32.xlu1 %v7204_v13  ;;  %v4267_v37 = vadd.f32 %v4266_v3, %v4265_v36 }
 0x7d6   :  { %v4204_v32 = vpop.f32.mrf.mxu0  ;;  %v4268_v29 = vpop.f32.mrf.mxu1 }
 0x7d7   :  { %v3525_v16 = vadd.f32 %v4203_v42, %v7184_v51  ;;  %v7209_v8 = vadd.f32 %v3619_v27, %v6931_v30 }
 0x7d8   :  { %v4205_v62 = vpop.f32.mrf.mxu0  ;;  %v4269_v20 = vpop.f32.mrf.mxu1 }
 0x7d9   :  { %v3622_v1 = vadd.f32 %v4267_v37, %v3525_v16  ;;  %v4206_v60 = vadd.f32 %v4205_v62, %v4204_v32  ;;  %3689 = vadd.xlane.f32.xlu0 %v7209_v8  ;;  %v4270_v39 = vadd.f32 %v4269_v20, %v4268_v29 }
 0x7da   :  { %v4207_v18 = vpop.f32.mrf.mxu0  ;;  %v4271_v40 = vpop.f32.mrf.mxu1 }
 0x7db   :  { %v3530_v23 = vadd.f32 %v4206_v60, %v7184_v51  ;;  %v7214_v55 = vadd.f32 %v3622_v1, %v6927_v34 }
 0x7dc   :  { %v4208_v56 = vpop.f32.mrf.mxu0  ;;  %v4272_v52 = vpop.f32.mrf.mxu1 }
 0x7dd   :  { %v3627_v58 = vadd.f32 %v4270_v39, %v3530_v23  ;;  %v4209_v14 = vadd.f32 %v4208_v56, %v4207_v18  ;;  %3691 = vadd.xlane.f32.xlu1 %v7214_v55  ;;  %v4273_v19 = vadd.f32 %v4272_v52, %v4271_v40 }
 0x7df   :  { %v3533_v30 = vadd.f32 %v4209_v14, %v7184_v51  ;;  %v7219_v25 = vadd.f32 %v3627_v58, %v6953_v49 }
 0x7e1   :  { %v3630_v7 = vadd.f32 %v4273_v19, %v3533_v30  ;;  %3693 = vadd.xlane.f32.xlu0 %v7219_v25 }
 0x7e3   :  { %v7223_v11 = vadd.f32 %v3630_v7, %v6944_v54 }
 0x7e5   :  { %3695 = vadd.xlane.f32.xlu1 %v7223_v11 }
 0x7f9   :  { %v4210_v34 = vpop.f32.mrf.mxu0  ;;  %v4274_v15 = vpop.f32.mrf.mxu1 }
 0x7fb   :  { %v4211_v21 = vpop.f32.mrf.mxu0  ;;  %v4275_v6 = vpop.f32.mrf.mxu1 }
 0x7fc   :  { %v4212_v4 = vadd.f32 %v4211_v21, %v4210_v34  ;;  %v4276_v17 = vadd.f32 %v4275_v6, %v4274_v15 }
 0x7fd   :  { %v4213_v31 = vpop.f32.mrf.mxu0  ;;  %v4277_v33 = vpop.f32.mrf.mxu1 }
 0x7fe   :  { %v3538_v22 = vadd.f32 %v4212_v4, %v7184_v51 }
 0x7ff   :  { %v4214_v49 = vpop.f32.mrf.mxu0  ;;  %v4278_v46 = vpop.f32.mrf.mxu1 }
 0x800   :  { %v3635_v47 = vadd.f32 %v4276_v17, %v3538_v22  ;;  %v4215_v57 = vadd.f32 %v4214_v49, %v4213_v31  ;;  %v4279_v0 = vadd.f32 %v4278_v46, %v4277_v33 }
 0x801   :  { %v4216_v63 = vpop.f32.mrf.mxu0  ;;  %v4280_v41 = vpop.f32.mrf.mxu1 }
 0x802   :  { %v3541_v54 = vadd.f32 %v4215_v57, %v7184_v51  ;;  %v7229_v38 = vadd.f32 %v3635_v47, %v7015_v50 }
 0x803   :  { %v4217_v59 = vpop.f32.mrf.mxu0  ;;  %v4281_v45 = vpop.f32.mrf.mxu1 }
 0x804   :  { %v3638_v53 = vadd.f32 %v4279_v0, %v3541_v54  ;;  %v4218_v36 = vadd.f32 %v4217_v59, %v4216_v63  ;;  %3697 = vadd.xlane.f32.xlu0 %v7229_v38  ;;  %v4282_v3 = vadd.f32 %v4281_v45, %v4280_v41 }
 0x805   :  { %v4219_v24 = vpop.f32.mrf.mxu0  ;;  %v4283_v61 = vpop.f32.mrf.mxu1 }
 0x806   :  { %v3546_v35 = vadd.f32 %v4218_v36, %v7184_v51  ;;  %v7234_v27 = vadd.f32 %v3638_v53, %v7018_v9 }
 0x807   :  { %v4220_v42 = vpop.f32.mrf.mxu0  ;;  %v4284_v32 = vpop.f32.mrf.mxu1 }
 0x808   :  { %v3643_v29 = vadd.f32 %v4282_v3, %v3546_v35  ;;  %v4221_v16 = vadd.f32 %v4220_v42, %v4219_v24  ;;  %3699 = vadd.xlane.f32.xlu1 %v7234_v27  ;;  %v4285_v37 = vadd.f32 %v4284_v32, %v4283_v61 }
 0x80a   :  { %v3549_v50 = vadd.f32 %v4221_v16, %v7184_v51  ;;  %v7239_v62 = vadd.f32 %v3643_v29, %v7032_v5 }
 0x80c   :  { %v3646_v20 = vadd.f32 %v4285_v37, %v3549_v50  ;;  %3701 = vadd.xlane.f32.xlu0 %v7239_v62 }
 0x80e   :  { %v7243_v1 = vadd.f32 %v3646_v20, %v7029_v26 }
 0x810   :  { %3703 = vadd.xlane.f32.xlu1 %v7243_v1 }
 0x846   :  { %v4222_v9 = vpop.f32.mrf.mxu0  ;;  %v4286_v60 = vpop.f32.mrf.mxu1 }
 0x848   :  { %v4223_v18 = vpop.f32.mrf.mxu0  ;;  %v4287_v40 = vpop.f32.mrf.mxu1 }
 0x849   :  { %v4224_v23 = vadd.f32 %v4223_v18, %v4222_v9  ;;  %v4288_v58 = vadd.f32 %v4287_v40, %v4286_v60 }
 0x84a   :  { %v4225_v39 = vpop.f32.mrf.mxu0  ;;  %v4289_v56 = vpop.f32.mrf.mxu1 }
 0x84b   :  { %v3554_v52 = vadd.f32 %v4224_v23, %v7184_v51 }
 0x84c   :  { %v4226_v5 = vpop.f32.mrf.mxu0  ;;  %v4290_v14 = vpop.f32.mrf.mxu1 }
 0x84d   :  { %v3651_v30 = vadd.f32 %v4288_v58, %v3554_v52  ;;  %v4227_v19 = vadd.f32 %v4226_v5, %v4225_v39  ;;  %v4291_v15 = vadd.f32 %v4290_v14, %v4289_v56 }
 0x84e   :  { %v4228_v7 = vpop.f32.mrf.mxu0  ;;  %v4292_v34 = vpop.f32.mrf.mxu1 }
 0x84f   :  { %v3557_v26 = vadd.f32 %v4227_v19, %v7184_v51  ;;  %v7249_v21 = vadd.f32 %v3651_v30, %v7079_v12 }
 0x850   :  { %v4229_v6 = vpop.f32.mrf.mxu0  ;;  %v4293_v4 = vpop.f32.mrf.mxu1 }
 0x851   :  { %v3654_v31 = vadd.f32 %v4291_v15, %v3557_v26  ;;  %v4230_v33 = vadd.f32 %v4229_v6, %v4228_v7  ;;  %3705 = vadd.xlane.f32.xlu0 %v7249_v21  ;;  %v4294_v46 = vadd.f32 %v4293_v4, %v4292_v34 }
 0x852   :  { %v4295_v22 = vpop.f32.mrf.mxu1  ;;  %v3682_v17 = vpop.xlane.xlu0 %3681 }
 0x853   :  { %v3562_v49 = vadd.f32 %v4230_v33, %v7184_v51  ;;  %v3713_v47 = vmul.f32 0.0078125, %v3682_v17  ;;  %v4231_v57 = vpop.f32.mrf.mxu0  ;;  %v7254_v63 = vadd.f32 %v3654_v31, %v7082_v10 }
 0x854   :  { %v4296_v12 = vpop.f32.mrf.mxu1 }
 0x855   :  { %v3659_v41 = vadd.f32 %v4294_v46, %v3562_v49  ;;  %v4232_v54 = vpop.f32.mrf.mxu0  ;;  %3707 = vadd.xlane.f32.xlu1 %v7254_v63  ;;  %v7258_v45 = vsub.f32 %v7189_v28, %v3713_v47  ;;  %v4297_v24 = vadd.f32 %v4296_v12, %v4295_v22 }
 0x856   :  { %v4233_v0 = vadd.f32 %v4232_v54, %v4231_v57  ;;  %v3684_v59 = vpop.xlane.xlu1 %3683 }
 0x857   :  { %v7261_v53 = vadd.f32 %v3659_v41, %v7096_v43  ;;  %v3714_v61 = vmul.f32 0.0078125, %v3684_v59  ;;  %v3745_v42 = vmul.f32 %v7258_v45, %v7258_v45 }
 0x858   :  { %v3565_v36 = vadd.f32 %v4233_v0, %v7184_v51 }
 0x859   :  { %3709 = vadd.xlane.f32.xlu0 %v7261_v53  ;;  %v7268_v32 = vsub.f32 %v7194_v2, %v3714_v61 }
 0x85a   :  { %v3662_v10 = vadd.f32 %v4297_v24, %v3565_v36  ;;  %v3686_v35 = vpop.xlane.xlu0 %3685 }
 0x85b   :  { %v3715_v3 = vmul.f32 0.0078125, %v3686_v35  ;;  %v3746_v50 = vmul.f32 %v7268_v32, %v7268_v32 }
 0x85c   :  { %v7271_v28 = vadd.f32 %v3662_v10, %v7093_v48 }
 0x85d   :  { %v7274_v43 = vsub.f32 %v7199_v44, %v3715_v3  ;;  %3761 = vadd.xlane.f32.xlu0 %v3745_v42 }
 0x85e   :  { %3711 = vadd.xlane.f32.xlu1 %v7271_v28  ;;  %v3688_v51 = vpop.xlane.xlu1 %3687 }
 0x85f   :  { %v3716_v29 = vmul.f32 0.0078125, %v3688_v51  ;;  %v3747_v16 = vmul.f32 %v7274_v43, %v7274_v43 }
 0x861   :  { %v7282_v2 = vsub.f32 %v7204_v13, %v3716_v29  ;;  %3765 = vadd.xlane.f32.xlu0 %v3747_v16 }
 0x862   :  { %3763 = vadd.xlane.f32.xlu1 %v3746_v50  ;;  %v3690_v48 = vpop.xlane.xlu0 %3689 }
 0x863   :  { %v3717_v37 = vmul.f32 0.0078125, %v3690_v48  ;;  %v3748_v44 = vmul.f32 %v7282_v2, %v7282_v2 }
 0x865   :  { %v7287_v20 = vsub.f32 %v7209_v8, %v3717_v37 }
 0x866   :  { %3767 = vadd.xlane.f32.xlu1 %v3748_v44  ;;  %v3692_v9 = vpop.xlane.xlu1 %3691 }
 0x867   :  { %v3718_v60 = vmul.f32 0.0078125, %v3692_v9  ;;  %v3749_v18 = vmul.f32 %v7287_v20, %v7287_v20 }
 0x869   :  { %v7292_v40 = vsub.f32 %v7214_v55, %v3718_v60  ;;  %3769 = vadd.xlane.f32.xlu0 %v3749_v18 }
 0x86a   :  { %v3694_v13 = vpop.xlane.xlu0 %3693 }
 0x86b   :  { %v3719_v23 = vmul.f32 0.0078125, %v3694_v13  ;;  %v3750_v39 = vmul.f32 %v7292_v40, %v7292_v40 }
 0x86d   :  { %v7297_v56 = vsub.f32 %v7219_v25, %v3719_v23  ;;  %3771 = vadd.xlane.f32.xlu1 %v3750_v39  ;;  %v7349_v23 = vld [vmem:[%s7464_s12] ss:$0 sm:$0xff] }
 0x86e   :  { %v3696_v8 = vpop.xlane.xlu1 %3695 }
 0x86f   :  { %v3720_v52 = vmul.f32 0.0078125, %v3696_v8  ;;  %v3751_v58 = vmul.f32 %v7297_v56, %v7297_v56 }
 0x871   :  { %v7302_v5 = vsub.f32 %v7223_v11, %v3720_v52  ;;  %3773 = vadd.xlane.f32.xlu0 %v3751_v58  ;;  %v7355_v52 = vld [vmem:[%s7465_s13] ss:$0 sm:$0xff] }
 0x873   :  { %v3752_v55 = vmul.f32 %v7302_v5, %v7302_v5 }
 0x875   :  { %3775 = vadd.xlane.f32.xlu1 %v3752_v55 }
 0x88d   :  { %v3698_v14 = vpop.xlane.xlu0 %3697 }
 0x88e   :  { %v3721_v30 = vmul.f32 0.0078125, %v3698_v14 }
 0x890   :  { %v7307_v19 = vsub.f32 %v7229_v38, %v3721_v30 }
 0x891   :  { %v3700_v25 = vpop.xlane.xlu1 %3699 }
 0x892   :  { %v3722_v7 = vmul.f32 0.0078125, %v3700_v25  ;;  %v3753_v34 = vmul.f32 %v7307_v19, %v7307_v19 }
 0x894   :  { %v7312_v26 = vsub.f32 %v7234_v27, %v3722_v7  ;;  %3777 = vadd.xlane.f32.xlu0 %v3753_v34 }
 0x895   :  { %v3702_v11 = vpop.xlane.xlu0 %3701 }
 0x896   :  { %v3723_v15 = vmul.f32 0.0078125, %v3702_v11  ;;  %v3754_v6 = vmul.f32 %v7312_v26, %v7312_v26 }
 0x898   :  { %v7317_v4 = vsub.f32 %v7239_v62, %v3723_v15  ;;  %3779 = vadd.xlane.f32.xlu1 %v3754_v6 }
 0x899   :  { %v3704_v38 = vpop.xlane.xlu1 %3703 }
 0x89a   :  { %v3724_v31 = vmul.f32 0.0078125, %v3704_v38  ;;  %v3755_v33 = vmul.f32 %v7317_v4, %v7317_v4 }
 0x89c   :  { %v7322_v22 = vsub.f32 %v7243_v1, %v3724_v31  ;;  %3781 = vadd.xlane.f32.xlu0 %v3755_v33 }
 0x89e   :  { %v3756_v27 = vmul.f32 %v7322_v22, %v7322_v22 }
 0x8a0   :  { %3783 = vadd.xlane.f32.xlu1 %v3756_v27 }
 0x8da   :  { %v3706_v17 = vpop.xlane.xlu0 %3705 }
 0x8db   :  { %v3725_v49 = vmul.f32 0.0078125, %v3706_v17 }
 0x8dd   :  { %v7327_v46 = vsub.f32 %v7249_v21, %v3725_v49 }
 0x8de   :  { %v3708_v62 = vpop.xlane.xlu1 %3707 }
 0x8df   :  { %v3726_v47 = vmul.f32 0.0078125, %v3708_v62  ;;  %v3757_v57 = vmul.f32 %v7327_v46, %v7327_v46 }
 0x8e1   :  { %v7332_v41 = vsub.f32 %v7254_v63, %v3726_v47  ;;  %3785 = vadd.xlane.f32.xlu0 %v3757_v57 }
 0x8e2   :  { %v3710_v1 = vpop.xlane.xlu0 %3709 }
 0x8e3   :  { %v3727_v54 = vmul.f32 0.0078125, %v3710_v1  ;;  %v3758_v12 = vmul.f32 %v7332_v41, %v7332_v41 }
 0x8e5   :  { %v7337_v0 = vsub.f32 %v7261_v53, %v3727_v54  ;;  %3787 = vadd.xlane.f32.xlu1 %v3758_v12 }
 0x8e6   :  { %v3762_v21 = vpop.xlane.xlu0 %3761 }
 0x8e7   :  { %v3712_v59 = vpop.xlane.xlu1 %3711  ;;  %v3793_v36 = vmul.f32 0.0078125, %v3762_v21  ;;  %v3759_v24 = vmul.f32 %v7337_v0, %v7337_v0 }
 0x8e8   :  { %v3728_v61 = vmul.f32 0.0078125, %v3712_v59 }
 0x8e9   :  { %v3809_v10 = vadd.f32 1e-05, %v3793_v36  ;;  %3789 = vadd.xlane.f32.xlu0 %v3759_v24 }
 0x8ea   :  { %v7342_v63 = vsub.f32 %v7271_v28, %v3728_v61  ;;  %v3766_v35 = vpop.xlane.xlu0 %3765 }
 0x8eb   :  { %4933 = vrsqrt.f32 %v3809_v10  ;;  %v3764_v3 = vpop.xlane.xlu1 %3763  ;;  %v3795_v42 = vmul.f32 0.0078125, %v3766_v35 }
 0x8ec   :  { %v3794_v51 = vmul.f32 0.0078125, %v3764_v3  ;;  %v3760_v53 = vmul.f32 %v7342_v63, %v7342_v63 }
 0x8ed   :  { %v3811_v29 = vadd.f32 1e-05, %v3795_v42 }
 0x8ee   :  { %v3810_v16 = vadd.f32 1e-05, %v3794_v51  ;;  %3791 = vadd.xlane.f32.xlu1 %v3760_v53 }
 0x8ef   :  { %4935 = vrsqrt.f32 %v3811_v29  ;;  %v3768_v50 = vpop.xlane.xlu1 %3767 }
 0x8f0   :  { %4937 = vrsqrt.f32 %v3810_v16  ;;  %v3796_v48 = vmul.f32 0.0078125, %v3768_v50 }
 0x8f2   :  { %v3812_v37 = vadd.f32 1e-05, %v3796_v48  ;;  %v3770_v44 = vpop.xlane.xlu0 %3769 }
 0x8f3   :  { %v3797_v9 = vmul.f32 0.0078125, %v3770_v44 }
 0x8f4   :  { %4939 = vrsqrt.f32 %v3812_v37 }
 0x8f5   :  { %v3813_v28 = vadd.f32 1e-05, %v3797_v9 }
 0x8f6   :  { %v3772_v60 = vpop.xlane.xlu1 %3771 }
 0x8f7   :  { %4941 = vrsqrt.f32 %v3813_v28  ;;  %v3798_v18 = vmul.f32 0.0078125, %v3772_v60 }
 0x8f8   :  { %v4934_v13 = vpop.eup %4933 }
 0x8f9   :  { %v3841_v39 = vmul.f32 %v4934_v13, %v7258_v45  ;;  %v3814_v8 = vadd.f32 1e-05, %v3798_v18 }
 0x8fa   :  { %v3774_v58 = vpop.xlane.xlu0 %3773 }
 0x8fb   :  { %v3864_v55 = vmul.f32 %v7349_v23, %v3841_v39  ;;  %4943 = vrsqrt.f32 %v3814_v8  ;;  %v3799_v14 = vmul.f32 0.0078125, %v3774_v58 }
 0x8fc   :  { %v4936_v30 = vpop.eup %4935 }
 0x8fd   :  { %v4938_v25 = vpop.eup %4937  ;;  %v3887_v7 = vadd.f32 %v7355_v52, %v3864_v55  ;;  %v3843_v34 = vmul.f32 %v4936_v30, %v7274_v43  ;;  %v3815_v11 = vadd.f32 1e-05, %v3799_v14 }
 0x8fe   :  { %v3842_v45 = vmul.f32 %v4938_v25, %v7268_v32  ;;  %v3776_v15 = vpop.xlane.xlu1 %3775 }
 0x8ff   :  { %3903 = vst [vmem:[%s7466_s14] sm:$0xff] %v3887_v7  ;;  %v3866_v6 = vmul.f32 %v7349_v23, %v3843_v34  ;;  %4945 = vrsqrt.f32 %v3815_v11  ;;  %v3800_v38 = vmul.f32 0.0078125, %v3776_v15 }
 0x900   :  { %v3865_v31 = vmul.f32 %v7349_v23, %v3842_v45 }
 0x901   :  { %v4940_v33 = vpop.eup %4939  ;;  %v3889_v27 = vadd.f32 %v7355_v52, %v3866_v6  ;;  %v3816_v17 = vadd.f32 1e-05, %v3800_v38 }
 0x902   :  { %v3888_v43 = vadd.f32 %v7355_v52, %v3865_v31  ;;  %v3844_v49 = vmul.f32 %v4940_v33, %v7282_v2 }
 0x903   :  { %3905 = vst [vmem:[%s7466_s14 + $0x10] sm:$0xff] %v3889_v27  ;;  %4947 = vrsqrt.f32 %v3816_v17 }
 0x904   :  { %v4942_v32 = vpop.eup %4941  ;;  %3904 = vst [vmem:[%s7466_s14 + $0x8] sm:$0xff] %v3888_v43  ;;  %v3867_v62 = vmul.f32 %v7349_v23, %v3844_v49 }
 0x905   :  { %v3845_v47 = vmul.f32 %v4942_v32, %v7287_v20 }
 0x906   :  { %v3890_v57 = vadd.f32 %v7355_v52, %v3867_v62 }
 0x907   :  { %v3868_v1 = vmul.f32 %v7349_v23, %v3845_v47 }
 0x908   :  { %v4944_v54 = vpop.eup %4943  ;;  %3906 = vst [vmem:[%s7466_s14 + $0x18] sm:$0xff] %v3890_v57 }
 0x909   :  { %v3891_v2 = vadd.f32 %v7355_v52, %v3868_v1  ;;  %v3846_v12 = vmul.f32 %v4944_v54, %v7292_v40 }
 0x90b   :  { %3907 = vst [vmem:[%s7466_s14 + $0x20] sm:$0xff] %v3891_v2  ;;  %v3869_v21 = vmul.f32 %v7349_v23, %v3846_v12 }
 0x90c   :  { %v4946_v20 = vpop.eup %4945 }
 0x90d   :  { %v3892_v59 = vadd.f32 %v7355_v52, %v3869_v21  ;;  %v3847_v36 = vmul.f32 %v4946_v20, %v7297_v56 }
 0x90f   :  { %3908 = vst [vmem:[%s7466_s14 + $0x28] sm:$0xff] %v3892_v59  ;;  %v3870_v24 = vmul.f32 %v7349_v23, %v3847_v36 }
 0x910   :  { %v4948_v61 = vpop.eup %4947 }
 0x911   :  { %v3893_v40 = vadd.f32 %v7355_v52, %v3870_v24  ;;  %v3848_v10 = vmul.f32 %v4948_v61, %v7302_v5 }
 0x913   :  { %3909 = vst [vmem:[%s7466_s14 + $0x30] sm:$0xff] %v3893_v40  ;;  %v3871_v35 = vmul.f32 %v7349_v23, %v3848_v10 }
 0x915   :  { %v3894_v3 = vadd.f32 %v7355_v52, %v3871_v35 }
 0x917   :  { %3910 = vst [vmem:[%s7466_s14 + $0x38] sm:$0xff] %v3894_v3 }
 0x91d   :  { %v3778_v56 = vpop.xlane.xlu0 %3777 }
 0x91e   :  { %v3801_v42 = vmul.f32 0.0078125, %v3778_v56 }
 0x920   :  { %v3817_v51 = vadd.f32 1e-05, %v3801_v42 }
 0x921   :  { %v3780_v53 = vpop.xlane.xlu1 %3779 }
 0x922   :  { %4949 = vrsqrt.f32 %v3817_v51  ;;  %v3802_v29 = vmul.f32 0.0078125, %v3780_v53 }
 0x924   :  { %v3818_v16 = vadd.f32 1e-05, %v3802_v29 }
 0x925   :  { %v3782_v5 = vpop.xlane.xlu0 %3781 }
 0x926   :  { %4951 = vrsqrt.f32 %v3818_v16  ;;  %v3803_v50 = vmul.f32 0.0078125, %v3782_v5 }
 0x928   :  { %v3819_v48 = vadd.f32 1e-05, %v3803_v50 }
 0x929   :  { %v3784_v37 = vpop.xlane.xlu1 %3783 }
 0x92a   :  { %4953 = vrsqrt.f32 %v3819_v48  ;;  %v3804_v44 = vmul.f32 0.0078125, %v3784_v37 }
 0x92c   :  { %v3820_v9 = vadd.f32 1e-05, %v3804_v44 }
 0x92e   :  { %4955 = vrsqrt.f32 %v3820_v9 }
 0x92f   :  { %v4950_v28 = vpop.eup %4949 }
 0x930   :  { %v3849_v60 = vmul.f32 %v4950_v28, %v7307_v19 }
 0x932   :  { %v3872_v18 = vmul.f32 %v7349_v23, %v3849_v60 }
 0x933   :  { %v4952_v13 = vpop.eup %4951 }
 0x934   :  { %v3895_v39 = vadd.f32 %v7355_v52, %v3872_v18  ;;  %v3850_v8 = vmul.f32 %v4952_v13, %v7312_v26 }
 0x936   :  { %3911 = vst [vmem:[%s7466_s14 + $0x40] sm:$0xff] %v3895_v39  ;;  %v3873_v58 = vmul.f32 %v7349_v23, %v3850_v8 }
 0x937   :  { %v4954_v55 = vpop.eup %4953 }
 0x938   :  { %v3896_v14 = vadd.f32 %v7355_v52, %v3873_v58  ;;  %v3851_v30 = vmul.f32 %v4954_v55, %v7317_v4 }
 0x93a   :  { %3912 = vst [vmem:[%s7466_s14 + $0x48] sm:$0xff] %v3896_v14  ;;  %v3874_v19 = vmul.f32 %v7349_v23, %v3851_v30 }
 0x93b   :  { %v4956_v25 = vpop.eup %4955 }
 0x93c   :  { %v3897_v26 = vadd.f32 %v7355_v52, %v3874_v19  ;;  %v3852_v7 = vmul.f32 %v4956_v25, %v7322_v22 }
 0x93e   :  { %3913 = vst [vmem:[%s7466_s14 + $0x50] sm:$0xff] %v3897_v26  ;;  %v3875_v34 = vmul.f32 %v7349_v23, %v3852_v7 }
 0x940   :  { %v3898_v11 = vadd.f32 %v7355_v52, %v3875_v34 }
 0x942   :  { %3914 = vst [vmem:[%s7466_s14 + $0x58] sm:$0xff] %v3898_v11 }
 0x96a   :  { %v3786_v4 = vpop.xlane.xlu0 %3785 }
 0x96b   :  { %v3805_v45 = vmul.f32 0.0078125, %v3786_v4 }
 0x96d   :  { %v3821_v15 = vadd.f32 1e-05, %v3805_v45 }
 0x96e   :  { %v3788_v6 = vpop.xlane.xlu1 %3787 }
 0x96f   :  { %4957 = vrsqrt.f32 %v3821_v15  ;;  %v3806_v38 = vmul.f32 0.0078125, %v3788_v6 }
 0x971   :  { %v3822_v31 = vadd.f32 1e-05, %v3806_v38 }
 0x972   :  { %v3790_v22 = vpop.xlane.xlu0 %3789 }
 0x973   :  { %4959 = vrsqrt.f32 %v3822_v31  ;;  %v3807_v33 = vmul.f32 0.0078125, %v3790_v22 }
 0x975   :  { %v3823_v27 = vadd.f32 1e-05, %v3807_v33 }
 0x977   :  { %4961 = vrsqrt.f32 %v3823_v27  ;;  %v3792_v17 = vpop.xlane.xlu1 %3791 }
 0x978   :  { %v3808_v43 = vmul.f32 0.0078125, %v3792_v17 }
 0x97a   :  { %v3824_v49 = vadd.f32 1e-05, %v3808_v43 }
 0x97c   :  { %v4958_v32 = vpop.eup %4957  ;;  %4963 = vrsqrt.f32 %v3824_v49 }
 0x97d   :  { %v3853_v62 = vmul.f32 %v4958_v32, %v7327_v46 }
 0x97f   :  { %v3876_v47 = vmul.f32 %v7349_v23, %v3853_v62 }
 0x980   :  { %v4960_v57 = vpop.eup %4959 }
 0x981   :  { %v3899_v1 = vadd.f32 %v7355_v52, %v3876_v47  ;;  %v3854_v54 = vmul.f32 %v4960_v57, %v7332_v41 }
 0x983   :  { %3915 = vst [vmem:[%s7466_s14 + $0x60] sm:$0xff] %v3899_v1  ;;  %v3877_v2 = vmul.f32 %v7349_v23, %v3854_v54 }
 0x984   :  { %v4962_v12 = vpop.eup %4961 }
 0x985   :  { %v3900_v21 = vadd.f32 %v7355_v52, %v3877_v2  ;;  %v3855_v20 = vmul.f32 %v4962_v12, %v7337_v0 }
 0x987   :  { %3916 = vst [vmem:[%s7466_s14 + $0x68] sm:$0xff] %v3900_v21  ;;  %v3878_v46 = vmul.f32 %v7349_v23, %v3855_v20 }
 0x989   :  { %v4964_v59 = vpop.eup %4963  ;;  %v3901_v41 = vadd.f32 %v7355_v52, %v3878_v46 }
 0x98a   :  { %v3856_v36 = vmul.f32 %v4964_v59, %v7342_v63 }
 0x98b   :  { %3917 = vst [vmem:[%s7466_s14 + $0x70] sm:$0xff] %v3901_v41 }
 0x98c   :  { %v3879_v24 = vmul.f32 %v7349_v23, %v3856_v36 }
 0x98e   :  { %v3902_v61 = vadd.f32 %v7355_v52, %v3879_v24 }
 0x990   :  { %3918 = vst [vmem:[%s7466_s14 + $0x78] sm:$0xff] %v3902_v61 }

</bundles_post_ra>
